<compile_context>
chip_gen: v5e
topology: v5e:2x2
jax: 0.10.0
libtpu: 0.0.40
codegen_flags: <defaults>
</compile_context>

<pallas_src>
import numpy as np
import jax
import jax.numpy as jnp
from jax.experimental import pallas as pl
from jax.experimental.pallas import tpu as pltpu


_BN_EPS = 1e-5
_GEM_EPS = 1e-6
_ADAPTIVE_OUT = 64

# (C_in, C_out, kernel_size, padding, GeM pool size or None) per conv block.
_LAYERS = (
    (1, 16, 32, 0, None),
    (16, 16, 32, 0, 4),
    (16, 32, 32, 1, None),
    (32, 32, 16, 1, 4),
    (32, 64, 16, 1, None),
    (64, 64, 16, 1, 2),
)


# ----------------------------------------------------------------------------
# Static shape plan + host-built pooling matrices (trace-time constants).
# ----------------------------------------------------------------------------
def _plan(L_in):
    plan = []
    L = L_in
    for (ci, co, k, pad, gem) in _LAYERS:
        l_in = L
        l_conv = l_in + 2 * pad - k + 1
        l_out = l_conv // gem if gem else l_conv
        plan.append(dict(ci=ci, co=co, K=k, pad=pad, gem=gem,
                         l_in=l_in, l_conv=l_conv, l_out=l_out))
        L = l_out
    return plan, L


def _avg_pool_matrix(L, pk):
    """avg_pool1d(kernel=stride=pk, no padding) as an (L, L//pk) matrix."""
    l_out = L // pk
    P = np.zeros((L, l_out), np.float32)
    for t in range(l_out):
        P[t * pk:(t + 1) * pk, t] = 1.0 / pk
    return P


def _adaptive_pool_matrix(L, out):
    """AdaptiveAvgPool1d(out) as an (L, out) matrix (PyTorch bin boundaries)."""
    P = np.zeros((L, out), np.float32)
    for i in range(out):
        s = (i * L) // out
        e = -((-(i + 1) * L) // out)          # ceil
        P[s:e, i] = 1.0 / (e - s)
    return P


# ----------------------------------------------------------------------------
# Fused kernel: the entire network for one sample per grid step.
# ----------------------------------------------------------------------------
def _cnn1d_hight_kernel(x_ref,
                        wm1_ref, c1_ref,
                        wm2_ref, bst2_ref,
                        wm3_ref, c3_ref,
                        wm4_ref, bst4_ref,
                        wm5_ref, c5_ref,
                        wm6_ref, bst6_ref,
                        pm2_ref, pm4_ref, pm6_ref, pa_ref,
                        p_ref,
                        o_ref):

    def conv(x, w_ref, pad):
        # x: (C_in, L_in) f32.  w_ref: (C_out, K*C_in) bf16, im2col layout with
        # column index = k*C_in + c.  One MXU matmul per conv layer.
        c_in, l_in = x.shape
        K = w_ref.shape[1] // c_in
        xb = x.astype(jnp.bfloat16)              # halve im2col build traffic
        if pad:
            z = jnp.zeros((c_in, pad), jnp.bfloat16)
            xb = jnp.concatenate([z, xb, z], axis=1)   # padding folded in
            l_in = l_in + 2 * pad
        l_out = l_in - K + 1
        xcol = jnp.concatenate([xb[:, k:k + l_out] for k in range(K)], axis=0)
        return jnp.dot(w_ref[...], xcol, preferred_element_type=jnp.float32)

    def bn_silu(y, c_ref):
        # Eval-mode BN already folded into the conv weights; c = b*scale+shift.
        a = y + c_ref[...]
        return a * jax.nn.sigmoid(a)

    def gem_bn_silu(y, p, inv_p, pm_ref, bst_ref):
        # GeM: clamp(min=eps) -> ^p -> avg_pool1d -> ^(1/p); then BN + SiLU.
        b = bst_ref[:, 0:1]
        s = bst_ref[:, 1:2]
        t = bst_ref[:, 2:3]
        z = jnp.maximum(y + b, _GEM_EPS)
        zp = jnp.exp(p * jnp.log(z))                                 # z ** p
        pooled = jnp.dot(zp, pm_ref[...], preferred_element_type=jnp.float32)
        g = jnp.exp(jnp.log(pooled) * inv_p)                         # ** (1/p)
        a = g * s + t
        return a * jax.nn.sigmoid(a)

    # Hoisted GeM scalar prep: 1/p once per grid step (EUP), no divides below.
    p_all = p_ref[...]                                # (1, 3) GeM exponents
    inv_p_all = pl.reciprocal(p_all, approx=True)
    p2, p4, p6 = p_all[:, 0:1], p_all[:, 1:2], p_all[:, 2:3]
    q2, q4, q6 = inv_p_all[:, 0:1], inv_p_all[:, 1:2], inv_p_all[:, 2:3]

    h = bn_silu(conv(x_ref[0], wm1_ref, 0), c1_ref)            # conv1 on MXU
    h = gem_bn_silu(conv(h, wm2_ref, 0), p2, q2, pm2_ref, bst2_ref)
    h = bn_silu(conv(h, wm3_ref, 1), c3_ref)
    h = gem_bn_silu(conv(h, wm4_ref, 1), p4, q4, pm4_ref, bst4_ref)
    h = bn_silu(conv(h, wm5_ref, 1), c5_ref)
    h = gem_bn_silu(conv(h, wm6_ref, 1), p6, q6, pm6_ref, bst6_ref)
    # AdaptiveAvgPool1d(64) as a matmul against a host-built matrix.
    o_ref[0] = jnp.dot(h, pa_ref[...], preferred_element_type=jnp.float32)


# ----------------------------------------------------------------------------
# Wrapper: one pallas_call for the whole network, grid over the batch.
# ----------------------------------------------------------------------------
def cnn1d_hight_forward(x, packed):
    N, c0, L = x.shape
    assert c0 == 1, "CNN1d_hight expects a single input channel"
    plan, L_final = _plan(L)
    for lay in plan:
        assert lay["l_conv"] >= 1 and lay["l_out"] >= 1, "input length too short"

    ops, specs = [], []

    def add_const(a):
        a = jnp.asarray(a)                          # keep packed dtype (bf16/f32)
        ops.append(a)
        specs.append(pl.BlockSpec(a.shape, lambda i: (0, 0)))

    # Order must match the kernel signature.
    for idx, lay in enumerate(plan, start=1):
        add_const(packed[f"wm{idx}"])
        add_const(packed[f"bst{idx}"] if lay["gem"] else packed[f"c{idx}"])
    for lay in plan:
        if lay["gem"]:
            add_const(_avg_pool_matrix(lay["l_conv"], lay["gem"]))
    add_const(_adaptive_pool_matrix(L_final, _ADAPTIVE_OUT))
    add_const(packed["p_all"])

    return pl.pallas_call(
        _cnn1d_hight_kernel,
        out_shape=jax.ShapeDtypeStruct((N, plan[-1]["co"], _ADAPTIVE_OUT),
                                       jnp.float32),
        grid=(N,),
        in_specs=[pl.BlockSpec((1, 1, L), lambda i: (i, 0, 0))] + specs,
        out_specs=pl.BlockSpec((1, plan[-1]["co"], _ADAPTIVE_OUT),
                               lambda i: (i, 0, 0)),
        compiler_params=pltpu.CompilerParams(
            dimension_semantics=("parallel",)),
    )(x, *ops)


# ----------------------------------------------------------------------------
# Parameters: PyTorch-style raw params + one-time kernel-layout repacking.
# ----------------------------------------------------------------------------
def init_params(key):
    """PyTorch-default-style init, fresh (eval-mode) BatchNorm stats."""
    params = {}
    for idx, (ci, co, k, _pad, gem) in enumerate(_LAYERS, start=1):
        key, kw, kb = jax.random.split(key, 3)
        bound = 1.0 / np.sqrt(ci * k)
        params[f"w{idx}"] = jax.random.uniform(kw, (co, ci, k), jnp.float32,
                                               -bound, bound)
        params[f"b{idx}"] = jax.random.uniform(kb, (co,), jnp.float32,
                                               -bound, bound)
        params[f"gamma{idx}"] = jnp.ones((co,), jnp.float32)
        params[f"beta{idx}"] = jnp.zeros((co,), jnp.float32)
        params[f"mean{idx}"] = jnp.zeros((co,), jnp.float32)
        params[f"var{idx}"] = jnp.ones((co,), jnp.float32)
        if gem is not None:
            params[f"p{idx}"] = jnp.array([3.0], jnp.float32)
    return params


def pack_params(params):
    """One-time repack: im2col layout, eval-mode BN folding, bf16 weights."""
    packed = {}
    p_list = []
    for idx, (ci, co, k, _pad, gem) in enumerate(_LAYERS, start=1):
        w = params[f"w{idx}"]                                      # (co, ci, k)
        wm = jnp.transpose(w, (0, 2, 1)).reshape(co, k * ci)       # col = k*ci+c
        b = params[f"b{idx}"]
        scale = params[f"gamma{idx}"] / jnp.sqrt(params[f"var{idx}"] + _BN_EPS)
        shift = params[f"beta{idx}"] - params[f"mean{idx}"] * scale
        if gem is None:
            # Fold BN into the conv weights, then cast once to bf16 (MXU-native).
            packed[f"wm{idx}"] = (wm * scale[:, None]).astype(jnp.bfloat16)
            packed[f"c{idx}"] = (b * scale + shift).reshape(co, 1)
        else:
            packed[f"wm{idx}"] = wm.astype(jnp.bfloat16)           # BN after GeM
            packed[f"bst{idx}"] = jnp.stack([b, scale, shift], axis=1)  # (co,3)
            p_list.append(params[f"p{idx}"])
    packed["p_all"] = jnp.concatenate(p_list).reshape(1, len(p_list))
    return packed


# ----------------------------------------------------------------------------
# Plain-XLA reference (no Pallas) for a numerical sanity check.
# ----------------------------------------------------------------------------
def _reference_forward(x, params):
    h = x
    for idx, (ci, co, k, pad, gem) in enumerate(_LAYERS, start=1):
        h = jax.lax.conv_general_dilated(
            h, params[f"w{idx}"], window_strides=(1,), padding=[(pad, pad)],
            dimension_numbers=("NCH", "OIH", "NCH"),
            precision=jax.lax.Precision.HIGHEST)
        h = h + params[f"b{idx}"][None, :, None]
        if gem is not None:
            p = params[f"p{idx}"]
            hp = jnp.maximum(h, _GEM_EPS) ** p
            L = hp.shape[-1]
            l_out = L // gem
            hp = hp[..., :l_out * gem].reshape(h.shape[0], h.shape[1], l_out, gem)
            h = hp.mean(axis=-1) ** (1.0 / p)
        scale = params[f"gamma{idx}"] / jnp.sqrt(params[f"var{idx}"] + _BN_EPS)
        shift = params[f"beta{idx}"] - params[f"mean{idx}"] * scale
        h = h * scale[None, :, None] + shift[None, :, None]
        h = h * jax.nn.sigmoid(h)
    P = jnp.asarray(_adaptive_pool_matrix(h.shape[-1], _ADAPTIVE_OUT))
    return jnp.einsum("ncl,lo->nco", h, P, precision=jax.lax.Precision.HIGHEST)


if __name__ == "__main__":
    key = jax.random.PRNGKey(0)
    key, kx = jax.random.split(key)
    # (batch=2, channels=1, length=1024): 1024 is roughly the smallest "nice"
    # length that survives the fixed 32/16-tap convs and the three GeM pools.
    x = jax.random.normal(kx, (2, 1, 1024), dtype=jnp.float32)

    params = init_params(key)
    packed = pack_params(params)

    fwd = jax.jit(cnn1d_hight_forward)
    out = jax.block_until_ready(fwd(x, packed))

    assert out.shape == (2, 64, _ADAPTIVE_OUT), out.shape
    assert bool(jnp.all(jnp.isfinite(out)))

    # Sanity check against the f32 plain-XLA reference.  The kernel feeds the
    # MXU bf16 operands, so allow bf16-rounding headroom on the max-abs error
    # but also gate the RMS error, which still catches real packing/layout
    # bugs (those are O(0.1+)).
    ref = _reference_forward(x, params)
    err = jnp.abs(out - ref)
    max_err = float(jnp.max(err))
    rms_err = float(jnp.sqrt(jnp.mean(err * err)))
    assert max_err < 1e-1, f"kernel/reference mismatch: max abs err {max_err}"
    assert rms_err < 3e-2, f"kernel/reference mismatch: rms err {rms_err}"

    print("KERNEL_OK")
</pallas_src>

<mosaic_0001>
module attributes {stable_mosaic.version = 11 : i64} {
  func.func @_cnn1d_hight_kernel(%arg0: i32, %arg1: memref<1x1x1024xf32, #tpu.memory_space<vmem>>, %arg2: memref<16x32xbf16, #tpu.memory_space<vmem>>, %arg3: memref<16x1xf32, #tpu.memory_space<vmem>>, %arg4: memref<16x512xbf16, #tpu.memory_space<vmem>>, %arg5: memref<16x3xf32, #tpu.memory_space<vmem>>, %arg6: memref<32x512xbf16, #tpu.memory_space<vmem>>, %arg7: memref<32x1xf32, #tpu.memory_space<vmem>>, %arg8: memref<32x512xbf16, #tpu.memory_space<vmem>>, %arg9: memref<32x3xf32, #tpu.memory_space<vmem>>, %arg10: memref<64x512xbf16, #tpu.memory_space<vmem>>, %arg11: memref<64x1xf32, #tpu.memory_space<vmem>>, %arg12: memref<64x1024xbf16, #tpu.memory_space<vmem>>, %arg13: memref<64x3xf32, #tpu.memory_space<vmem>>, %arg14: memref<962x240xf32, #tpu.memory_space<vmem>>, %arg15: memref<198x49xf32, #tpu.memory_space<vmem>>, %arg16: memref<23x11xf32, #tpu.memory_space<vmem>>, %arg17: memref<11x64xf32, #tpu.memory_space<vmem>>, %arg18: memref<1x3xf32, #tpu.memory_space<vmem>>, %arg19: memref<1x64x64xf32, #tpu.memory_space<vmem>>) attributes {dimension_semantics = [#tpu.dimension_semantics<parallel>], iteration_bounds = array<i64: 2>, scalar_prefetch = 0 : i64, scratch_operands = 0 : i64, tpu.core_type = #tpu.core_type<tc>, window_params = [{transform_indices = @transform_0, window_bounds = array<i64: 1, 1, 1024>}, {pipeline_mode = #tpu.pipeline_mode<synchronous>, transform_indices = @transform_1, window_bounds = array<i64: 16, 32>}, {pipeline_mode = #tpu.pipeline_mode<synchronous>, transform_indices = @transform_2, window_bounds = array<i64: 16, 1>}, {pipeline_mode = #tpu.pipeline_mode<synchronous>, transform_indices = @transform_3, window_bounds = array<i64: 16, 512>}, {pipeline_mode = #tpu.pipeline_mode<synchronous>, transform_indices = @transform_4, window_bounds = array<i64: 16, 3>}, {pipeline_mode = #tpu.pipeline_mode<synchronous>, transform_indices = @transform_5, window_bounds = array<i64: 32, 512>}, {pipeline_mode = #tpu.pipeline_mode<synchronous>, transform_indices = @transform_6, window_bounds = array<i64: 32, 1>}, {pipeline_mode = #tpu.pipeline_mode<synchronous>, transform_indices = @transform_7, window_bounds = array<i64: 32, 512>}, {pipeline_mode = #tpu.pipeline_mode<synchronous>, transform_indices = @transform_8, window_bounds = array<i64: 32, 3>}, {pipeline_mode = #tpu.pipeline_mode<synchronous>, transform_indices = @transform_9, window_bounds = array<i64: 64, 512>}, {pipeline_mode = #tpu.pipeline_mode<synchronous>, transform_indices = @transform_10, window_bounds = array<i64: 64, 1>}, {pipeline_mode = #tpu.pipeline_mode<synchronous>, transform_indices = @transform_11, window_bounds = array<i64: 64, 1024>}, {pipeline_mode = #tpu.pipeline_mode<synchronous>, transform_indices = @transform_12, window_bounds = array<i64: 64, 3>}, {pipeline_mode = #tpu.pipeline_mode<synchronous>, transform_indices = @transform_13, window_bounds = array<i64: 962, 240>}, {pipeline_mode = #tpu.pipeline_mode<synchronous>, transform_indices = @transform_14, window_bounds = array<i64: 198, 49>}, {pipeline_mode = #tpu.pipeline_mode<synchronous>, transform_indices = @transform_15, window_bounds = array<i64: 23, 11>}, {pipeline_mode = #tpu.pipeline_mode<synchronous>, transform_indices = @transform_16, window_bounds = array<i64: 11, 64>}, {pipeline_mode = #tpu.pipeline_mode<synchronous>, transform_indices = @transform_17, window_bounds = array<i64: 1, 3>}, {transform_indices = @transform_18, window_bounds = array<i64: 1, 64, 64>}]} {
    %c0 = arith.constant 0 : index
    %c0_0 = arith.constant 0 : index
    %0 = vector.load %arg18[%c0, %c0_0] : memref<1x3xf32, #tpu.memory_space<vmem>>, vector<1x3xf32>
    %1 = tpu.reciprocal %0 {approx = true} : vector<1x3xf32> -> vector<1x3xf32>
    %2 = vector.extract_strided_slice %0 {offsets = [0, 0], sizes = [1, 1], strides = [1, 1]} : vector<1x3xf32> to vector<1x1xf32>
    %3 = vector.extract_strided_slice %0 {offsets = [0, 1], sizes = [1, 1], strides = [1, 1]} : vector<1x3xf32> to vector<1x1xf32>
    %4 = vector.extract_strided_slice %0 {offsets = [0, 2], sizes = [1, 1], strides = [1, 1]} : vector<1x3xf32> to vector<1x1xf32>
    %5 = vector.extract_strided_slice %1 {offsets = [0, 0], sizes = [1, 1], strides = [1, 1]} : vector<1x3xf32> to vector<1x1xf32>
    %6 = vector.extract_strided_slice %1 {offsets = [0, 1], sizes = [1, 1], strides = [1, 1]} : vector<1x3xf32> to vector<1x1xf32>
    %7 = vector.extract_strided_slice %1 {offsets = [0, 2], sizes = [1, 1], strides = [1, 1]} : vector<1x3xf32> to vector<1x1xf32>
    %c0_1 = arith.constant 0 : index
    %c0_2 = arith.constant 0 : index
    %c0_3 = arith.constant 0 : index
    %8 = vector.load %arg1[%c0_1, %c0_2, %c0_3] : memref<1x1x1024xf32, #tpu.memory_space<vmem>>, vector<1x1x1024xf32>
    %9 = vector.shape_cast %8 : vector<1x1x1024xf32> to vector<1x1024xf32>
    %10 = arith.truncf %9 : vector<1x1024xf32> to vector<1x1024xbf16>
    %11 = vector.extract_strided_slice %10 {offsets = [0, 0], sizes = [1, 993], strides = [1, 1]} : vector<1x1024xbf16> to vector<1x993xbf16>
    %12 = vector.extract_strided_slice %10 {offsets = [0, 1], sizes = [1, 993], strides = [1, 1]} : vector<1x1024xbf16> to vector<1x993xbf16>
    %13 = vector.extract_strided_slice %10 {offsets = [0, 2], sizes = [1, 993], strides = [1, 1]} : vector<1x1024xbf16> to vector<1x993xbf16>
    %14 = vector.extract_strided_slice %10 {offsets = [0, 3], sizes = [1, 993], strides = [1, 1]} : vector<1x1024xbf16> to vector<1x993xbf16>
    %15 = vector.extract_strided_slice %10 {offsets = [0, 4], sizes = [1, 993], strides = [1, 1]} : vector<1x1024xbf16> to vector<1x993xbf16>
    %16 = vector.extract_strided_slice %10 {offsets = [0, 5], sizes = [1, 993], strides = [1, 1]} : vector<1x1024xbf16> to vector<1x993xbf16>
    %17 = vector.extract_strided_slice %10 {offsets = [0, 6], sizes = [1, 993], strides = [1, 1]} : vector<1x1024xbf16> to vector<1x993xbf16>
    %18 = vector.extract_strided_slice %10 {offsets = [0, 7], sizes = [1, 993], strides = [1, 1]} : vector<1x1024xbf16> to vector<1x993xbf16>
    %19 = vector.extract_strided_slice %10 {offsets = [0, 8], sizes = [1, 993], strides = [1, 1]} : vector<1x1024xbf16> to vector<1x993xbf16>
    %20 = vector.extract_strided_slice %10 {offsets = [0, 9], sizes = [1, 993], strides = [1, 1]} : vector<1x1024xbf16> to vector<1x993xbf16>
    %21 = vector.extract_strided_slice %10 {offsets = [0, 10], sizes = [1, 993], strides = [1, 1]} : vector<1x1024xbf16> to vector<1x993xbf16>
    %22 = vector.extract_strided_slice %10 {offsets = [0, 11], sizes = [1, 993], strides = [1, 1]} : vector<1x1024xbf16> to vector<1x993xbf16>
    %23 = vector.extract_strided_slice %10 {offsets = [0, 12], sizes = [1, 993], strides = [1, 1]} : vector<1x1024xbf16> to vector<1x993xbf16>
    %24 = vector.extract_strided_slice %10 {offsets = [0, 13], sizes = [1, 993], strides = [1, 1]} : vector<1x1024xbf16> to vector<1x993xbf16>
    %25 = vector.extract_strided_slice %10 {offsets = [0, 14], sizes = [1, 993], strides = [1, 1]} : vector<1x1024xbf16> to vector<1x993xbf16>
    %26 = vector.extract_strided_slice %10 {offsets = [0, 15], sizes = [1, 993], strides = [1, 1]} : vector<1x1024xbf16> to vector<1x993xbf16>
    %27 = vector.extract_strided_slice %10 {offsets = [0, 16], sizes = [1, 993], strides = [1, 1]} : vector<1x1024xbf16> to vector<1x993xbf16>
    %28 = vector.extract_strided_slice %10 {offsets = [0, 17], sizes = [1, 993], strides = [1, 1]} : vector<1x1024xbf16> to vector<1x993xbf16>
    %29 = vector.extract_strided_slice %10 {offsets = [0, 18], sizes = [1, 993], strides = [1, 1]} : vector<1x1024xbf16> to vector<1x993xbf16>
    %30 = vector.extract_strided_slice %10 {offsets = [0, 19], sizes = [1, 993], strides = [1, 1]} : vector<1x1024xbf16> to vector<1x993xbf16>
    %31 = vector.extract_strided_slice %10 {offsets = [0, 20], sizes = [1, 993], strides = [1, 1]} : vector<1x1024xbf16> to vector<1x993xbf16>
    %32 = vector.extract_strided_slice %10 {offsets = [0, 21], sizes = [1, 993], strides = [1, 1]} : vector<1x1024xbf16> to vector<1x993xbf16>
    %33 = vector.extract_strided_slice %10 {offsets = [0, 22], sizes = [1, 993], strides = [1, 1]} : vector<1x1024xbf16> to vector<1x993xbf16>
    %34 = vector.extract_strided_slice %10 {offsets = [0, 23], sizes = [1, 993], strides = [1, 1]} : vector<1x1024xbf16> to vector<1x993xbf16>
    %35 = vector.extract_strided_slice %10 {offsets = [0, 24], sizes = [1, 993], strides = [1, 1]} : vector<1x1024xbf16> to vector<1x993xbf16>
    %36 = vector.extract_strided_slice %10 {offsets = [0, 25], sizes = [1, 993], strides = [1, 1]} : vector<1x1024xbf16> to vector<1x993xbf16>
    %37 = vector.extract_strided_slice %10 {offsets = [0, 26], sizes = [1, 993], strides = [1, 1]} : vector<1x1024xbf16> to vector<1x993xbf16>
    %38 = vector.extract_strided_slice %10 {offsets = [0, 27], sizes = [1, 993], strides = [1, 1]} : vector<1x1024xbf16> to vector<1x993xbf16>
    %39 = vector.extract_strided_slice %10 {offsets = [0, 28], sizes = [1, 993], strides = [1, 1]} : vector<1x1024xbf16> to vector<1x993xbf16>
    %40 = vector.extract_strided_slice %10 {offsets = [0, 29], sizes = [1, 993], strides = [1, 1]} : vector<1x1024xbf16> to vector<1x993xbf16>
    %41 = vector.extract_strided_slice %10 {offsets = [0, 30], sizes = [1, 993], strides = [1, 1]} : vector<1x1024xbf16> to vector<1x993xbf16>
    %42 = vector.extract_strided_slice %10 {offsets = [0, 31], sizes = [1, 993], strides = [1, 1]} : vector<1x1024xbf16> to vector<1x993xbf16>
    %43 = tpu.concatenate %11, %12, %13, %14, %15, %16, %17, %18, %19, %20, %21, %22, %23, %24, %25, %26 in 0 : vector<1x993xbf16>, vector<1x993xbf16>, vector<1x993xbf16>, vector<1x993xbf16>, vector<1x993xbf16>, vector<1x993xbf16>, vector<1x993xbf16>, vector<1x993xbf16>, vector<1x993xbf16>, vector<1x993xbf16>, vector<1x993xbf16>, vector<1x993xbf16>, vector<1x993xbf16>, vector<1x993xbf16>, vector<1x993xbf16>, vector<1x993xbf16> -> vector<16x993xbf16>
    %44 = tpu.concatenate %27, %28, %29, %30, %31, %32, %33, %34, %35, %36, %37, %38, %39, %40, %41, %42 in 0 : vector<1x993xbf16>, vector<1x993xbf16>, vector<1x993xbf16>, vector<1x993xbf16>, vector<1x993xbf16>, vector<1x993xbf16>, vector<1x993xbf16>, vector<1x993xbf16>, vector<1x993xbf16>, vector<1x993xbf16>, vector<1x993xbf16>, vector<1x993xbf16>, vector<1x993xbf16>, vector<1x993xbf16>, vector<1x993xbf16>, vector<1x993xbf16> -> vector<16x993xbf16>
    %45 = tpu.concatenate %43, %44 in 0 : vector<16x993xbf16>, vector<16x993xbf16> -> vector<32x993xbf16>
    %c0_4 = arith.constant 0 : index
    %c0_5 = arith.constant 0 : index
    %46 = vector.load %arg2[%c0_4, %c0_5] : memref<16x32xbf16, #tpu.memory_space<vmem>>, vector<16x32xbf16>
    %cst = arith.constant dense<0.000000e+00> : vector<16x993xf32>
    %47 = tpu.matmul %46, %45, %cst {dimension_numbers = #tpu.dot_dimension_numbers<[1], [0], [0], [1], [0, 0, 1, 1], [], []>} : vector<16x32xbf16>, vector<32x993xbf16>, vector<16x993xf32> -> vector<16x993xf32>
    %c0_6 = arith.constant 0 : index
    %c0_7 = arith.constant 0 : index
    %48 = vector.load %arg3[%c0_6, %c0_7] : memref<16x1xf32, #tpu.memory_space<vmem>>, vector<16x1xf32>
    %49 = vector.broadcast %48 : vector<16x1xf32> to vector<16x993xf32>
    %50 = arith.addf %47, %49 : vector<16x993xf32>
    %51 = arith.negf %50 : vector<16x993xf32>
    %52 = math.exp %51 : vector<16x993xf32>
    %cst_8 = arith.constant 1.000000e+00 : f32
    %53 = vector.broadcast %cst_8 : f32 to vector<16x993xf32>
    %54 = arith.addf %53, %52 : vector<16x993xf32>
    %55 = arith.divf %53, %54 : vector<16x993xf32>
    %56 = arith.mulf %50, %55 : vector<16x993xf32>
    %57 = arith.truncf %56 : vector<16x993xf32> to vector<16x993xbf16>
    %58 = vector.extract_strided_slice %57 {offsets = [0, 0], sizes = [16, 962], strides = [1, 1]} : vector<16x993xbf16> to vector<16x962xbf16>
    %59 = vector.extract_strided_slice %57 {offsets = [0, 1], sizes = [16, 962], strides = [1, 1]} : vector<16x993xbf16> to vector<16x962xbf16>
    %60 = vector.extract_strided_slice %57 {offsets = [0, 2], sizes = [16, 962], strides = [1, 1]} : vector<16x993xbf16> to vector<16x962xbf16>
    %61 = vector.extract_strided_slice %57 {offsets = [0, 3], sizes = [16, 962], strides = [1, 1]} : vector<16x993xbf16> to vector<16x962xbf16>
    %62 = vector.extract_strided_slice %57 {offsets = [0, 4], sizes = [16, 962], strides = [1, 1]} : vector<16x993xbf16> to vector<16x962xbf16>
    %63 = vector.extract_strided_slice %57 {offsets = [0, 5], sizes = [16, 962], strides = [1, 1]} : vector<16x993xbf16> to vector<16x962xbf16>
    %64 = vector.extract_strided_slice %57 {offsets = [0, 6], sizes = [16, 962], strides = [1, 1]} : vector<16x993xbf16> to vector<16x962xbf16>
    %65 = vector.extract_strided_slice %57 {offsets = [0, 7], sizes = [16, 962], strides = [1, 1]} : vector<16x993xbf16> to vector<16x962xbf16>
    %66 = vector.extract_strided_slice %57 {offsets = [0, 8], sizes = [16, 962], strides = [1, 1]} : vector<16x993xbf16> to vector<16x962xbf16>
    %67 = vector.extract_strided_slice %57 {offsets = [0, 9], sizes = [16, 962], strides = [1, 1]} : vector<16x993xbf16> to vector<16x962xbf16>
    %68 = vector.extract_strided_slice %57 {offsets = [0, 10], sizes = [16, 962], strides = [1, 1]} : vector<16x993xbf16> to vector<16x962xbf16>
    %69 = vector.extract_strided_slice %57 {offsets = [0, 11], sizes = [16, 962], strides = [1, 1]} : vector<16x993xbf16> to vector<16x962xbf16>
    %70 = vector.extract_strided_slice %57 {offsets = [0, 12], sizes = [16, 962], strides = [1, 1]} : vector<16x993xbf16> to vector<16x962xbf16>
    %71 = vector.extract_strided_slice %57 {offsets = [0, 13], sizes = [16, 962], strides = [1, 1]} : vector<16x993xbf16> to vector<16x962xbf16>
    %72 = vector.extract_strided_slice %57 {offsets = [0, 14], sizes = [16, 962], strides = [1, 1]} : vector<16x993xbf16> to vector<16x962xbf16>
    %73 = vector.extract_strided_slice %57 {offsets = [0, 15], sizes = [16, 962], strides = [1, 1]} : vector<16x993xbf16> to vector<16x962xbf16>
    %74 = vector.extract_strided_slice %57 {offsets = [0, 16], sizes = [16, 962], strides = [1, 1]} : vector<16x993xbf16> to vector<16x962xbf16>
    %75 = vector.extract_strided_slice %57 {offsets = [0, 17], sizes = [16, 962], strides = [1, 1]} : vector<16x993xbf16> to vector<16x962xbf16>
    %76 = vector.extract_strided_slice %57 {offsets = [0, 18], sizes = [16, 962], strides = [1, 1]} : vector<16x993xbf16> to vector<16x962xbf16>
    %77 = vector.extract_strided_slice %57 {offsets = [0, 19], sizes = [16, 962], strides = [1, 1]} : vector<16x993xbf16> to vector<16x962xbf16>
    %78 = vector.extract_strided_slice %57 {offsets = [0, 20], sizes = [16, 962], strides = [1, 1]} : vector<16x993xbf16> to vector<16x962xbf16>
    %79 = vector.extract_strided_slice %57 {offsets = [0, 21], sizes = [16, 962], strides = [1, 1]} : vector<16x993xbf16> to vector<16x962xbf16>
    %80 = vector.extract_strided_slice %57 {offsets = [0, 22], sizes = [16, 962], strides = [1, 1]} : vector<16x993xbf16> to vector<16x962xbf16>
    %81 = vector.extract_strided_slice %57 {offsets = [0, 23], sizes = [16, 962], strides = [1, 1]} : vector<16x993xbf16> to vector<16x962xbf16>
    %82 = vector.extract_strided_slice %57 {offsets = [0, 24], sizes = [16, 962], strides = [1, 1]} : vector<16x993xbf16> to vector<16x962xbf16>
    %83 = vector.extract_strided_slice %57 {offsets = [0, 25], sizes = [16, 962], strides = [1, 1]} : vector<16x993xbf16> to vector<16x962xbf16>
    %84 = vector.extract_strided_slice %57 {offsets = [0, 26], sizes = [16, 962], strides = [1, 1]} : vector<16x993xbf16> to vector<16x962xbf16>
    %85 = vector.extract_strided_slice %57 {offsets = [0, 27], sizes = [16, 962], strides = [1, 1]} : vector<16x993xbf16> to vector<16x962xbf16>
    %86 = vector.extract_strided_slice %57 {offsets = [0, 28], sizes = [16, 962], strides = [1, 1]} : vector<16x993xbf16> to vector<16x962xbf16>
    %87 = vector.extract_strided_slice %57 {offsets = [0, 29], sizes = [16, 962], strides = [1, 1]} : vector<16x993xbf16> to vector<16x962xbf16>
    %88 = vector.extract_strided_slice %57 {offsets = [0, 30], sizes = [16, 962], strides = [1, 1]} : vector<16x993xbf16> to vector<16x962xbf16>
    %89 = vector.extract_strided_slice %57 {offsets = [0, 31], sizes = [16, 962], strides = [1, 1]} : vector<16x993xbf16> to vector<16x962xbf16>
    %90 = tpu.concatenate %58, %59, %60, %61, %62, %63, %64, %65, %66, %67, %68, %69, %70, %71, %72, %73 in 0 : vector<16x962xbf16>, vector<16x962xbf16>, vector<16x962xbf16>, vector<16x962xbf16>, vector<16x962xbf16>, vector<16x962xbf16>, vector<16x962xbf16>, vector<16x962xbf16>, vector<16x962xbf16>, vector<16x962xbf16>, vector<16x962xbf16>, vector<16x962xbf16>, vector<16x962xbf16>, vector<16x962xbf16>, vector<16x962xbf16>, vector<16x962xbf16> -> vector<256x962xbf16>
    %91 = tpu.concatenate %74, %75, %76, %77, %78, %79, %80, %81, %82, %83, %84, %85, %86, %87, %88, %89 in 0 : vector<16x962xbf16>, vector<16x962xbf16>, vector<16x962xbf16>, vector<16x962xbf16>, vector<16x962xbf16>, vector<16x962xbf16>, vector<16x962xbf16>, vector<16x962xbf16>, vector<16x962xbf16>, vector<16x962xbf16>, vector<16x962xbf16>, vector<16x962xbf16>, vector<16x962xbf16>, vector<16x962xbf16>, vector<16x962xbf16>, vector<16x962xbf16> -> vector<256x962xbf16>
    %92 = tpu.concatenate %90, %91 in 0 : vector<256x962xbf16>, vector<256x962xbf16> -> vector<512x962xbf16>
    %c0_9 = arith.constant 0 : index
    %c0_10 = arith.constant 0 : index
    %93 = vector.load %arg4[%c0_9, %c0_10] : memref<16x512xbf16, #tpu.memory_space<vmem>>, vector<16x512xbf16>
    %cst_11 = arith.constant dense<0.000000e+00> : vector<16x962xf32>
    %94 = tpu.matmul %93, %92, %cst_11 {dimension_numbers = #tpu.dot_dimension_numbers<[1], [0], [0], [1], [0, 0, 1, 1], [], []>} : vector<16x512xbf16>, vector<512x962xbf16>, vector<16x962xf32> -> vector<16x962xf32>
    %c0_12 = arith.constant 0 : index
    %c0_13 = arith.constant 0 : index
    %95 = vector.load %arg5[%c0_12, %c0_13] : memref<16x3xf32, #tpu.memory_space<vmem>>, vector<16x1xf32>
    %c0_14 = arith.constant 0 : index
    %c1 = arith.constant 1 : index
    %96 = vector.load %arg5[%c0_14, %c1] : memref<16x3xf32, #tpu.memory_space<vmem>>, vector<16x1xf32>
    %c0_15 = arith.constant 0 : index
    %c2 = arith.constant 2 : index
    %97 = vector.load %arg5[%c0_15, %c2] : memref<16x3xf32, #tpu.memory_space<vmem>>, vector<16x1xf32>
    %98 = vector.broadcast %95 : vector<16x1xf32> to vector<16x962xf32>
    %99 = arith.addf %94, %98 : vector<16x962xf32>
    %cst_16 = arith.constant 9.99999997E-7 : f32
    %100 = vector.broadcast %cst_16 : f32 to vector<16x962xf32>
    %101 = arith.maximumf %99, %100 : vector<16x962xf32>
    %102 = math.log %101 : vector<16x962xf32>
    %103 = vector.broadcast %2 : vector<1x1xf32> to vector<16x962xf32>
    %104 = arith.mulf %103, %102 : vector<16x962xf32>
    %105 = math.exp %104 : vector<16x962xf32>
    %c0_17 = arith.constant 0 : index
    %c0_18 = arith.constant 0 : index
    %106 = vector.load %arg14[%c0_17, %c0_18] : memref<962x240xf32, #tpu.memory_space<vmem>>, vector<962x240xf32>
    %cst_19 = arith.constant dense<0.000000e+00> : vector<16x240xf32>
    %107 = tpu.matmul %105, %106, %cst_19 {dimension_numbers = #tpu.dot_dimension_numbers<[1], [0], [0], [1], [0, 0, 1, 1], [], []>} : vector<16x962xf32>, vector<962x240xf32>, vector<16x240xf32> -> vector<16x240xf32>
    %108 = math.log %107 : vector<16x240xf32>
    %109 = vector.broadcast %5 : vector<1x1xf32> to vector<16x240xf32>
    %110 = arith.mulf %108, %109 : vector<16x240xf32>
    %111 = math.exp %110 : vector<16x240xf32>
    %112 = vector.broadcast %96 : vector<16x1xf32> to vector<16x240xf32>
    %113 = arith.mulf %111, %112 : vector<16x240xf32>
    %114 = vector.broadcast %97 : vector<16x1xf32> to vector<16x240xf32>
    %115 = arith.addf %113, %114 : vector<16x240xf32>
    %116 = arith.negf %115 : vector<16x240xf32>
    %117 = math.exp %116 : vector<16x240xf32>
    %cst_20 = arith.constant 1.000000e+00 : f32
    %118 = vector.broadcast %cst_20 : f32 to vector<16x240xf32>
    %119 = arith.addf %118, %117 : vector<16x240xf32>
    %120 = arith.divf %118, %119 : vector<16x240xf32>
    %121 = arith.mulf %115, %120 : vector<16x240xf32>
    %122 = arith.truncf %121 : vector<16x240xf32> to vector<16x240xbf16>
    %cst_21 = arith.constant 0.000000e+00 : bf16
    %123 = vector.broadcast %cst_21 : bf16 to vector<16x1xbf16>
    %124 = tpu.concatenate %123, %122, %123 in 1 : vector<16x1xbf16>, vector<16x240xbf16>, vector<16x1xbf16> -> vector<16x242xbf16>
    %125 = vector.extract_strided_slice %124 {offsets = [0, 0], sizes = [16, 211], strides = [1, 1]} : vector<16x242xbf16> to vector<16x211xbf16>
    %126 = vector.extract_strided_slice %124 {offsets = [0, 1], sizes = [16, 211], strides = [1, 1]} : vector<16x242xbf16> to vector<16x211xbf16>
    %127 = vector.extract_strided_slice %124 {offsets = [0, 2], sizes = [16, 211], strides = [1, 1]} : vector<16x242xbf16> to vector<16x211xbf16>
    %128 = vector.extract_strided_slice %124 {offsets = [0, 3], sizes = [16, 211], strides = [1, 1]} : vector<16x242xbf16> to vector<16x211xbf16>
    %129 = vector.extract_strided_slice %124 {offsets = [0, 4], sizes = [16, 211], strides = [1, 1]} : vector<16x242xbf16> to vector<16x211xbf16>
    %130 = vector.extract_strided_slice %124 {offsets = [0, 5], sizes = [16, 211], strides = [1, 1]} : vector<16x242xbf16> to vector<16x211xbf16>
    %131 = vector.extract_strided_slice %124 {offsets = [0, 6], sizes = [16, 211], strides = [1, 1]} : vector<16x242xbf16> to vector<16x211xbf16>
    %132 = vector.extract_strided_slice %124 {offsets = [0, 7], sizes = [16, 211], strides = [1, 1]} : vector<16x242xbf16> to vector<16x211xbf16>
    %133 = vector.extract_strided_slice %124 {offsets = [0, 8], sizes = [16, 211], strides = [1, 1]} : vector<16x242xbf16> to vector<16x211xbf16>
    %134 = vector.extract_strided_slice %124 {offsets = [0, 9], sizes = [16, 211], strides = [1, 1]} : vector<16x242xbf16> to vector<16x211xbf16>
    %135 = vector.extract_strided_slice %124 {offsets = [0, 10], sizes = [16, 211], strides = [1, 1]} : vector<16x242xbf16> to vector<16x211xbf16>
    %136 = vector.extract_strided_slice %124 {offsets = [0, 11], sizes = [16, 211], strides = [1, 1]} : vector<16x242xbf16> to vector<16x211xbf16>
    %137 = vector.extract_strided_slice %124 {offsets = [0, 12], sizes = [16, 211], strides = [1, 1]} : vector<16x242xbf16> to vector<16x211xbf16>
    %138 = vector.extract_strided_slice %124 {offsets = [0, 13], sizes = [16, 211], strides = [1, 1]} : vector<16x242xbf16> to vector<16x211xbf16>
    %139 = vector.extract_strided_slice %124 {offsets = [0, 14], sizes = [16, 211], strides = [1, 1]} : vector<16x242xbf16> to vector<16x211xbf16>
    %140 = vector.extract_strided_slice %124 {offsets = [0, 15], sizes = [16, 211], strides = [1, 1]} : vector<16x242xbf16> to vector<16x211xbf16>
    %141 = vector.extract_strided_slice %124 {offsets = [0, 16], sizes = [16, 211], strides = [1, 1]} : vector<16x242xbf16> to vector<16x211xbf16>
    %142 = vector.extract_strided_slice %124 {offsets = [0, 17], sizes = [16, 211], strides = [1, 1]} : vector<16x242xbf16> to vector<16x211xbf16>
    %143 = vector.extract_strided_slice %124 {offsets = [0, 18], sizes = [16, 211], strides = [1, 1]} : vector<16x242xbf16> to vector<16x211xbf16>
    %144 = vector.extract_strided_slice %124 {offsets = [0, 19], sizes = [16, 211], strides = [1, 1]} : vector<16x242xbf16> to vector<16x211xbf16>
    %145 = vector.extract_strided_slice %124 {offsets = [0, 20], sizes = [16, 211], strides = [1, 1]} : vector<16x242xbf16> to vector<16x211xbf16>
    %146 = vector.extract_strided_slice %124 {offsets = [0, 21], sizes = [16, 211], strides = [1, 1]} : vector<16x242xbf16> to vector<16x211xbf16>
    %147 = vector.extract_strided_slice %124 {offsets = [0, 22], sizes = [16, 211], strides = [1, 1]} : vector<16x242xbf16> to vector<16x211xbf16>
    %148 = vector.extract_strided_slice %124 {offsets = [0, 23], sizes = [16, 211], strides = [1, 1]} : vector<16x242xbf16> to vector<16x211xbf16>
    %149 = vector.extract_strided_slice %124 {offsets = [0, 24], sizes = [16, 211], strides = [1, 1]} : vector<16x242xbf16> to vector<16x211xbf16>
    %150 = vector.extract_strided_slice %124 {offsets = [0, 25], sizes = [16, 211], strides = [1, 1]} : vector<16x242xbf16> to vector<16x211xbf16>
    %151 = vector.extract_strided_slice %124 {offsets = [0, 26], sizes = [16, 211], strides = [1, 1]} : vector<16x242xbf16> to vector<16x211xbf16>
    %152 = vector.extract_strided_slice %124 {offsets = [0, 27], sizes = [16, 211], strides = [1, 1]} : vector<16x242xbf16> to vector<16x211xbf16>
    %153 = vector.extract_strided_slice %124 {offsets = [0, 28], sizes = [16, 211], strides = [1, 1]} : vector<16x242xbf16> to vector<16x211xbf16>
    %154 = vector.extract_strided_slice %124 {offsets = [0, 29], sizes = [16, 211], strides = [1, 1]} : vector<16x242xbf16> to vector<16x211xbf16>
    %155 = vector.extract_strided_slice %124 {offsets = [0, 30], sizes = [16, 211], strides = [1, 1]} : vector<16x242xbf16> to vector<16x211xbf16>
    %156 = vector.extract_strided_slice %124 {offsets = [0, 31], sizes = [16, 211], strides = [1, 1]} : vector<16x242xbf16> to vector<16x211xbf16>
    %157 = tpu.concatenate %125, %126, %127, %128, %129, %130, %131, %132, %133, %134, %135, %136, %137, %138, %139, %140 in 0 : vector<16x211xbf16>, vector<16x211xbf16>, vector<16x211xbf16>, vector<16x211xbf16>, vector<16x211xbf16>, vector<16x211xbf16>, vector<16x211xbf16>, vector<16x211xbf16>, vector<16x211xbf16>, vector<16x211xbf16>, vector<16x211xbf16>, vector<16x211xbf16>, vector<16x211xbf16>, vector<16x211xbf16>, vector<16x211xbf16>, vector<16x211xbf16> -> vector<256x211xbf16>
    %158 = tpu.concatenate %141, %142, %143, %144, %145, %146, %147, %148, %149, %150, %151, %152, %153, %154, %155, %156 in 0 : vector<16x211xbf16>, vector<16x211xbf16>, vector<16x211xbf16>, vector<16x211xbf16>, vector<16x211xbf16>, vector<16x211xbf16>, vector<16x211xbf16>, vector<16x211xbf16>, vector<16x211xbf16>, vector<16x211xbf16>, vector<16x211xbf16>, vector<16x211xbf16>, vector<16x211xbf16>, vector<16x211xbf16>, vector<16x211xbf16>, vector<16x211xbf16> -> vector<256x211xbf16>
    %159 = tpu.concatenate %157, %158 in 0 : vector<256x211xbf16>, vector<256x211xbf16> -> vector<512x211xbf16>
    %c0_22 = arith.constant 0 : index
    %c0_23 = arith.constant 0 : index
    %160 = vector.load %arg6[%c0_22, %c0_23] : memref<32x512xbf16, #tpu.memory_space<vmem>>, vector<32x512xbf16>
    %cst_24 = arith.constant dense<0.000000e+00> : vector<32x211xf32>
    %161 = tpu.matmul %160, %159, %cst_24 {dimension_numbers = #tpu.dot_dimension_numbers<[1], [0], [0], [1], [0, 0, 1, 1], [], []>} : vector<32x512xbf16>, vector<512x211xbf16>, vector<32x211xf32> -> vector<32x211xf32>
    %c0_25 = arith.constant 0 : index
    %c0_26 = arith.constant 0 : index
    %162 = vector.load %arg7[%c0_25, %c0_26] : memref<32x1xf32, #tpu.memory_space<vmem>>, vector<32x1xf32>
    %163 = vector.broadcast %162 : vector<32x1xf32> to vector<32x211xf32>
    %164 = arith.addf %161, %163 : vector<32x211xf32>
    %165 = arith.negf %164 : vector<32x211xf32>
    %166 = math.exp %165 : vector<32x211xf32>
    %cst_27 = arith.constant 1.000000e+00 : f32
    %167 = vector.broadcast %cst_27 : f32 to vector<32x211xf32>
    %168 = arith.addf %167, %166 : vector<32x211xf32>
    %169 = arith.divf %167, %168 : vector<32x211xf32>
    %170 = arith.mulf %164, %169 : vector<32x211xf32>
    %171 = arith.truncf %170 : vector<32x211xf32> to vector<32x211xbf16>
    %cst_28 = arith.constant 0.000000e+00 : bf16
    %172 = vector.broadcast %cst_28 : bf16 to vector<32x1xbf16>
    %173 = tpu.concatenate %172, %171, %172 in 1 : vector<32x1xbf16>, vector<32x211xbf16>, vector<32x1xbf16> -> vector<32x213xbf16>
    %174 = vector.extract_strided_slice %173 {offsets = [0, 0], sizes = [32, 198], strides = [1, 1]} : vector<32x213xbf16> to vector<32x198xbf16>
    %175 = vector.extract_strided_slice %173 {offsets = [0, 1], sizes = [32, 198], strides = [1, 1]} : vector<32x213xbf16> to vector<32x198xbf16>
    %176 = vector.extract_strided_slice %173 {offsets = [0, 2], sizes = [32, 198], strides = [1, 1]} : vector<32x213xbf16> to vector<32x198xbf16>
    %177 = vector.extract_strided_slice %173 {offsets = [0, 3], sizes = [32, 198], strides = [1, 1]} : vector<32x213xbf16> to vector<32x198xbf16>
    %178 = vector.extract_strided_slice %173 {offsets = [0, 4], sizes = [32, 198], strides = [1, 1]} : vector<32x213xbf16> to vector<32x198xbf16>
    %179 = vector.extract_strided_slice %173 {offsets = [0, 5], sizes = [32, 198], strides = [1, 1]} : vector<32x213xbf16> to vector<32x198xbf16>
    %180 = vector.extract_strided_slice %173 {offsets = [0, 6], sizes = [32, 198], strides = [1, 1]} : vector<32x213xbf16> to vector<32x198xbf16>
    %181 = vector.extract_strided_slice %173 {offsets = [0, 7], sizes = [32, 198], strides = [1, 1]} : vector<32x213xbf16> to vector<32x198xbf16>
    %182 = vector.extract_strided_slice %173 {offsets = [0, 8], sizes = [32, 198], strides = [1, 1]} : vector<32x213xbf16> to vector<32x198xbf16>
    %183 = vector.extract_strided_slice %173 {offsets = [0, 9], sizes = [32, 198], strides = [1, 1]} : vector<32x213xbf16> to vector<32x198xbf16>
    %184 = vector.extract_strided_slice %173 {offsets = [0, 10], sizes = [32, 198], strides = [1, 1]} : vector<32x213xbf16> to vector<32x198xbf16>
    %185 = vector.extract_strided_slice %173 {offsets = [0, 11], sizes = [32, 198], strides = [1, 1]} : vector<32x213xbf16> to vector<32x198xbf16>
    %186 = vector.extract_strided_slice %173 {offsets = [0, 12], sizes = [32, 198], strides = [1, 1]} : vector<32x213xbf16> to vector<32x198xbf16>
    %187 = vector.extract_strided_slice %173 {offsets = [0, 13], sizes = [32, 198], strides = [1, 1]} : vector<32x213xbf16> to vector<32x198xbf16>
    %188 = vector.extract_strided_slice %173 {offsets = [0, 14], sizes = [32, 198], strides = [1, 1]} : vector<32x213xbf16> to vector<32x198xbf16>
    %189 = vector.extract_strided_slice %173 {offsets = [0, 15], sizes = [32, 198], strides = [1, 1]} : vector<32x213xbf16> to vector<32x198xbf16>
    %190 = tpu.concatenate %174, %175, %176, %177, %178, %179, %180, %181, %182, %183, %184, %185, %186, %187, %188, %189 in 0 : vector<32x198xbf16>, vector<32x198xbf16>, vector<32x198xbf16>, vector<32x198xbf16>, vector<32x198xbf16>, vector<32x198xbf16>, vector<32x198xbf16>, vector<32x198xbf16>, vector<32x198xbf16>, vector<32x198xbf16>, vector<32x198xbf16>, vector<32x198xbf16>, vector<32x198xbf16>, vector<32x198xbf16>, vector<32x198xbf16>, vector<32x198xbf16> -> vector<512x198xbf16>
    %c0_29 = arith.constant 0 : index
    %c0_30 = arith.constant 0 : index
    %191 = vector.load %arg8[%c0_29, %c0_30] : memref<32x512xbf16, #tpu.memory_space<vmem>>, vector<32x512xbf16>
    %cst_31 = arith.constant dense<0.000000e+00> : vector<32x198xf32>
    %192 = tpu.matmul %191, %190, %cst_31 {dimension_numbers = #tpu.dot_dimension_numbers<[1], [0], [0], [1], [0, 0, 1, 1], [], []>} : vector<32x512xbf16>, vector<512x198xbf16>, vector<32x198xf32> -> vector<32x198xf32>
    %c0_32 = arith.constant 0 : index
    %c0_33 = arith.constant 0 : index
    %193 = vector.load %arg9[%c0_32, %c0_33] : memref<32x3xf32, #tpu.memory_space<vmem>>, vector<32x1xf32>
    %c0_34 = arith.constant 0 : index
    %c1_35 = arith.constant 1 : index
    %194 = vector.load %arg9[%c0_34, %c1_35] : memref<32x3xf32, #tpu.memory_space<vmem>>, vector<32x1xf32>
    %c0_36 = arith.constant 0 : index
    %c2_37 = arith.constant 2 : index
    %195 = vector.load %arg9[%c0_36, %c2_37] : memref<32x3xf32, #tpu.memory_space<vmem>>, vector<32x1xf32>
    %196 = vector.broadcast %193 : vector<32x1xf32> to vector<32x198xf32>
    %197 = arith.addf %192, %196 : vector<32x198xf32>
    %cst_38 = arith.constant 9.99999997E-7 : f32
    %198 = vector.broadcast %cst_38 : f32 to vector<32x198xf32>
    %199 = arith.maximumf %197, %198 : vector<32x198xf32>
    %200 = math.log %199 : vector<32x198xf32>
    %201 = vector.broadcast %3 : vector<1x1xf32> to vector<32x198xf32>
    %202 = arith.mulf %201, %200 : vector<32x198xf32>
    %203 = math.exp %202 : vector<32x198xf32>
    %c0_39 = arith.constant 0 : index
    %c0_40 = arith.constant 0 : index
    %204 = vector.load %arg15[%c0_39, %c0_40] : memref<198x49xf32, #tpu.memory_space<vmem>>, vector<198x49xf32>
    %cst_41 = arith.constant dense<0.000000e+00> : vector<32x49xf32>
    %205 = tpu.matmul %203, %204, %cst_41 {dimension_numbers = #tpu.dot_dimension_numbers<[1], [0], [0], [1], [0, 0, 1, 1], [], []>} : vector<32x198xf32>, vector<198x49xf32>, vector<32x49xf32> -> vector<32x49xf32>
    %206 = math.log %205 : vector<32x49xf32>
    %207 = vector.broadcast %6 : vector<1x1xf32> to vector<32x49xf32>
    %208 = arith.mulf %206, %207 : vector<32x49xf32>
    %209 = math.exp %208 : vector<32x49xf32>
    %210 = vector.broadcast %194 : vector<32x1xf32> to vector<32x49xf32>
    %211 = arith.mulf %209, %210 : vector<32x49xf32>
    %212 = vector.broadcast %195 : vector<32x1xf32> to vector<32x49xf32>
    %213 = arith.addf %211, %212 : vector<32x49xf32>
    %214 = arith.negf %213 : vector<32x49xf32>
    %215 = math.exp %214 : vector<32x49xf32>
    %cst_42 = arith.constant 1.000000e+00 : f32
    %216 = vector.broadcast %cst_42 : f32 to vector<32x49xf32>
    %217 = arith.addf %216, %215 : vector<32x49xf32>
    %218 = arith.divf %216, %217 : vector<32x49xf32>
    %219 = arith.mulf %213, %218 : vector<32x49xf32>
    %220 = arith.truncf %219 : vector<32x49xf32> to vector<32x49xbf16>
    %cst_43 = arith.constant 0.000000e+00 : bf16
    %221 = vector.broadcast %cst_43 : bf16 to vector<32x1xbf16>
    %222 = tpu.concatenate %221, %220, %221 in 1 : vector<32x1xbf16>, vector<32x49xbf16>, vector<32x1xbf16> -> vector<32x51xbf16>
    %223 = vector.extract_strided_slice %222 {offsets = [0, 0], sizes = [32, 36], strides = [1, 1]} : vector<32x51xbf16> to vector<32x36xbf16>
    %224 = vector.extract_strided_slice %222 {offsets = [0, 1], sizes = [32, 36], strides = [1, 1]} : vector<32x51xbf16> to vector<32x36xbf16>
    %225 = vector.extract_strided_slice %222 {offsets = [0, 2], sizes = [32, 36], strides = [1, 1]} : vector<32x51xbf16> to vector<32x36xbf16>
    %226 = vector.extract_strided_slice %222 {offsets = [0, 3], sizes = [32, 36], strides = [1, 1]} : vector<32x51xbf16> to vector<32x36xbf16>
    %227 = vector.extract_strided_slice %222 {offsets = [0, 4], sizes = [32, 36], strides = [1, 1]} : vector<32x51xbf16> to vector<32x36xbf16>
    %228 = vector.extract_strided_slice %222 {offsets = [0, 5], sizes = [32, 36], strides = [1, 1]} : vector<32x51xbf16> to vector<32x36xbf16>
    %229 = vector.extract_strided_slice %222 {offsets = [0, 6], sizes = [32, 36], strides = [1, 1]} : vector<32x51xbf16> to vector<32x36xbf16>
    %230 = vector.extract_strided_slice %222 {offsets = [0, 7], sizes = [32, 36], strides = [1, 1]} : vector<32x51xbf16> to vector<32x36xbf16>
    %231 = vector.extract_strided_slice %222 {offsets = [0, 8], sizes = [32, 36], strides = [1, 1]} : vector<32x51xbf16> to vector<32x36xbf16>
    %232 = vector.extract_strided_slice %222 {offsets = [0, 9], sizes = [32, 36], strides = [1, 1]} : vector<32x51xbf16> to vector<32x36xbf16>
    %233 = vector.extract_strided_slice %222 {offsets = [0, 10], sizes = [32, 36], strides = [1, 1]} : vector<32x51xbf16> to vector<32x36xbf16>
    %234 = vector.extract_strided_slice %222 {offsets = [0, 11], sizes = [32, 36], strides = [1, 1]} : vector<32x51xbf16> to vector<32x36xbf16>
    %235 = vector.extract_strided_slice %222 {offsets = [0, 12], sizes = [32, 36], strides = [1, 1]} : vector<32x51xbf16> to vector<32x36xbf16>
    %236 = vector.extract_strided_slice %222 {offsets = [0, 13], sizes = [32, 36], strides = [1, 1]} : vector<32x51xbf16> to vector<32x36xbf16>
    %237 = vector.extract_strided_slice %222 {offsets = [0, 14], sizes = [32, 36], strides = [1, 1]} : vector<32x51xbf16> to vector<32x36xbf16>
    %238 = vector.extract_strided_slice %222 {offsets = [0, 15], sizes = [32, 36], strides = [1, 1]} : vector<32x51xbf16> to vector<32x36xbf16>
    %239 = tpu.concatenate %223, %224, %225, %226, %227, %228, %229, %230, %231, %232, %233, %234, %235, %236, %237, %238 in 0 : vector<32x36xbf16>, vector<32x36xbf16>, vector<32x36xbf16>, vector<32x36xbf16>, vector<32x36xbf16>, vector<32x36xbf16>, vector<32x36xbf16>, vector<32x36xbf16>, vector<32x36xbf16>, vector<32x36xbf16>, vector<32x36xbf16>, vector<32x36xbf16>, vector<32x36xbf16>, vector<32x36xbf16>, vector<32x36xbf16>, vector<32x36xbf16> -> vector<512x36xbf16>
    %c0_44 = arith.constant 0 : index
    %c0_45 = arith.constant 0 : index
    %240 = vector.load %arg10[%c0_44, %c0_45] : memref<64x512xbf16, #tpu.memory_space<vmem>>, vector<64x512xbf16>
    %cst_46 = arith.constant dense<0.000000e+00> : vector<64x36xf32>
    %241 = tpu.matmul %240, %239, %cst_46 {dimension_numbers = #tpu.dot_dimension_numbers<[1], [0], [0], [1], [0, 0, 1, 1], [], []>} : vector<64x512xbf16>, vector<512x36xbf16>, vector<64x36xf32> -> vector<64x36xf32>
    %c0_47 = arith.constant 0 : index
    %c0_48 = arith.constant 0 : index
    %242 = vector.load %arg11[%c0_47, %c0_48] : memref<64x1xf32, #tpu.memory_space<vmem>>, vector<64x1xf32>
    %243 = vector.broadcast %242 : vector<64x1xf32> to vector<64x36xf32>
    %244 = arith.addf %241, %243 : vector<64x36xf32>
    %245 = arith.negf %244 : vector<64x36xf32>
    %246 = math.exp %245 : vector<64x36xf32>
    %cst_49 = arith.constant 1.000000e+00 : f32
    %247 = vector.broadcast %cst_49 : f32 to vector<64x36xf32>
    %248 = arith.addf %247, %246 : vector<64x36xf32>
    %249 = arith.divf %247, %248 : vector<64x36xf32>
    %250 = arith.mulf %244, %249 : vector<64x36xf32>
    %251 = arith.truncf %250 : vector<64x36xf32> to vector<64x36xbf16>
    %cst_50 = arith.constant 0.000000e+00 : bf16
    %252 = vector.broadcast %cst_50 : bf16 to vector<64x1xbf16>
    %253 = tpu.concatenate %252, %251, %252 in 1 : vector<64x1xbf16>, vector<64x36xbf16>, vector<64x1xbf16> -> vector<64x38xbf16>
    %254 = vector.extract_strided_slice %253 {offsets = [0, 0], sizes = [64, 23], strides = [1, 1]} : vector<64x38xbf16> to vector<64x23xbf16>
    %255 = vector.extract_strided_slice %253 {offsets = [0, 1], sizes = [64, 23], strides = [1, 1]} : vector<64x38xbf16> to vector<64x23xbf16>
    %256 = vector.extract_strided_slice %253 {offsets = [0, 2], sizes = [64, 23], strides = [1, 1]} : vector<64x38xbf16> to vector<64x23xbf16>
    %257 = vector.extract_strided_slice %253 {offsets = [0, 3], sizes = [64, 23], strides = [1, 1]} : vector<64x38xbf16> to vector<64x23xbf16>
    %258 = vector.extract_strided_slice %253 {offsets = [0, 4], sizes = [64, 23], strides = [1, 1]} : vector<64x38xbf16> to vector<64x23xbf16>
    %259 = vector.extract_strided_slice %253 {offsets = [0, 5], sizes = [64, 23], strides = [1, 1]} : vector<64x38xbf16> to vector<64x23xbf16>
    %260 = vector.extract_strided_slice %253 {offsets = [0, 6], sizes = [64, 23], strides = [1, 1]} : vector<64x38xbf16> to vector<64x23xbf16>
    %261 = vector.extract_strided_slice %253 {offsets = [0, 7], sizes = [64, 23], strides = [1, 1]} : vector<64x38xbf16> to vector<64x23xbf16>
    %262 = vector.extract_strided_slice %253 {offsets = [0, 8], sizes = [64, 23], strides = [1, 1]} : vector<64x38xbf16> to vector<64x23xbf16>
    %263 = vector.extract_strided_slice %253 {offsets = [0, 9], sizes = [64, 23], strides = [1, 1]} : vector<64x38xbf16> to vector<64x23xbf16>
    %264 = vector.extract_strided_slice %253 {offsets = [0, 10], sizes = [64, 23], strides = [1, 1]} : vector<64x38xbf16> to vector<64x23xbf16>
    %265 = vector.extract_strided_slice %253 {offsets = [0, 11], sizes = [64, 23], strides = [1, 1]} : vector<64x38xbf16> to vector<64x23xbf16>
    %266 = vector.extract_strided_slice %253 {offsets = [0, 12], sizes = [64, 23], strides = [1, 1]} : vector<64x38xbf16> to vector<64x23xbf16>
    %267 = vector.extract_strided_slice %253 {offsets = [0, 13], sizes = [64, 23], strides = [1, 1]} : vector<64x38xbf16> to vector<64x23xbf16>
    %268 = vector.extract_strided_slice %253 {offsets = [0, 14], sizes = [64, 23], strides = [1, 1]} : vector<64x38xbf16> to vector<64x23xbf16>
    %269 = vector.extract_strided_slice %253 {offsets = [0, 15], sizes = [64, 23], strides = [1, 1]} : vector<64x38xbf16> to vector<64x23xbf16>
    %270 = tpu.concatenate %254, %255, %256, %257, %258, %259, %260, %261, %262, %263, %264, %265, %266, %267, %268, %269 in 0 : vector<64x23xbf16>, vector<64x23xbf16>, vector<64x23xbf16>, vector<64x23xbf16>, vector<64x23xbf16>, vector<64x23xbf16>, vector<64x23xbf16>, vector<64x23xbf16>, vector<64x23xbf16>, vector<64x23xbf16>, vector<64x23xbf16>, vector<64x23xbf16>, vector<64x23xbf16>, vector<64x23xbf16>, vector<64x23xbf16>, vector<64x23xbf16> -> vector<1024x23xbf16>
    %c0_51 = arith.constant 0 : index
    %c0_52 = arith.constant 0 : index
    %271 = vector.load %arg12[%c0_51, %c0_52] : memref<64x1024xbf16, #tpu.memory_space<vmem>>, vector<64x1024xbf16>
    %cst_53 = arith.constant dense<0.000000e+00> : vector<64x23xf32>
    %272 = tpu.matmul %271, %270, %cst_53 {dimension_numbers = #tpu.dot_dimension_numbers<[1], [0], [0], [1], [0, 0, 1, 1], [], []>} : vector<64x1024xbf16>, vector<1024x23xbf16>, vector<64x23xf32> -> vector<64x23xf32>
    %c0_54 = arith.constant 0 : index
    %c0_55 = arith.constant 0 : index
    %273 = vector.load %arg13[%c0_54, %c0_55] : memref<64x3xf32, #tpu.memory_space<vmem>>, vector<64x1xf32>
    %c0_56 = arith.constant 0 : index
    %c1_57 = arith.constant 1 : index
    %274 = vector.load %arg13[%c0_56, %c1_57] : memref<64x3xf32, #tpu.memory_space<vmem>>, vector<64x1xf32>
    %c0_58 = arith.constant 0 : index
    %c2_59 = arith.constant 2 : index
    %275 = vector.load %arg13[%c0_58, %c2_59] : memref<64x3xf32, #tpu.memory_space<vmem>>, vector<64x1xf32>
    %276 = vector.broadcast %273 : vector<64x1xf32> to vector<64x23xf32>
    %277 = arith.addf %272, %276 : vector<64x23xf32>
    %cst_60 = arith.constant 9.99999997E-7 : f32
    %278 = vector.broadcast %cst_60 : f32 to vector<64x23xf32>
    %279 = arith.maximumf %277, %278 : vector<64x23xf32>
    %280 = math.log %279 : vector<64x23xf32>
    %281 = vector.broadcast %4 : vector<1x1xf32> to vector<64x23xf32>
    %282 = arith.mulf %281, %280 : vector<64x23xf32>
    %283 = math.exp %282 : vector<64x23xf32>
    %c0_61 = arith.constant 0 : index
    %c0_62 = arith.constant 0 : index
    %284 = vector.load %arg16[%c0_61, %c0_62] : memref<23x11xf32, #tpu.memory_space<vmem>>, vector<23x11xf32>
    %cst_63 = arith.constant dense<0.000000e+00> : vector<64x11xf32>
    %285 = tpu.matmul %283, %284, %cst_63 {dimension_numbers = #tpu.dot_dimension_numbers<[1], [0], [0], [1], [0, 0, 1, 1], [], []>} : vector<64x23xf32>, vector<23x11xf32>, vector<64x11xf32> -> vector<64x11xf32>
    %286 = math.log %285 : vector<64x11xf32>
    %287 = vector.broadcast %7 : vector<1x1xf32> to vector<64x11xf32>
    %288 = arith.mulf %286, %287 : vector<64x11xf32>
    %289 = math.exp %288 : vector<64x11xf32>
    %290 = vector.broadcast %274 : vector<64x1xf32> to vector<64x11xf32>
    %291 = arith.mulf %289, %290 : vector<64x11xf32>
    %292 = vector.broadcast %275 : vector<64x1xf32> to vector<64x11xf32>
    %293 = arith.addf %291, %292 : vector<64x11xf32>
    %294 = arith.negf %293 : vector<64x11xf32>
    %295 = math.exp %294 : vector<64x11xf32>
    %cst_64 = arith.constant 1.000000e+00 : f32
    %296 = vector.broadcast %cst_64 : f32 to vector<64x11xf32>
    %297 = arith.addf %296, %295 : vector<64x11xf32>
    %298 = arith.divf %296, %297 : vector<64x11xf32>
    %299 = arith.mulf %293, %298 : vector<64x11xf32>
    %c0_65 = arith.constant 0 : index
    %c0_66 = arith.constant 0 : index
    %300 = vector.load %arg17[%c0_65, %c0_66] : memref<11x64xf32, #tpu.memory_space<vmem>>, vector<11x64xf32>
    %cst_67 = arith.constant dense<0.000000e+00> : vector<64x64xf32>
    %301 = tpu.matmul %299, %300, %cst_67 {dimension_numbers = #tpu.dot_dimension_numbers<[1], [0], [0], [1], [0, 0, 1, 1], [], []>} : vector<64x11xf32>, vector<11x64xf32>, vector<64x64xf32> -> vector<64x64xf32>
    %c0_68 = arith.constant 0 : index
    %c0_69 = arith.constant 0 : index
    %c0_70 = arith.constant 0 : index
    %302 = vector.load %arg19[%c0_68, %c0_69, %c0_70] : memref<1x64x64xf32, #tpu.memory_space<vmem>>, vector<1x64x64xf32>
    %303 = vector.shape_cast %302 : vector<1x64x64xf32> to vector<64x64xf32>
    %304 = vector.shape_cast %301 : vector<64x64xf32> to vector<1x64x64xf32>
    tpu.vector_store %arg19[%c0_68, %c0_69, %c0_70], %304 {strides = array<i32>} : memref<1x64x64xf32, #tpu.memory_space<vmem>>, vector<1x64x64xf32>,
    return
  }
  func.func @transform_0(%arg0: i32) -> (i32, i32, i32) {
    %c0_i32 = arith.constant 0 : i32
    %c0_i32_0 = arith.constant 0 : i32
    %c0_i32_1 = arith.constant 0 : i32
    return %arg0, %c0_i32, %c0_i32_0 : i32, i32, i32
  }
  func.func @transform_1(%arg0: i32) -> (i32, i32) {
    %c0_i32 = arith.constant 0 : i32
    %c0_i32_0 = arith.constant 0 : i32
    %c0_i32_1 = arith.constant 0 : i32
    return %c0_i32, %c0_i32_0 : i32, i32
  }
  func.func @transform_2(%arg0: i32) -> (i32, i32) {
    %c0_i32 = arith.constant 0 : i32
    %c0_i32_0 = arith.constant 0 : i32
    %c0_i32_1 = arith.constant 0 : i32
    return %c0_i32, %c0_i32_0 : i32, i32
  }
  func.func @transform_3(%arg0: i32) -> (i32, i32) {
    %c0_i32 = arith.constant 0 : i32
    %c0_i32_0 = arith.constant 0 : i32
    %c0_i32_1 = arith.constant 0 : i32
    return %c0_i32, %c0_i32_0 : i32, i32
  }
  func.func @transform_4(%arg0: i32) -> (i32, i32) {
    %c0_i32 = arith.constant 0 : i32
    %c0_i32_0 = arith.constant 0 : i32
    %c0_i32_1 = arith.constant 0 : i32
    return %c0_i32, %c0_i32_0 : i32, i32
  }
  func.func @transform_5(%arg0: i32) -> (i32, i32) {
    %c0_i32 = arith.constant 0 : i32
    %c0_i32_0 = arith.constant 0 : i32
    %c0_i32_1 = arith.constant 0 : i32
    return %c0_i32, %c0_i32_0 : i32, i32
  }
  func.func @transform_6(%arg0: i32) -> (i32, i32) {
    %c0_i32 = arith.constant 0 : i32
    %c0_i32_0 = arith.constant 0 : i32
    %c0_i32_1 = arith.constant 0 : i32
    return %c0_i32, %c0_i32_0 : i32, i32
  }
  func.func @transform_7(%arg0: i32) -> (i32, i32) {
    %c0_i32 = arith.constant 0 : i32
    %c0_i32_0 = arith.constant 0 : i32
    %c0_i32_1 = arith.constant 0 : i32
    return %c0_i32, %c0_i32_0 : i32, i32
  }
  func.func @transform_8(%arg0: i32) -> (i32, i32) {
    %c0_i32 = arith.constant 0 : i32
    %c0_i32_0 = arith.constant 0 : i32
    %c0_i32_1 = arith.constant 0 : i32
    return %c0_i32, %c0_i32_0 : i32, i32
  }
  func.func @transform_9(%arg0: i32) -> (i32, i32) {
    %c0_i32 = arith.constant 0 : i32
    %c0_i32_0 = arith.constant 0 : i32
    %c0_i32_1 = arith.constant 0 : i32
    return %c0_i32, %c0_i32_0 : i32, i32
  }
  func.func @transform_10(%arg0: i32) -> (i32, i32) {
    %c0_i32 = arith.constant 0 : i32
    %c0_i32_0 = arith.constant 0 : i32
    %c0_i32_1 = arith.constant 0 : i32
    return %c0_i32, %c0_i32_0 : i32, i32
  }
  func.func @transform_11(%arg0: i32) -> (i32, i32) {
    %c0_i32 = arith.constant 0 : i32
    %c0_i32_0 = arith.constant 0 : i32
    %c0_i32_1 = arith.constant 0 : i32
    return %c0_i32, %c0_i32_0 : i32, i32
  }
  func.func @transform_12(%arg0: i32) -> (i32, i32) {
    %c0_i32 = arith.constant 0 : i32
    %c0_i32_0 = arith.constant 0 : i32
    %c0_i32_1 = arith.constant 0 : i32
    return %c0_i32, %c0_i32_0 : i32, i32
  }
  func.func @transform_13(%arg0: i32) -> (i32, i32) {
    %c0_i32 = arith.constant 0 : i32
    %c0_i32_0 = arith.constant 0 : i32
    %c0_i32_1 = arith.constant 0 : i32
    return %c0_i32, %c0_i32_0 : i32, i32
  }
  func.func @transform_14(%arg0: i32) -> (i32, i32) {
    %c0_i32 = arith.constant 0 : i32
    %c0_i32_0 = arith.constant 0 : i32
    %c0_i32_1 = arith.constant 0 : i32
    return %c0_i32, %c0_i32_0 : i32, i32
  }
  func.func @transform_15(%arg0: i32) -> (i32, i32) {
    %c0_i32 = arith.constant 0 : i32
    %c0_i32_0 = arith.constant 0 : i32
    %c0_i32_1 = arith.constant 0 : i32
    return %c0_i32, %c0_i32_0 : i32, i32
  }
  func.func @transform_16(%arg0: i32) -> (i32, i32) {
    %c0_i32 = arith.constant 0 : i32
    %c0_i32_0 = arith.constant 0 : i32
    %c0_i32_1 = arith.constant 0 : i32
    return %c0_i32, %c0_i32_0 : i32, i32
  }
  func.func @transform_17(%arg0: i32) -> (i32, i32) {
    %c0_i32 = arith.constant 0 : i32
    %c0_i32_0 = arith.constant 0 : i32
    %c0_i32_1 = arith.constant 0 : i32
    return %c0_i32, %c0_i32_0 : i32, i32
  }
  func.func @transform_18(%arg0: i32) -> (i32, i32, i32) {
    %c0_i32 = arith.constant 0 : i32
    %c0_i32_0 = arith.constant 0 : i32
    %c0_i32_1 = arith.constant 0 : i32
    return %arg0, %c0_i32, %c0_i32_0 : i32, i32, i32
  }
}

</mosaic_0001>

<bundles_post_ra>
// kernel: cnn1d_hight_forward.1
= control target key start
LH: loop header
LB: loop body
LE: loop exit
PB: predicated region body
PF: predicated region fallthrough
CT: control target
= control target key end

     0   :  { %s14459_s0 = inlined_call_operand.hbm [shape: f32[2,1,1024], index: 0, kind: input, shape index: {}]   ;;  %s14460_s1 = inlined_call_operand.hbm [shape: bf16[16,32], index: 1, kind: input, shape index: {}]   ;;  %s14461_s2 = inlined_call_operand.vmem [shape: f32[16,1], index: 2, kind: input, shape index: {}]   ;;  %s14462_s3 = inlined_call_operand.vmem [shape: bf16[16,512], index: 3, kind: input, shape index: {}]   ;;  %s14463_s4 = inlined_call_operand.vmem [shape: f32[16,3], index: 4, kind: input, shape index: {}]   ;;  %s14464_s5 = inlined_call_operand.vmem [shape: bf16[32,512], index: 5, kind: input, shape index: {}]   ;;  %s14465_s6 = inlined_call_operand.vmem [shape: f32[32,1], index: 6, kind: input, shape index: {}]   ;;  %s14466_s7 = inlined_call_operand.hbm [shape: bf16[32,512], index: 7, kind: input, shape index: {}]   ;;  %s14467_s8 = inlined_call_operand.vmem [shape: f32[32,3], index: 8, kind: input, shape index: {}]   ;;  %s14468_s9 = inlined_call_operand.vmem [shape: bf16[64,512], index: 9, kind: input, shape index: {}]   ;;  %s14469_s10 = inlined_call_operand.vmem [shape: f32[64,1], index: 10, kind: input, shape index: {}]   ;;  %s14470_s11 = inlined_call_operand.hbm [shape: bf16[64,1024], index: 11, kind: input, shape index: {}]   ;;  %s14471_s12 = inlined_call_operand.vmem [shape: f32[64,3], index: 12, kind: input, shape index: {}]   ;;  %s14472_s13 = inlined_call_operand.hbm [shape: f32[962,240], index: 13, kind: input, shape index: {}]   ;;  %s14473_s14 = inlined_call_operand.hbm [shape: f32[198,49], index: 14, kind: input, shape index: {}]   ;;  %s14474_s15 = inlined_call_operand.hbm [shape: f32[23,11], index: 15, kind: input, shape index: {}]   ;;  %s14475_s16 = inlined_call_operand.hbm [shape: f32[11,64], index: 16, kind: input, shape index: {}]   ;;  %s14476_s17 = inlined_call_operand.vmem [shape: f32[1,3], index: 17, kind: input, shape index: {}]   ;;  %s14477_s18 = inlined_call_operand.hbm [shape: f32[2,64,64], index: 18, kind: output, shape index: {}]  }
   0x1   :  { %14579 = sst [smem:[#allocation39_spill]] %s14459_s0 }
   0x2   :  { %14580 = sst [smem:[#allocation40_spill]] %s14460_s1 }
   0x3   :  { %14581 = sst [smem:[#allocation41_spill]] %s14461_s2 }
   0x4   :  { %14582 = sst [smem:[#allocation42_spill]] %s14462_s3 }
   0x5   :  { %14583 = sst [smem:[#allocation43_spill]] %s14463_s4 }
   0x6   :  { %14584 = sst [smem:[#allocation44_spill]] %s14464_s5 }
   0x7   :  { %14585 = sst [smem:[#allocation45_spill]] %s14465_s6 }
   0x8   :  { %14586 = sst [smem:[#allocation46_spill]] %s14466_s7 }
   0x9   :  { %14587 = sst [smem:[#allocation47_spill]] %s14467_s8 }
   0xa   :  { %14588 = sst [smem:[#allocation48_spill]] %s14468_s9 }
   0xb   :  { %14589 = sst [smem:[#allocation49_spill]] %s14469_s10 }
   0xc   :  { %14590 = sst [smem:[#allocation50_spill]] %s14470_s11 }
   0xd   :  { %14591 = sst [smem:[#allocation51_spill]] %s14471_s12 }
   0xe   :  { %14592 = sst [smem:[#allocation52_spill]] %s14472_s13 }
   0xf   :  { %14593 = sst [smem:[#allocation53_spill]] %s14473_s14 }
  0x10   :  { %14594 = sst [smem:[#allocation54_spill]] %s14474_s15 }
  0x11   :  { %14595 = sst [smem:[#allocation55_spill]] %s14475_s16 }
  0x12   :  { %14596 = sst [smem:[#allocation56_spill]] %s14476_s17 }
  0x13   :  { %14597 = sst [smem:[#allocation57_spill]] %s14477_s18 }
  0x14   :  { %23 = vsyncpa [#allocation3], 0 }
  0x15   :  { %25 = vsyncpa [#allocation3 + $0x1], 0 }
  0x16   :  { %26 = vsyncpa [#allocation6], 0 }
  0x17   :  { %27 = vsyncpa [#allocation9], 0 }
  0x18   :  { %28 = vsyncpa [#allocation12], 0 }
  0x19   :  { %29 = vsyncpa [#allocation15], 0 }
  0x1a   :  { %30 = vsyncpa [#allocation4], 0 }
  0x1b   :  { %32 = vsyncpa [#allocation4 + $0x1], 0  ;;  %s9423_s27 = smov 0   ;;  %s9425_s28 = smov 0  }
  0x1c   :  { %s9427_s29 = smov 0   ;;  %s9429_s30 = smov 0  }
  0x1d LB: > { %14598 = sst [smem:[#allocation23_spill]] %s9277_s27  ;;  %s9447_s21 = sadd.s32 4294967295, %s9289_s30   ;;  %s9289_s30 = sphi %s9429_s30, %s15098_s30   ;;  %s9285_s29 = sphi %s9427_s29, %s15101_s29   ;;  %s9281_s28 = sphi %s9425_s28, %s15100_s28   ;;  %s9277_s27 = sphi %s9423_s27, %s15099_s27  }
  0x1e   : > { %14599 = sst [smem:[#allocation24_spill]] %s9281_s28  ;;  %p7773_p0 = scmp.ge.s32.totalorder %s9289_s30, 1 }
  0x1f   : > { %14600 = sst [smem:[#allocation25_spill]] %s9285_s29  ;;  %p59_p1 = scmp.eq.s32.totalorder %s9447_s21, 0 }
  0x20   : > { %14601 = sst [smem:[#allocation26_spill]] %s9289_s30  ;;  %p452_p2 = scmp.lt.s32.totalorder %s9289_s30, 3 }
  0x21   : > { %s14602_s1 = sld [smem:[#allocation40_spill]]  ;;  %s9291_s2 = smov [#allocation5]  }
  0x22   : > { %p9452_p3 = pnand %p7773_p0, %p452_p2  ;;  %s465_s23 = sshll.u32 %s9291_s2, 4  ;;  %s466_s23 = int_to_ptr.vmem [resolvable:$true] %s465_s23 }
  0x23   : > { %s14604_s11 = sld [smem:[#allocation50_spill]]  ;;  %s9292_s19 = smov [#allocation8]  }
  0x24   : > { %p8268_p4 = pneg %p9452_p3  ;;  %s9293_s2 = smov 64  }
  0x25   : > { %s9294_s18 = smov 4   ;;  %s9295_s12 = smov 512  }
  0x26   : > { %p9464_p6 = pnand %p8268_p4, %p59_p1  ;;  %s9296_s9 = smov 32  }
  0x27   : > { %s463_s20 = sshll.u32 %s14602_s1, 4  ;;  %s517_s1 = sshll.u32 %s9292_s19, 4  ;;  %s464_s20 = int_to_ptr.hbm [resolvable:$true] %s463_s20  ;;  %s518_s1 = int_to_ptr.vmem [resolvable:$true] %s517_s1 }
  0x28   : > { %8271 = dma.hbm_to_vmem [thread:$0]  (!%p9464_p6), %s464_s20, 128, %s466_s23, [#allocation6], %s9293_s2, %s9293_s2, %s9294_s18  }
  0x29   : > { %s515_s26 = sshll.u32 %s14604_s11, 4  ;;  %s14606_s14 = sld [smem:[#allocation53_spill]]  ;;  %s516_s26 = int_to_ptr.hbm [resolvable:$true] %s515_s26 }
  0x2a   : > { %8277 = dma.hbm_to_vmem [thread:$0]  (!%p9464_p6), %s516_s26, 4096, %s518_s1, [#allocation9], %s9295_s12, %s9295_s12, %s9296_s9  }
  0x2b   : > { %s9297_s10 = smov [#allocation11]   ;;  %s14607_s7 = sld [smem:[#allocation46_spill]] }
  0x2c   : > { %s548_s8 = sshll.u32 %s9297_s10, 4  ;;  %s9298_s17 = smov 128   ;;  %s549_s8 = int_to_ptr.vmem [resolvable:$true] %s548_s8 }
  0x2d   : > { %s9299_s18 = smov 8   ;;  %s9300_s9 = smov [#allocation7]  }
  0x2e   : > { %s494_s12 = sshll.u32 %s9300_s9, 4  ;;  %s9301_s20 = smov 256   ;;  %s495_s12 = int_to_ptr.vmem [resolvable:$true] %s494_s12 }
  0x2f   : > { %s546_s11 = sshll.u32 %s14606_s14, 4  ;;  %s9302_s10 = smov 16   ;;  %s547_s11 = int_to_ptr.hbm [resolvable:$true] %s546_s11 }
  0x30   : > { %8283 = dma.hbm_to_vmem [thread:$0]  (!%p9464_p6), %s547_s11, 3200, %s549_s8, [#allocation12], %s9298_s17, %s9298_s17, %s9299_s18  }
  0x31   : > { %s492_s5 = sshll.u32 %s14607_s7, 4  ;;  %s14608_s13 = sld [smem:[#allocation52_spill]]  ;;  %s493_s5 = int_to_ptr.hbm [resolvable:$true] %s492_s5 }
  0x32   : > { %8274 = dma.hbm_to_vmem [thread:$0]  (!%p9464_p6), %s493_s5, 1024, %s495_s12, [#allocation6], %s9301_s20, %s9301_s20, %s9302_s10  }
  0x33   : > { %s9303_s1 = smov [#allocation10]   ;;  %s14609_s15 = sld [smem:[#allocation54_spill]] }
  0x34   : > { %s534_s2 = sshll.u32 %s9303_s1, 4  ;;  %s9304_s5 = smov [#allocation13]   ;;  %s535_s2 = int_to_ptr.vmem [resolvable:$true] %s534_s2 }
  0x35   : > { %s562_s25 = sshll.u32 %s9304_s5, 4  ;;  %s14610_s16 = sld [smem:[#allocation55_spill]]  ;;  %s563_s25 = int_to_ptr.vmem [resolvable:$true] %s562_s25 }
  0x36   : > { %s7772_s23 = sadd.s32 4294967294, %s9289_s30   ;;  %s9508_s6 = sadd.s32 1, %s9289_s30  }
  0x37   : > { %s532_s26 = sshll.u32 %s14608_s13, 4  ;;  %14611 = sst [smem:[#allocation27_spill]] %s9508_s6  ;;  %s533_s26 = int_to_ptr.hbm [resolvable:$true] %s532_s26 }
  0x38   : > { %8280 = dma.hbm_to_vmem [thread:$0]  (!%p9464_p6), %s533_s26, 30976, %s535_s2, [#allocation9], %s9301_s20, %s9301_s20, %s9302_s10  }
  0x39   : > { %s560_s24 = sshll.u32 %s14609_s15, 4  ;;  %s9305_s20 = smov [#allocation14]   ;;  %s561_s24 = int_to_ptr.hbm [resolvable:$true] %s560_s24 }
  0x3a   : > { %8286 = dma.hbm_to_vmem [thread:$0]  (!%p9464_p6), %s561_s24, 384, %s563_s25, [#allocation12], %s9298_s17, %s9298_s17, %s9299_s18  }
  0x3b   : > { %s574_s12 = sshll.u32 %s14610_s16, 4  ;;  %s576_s10 = sshll.u32 %s9305_s20, 4  ;;  %s575_s12 = int_to_ptr.hbm [resolvable:$true] %s574_s12  ;;  %s577_s10 = int_to_ptr.vmem [resolvable:$true] %s576_s10 }
  0x3c   : > { %8289 = dma.hbm_to_vmem [thread:$0]  (!%p9464_p6), %s575_s12, 256, %s577_s10, [#allocation15], %s9298_s17, %s9298_s17, %s9299_s18  }
  0x3d   : > { %s45_s26 = sadd.s32 1, %s9285_s29  ;;  %s42_s1 = ssub.s32 %s9289_s30, %s9508_s6 }
  0x3e   : > { %p52_p7 = scmp.ne.s32.totalorder %s9285_s29, %s9281_s28  ;;  %p43_p8 = scmp.eq.s32.totalorder %s42_s1, 0 }
  0x3f   : > { %p53_p9 = scmp.eq.s32.totalorder %s9289_s30, 0  ;;  %p58_p10 = scmp.ne.s32.totalorder %s9281_s28, %s9277_s27 }
  0x40   : > { %p439_p11 = scmp.eq.s32.totalorder %s9447_s21, 1  ;;  %p445_p0 = scmp.eq.s32.totalorder %s7772_s23, 1 }
  0x41   : > { %s9520_s2 = scalar_select %p43_p8, %s9285_s29, %s45_s26  }
  0x42   : > { %p9524_p12 = por %p59_p1, %p58_p10  ;;  %p9528_p13 = por %p439_p11, %p52_p7 }
  0x43   : > { %14612 = sst [smem:[#allocation28_spill]] %s9520_s2  ;;  %p54_p2 = por %p53_p9, %p52_p7 }
  0x44   : > { %s593_s18 = sand.u32 1, %s9285_s29   ;;  %p9533_p4 = por %p445_p0, %p58_p10 }
  0x45   : > { %p8305_p6 = scmp.lt.s32.totalorder %s9289_s30, 2  ;;  %s7782_s11 = sshll.u32 %s593_s18, 3 }
  0x46   : > { %s14615_s8 = scalar_select %p9533_p4, 1, 0 }
  0x47   : > { %s7783_s24 = sshll.u32 %s9289_s30, 3  ;;  %s14617_s19 = sld [smem:[#allocation39_spill]] }
  0x48   : > { %14616 = sst [smem:[#allocation29_spill]] %s14615_s8  ;;  %s597_s20 = scalar_lea.vmem [#allocation2], %s7782_s11 }
  0x49   : > { %s605_s10 = sshll.u32 %s597_s20, 4  ;;  %p9542_p8 = pnand %p8305_p6, %p54_p2  ;;  %s606_s10 = int_to_ptr.vmem [resolvable:$true] %s605_s10 }
  0x4a   : > { %s594_s26 = scalar_lea.sflag [#allocation3], %s593_s18 }
  0x4b   : > { %p9181_p9 = pneg %p9542_p8 }
  0x4d   : > { %s601_s9 = scalar_lea.hbm %s14617_s19, %s7783_s24  ;;  %s9184_s11 = scalar_lea.hbm %s14617_s19, 16 }
  0x4e   : > { %s603_s12 = sshll.u32 %s601_s9, 4  ;;  %s604_s12 = int_to_ptr.hbm [resolvable:$true] %s603_s12 }
  0x4f   : > { %s9177_s1 = sshra.s32 %s604_s12, 4  ;;  %s9178_s1 = int_to_ptr.hbm [resolvable:$true] %s9177_s1 }
  0x50   : > { %s9179_s7 = scalar_lea.hbm %s9178_s1, 8  ;;  %p9185_p0 = scmp.lt.s32.totalorder %s9178_s1, %s14617_s19 }
  0x51   : > { %p9180_p7 = scmp.ne.s32.totalorder %s9178_s1, %s9179_s7  ;;  %p9186_p2 = scmp.lt.s32.totalorder %s9184_s11, %s9179_s7 }
  0x53   : > { %p9182_p10 = pnand %p9181_p9, %p9180_p7  ;;  %p9187_p6 = por %p9186_p2, %p9185_p0 }
  0x55   : > { %p9183_p11 = pneg %p9182_p10 }
  0x57   : > { %p9188_p5 = pnand %p9187_p6, %p9183_p11 }
  0x59   : > { %9191 = shalt.err (!%p9188_p5)
}
  0x5a   : > { %8293 = dma.hbm_to_vmem [thread:$0]  (!%p9542_p8), %s604_s12, 128, %s606_s10, %s594_s26  }
  0x5b   : > { %614 = sbr.rel (%p9452_p3) target bundleno = 4849 (0x12f1), region = 92 }
  0x60   : > { %s9559_s18 = sand.u32 1, %s9281_s28  }
  0x61   : > { %s7785_s20 = sshll.u32 %s9559_s18, 3  ;;  %s617_s24 = scalar_lea.sflag [#allocation3], %s9559_s18 }
  0x62   : > { %s620_s5 = scalar_lea.vmem [#allocation2], %s7785_s20 }
  0x63   : > { %9252 = dma.done.wait (%p9524_p12), %s617_s24, 128  }
  0x64   : > { %9254 = vsyncadd (%p9524_p12), %s617_s24, 4294967168 }
  0x65   : > { %9256 = dma.done.wait (%p59_p1), [#allocation6], 1152  }
  0x66   : > { %9258 = vsyncadd (%p59_p1), [#allocation6], 4294966144 }
  0x67   : > { %9260 = dma.done.wait (%p59_p1), [#allocation9], 35072  }
  0x68   : > { %9262 = vsyncadd (%p59_p1), [#allocation9], 4294932224 }
  0x69   : > { %9264 = dma.done.wait (%p59_p1), [#allocation12], 3584  }
  0x6a   : > { %9266 = vsyncadd (%p59_p1), [#allocation12], 4294963712 }
  0x6b   : > { %9268 = dma.done.wait (%p59_p1), [#allocation15], 256  }
  0x6c   : > { %9270 = vsyncadd (%p59_p1), [#allocation15], 4294967040  ;;  %v9583_v0 = vld [vmem:[%s620_s5] sm:$0xff]  ;;  %s14508_s7 = smov 126   ;;  %s14527_s22 = smov 127   ;;  %vm14504_vm0 = vcmask 1039360  }
  0x6d   : > { %v716_v1 = vperm.slane %v9583_v0, 2  ;;  %v717_v2 = vperm.slane %v9583_v0, 3  ;;  %v714_v3 = vperm.slane %v9583_v0, 0  ;;  %v715_v4 = vperm.slane %v9583_v0, 1  ;;  %s14533_s0 = smov 124   ;;  %s14539_s12 = smov 125  }
  0x6e   : > { %s14541_s10 = smov 122   ;;  %s14535_s23 = smov 123   ;;  %vm14492_vm1 = vcmask 1040384   ;;  %vm1315_vm2 = vsmask.f32 256  ;;  %vm14503_vm3 = vcmask 1031168  }
  0x6f   : > { %v731_v5 = vpack.c.bf16 %v717_v2, %v716_v1  ;;  %v730_v6 = vpack.c.bf16 %v715_v4, %v714_v3  ;;  %s14520_s26 = smov 120   ;;  %s14545_s1 = smov 121   ;;  %vm9870_vm4 = vmand %vm14492_vm1, %vm1315_vm2  ;;  %vm14495_vm5 = vcmask 1022976   ;;  %vm14494_vm6 = vcmask 1014784  }
  0x70   : > { %s14529_s11 = smov 118   ;;  %s14525_s25 = smov 119   ;;  %vm14496_vm7 = vcmask 1041408   ;;  %vm1359_vm8 = vsmask.f32 1280  ;;  %vm14493_vm9 = vcmask 1006592  }
  0x71   : > { %v740_v7 = vunpack.c.l.b16 %v731_v5  ;;  %v738_v8 = vunpack.c.l.b16 %v730_v6  ;;  %v739_v9 = vunpack.c.h.b16 %v730_v6  ;;  %v741_v10 = vunpack.c.h.b16 %v731_v5  ;;  %s14488_s9 = smov 116   ;;  %s14490_s20 = smov 117   ;;  %vm9910_vm12 = vmand %vm14496_vm7, %vm1359_vm8 }
  0x72   : > { %s14537_s24 = smov 114   ;;  %s14547_s5 = smov 115   ;;  %vm14500_vm10 = vcmask 1042432   ;;  %vm1403_vm11 = vsmask.f32 2304  ;;  %vm14499_vm13 = vcmask 998400  }
  0x73   : > { %v9589_v11 = vpack.c.b16 %v740_v7, %v740_v7  ;;  %v9591_v12 = vpack.c.b16 %v738_v8, %v738_v8  ;;  %v9593_v13 = vpack.c.b16 %v739_v9, %v739_v9  ;;  %v9603_v18 = vpack.c.b16 %v741_v10, %v741_v10  ;;  %vm9947_vm8 = vmand %vm14500_vm10, %vm1403_vm11  ;;  %s14798_s13 = smov 112   ;;  %s14799_s14 = smov 113  }
  0x74   : > { %v718_v8 = vperm.slane %v9583_v0, 4  ;;  %v719_v9 = vperm.slane %v9583_v0, 5  ;;  %vm14497_vm14 = vcmask 990208   ;;  %vm14501_vm15 = vcmask 1043456   ;;  %s14806_s3 = sld [smem:[#allocation42_spill]]  ;;  %s14568_s28 = smov 1  }
  0x75   : > { %v820_v14 = vrot.slane %v9589_v11, 7  ;;  %v818_v15 = vrot.slane %v9591_v12, 7  ;;  %v9598_v16 = vshll.u32 %v9591_v12, 16  ;;  %v9601_v17 = vshll.u32 %v9593_v13, 16  ;;  %s14960_s4 = sld [smem:[#allocation43_spill]]  ;;  %s15056_s30 = smov 1  }
  0x76   : > { %v9611_v20 = vshll.u32 %v9589_v11, 16  ;;  %v9614_v21 = vshll.u32 %v9603_v18, 16  ;;  %v821_v22 = vrot.slane %v9603_v18, 7  ;;  %v819_v23 = vrot.slane %v9593_v13, 7  ;;  %s15027_s15 = sld [smem:[#allocation44_spill]]  ;;  %s7793_s19 = sshll.u32 %s9559_s18, 6 }
  0x77   : > { %830 = vrot.lane.b32.xlu2 %v820_v14, %s14508_s7  ;;  %826 = vrot.lane.b32.xlu1 %v818_v15, %s14508_s7  ;;  %v8383_v19 = vpack.i.bf16 %v9601_v17, %v9598_v16  ;;  %v850_v27 = vrot.slane %v9598_v16, 7  ;;  %v851_v28 = vrot.slane %v9601_v17, 7  ;;  %v890_v29 = vrot.slane %v9591_v12, 6  ;;  %s15057_s29 = sld [smem:[#allocation47_spill]] }
  0x78   : > { %v8388_v24 = vpack.i.bf16 %v9614_v21, %v9611_v20  ;;  %v852_v25 = vrot.slane %v9611_v20, 7  ;;  %v853_v26 = vrot.slane %v9614_v21, 7  ;;  %v893_v32 = vrot.slane %v9603_v18, 6  ;;  %s15086_s2 = sld [smem:[#allocation49_spill]] }
  0x79   : > { %8384 = vrot.lane.b32.xlu0 %v8383_v19, %s14527_s22  ;;  %v8393_v31 = vpack.i.bf16 %v851_v28, %v850_v27  ;;  %v892_v33 = vrot.slane %v9589_v11, 6  ;;  %v891_v34 = vrot.slane %v9593_v13, 6  ;;  %v924_v35 = vrot.slane %v9611_v20, 6 }
  0x7a   : > { %v8398_v30 = vpack.i.bf16 %v853_v26, %v852_v25  ;;  %v925_v36 = vrot.slane %v9614_v21, 6  ;;  %v922_v37 = vrot.slane %v9598_v16, 6  ;;  %v923_v38 = vrot.slane %v9601_v17, 6 }
  0x7b   : > { %v962_v39 = vrot.slane %v9591_v12, 5  ;;  %v965_v42 = vrot.slane %v9603_v18, 5  ;;  %v964_v43 = vrot.slane %v9589_v11, 5  ;;  %v963_v44 = vrot.slane %v9593_v13, 5 }
  0x7c   : > { %v8408_v40 = vpack.i.bf16 %v925_v36, %v924_v35  ;;  %v8403_v41 = vpack.i.bf16 %v923_v38, %v922_v37  ;;  %v996_v45 = vrot.slane %v9611_v20, 5  ;;  %v997_v46 = vrot.slane %v9614_v21, 5 }
  0x7d   : > { %v994_v47 = vrot.slane %v9598_v16, 5  ;;  %v995_v48 = vrot.slane %v9601_v17, 5  ;;  %v1060_v51 = vrot.slane %v9611_v20, 4  ;;  %v1061_v52 = vrot.slane %v9614_v21, 4  ;;  %s15058_s16 = smov %s15057_s29 }
  0x7e   : > { %v8418_v49 = vpack.i.bf16 %v997_v46, %v996_v45  ;;  %v1058_v53 = vrot.slane %v9598_v16, 4  ;;  %v1059_v54 = vrot.slane %v9601_v17, 4  ;;  %v1098_v55 = vrot.slane %v9591_v12, 3 }
  0x7f   : > { %832 = vrot.lane.b32.xlu2 %v821_v22, %s14508_s7  ;;  %828 = vrot.lane.b32.xlu1 %v819_v23, %s14508_s7  ;;  %v8413_v50 = vpack.i.bf16 %v995_v48, %v994_v47  ;;  %v8428_v56 = vpack.i.bf16 %v1061_v52, %v1060_v51  ;;  %v1101_v58 = vrot.slane %v9603_v18, 3  ;;  %v1100_v59 = vrot.slane %v9589_v11, 3 }
  0x80   : > { %v8423_v57 = vpack.i.bf16 %v1059_v54, %v1058_v53  ;;  %v1099_v60 = vrot.slane %v9593_v13, 3  ;;  %v1132_v61 = vrot.slane %v9611_v20, 3  ;;  %v1133_v62 = vrot.slane %v9614_v21, 3 }
  0x81   : > { %8389 = vrot.lane.b32.xlu0 %v8388_v24, %s14527_s22  ;;  %v1130_v63 = vrot.slane %v9598_v16, 3  ;;  %v1131_v1 = vrot.slane %v9601_v17, 3  ;;  %v1170_v2 = vrot.slane %v9591_v12, 2  ;;  %v1173_v5 = vrot.slane %v9603_v18, 2 }
  0x82   : > { %v8438_v3 = vpack.i.bf16 %v1133_v62, %v1132_v61  ;;  %v1172_v6 = vrot.slane %v9589_v11, 2  ;;  %v1171_v7 = vrot.slane %v9593_v13, 2  ;;  %v1204_v10 = vrot.slane %v9611_v20, 2 }
  0x83   : > { %v8433_v4 = vpack.i.bf16 %v1131_v1, %v1130_v63  ;;  %v1205_v14 = vrot.slane %v9614_v21, 2  ;;  %v1202_v19 = vrot.slane %v9598_v16, 2  ;;  %v1203_v22 = vrot.slane %v9601_v17, 2 }
  0x84   : > { %v1242_v23 = vrot.slane %v9591_v12, 1  ;;  %v732_v24 = vpack.c.bf16 %v719_v9, %v718_v8  ;;  %v1276_v37 = vrot.slane %v9611_v20, 1  ;;  %v1277_v38 = vrot.slane %v9614_v21, 1 }
  0x85   : > { %v8448_v25 = vpack.i.bf16 %v1205_v14, %v1204_v10  ;;  %v8443_v26 = vpack.i.bf16 %v1203_v22, %v1202_v19  ;;  %vm1447_vm2 = vsmask.f32 3328  ;;  %vm14502_vm11 = vcmask 973824  }
  0x86   : > { %v742_v27 = vunpack.c.l.b16 %v732_v24  ;;  %v743_v28 = vunpack.c.h.b16 %v732_v24 }
  0x87   : > { %898 = vrot.lane.b32.xlu2 %v890_v29, %s14533_s0  ;;  %8399 = vrot.lane.b32.xlu1 %v8398_v30, %s14539_s12  ;;  %v1245_v30 = vrot.slane %v9603_v18, 1 }
  0x89   : > { %8394 = vrot.lane.b32.xlu0 %v8393_v31, %s14539_s12  ;;  %v9708_v31 = vpack.c.b16 %v742_v27, %v742_v27 }
  0x8b   : > { %v9716_v35 = vshll.u32 %v9708_v31, 16  ;;  %v822_v48 = vrot.slane %v9708_v31, 7  ;;  %v966_v1 = vrot.slane %v9708_v31, 5  ;;  %v1102_v24 = vrot.slane %v9708_v31, 3 }
  0x8d   : > { %v854_v45 = vrot.slane %v9716_v35, 7  ;;  %v1134_v8 = vrot.slane %v9716_v35, 3 }
  0x8f   : > { %904 = vrot.lane.b32.xlu2 %v893_v32, %s14533_s0  ;;  %902 = vrot.lane.b32.xlu1 %v892_v33, %s14533_s0  ;;  %v9710_v32 = vpack.c.b16 %v743_v28, %v743_v28  ;;  %v1244_v33 = vrot.slane %v9589_v11, 1 }
  0x91   : > { %900 = vrot.lane.b32.xlu0 %v891_v34, %s14533_s0  ;;  %v1243_v34 = vrot.slane %v9593_v13, 1  ;;  %v9719_v36 = vshll.u32 %v9710_v32, 16  ;;  %v823_v47 = vrot.slane %v9710_v32, 7  ;;  %v967_v63 = vrot.slane %v9710_v32, 5 }
  0x93   : > { %v855_v20 = vrot.slane %v9719_v36, 7  ;;  %v1135_v9 = vrot.slane %v9719_v36, 3 }
  0x95   : > { %v8488_v19 = vpack.i.bf16 %v1135_v9, %v1134_v8 }
  0x97   : > { %970 = vrot.lane.b32.xlu2 %v962_v39, %s14541_s10  ;;  %8409 = vrot.lane.b32.xlu1 %v8408_v40, %s14535_s23  ;;  %v1274_v40 = vrot.slane %v9598_v16, 1  ;;  %v8468_v16 = vpack.i.bf16 %v855_v20, %v854_v45 }
  0x99   : > { %8404 = vrot.lane.b32.xlu0 %v8403_v41, %s14535_s23  ;;  %v1275_v41 = vrot.slane %v9601_v17, 1 }
  0x9f   : > { %976 = vrot.lane.b32.xlu2 %v965_v42, %s14541_s10  ;;  %974 = vrot.lane.b32.xlu1 %v964_v43, %s14541_s10  ;;  %v8463_v42 = vpack.i.bf16 %v9719_v36, %v9716_v35  ;;  %v8458_v43 = vpack.i.bf16 %v1277_v38, %v1276_v37  ;;  %v1175_v38 = vrot.slane %v9710_v32, 2 }
  0xa1   : > { %972 = vrot.lane.b32.xlu0 %v963_v44, %s14541_s10  ;;  %v8453_v44 = vpack.i.bf16 %v1275_v41, %v1274_v40  ;;  %v1174_v40 = vrot.slane %v9708_v31, 2 }
  0xa7   : > { %1034 = vrot.lane.b32.xlu2 %v9591_v12, %s14520_s26  ;;  %8419 = vrot.lane.b32.xlu1 %v8418_v49, %s14545_s1  ;;  %v926_v49 = vrot.slane %v9716_v35, 6 }
  0xa9   : > { %8414 = vrot.lane.b32.xlu0 %v8413_v50, %s14545_s1  ;;  %v927_v50 = vrot.slane %v9719_v36, 6 }
  0xab   : > { %v8473_v53 = vpack.i.bf16 %v927_v50, %v926_v49  ;;  %v1246_v49 = vrot.slane %v9708_v31, 1 }
  0xaf   : > { %1040 = vrot.lane.b32.xlu2 %v9603_v18, %s14520_s26  ;;  %1038 = vrot.lane.b32.xlu1 %v9589_v11, %s14520_s26 }
  0xb1   : > { %1036 = vrot.lane.b32.xlu0 %v9593_v13, %s14520_s26 }
  0xb7   : > { %1106 = vrot.lane.b32.xlu2 %v1098_v55, %s14529_s11  ;;  %8429 = vrot.lane.b32.xlu1 %v8428_v56, %s14525_s25  ;;  %v895_v55 = vrot.slane %v9710_v32, 6  ;;  %v894_v56 = vrot.slane %v9708_v31, 6 }
  0xb9   : > { %8424 = vrot.lane.b32.xlu0 %v8423_v57, %s14525_s25  ;;  %v998_v57 = vrot.slane %v9716_v35, 5 }
  0xbf   : > { %1112 = vrot.lane.b32.xlu2 %v1101_v58, %s14529_s11  ;;  %1110 = vrot.lane.b32.xlu1 %v1100_v59, %s14529_s11  ;;  %v999_v58 = vrot.slane %v9719_v36, 5 }
  0xc1   : > { %1108 = vrot.lane.b32.xlu0 %v1099_v60, %s14529_s11  ;;  %v8478_v61 = vpack.i.bf16 %v999_v58, %v998_v57 }
  0xc7   : > { %1178 = vrot.lane.b32.xlu2 %v1170_v2, %s14488_s9  ;;  %8439 = vrot.lane.b32.xlu1 %v8438_v3, %s14490_s20  ;;  %v1062_v2 = vrot.slane %v9716_v35, 4  ;;  %v1063_v3 = vrot.slane %v9719_v36, 4 }
  0xc9   : > { %8434 = vrot.lane.b32.xlu0 %v8433_v4, %s14490_s20 }
  0xcf   : > { %1184 = vrot.lane.b32.xlu2 %v1173_v5, %s14488_s9  ;;  %1182 = vrot.lane.b32.xlu1 %v1172_v6, %s14488_s9  ;;  %v8483_v6 = vpack.i.bf16 %v1063_v3, %v1062_v2 }
  0xd1   : > { %v9696_v15 = vpop.permute.xlu2 %830  ;;  %1180 = vrot.lane.b32.xlu0 %v1171_v7, %s14488_s9  ;;  %s14543_s9 = smov 113  }
  0xd7   : > { %1250 = vrot.lane.b32.xlu2 %v1242_v23, %s14537_s24  ;;  %8449 = vrot.lane.b32.xlu1 %v8448_v25, %s14547_s5  ;;  %v1103_v23 = vrot.slane %v9710_v32, 3  ;;  %v1206_v25 = vrot.slane %v9716_v35, 2 }
  0xd9   : > { %v9704_v29 = vpop.permute.xlu2 %832  ;;  %8444 = vrot.lane.b32.xlu0 %v8443_v26, %s14547_s5  ;;  %v1207_v26 = vrot.slane %v9719_v36, 2 }
  0xdf   : > { %1256 = vrot.lane.b32.xlu2 %v1245_v30, %s14537_s24  ;;  %1254 = vrot.lane.b32.xlu1 %v1244_v33, %s14537_s24  ;;  %v720_v30 = vperm.slane %v9583_v0, 6  ;;  %v721_v33 = vperm.slane %v9583_v0, 7 }
  0xe1   : > { %v9724_v39 = vpop.permute.xlu2 %898  ;;  %1252 = vrot.lane.b32.xlu0 %v1243_v34, %s14537_s24  ;;  %v8493_v34 = vpack.i.bf16 %v1207_v26, %v1206_v25  ;;  %v733_v41 = vpack.c.bf16 %v721_v33, %v720_v30 }
  0xe3   : > { %v744_v0 = vunpack.c.l.b16 %v733_v41  ;;  %v745_v20 = vunpack.c.h.b16 %v733_v41 }
  0xe7   : > { %8464 = vrot.lane.b32.xlu2 %v8463_v42, %s14527_s22  ;;  %8459 = vrot.lane.b32.xlu1 %v8458_v43, %s14543_s9  ;;  %v1278_v42 = vrot.slane %v9716_v35, 1  ;;  %v1279_v43 = vrot.slane %v9719_v36, 1  ;;  %v9824_v35 = vpack.c.b16 %v744_v0, %v744_v0  ;;  %v9826_v36 = vpack.c.b16 %v745_v20, %v745_v20 }
  0xe8   : > { %v845_v0 = vsel %vm14503_vm3, %v9696_v15, %v9704_v29 }
  0xe9   : > { %v9735_v21 = vpop.permute.xlu2 %904  ;;  %v9737_v46 = vpop.permute.xlu1 %826  ;;  %8454 = vrot.lane.b32.xlu0 %v8453_v44, %s14543_s9  ;;  %v824_v58 = vrot.slane %v9824_v35, 7  ;;  %v825_v9 = vrot.slane %v9826_v36, 7 }
  0xeb   : > { %v9740_v17 = vpop.permute.xlu0 %8384 }
  0xef   : > { %8469 = vrot.lane.b32.xlu2 %v8468_v16, %s14539_s12  ;;  %836 = vrot.lane.b32.xlu1 %v823_v47, %s14508_s7  ;;  %v8498_v16 = vpack.i.bf16 %v1279_v43, %v1278_v42 }
  0xf1   : > { %v9748_v51 = vpop.permute.xlu2 %970  ;;  %v9750_v52 = vpop.permute.xlu1 %828  ;;  %834 = vrot.lane.b32.xlu0 %v822_v48, %s14508_s7  ;;  %v1247_v48 = vrot.slane %v9710_v32, 1 }
  0xf3   : > { %v9753_v54 = vpop.permute.xlu0 %8389 }
  0xf4   : > { %v8391_v25 = vunpack.i.l.bf16 %v9753_v54 }
  0xf7   : > { %8474 = vrot.lane.b32.xlu2 %v8473_v53, %s14535_s23  ;;  %908 = vrot.lane.b32.xlu1 %v895_v55, %s14533_s0  ;;  %v9836_v55 = vshll.u32 %v9824_v35, 16 }
  0xf9   : > { %v9761_v59 = vpop.permute.xlu2 %976  ;;  %v9763_v60 = vpop.permute.xlu1 %8399  ;;  %906 = vrot.lane.b32.xlu0 %v894_v56, %s14533_s0  ;;  %v9839_v56 = vshll.u32 %v9826_v36, 16 }
  0xfa   : > { %v8401_v41 = vunpack.i.l.bf16 %v9763_v60 }
  0xfb   : > { %v9766_v62 = vpop.permute.xlu0 %8394 }
  0xfc   : > { %v8397_v42 = vunpack.i.h.bf16 %v9766_v62  ;;  %v8396_v43 = vunpack.i.l.bf16 %v9766_v62  ;;  %v843_v62 = vsel %vm14503_vm3, %v9737_v46, %v9750_v52 }
  0xfe   : > { %v875_v46 = vsel %vm14495_vm5, %v8396_v43, %v8397_v42 }
  0xff   : > { %8479 = vrot.lane.b32.xlu2 %v8478_v61, %s14545_s1  ;;  %980 = vrot.lane.b32.xlu1 %v967_v63, %s14541_s10  ;;  %v8503_v61 = vpack.i.bf16 %v9839_v56, %v9836_v55 }
 0x101   : > { %v9774_v4 = vpop.permute.xlu2 %1034  ;;  %v9776_v5 = vpop.permute.xlu1 %902  ;;  %978 = vrot.lane.b32.xlu0 %v966_v1, %s14541_s10 }
 0x103   : > { %v9779_v7 = vpop.permute.xlu0 %900 }
 0x104   : > { %v916_v43 = vsel %vm14494_vm6, %v9779_v7, %v9776_v5 }
 0x107   : > { %8484 = vrot.lane.b32.xlu2 %v8483_v6, %s14525_s25  ;;  %1044 = vrot.lane.b32.xlu1 %v9710_v32, %s14520_s26 }
 0x109   : > { %v9786_v10 = vpop.permute.xlu2 %1040  ;;  %v9788_v14 = vpop.permute.xlu1 %8409  ;;  %1042 = vrot.lane.b32.xlu0 %v9708_v31, %s14520_s26 }
 0x10b   : > { %v9792_v22 = vpop.permute.xlu0 %8404 }
 0x10f   : > { %8489 = vrot.lane.b32.xlu2 %v8488_v19, %s14490_s20  ;;  %1116 = vrot.lane.b32.xlu1 %v1103_v23, %s14529_s11  ;;  %s14619_s20 = smov 116   ;;  %v8387_v19 = vunpack.i.h.bf16 %v9740_v17  ;;  %v8386_v23 = vunpack.i.l.bf16 %v9740_v17 }
 0x111   : > { %v9800_v27 = vpop.permute.xlu2 %1106  ;;  %v9802_v28 = vpop.permute.xlu1 %974  ;;  %1114 = vrot.lane.b32.xlu0 %v1102_v24, %s14529_s11  ;;  %v8392_v24 = vunpack.i.h.bf16 %v9753_v54  ;;  %v803_v30 = vsel %vm14504_vm0, %v8386_v23, %v8387_v19 }
 0x112   : > { %v1317_v20 = vsel %vm9870_vm4, %v9591_v12, %v803_v30 }
 0x113   : > { %v9807_v37 = vpop.permute.xlu0 %972  ;;  %v805_v17 = vsel %vm14504_vm0, %v8391_v25, %v8392_v24  ;;  %v1328_v23 = vsel %vm14492_vm1, %v1317_v20, %v843_v62 }
 0x114   : > { %v1319_v12 = vsel %vm9870_vm4, %v9589_v11, %v805_v17  ;;  %v8407_v11 = vunpack.i.h.bf16 %v9792_v22  ;;  %v1361_v17 = vsel %vm9910_vm12, %v1328_v23, %v875_v46 }
 0x117   : > { %8494 = vrot.lane.b32.xlu2 %v8493_v34, %s14547_s5  ;;  %1188 = vrot.lane.b32.xlu1 %v1175_v38, %s14619_s20  ;;  %v804_v34 = vsel %vm14504_vm0, %v8387_v19, %v8391_v25  ;;  %v1336_v25 = vsel %vm14492_vm1, %v1319_v12, %v845_v0 }
 0x119   : > { %v9815_v44 = vpop.permute.xlu2 %1112  ;;  %v9817_v45 = vpop.permute.xlu1 %8419  ;;  %1186 = vrot.lane.b32.xlu0 %v1174_v40, %s14619_s20  ;;  %v8402_v40 = vunpack.i.h.bf16 %v9763_v60 }
 0x11b   : > { %v9820_v47 = vpop.permute.xlu0 %8414 }
 0x11c   : > { %v8417_v12 = vunpack.i.h.bf16 %v9820_v47 }
 0x11f   : > { %8499 = vrot.lane.b32.xlu2 %v8498_v16, %s14543_s9  ;;  %1260 = vrot.lane.b32.xlu1 %v1247_v48, %s14537_s24  ;;  %v844_v48 = vsel %vm14503_vm3, %v9750_v52, %v9696_v15  ;;  %v8411_v15 = vunpack.i.l.bf16 %v9788_v14  ;;  %v8406_v52 = vunpack.i.l.bf16 %v9792_v22  ;;  %v917_v22 = vsel %vm14494_vm6, %v9776_v5, %v9735_v21 }
 0x120   : > { %v8422_v5 = vunpack.i.h.bf16 %v9817_v45  ;;  %vm14517_vm3 = vcmask 932864  }
 0x121   : > { %v9830_v50 = vpop.permute.xlu2 %1178  ;;  %v9832_v53 = vpop.permute.xlu1 %1038  ;;  %1258 = vrot.lane.b32.xlu0 %v1246_v49, %s14537_s24  ;;  %v1318_v49 = vsel %vm9870_vm4, %v9593_v13, %v804_v34  ;;  %v8412_v13 = vunpack.i.h.bf16 %v9788_v14  ;;  %v948_v62 = vsel %vm14493_vm9, %v8407_v11, %v8411_v15 }
 0x122   : > { %v1332_v30 = vsel %vm14492_vm1, %v1318_v49, %v844_v48  ;;  %v947_v48 = vsel %vm14493_vm9, %v8406_v52, %v8407_v11  ;;  %vm14498_vm1 = vcmask 982016  }
 0x123   : > { %v9841_v57 = vpop.permute.xlu0 %1036  ;;  %v949_v20 = vsel %vm14493_vm9, %v8411_v15, %v8412_v13  ;;  %v8416_v15 = vunpack.i.l.bf16 %v9820_v47  ;;  %vm14507_vm9 = vcmask 1044480   ;;  %v987_v47 = vsel %vm14499_vm13, %v9748_v51, %v9807_v37 }
 0x124   : > { %v1053_v51 = vsel %vm14498_vm1, %v9832_v53, %v9786_v10 }
 0x127   : > { %838 = vrot.lane.b32.xlu1 %v824_v58, %s14508_s7  ;;  %840 = vrot.lane.b32.xlu2 %v825_v9, %s14508_s7  ;;  %v877_v58 = vsel %vm14495_vm5, %v8401_v41, %v8402_v40  ;;  %s14531_s7 = smov 112  }
 0x128   : > { %v1363_v34 = vsel %vm9910_vm12, %v1336_v25, %v877_v58 }
 0x129   : > { %v9847_v63 = vpop.permute.xlu1 %8429  ;;  %8504 = vrot.lane.b32.xlu0 %v8503_v61, %s14527_s22  ;;  %v9850_v1 = vpop.permute.xlu2 %1184  ;;  %v876_v61 = vsel %vm14495_vm5, %v8397_v42, %v8401_v41  ;;  %v915_v42 = vsel %vm14494_vm6, %v9724_v39, %v9779_v7  ;;  %v989_v39 = vsel %vm14499_vm13, %v9802_v28, %v9761_v59  ;;  %v8421_v7 = vunpack.i.l.bf16 %v9817_v45  ;;  %s14770_s22 = smov 118  }
 0x12a   : > { %v1362_v0 = vsel %vm9910_vm12, %v1332_v30, %v876_v61  ;;  %v1380_v58 = vsel %vm14496_vm7, %v1363_v34, %v917_v22  ;;  %v1372_v61 = vsel %vm14496_vm7, %v1361_v17, %v915_v42  ;;  %vm1491_vm6 = vsmask.f32 4352 }
 0x12b   : > { %v9852_v2 = vpop.permute.xlu0 %8424  ;;  %v1376_v46 = vsel %vm14496_vm7, %v1362_v0, %v916_v43  ;;  %v1407_v11 = vsel %vm9947_vm8, %v1380_v58, %v949_v20  ;;  %v1405_v25 = vsel %vm9947_vm8, %v1372_v61, %v947_v48  ;;  %vm14506_vm5 = vcmask 965632   ;;  %vm9985_vm7 = vmand %vm14501_vm15, %vm1447_vm2 }
 0x12c   : > { %v1424_v23 = vsel %vm14500_vm10, %v1407_v11, %v989_v39  ;;  %v1406_v30 = vsel %vm9947_vm8, %v1376_v46, %v948_v62  ;;  %v988_v17 = vsel %vm14499_vm13, %v9807_v37, %v9802_v28  ;;  %v1021_v22 = vsel %vm14497_vm14, %v8421_v7, %v8422_v5 }
 0x12d   : > { %v1020_v42 = vsel %vm14497_vm14, %v8417_v12, %v8421_v7  ;;  %v1019_v43 = vsel %vm14497_vm14, %v8416_v15, %v8417_v12  ;;  %v1051_v28 = vsel %vm14498_vm1, %v9774_v4, %v9841_v57  ;;  %v1052_v37 = vsel %vm14498_vm1, %v9841_v57, %v9832_v53 }
 0x12e   : > { %v14518_v62 = vunpack.i.h.bf16 %v9847_v63  ;;  %v8431_v48 = vunpack.i.l.bf16 %v9847_v63  ;;  %v8427_v39 = vunpack.i.h.bf16 %v9852_v2  ;;  %v8426_v7 = vunpack.i.l.bf16 %v9852_v2 }
 0x12f   : > { %v1416_v12 = vsel %vm14500_vm10, %v1405_v25, %v987_v47  ;;  %v1420_v58 = vsel %vm14500_vm10, %v1406_v30, %v988_v17  ;;  %vm14505_vm2 = vcmask 957440   ;;  %vm14522_vm14 = vcmask 1045504   ;;  %vm10022_vm10 = vmand %vm14507_vm9, %vm1491_vm6 }
 0x130   : > { %v1451_v4 = vsel %vm9985_vm7, %v1424_v23, %v1021_v22  ;;  %v1449_v53 = vsel %vm9985_vm7, %v1416_v12, %v1019_v43  ;;  %v1450_v57 = vsel %vm9985_vm7, %v1420_v58, %v1020_v42  ;;  %vm1535_vm1 = vsmask.f32 5376 }
 0x131   : > { %v9854_v3 = vpop.permute.xlu1 %1110  ;;  %v9858_v8 = vpop.permute.xlu2 %1250  ;;  %v1468_v61 = vsel %vm14501_vm15, %v1451_v4, %v1053_v51  ;;  %v1460_v2 = vsel %vm14501_vm15, %v1449_v53, %v1051_v28  ;;  %v1464_v46 = vsel %vm14501_vm15, %v1450_v57, %v1052_v37  ;;  %vm1194_vm13 = vcmask 949248   ;;  %vm10058_vm0 = vmand %vm14522_vm14, %vm1535_vm1 }
 0x132   : > { %v1085_v15 = vsel %vm14502_vm11, %v8431_v48, %v14518_v62  ;;  %v1084_v11 = vsel %vm14502_vm11, %v8427_v39, %v8431_v48  ;;  %v1083_v23 = vsel %vm14502_vm11, %v8426_v7, %v8427_v39  ;;  %v1125_v30 = vsel %vm14506_vm5, %v9854_v3, %v9815_v44 }
 0x133   : > { %v9856_v6 = vpop.permute.xlu0 %1108  ;;  %vm1226_vm6 = vcmask 941056   ;;  %vm14510_vm15 = vcmask 1046528   ;;  %vm1579_vm11 = vsmask.f32 6400  ;;  %v1495_v37 = vsel %vm10022_vm10, %v1468_v61, %v1085_v15 }
 0x134   : > { %v1123_v51 = vsel %vm14506_vm5, %v9800_v27, %v9856_v6  ;;  %v1493_v48 = vsel %vm10022_vm10, %v1460_v2, %v1083_v23  ;;  %v1494_v39 = vsel %vm10022_vm10, %v1464_v46, %v1084_v11  ;;  %v1512_v7 = vsel %vm14507_vm9, %v1495_v37, %v1125_v30 }
 0x135   : > { %v1124_v27 = vsel %vm14506_vm5, %v9856_v6, %v9854_v3  ;;  %v1504_v4 = vsel %vm14507_vm9, %v1493_v48, %v1123_v51  ;;  %vm1622_vm5 = vcmask 1047552   ;;  %vm1623_vm1 = vsmask.f32 7424 }
 0x136   : > { %v1508_v11 = vsel %vm14507_vm9, %v1494_v39, %v1124_v27  ;;  %vm10083_vm9 = vmand %vm14510_vm15, %vm1579_vm11  ;;  %v14551_v27 = vmov 0  }
 0x137   : > { %vm10101_vm11 = vmand %vm1622_vm5, %vm1623_vm1  ;;  %vm14636_vm5 = vcmask 1039360   ;;  %vm14637_vm1 = vcmask 1031168   ;;  %8544 = vset.pattern.permute.xlu1 %v14551_v27  ;;  %8543 = vset.pattern.permute.xlu0 %v14551_v27 }
 0x138   : > { %8545 = vset.pattern.permute.xlu2 %v14551_v27 }
 0x139   : > { %v9866_v26 = vpop.permute.xlu1 %8439  ;;  %v9890_v16 = vpop.permute.xlu2 %1256 }
 0x13a   : > { %v14516_v47 = vunpack.i.h.bf16 %v9866_v26  ;;  %v8441_v17 = vunpack.i.l.bf16 %v9866_v26 }
 0x13b   : > { %v9878_v38 = vpop.permute.xlu0 %8434 }
 0x13c   : > { %v8437_v22 = vunpack.i.h.bf16 %v9878_v38  ;;  %v8436_v42 = vunpack.i.l.bf16 %v9878_v38  ;;  %v1157_v53 = vsel %vm14505_vm2, %v8441_v17, %v14516_v47  ;;  %v1104_v47 = vrot.slane %v9824_v35, 3 }
 0x13d   : > { %v1539_v23 = vsel %vm10058_vm0, %v1512_v7, %v1157_v53 }
 0x13e   : > { %v1156_v57 = vsel %vm14505_vm2, %v8437_v22, %v8441_v17  ;;  %v1155_v61 = vsel %vm14505_vm2, %v8436_v42, %v8437_v22  ;;  %vm14519_vm2 = vcmask 924672  }
 0x13f   : > { %v1537_v17 = vsel %vm10058_vm0, %v1504_v4, %v1155_v61  ;;  %v1538_v42 = vsel %vm10058_vm0, %v1508_v11, %v1156_v57 }
 0x141   : > { %v9918_v19 = vpop.permute.xlu1 %1182  ;;  %v9963_v52 = vpop.permute.xlu2 %8464 }
 0x142   : > { %v1197_v3 = vsel %vm1194_vm13, %v9918_v19, %v9850_v1 }
 0x143   : > { %v9927_v41 = vpop.permute.xlu0 %1180  ;;  %v1556_v22 = vsel %vm14522_vm14, %v1539_v23, %v1197_v3 }
 0x144   : > { %v1195_v6 = vsel %vm1194_vm13, %v9830_v50, %v9927_v41  ;;  %v1196_v30 = vsel %vm1194_vm13, %v9927_v41, %v9918_v19 }
 0x145   : > { %v1548_v19 = vsel %vm14522_vm14, %v1537_v17, %v1195_v6  ;;  %v1552_v4 = vsel %vm14522_vm14, %v1538_v42, %v1196_v30 }
 0x149   : > { %v9970_v34 = vpop.permute.xlu1 %8449  ;;  %v10036_v28 = vpop.permute.xlu2 %8469 }
 0x14a   : > { %v14515_v12 = vunpack.i.h.bf16 %v9970_v34  ;;  %v8451_v58 = vunpack.i.l.bf16 %v9970_v34 }
 0x14b   : > { %v9998_v20 = vpop.permute.xlu0 %8444 }
 0x14c   : > { %v8447_v46 = vunpack.i.h.bf16 %v9998_v20  ;;  %v8446_v15 = vunpack.i.l.bf16 %v9998_v20  ;;  %v1229_v50 = vsel %vm1226_vm6, %v8451_v58, %v14515_v12  ;;  %v1105_v12 = vrot.slane %v9826_v36, 3 }
 0x14d   : > { %v1583_v61 = vsel %vm10083_vm9, %v1556_v22, %v1229_v50 }
 0x14e   : > { %v1228_v37 = vsel %vm1226_vm6, %v8447_v46, %v8451_v58  ;;  %v1227_v48 = vsel %vm1226_vm6, %v8446_v15, %v8447_v46 }
 0x151   : > { %v1255_v43 = vpop.permute.xlu1 %1254  ;;  %v10111_v3 = vpop.permute.xlu2 %8474 }
 0x152   : > { %v1269_v41 = vsel %vm14517_vm3, %v1255_v43, %v9890_v16 }
 0x153   : > { %v1253_v38 = vpop.permute.xlu0 %1252  ;;  %v1600_v11 = vsel %vm14510_vm15, %v1583_v61, %v1269_v41  ;;  %v857_v41 = vrot.slane %v9839_v56, 7  ;;  %v928_v61 = vrot.slane %v9836_v55, 6 }
 0x154   : > { %v1267_v53 = vsel %vm14517_vm3, %v9858_v8, %v1253_v38  ;;  %v1268_v57 = vsel %vm14517_vm3, %v1253_v38, %v1255_v43  ;;  %v1582_v8 = vsel %vm10083_vm9, %v1552_v4, %v1228_v37  ;;  %v1581_v43 = vsel %vm10083_vm9, %v1548_v19, %v1227_v48 }
 0x155   : > { %v1596_v30 = vsel %vm14510_vm15, %v1582_v8, %v1268_v57  ;;  %v1592_v50 = vsel %vm14510_vm15, %v1581_v43, %v1267_v53  ;;  %v856_v19 = vrot.slane %v9836_v55, 7  ;;  %v897_v48 = vrot.slane %v9826_v36, 6 }
 0x156   : > { %v896_v4 = vrot.slane %v9824_v35, 6  ;;  %vm14639_vm15 = vcmask 1040384   ;;  %vm14648_vm3 = vcmask 1042432  }
 0x157   : > { %v8508_v53 = vpack.i.bf16 %v857_v41, %v856_v19  ;;  %v8471_v41 = vunpack.i.l.bf16 %v10036_v28 }
 0x159   : > { %v10093_v51 = vpop.permute.xlu1 %8459  ;;  %v10149_v57 = vpop.permute.xlu2 %8479 }
 0x15a   : > { %v14512_v39 = vunpack.i.h.bf16 %v10093_v51  ;;  %v8461_v7 = vunpack.i.l.bf16 %v10093_v51  ;;  %v8481_v54 = vunpack.i.l.bf16 %v10149_v57 }
 0x15b   : > { %v8455_v58 = vpop.permute.xlu0 %8454 }
 0x15c   : > { %v8457_v6 = vunpack.i.h.bf16 %v8455_v58  ;;  %v8456_v46 = vunpack.i.l.bf16 %v8455_v58  ;;  %v1301_v15 = vsel %vm14519_vm2, %v8461_v7, %v14512_v39  ;;  %v14511_v58 = vunpack.i.h.bf16 %v9963_v52 }
 0x15d   : > { %v10119_v23 = vsel %vm10101_vm11, %v1600_v11, %v1301_v15  ;;  %v969_v11 = vrot.slane %v9826_v36, 5  ;;  %v8476_v39 = vunpack.i.l.bf16 %v10111_v3 }
 0x15e   : > { %1645 = vrot.lane.b32.xlu2 %v10119_v23, %s14531_s7  ;;  %v1300_v38 = vsel %vm14519_vm2, %v8457_v6, %v8461_v7  ;;  %v1299_v17 = vsel %vm14519_vm2, %v8456_v46, %v8457_v6  ;;  %v929_v6 = vrot.slane %v9839_v56, 6  ;;  %v8466_v46 = vunpack.i.l.bf16 %v9963_v52 }
 0x15f   : > { %v10133_v22 = vsel %vm10101_vm11, %v1596_v30, %v1300_v38  ;;  %v10137_v42 = vsel %vm10101_vm11, %v1592_v50, %v1299_v17  ;;  %v968_v38 = vrot.slane %v9824_v35, 5  ;;  %v14513_v17 = vunpack.i.h.bf16 %v10036_v28 }
 0x160   : > { %1643 = vrot.lane.b32.xlu1 %v10133_v22, %s14531_s7  ;;  %1641 = vrot.lane.b32.xlu0 %v10137_v42, %s14531_s7  ;;  %v807_v8 = vsel %vm14636_vm5, %v8466_v46, %v14511_v58  ;;  %v8513_v30 = vpack.i.bf16 %v929_v6, %v928_v61  ;;  %vm14638_vm5 = vcmask 1022976   ;;  %vm14650_vm2 = vcmask 1022976  }
 0x161   : > { %v10145_v37 = vpop.permute.xlu1 %836  ;;  %v1321_v50 = vsel %vm9870_vm4, %v9708_v31, %v807_v8  ;;  %v879_v31 = vsel %vm14638_vm5, %v8471_v41, %v14513_v17  ;;  %vm14642_vm5 = vcmask 1041408  }
 0x163   : > { %v835_v7 = vpop.permute.xlu0 %834 }
 0x164   : > { %v847_v19 = vsel %vm14637_vm1, %v835_v7, %v10145_v37  ;;  %vm14640_vm1 = vcmask 1014784  }
 0x165   : > { %v1344_v61 = vsel %vm14639_vm15, %v1321_v50, %v847_v19  ;;  %vm14641_vm15 = vcmask 1006592  }
 0x166   : > { %912 = vrot.lane.b32.xlu2 %v897_v48, %s14533_s0  ;;  %v10173_v48 = vpop.permute.xlu2 %8484 }
 0x167   : > { %v8486_v60 = vunpack.i.l.bf16 %v10173_v48 }
 0x168   : > { %910 = vrot.lane.b32.xlu1 %v896_v4, %s14533_s0  ;;  %8509 = vrot.lane.b32.xlu0 %v8508_v53, %s14539_s12  ;;  %v1000_v4 = vrot.slane %v9836_v55, 5  ;;  %v1001_v53 = vrot.slane %v9839_v56, 5  ;;  %s14771_s0 = smov 127  }
 0x169   : > { %v10158_v15 = vpop.permute.xlu1 %908 }
 0x16a   : > { %v8518_v58 = vpack.i.bf16 %v1001_v53, %v1000_v4  ;;  %v1065_v4 = vrot.slane %v9839_v56, 4 }
 0x16b   : > { %v907_v43 = vpop.permute.xlu0 %906 }
 0x16e   : > { %984 = vrot.lane.b32.xlu2 %v969_v11, %s14541_s10  ;;  %v14514_v11 = vunpack.i.h.bf16 %v10111_v3 }
 0x170   : > { %982 = vrot.lane.b32.xlu1 %v968_v38, %s14541_s10  ;;  %8514 = vrot.lane.b32.xlu0 %v8513_v30, %s14535_s23  ;;  %v1365_v38 = vsel %vm9910_vm12, %v1344_v61, %v879_v31  ;;  %v919_v30 = vsel %vm14640_vm1, %v907_v43, %v10158_v15  ;;  %v951_v50 = vsel %vm14641_vm15, %v8476_v39, %v14514_v11  ;;  %v1064_v31 = vrot.slane %v9836_v55, 4 }
 0x171   : > { %v10183_v6 = vpop.permute.xlu1 %980  ;;  %v1388_v19 = vsel %vm14642_vm5, %v1365_v38, %v919_v30  ;;  %vm14643_vm1 = vcmask 1039360   ;;  %v8482_v61 = vunpack.i.h.bf16 %v10149_v57  ;;  %vm14644_vm15 = vcmask 1031168   ;;  %v10210_v30 = vpop.permute.xlu2 %8489 }
 0x172   : > { %v806_v53 = vsel %vm14643_vm1, %v8392_v24, %v8466_v46  ;;  %v846_v38 = vsel %vm14644_vm15, %v9704_v29, %v835_v7  ;;  %vm14645_vm5 = vcmask 998400   ;;  %v8523_v29 = vpack.i.bf16 %v1065_v4, %v1064_v31 }
 0x173   : > { %v979_v8 = vpop.permute.xlu0 %978  ;;  %v1320_v46 = vsel %vm9870_vm4, %v9603_v18, %v806_v53  ;;  %vm14646_vm1 = vcmask 990208   ;;  %vm14647_vm15 = vcmask 1040384   ;;  %v878_v18 = vsel %vm14650_vm2, %v8402_v40, %v8471_v41 }
 0x174   : > { %v991_v11 = vsel %vm14645_vm5, %v979_v8, %v10183_v6  ;;  %v1023_v7 = vsel %vm14646_vm1, %v8481_v54, %v8482_v61  ;;  %vm14649_vm5 = vcmask 1014784   ;;  %v8487_v53 = vunpack.i.h.bf16 %v10173_v48 }
 0x175   : > { %v918_v62 = vsel %vm14649_vm5, %v9735_v21, %v907_v43  ;;  %v1136_v31 = vrot.slane %v9836_v55, 3  ;;  %v1137_v21 = vrot.slane %v9839_v56, 3  ;;  %vm14652_vm2 = vcmask 1041408  }
 0x176   : > { %1048 = vrot.lane.b32.xlu2 %v9826_v36, %s14520_s26  ;;  %vm14653_vm1 = vcmask 998400   ;;  %v1177_v41 = vrot.slane %v9826_v36, 2  ;;  %vm14655_vm5 = vcmask 973824  }
 0x177   : > { %v990_v43 = vsel %vm14653_vm1, %v9761_v59, %v979_v8  ;;  %v1176_v59 = vrot.slane %v9824_v35, 2  ;;  %v8528_v8 = vpack.i.bf16 %v1137_v21, %v1136_v31  ;;  %vm14658_vm1 = vcmask 982016  }
 0x178   : > { %1046 = vrot.lane.b32.xlu1 %v9824_v35, %s14520_s26  ;;  %8519 = vrot.lane.b32.xlu0 %v8518_v58, %s14545_s1  ;;  %v1409_v58 = vsel %vm9947_vm8, %v1388_v19, %v951_v50  ;;  %v1340_v50 = vsel %vm14647_vm15, %v1320_v46, %v846_v38  ;;  %vm14654_vm15 = vcmask 1006592   ;;  %v8491_v31 = vunpack.i.l.bf16 %v10210_v30  ;;  %s14661_s26 = smov 117  }
 0x179   : > { %v10206_v17 = vpop.permute.xlu1 %1044  ;;  %v1432_v19 = vsel %vm14648_vm3, %v1409_v58, %v991_v11  ;;  %v1364_v4 = vsel %vm9910_vm12, %v1340_v50, %v878_v18  ;;  %vm14651_vm3 = vcmask 982016   ;;  %v950_v58 = vsel %vm14654_vm15, %v8412_v13, %v8476_v39 }
 0x17a   : > { %v1453_v38 = vsel %vm9985_vm7, %v1432_v19, %v1023_v7  ;;  %v1384_v40 = vsel %vm14652_vm2, %v1364_v4, %v918_v62  ;;  %v10258_v7 = vpop.permute.xlu2 %8494  ;;  %v8492_v50 = vunpack.i.h.bf16 %v10210_v30  ;;  %vm14657_vm2 = vcmask 1042432  }
 0x17b   : > { %v1043_v24 = vpop.permute.xlu0 %1042  ;;  %v1408_v62 = vsel %vm9947_vm8, %v1384_v40, %v950_v58  ;;  %vm14659_vm15 = vcmask 965632   ;;  %v1249_v21 = vrot.slane %v9826_v36, 1  ;;  %v14665_v40 = vunpack.i.h.bf16 %v9847_v63 }
 0x17c   : > { %v1055_v11 = vsel %vm14651_vm3, %v1043_v24, %v10206_v17  ;;  %vm14656_vm3 = vcmask 1043456   ;;  %v1428_v14 = vsel %vm14657_vm2, %v1408_v62, %v990_v43  ;;  %v1054_v13 = vsel %vm14658_vm1, %v9786_v10, %v1043_v24 }
 0x17d   : > { %v1476_v46 = vsel %vm14656_vm3, %v1453_v38, %v1055_v11  ;;  %v1208_v10 = vrot.slane %v9836_v55, 2  ;;  %v1209_v24 = vrot.slane %v9839_v56, 2  ;;  %vm14662_vm3 = vcmask 957440  }
 0x17e   : > { %1120 = vrot.lane.b32.xlu2 %v1105_v12, %s14529_s11  ;;  %v1159_v38 = vsel %vm14662_vm3, %v8491_v31, %v8492_v50  ;;  %vm14663_vm2 = vcmask 1043456   ;;  %vm14664_vm1 = vcmask 1044480  }
 0x17f   : > { %vm14667_vm3 = vmmov %vm14664_vm1 }
 0x180   : > { %1118 = vrot.lane.b32.xlu1 %v1104_v47, %s14529_s11  ;;  %8524 = vrot.lane.b32.xlu0 %v8523_v29, %s14525_s25  ;;  %v1087_v47 = vsel %vm14655_vm5, %v8486_v60, %v8487_v53  ;;  %vm14660_vm5 = vcmask 990208   ;;  %s14732_s11 = sld [smem:[#allocation41_spill]]  ;;  %s14772_s25 = smov 126  }
 0x181   : > { %v10246_v12 = vpop.permute.xlu1 %1116  ;;  %v1497_v39 = vsel %vm10022_vm10, %v1476_v46, %v1087_v47  ;;  %v1022_v18 = vsel %vm14660_vm5, %v8422_v5, %v8481_v54  ;;  %vm14666_vm5 = vcmask 973824   ;;  %v1248_v47 = vrot.slane %v9824_v35, 1 }
 0x182   : > { %v1452_v4 = vsel %vm9985_vm7, %v1428_v14, %v1022_v18  ;;  %v1086_v43 = vsel %vm14666_vm5, %v14665_v40, %v8486_v60  ;;  %v10305_v60 = vpop.permute.xlu2 %8499  ;;  %v14668_v14 = vunpack.i.h.bf16 %v9866_v26  ;;  %v1281_v26 = vrot.slane %v9839_v56, 1 }
 0x183   : > { %v1115_v29 = vpop.permute.xlu0 %1114  ;;  %v1472_v45 = vsel %vm14663_vm2, %v1452_v4, %v1054_v13  ;;  %vm14669_vm2 = vcmask 957440  }
 0x184   : > { %v1127_v19 = vsel %vm14659_vm15, %v1115_v29, %v10246_v12  ;;  %v1126_v11 = vsel %vm14659_vm15, %v9815_v44, %v1115_v29  ;;  %v1496_v46 = vsel %vm10022_vm10, %v1472_v45, %v1086_v43  ;;  %v8533_v29 = vpack.i.bf16 %v1209_v24, %v1208_v10 }
 0x185   : > { %v1520_v5 = vsel %vm14664_vm1, %v1497_v39, %v1127_v19  ;;  %v1516_v63 = vsel %vm14667_vm3, %v1496_v46, %v1126_v11  ;;  %v1158_v13 = vsel %vm14669_vm2, %v14668_v14, %v8491_v31  ;;  %v8502_v19 = vunpack.i.h.bf16 %v10305_v60 }
 0x186   : > { %1192 = vrot.lane.b32.xlu2 %v1177_v41, %s14619_s20  ;;  %v8497_v41 = vunpack.i.h.bf16 %v10258_v7  ;;  %v1541_v62 = vsel %vm10058_vm0, %v1520_v5, %v1159_v38  ;;  %v1540_v4 = vsel %vm10058_vm0, %v1516_v63, %v1158_v13  ;;  %v8501_v31 = vunpack.i.l.bf16 %v10305_v60  ;;  %v1676_v60 = vld [vmem:[%s14732_s11 + $0x8] sm:$0xff] }
 0x187   : > { %v14670_v38 = vunpack.i.h.bf16 %v9970_v34  ;;  %vm14671_vm1 = vcmask 924672   ;;  %vm14672_vm15 = vcmask 932864   ;;  %v14674_v34 = vunpack.i.h.bf16 %v10093_v51 }
 0x188   : > { %1190 = vrot.lane.b32.xlu1 %v1176_v59, %s14619_s20  ;;  %8529 = vrot.lane.b32.xlu0 %v8528_v8, %s14661_s26  ;;  %v8496_v59 = vunpack.i.l.bf16 %v10258_v7  ;;  %vm14673_vm5 = vmmov %vm14672_vm15  ;;  %vm14676_vm2 = vcmask 1046528  }
 0x189   : > { %v10287_v54 = vpop.permute.xlu1 %1188  ;;  %vm14675_vm3 = vmmov %vm14671_vm1 }
 0x18a   : > { %v1231_v39 = vsel %vm1226_vm6, %v8496_v59, %v8497_v41  ;;  %v1230_v45 = vsel %vm1226_vm6, %v14670_v38, %v8496_v59  ;;  %v841_v51 = vpop.permute.xlu2 %840 }
 0x18b   : > { %v1187_v58 = vpop.permute.xlu0 %1186 }
 0x18c   : > { %v1199_v44 = vsel %vm1194_vm13, %v1187_v58, %v10287_v54  ;;  %v1198_v8 = vsel %vm1194_vm13, %v9850_v1, %v1187_v58  ;;  %v1280_v1 = vrot.slane %v9836_v55, 1  ;;  %v1303_v55 = vsel %vm14671_vm1, %v8501_v31, %v8502_v19 }
 0x18d   : > { %v1564_v18 = vsel %vm14522_vm14, %v1541_v62, %v1199_v44  ;;  %v1560_v10 = vsel %vm14522_vm14, %v1540_v4, %v1198_v8  ;;  %v1302_v58 = vsel %vm14675_vm3, %v14674_v34, %v8501_v31  ;;  %vm14677_vm14 = vmmov %vm14676_vm2  ;;  %vm14678_vm1 = vcmask 1039360  }
 0x18e   : > { %1264 = vrot.lane.b32.xlu2 %v1249_v21, %s14537_s24  ;;  %v1585_v24 = vsel %vm10083_vm9, %v1564_v18, %v1231_v39  ;;  %v1584_v40 = vsel %vm10083_vm9, %v1560_v10, %v1230_v45  ;;  %v8538_v43 = vpack.i.bf16 %v1281_v26, %v1280_v1  ;;  %vm14681_vm3 = vcmask 1031168  }
 0x190   : > { %1262 = vrot.lane.b32.xlu1 %v1248_v47, %s14537_s24  ;;  %8534 = vrot.lane.b32.xlu0 %v8533_v29, %s14547_s5 }
 0x191   : > { %v10331_v5 = vpop.permute.xlu1 %1260 }
 0x193   : > { %v1259_v11 = vpop.permute.xlu0 %1258 }
 0x194   : > { %v1270_v56 = vsel %vm14672_vm15, %v9890_v16, %v1259_v11  ;;  %v1271_v21 = vsel %vm14673_vm5, %v1259_v11, %v10331_v5  ;;  %vm14680_vm15 = vmmov %vm14678_vm1  ;;  %vm14524_vm5 = vcmask 261120  }
 0x195   : > { %v1604_v47 = vsel %vm14676_vm2, %v1584_v40, %v1270_v56  ;;  %v1608_v46 = vsel %vm14677_vm14, %v1585_v24, %v1271_v21  ;;  %vm14523_vm14 = vcmask 916480   ;;  %vm14682_vm2 = vcmask 1022976  }
 0x196   : > { %v10349_v62 = vsel %vm10101_vm11, %v1604_v47, %v1302_v58  ;;  %v10353_v16 = vsel %vm10101_vm11, %v1608_v46, %v1303_v55 }
 0x197   : > { %1649 = vrot.lane.b32.xlu2 %v10353_v16, %s14531_s7 }
 0x198   : > { %1647 = vrot.lane.b32.xlu1 %v10349_v62, %s14531_s7  ;;  %8539 = vrot.lane.b32.xlu0 %v8538_v43, %s14543_s9  ;;  %v10377_v43 = vld [vmem:[#allocation5] sm:$0xff] }
 0x199   : > { %v839_v29 = vpop.permute.xlu1 %838 }
 0x19a   : > { %v849_v34 = vsel %vm14681_vm3, %v839_v29, %v841_v51 }
 0x19b   : > { %v8505_v59 = vpop.permute.xlu0 %8504 }
 0x19c   : > { %v8507_v24 = vunpack.i.h.bf16 %v8505_v59  ;;  %v8506_v11 = vunpack.i.l.bf16 %v8505_v59 }
 0x19e   : > { %v809_v56 = vsel %vm14678_vm1, %v8506_v11, %v8507_v24  ;;  %v1324_v47 = vsel %vm9870_vm4, %v9826_v36, %v8507_v24  ;;  %vm14684_vm1 = vmmov %vm14682_vm2 }
 0x19f   : > { %v1323_v58 = vsel %vm9870_vm4, %v9824_v35, %v809_v56  ;;  %v14683_v35 = vunpack.i.h.bf16 %v10036_v28 }
 0x1b8   : > { %v10360_v44 = vpop.permute.xlu2 %1645 }
 0x1c0   : > { %v913_v63 = vpop.permute.xlu2 %912 }
 0x1c8   : > { %v985_v18 = vpop.permute.xlu2 %984 }
 0x1d0   : > { %v10367_v26 = vpop.permute.xlu2 %1048 }
 0x1d2   : > { %v1644_v8 = vpop.permute.xlu1 %1643  ;;  %v1642_v14 = vpop.permute.xlu0 %1641 }
 0x1d3   : > { %v1658_v13 = vsel %vm14523_vm14, %v1642_v14, %v1644_v8  ;;  %v1659_v39 = vsel %vm14523_vm14, %v1644_v8, %v10360_v44 }
 0x1d4   : > { %1702 = vmatpush.bf16.msra.mxu2 %v1658_v13  ;;  %1716 = vmatpush.bf16.msra.mxu3 %v1659_v39 }
 0x1d8   : > { %1703 = vmatpush.bf16.msra.mxu2 %v10137_v42  ;;  %1717 = vmatpush.bf16.msra.mxu3 %v10133_v22  ;;  %v10371_v55 = vpop.permute.xlu2 %1120  ;;  %v14679_v42 = vunpack.i.h.bf16 %v9963_v52 }
 0x1da   : > { %v911_v4 = vpop.permute.xlu1 %910  ;;  %v8510_v1 = vpop.permute.xlu0 %8509  ;;  %v808_v22 = vsel %vm14680_vm15, %v14679_v42, %v8506_v11  ;;  %vm14685_vm15 = vmmov %vm14681_vm3 }
 0x1db   : > { %v8512_v21 = vunpack.i.h.bf16 %v8510_v1  ;;  %v8511_v40 = vunpack.i.l.bf16 %v8510_v1  ;;  %v1322_v46 = vsel %vm9870_vm4, %v9710_v32, %v808_v22  ;;  %7799 = vmatmul.msk.bf16.vlgmr.msra.gmra.mxu3 %vm14524_vm5, %v10377_v43  ;;  %7798 = vmatmul.msk.bf16.vlgmr.msra.gmra.mxu2 %vm14524_vm5, %v10377_v43  ;;  %v848_v33 = vsel %vm14685_vm15, %v10145_v37, %v839_v29 }
 0x1dc   : > { %vm14686_vm4 = vcmask 1040384  }
 0x1dd   : > { %v881_v52 = vsel %vm14682_vm2, %v8511_v40, %v8512_v21  ;;  %v880_v36 = vsel %vm14684_vm1, %v14683_v35, %v8511_v40  ;;  %v1352_v32 = vsel %vm14686_vm4, %v1323_v58, %v849_v34  ;;  %vm14687_vm3 = vmmov %vm14686_vm4  ;;  %vm14688_vm2 = vcmask 1014784  }
 0x1de   : > { %v1356_v39 = vsel %vm14687_vm3, %v1324_v47, %v841_v51  ;;  %v921_v1 = vsel %vm14688_vm2, %v911_v4, %v913_v63  ;;  %vm14689_vm14 = vmmov %vm14687_vm3  ;;  %v1367_v11 = vsel %vm9910_vm12, %v1352_v32, %v881_v52  ;;  %vm14690_vm1 = vcmask 1006592  }
 0x1df   : > { %v1368_v24 = vsel %vm9910_vm12, %v1356_v39, %v8512_v21  ;;  %v14691_v51 = vunpack.i.h.bf16 %v10111_v3  ;;  %vm14692_vm15 = vmmov %vm14690_vm1  ;;  %vm14694_vm4 = vcmask 1041408  }
 0x1e0   : > { %v1193_v28 = vpop.permute.xlu2 %1192  ;;  %v1396_v21 = vsel %vm14694_vm4, %v1367_v11, %v921_v1  ;;  %vm14695_vm3 = vmmov %vm14694_vm4 }
 0x1e1   : > { %v1400_v34 = vsel %vm14695_vm3, %v1368_v24, %v913_v63  ;;  %vm14697_vm5 = vmmov %vm14695_vm3  ;;  %vm14705_vm3 = vcmask 973824  }
 0x1e2   : > { %v983_v31 = vpop.permute.xlu1 %982  ;;  %v8515_v10 = vpop.permute.xlu0 %8514 }
 0x1e3   : > { %v8517_v59 = vunpack.i.h.bf16 %v8515_v10  ;;  %v8516_v8 = vunpack.i.l.bf16 %v8515_v10  ;;  %v1348_v10 = vsel %vm14689_vm14, %v1322_v46, %v848_v33  ;;  %vm14693_vm14 = vmmov %vm14688_vm2  ;;  %vm14696_vm2 = vcmask 998400  }
 0x1e4   : > { %v1366_v56 = vsel %vm9910_vm12, %v1348_v10, %v880_v36  ;;  %v920_v22 = vsel %vm14693_vm14, %v10158_v15, %v911_v4  ;;  %v993_v58 = vsel %vm14696_vm2, %v983_v31, %v985_v18  ;;  %vm14698_vm12 = vcmask 990208  }
 0x1e5   : > { %v953_v37 = vsel %vm14690_vm1, %v8516_v8, %v8517_v59  ;;  %v952_v42 = vsel %vm14692_vm15, %v14691_v51, %v8516_v8  ;;  %v1392_v9 = vsel %vm14697_vm5, %v1366_v56, %v920_v22  ;;  %vm14699_vm1 = vmmov %vm14698_vm12  ;;  %vm14701_vm15 = vcmask 1042432  }
 0x1e6   : > { %v1411_v47 = vsel %vm9947_vm8, %v1396_v21, %v953_v37  ;;  %v1410_v3 = vsel %vm9947_vm8, %v1392_v9, %v952_v42  ;;  %vm14700_vm5 = vmmov %vm14696_vm2 }
 0x1e7   : > { %v992_v35 = vsel %vm14700_vm5, %v10183_v6, %v983_v31  ;;  %v1440_v36 = vsel %vm14701_vm15, %v1411_v47, %v993_v58  ;;  %vm14702_vm14 = vmmov %vm14701_vm15 }
 0x1e8   : > { %vm14704_vm4 = vmmov %vm14702_vm14  ;;  %v1265_v39 = vpop.permute.xlu2 %1264 }
 0x1e9   : > { %v1436_v33 = vsel %vm14704_vm4, %v1410_v3, %v992_v35  ;;  %vm14706_vm2 = vmmov %vm14705_vm3 }
 0x1ea   : > { %v10369_v38 = vpop.permute.xlu1 %1046  ;;  %v8520_v45 = vpop.permute.xlu0 %8519 }
 0x1eb   : > { %v8522_v29 = vunpack.i.h.bf16 %v8520_v45  ;;  %v8521_v40 = vunpack.i.l.bf16 %v8520_v45  ;;  %v1412_v45 = vsel %vm9947_vm8, %v1400_v34, %v8517_v59  ;;  %vm14703_vm8 = vcmask 982016  }
 0x1ec   : > { %v1444_v59 = vsel %vm14702_vm14, %v1412_v45, %v985_v18  ;;  %v1057_v49 = vsel %vm14703_vm8, %v10369_v38, %v10367_v26  ;;  %vm14712_vm14 = vcmask 957440  }
 0x1ed   : > { %v1025_v46 = vsel %vm14698_vm12, %v8521_v40, %v8522_v29  ;;  %v1024_v63 = vsel %vm14699_vm1, %v8482_v61, %v8521_v40  ;;  %v1456_v57 = vsel %vm9985_vm7, %v1444_v59, %v8522_v29  ;;  %vm14707_vm12 = vmmov %vm14703_vm8  ;;  %vm14708_vm1 = vcmask 1043456  }
 0x1ee   : > { %v1454_v61 = vsel %vm9985_vm7, %v1436_v33, %v1024_v63  ;;  %v1056_v1 = vsel %vm14707_vm12, %v10206_v17, %v10369_v38  ;;  %vm14709_vm5 = vmmov %vm14708_vm1  ;;  %vm14718_vm12 = vcmask 1045504  }
 0x1ef   : > { %v1488_v24 = vsel %vm14709_vm5, %v1456_v57, %v10367_v26  ;;  %vm14711_vm15 = vmmov %vm14708_vm1  ;;  %vm14720_vm5 = vcmask 932864  }
 0x1f0   : > { %v1480_v11 = vsel %vm14711_vm15, %v1454_v61, %v1056_v1  ;;  %vm14713_vm8 = vmmov %vm14712_vm14 }
 0x1f1   : > { %v1650_v47 = vpop.permute.xlu2 %1649 }
 0x1f2   : > { %v1119_v14 = vpop.permute.xlu1 %1118  ;;  %v8525_v13 = vpop.permute.xlu0 %8524 }
 0x1f3   : > { %v8527_v15 = vunpack.i.h.bf16 %v8525_v13  ;;  %v8526_v4 = vunpack.i.l.bf16 %v8525_v13  ;;  %v1455_v13 = vsel %vm9985_vm7, %v1440_v36, %v1025_v46  ;;  %vm14710_vm7 = vcmask 965632  }
 0x1f4   : > { %v1484_v10 = vsel %vm14708_vm1, %v1455_v13, %v1057_v49  ;;  %v1129_v0 = vsel %vm14710_vm7, %v1119_v14, %v10371_v55  ;;  %vm14714_vm4 = vmmov %vm14710_vm7  ;;  %vm14722_vm7 = vcmask 916480  }
 0x1f5   : > { %v1089_v6 = vsel %vm14705_vm3, %v8526_v4, %v8527_v15  ;;  %v1088_v18 = vsel %vm14706_vm2, %v8487_v53, %v8526_v4  ;;  %v1500_v53 = vsel %vm10022_vm10, %v1488_v24, %v8527_v15  ;;  %v1128_v51 = vsel %vm14714_vm4, %v10246_v12, %v1119_v14  ;;  %vm14719_vm1 = vmmov %vm14718_vm12 }
 0x1f6   : > { %v1499_v48 = vsel %vm10022_vm10, %v1484_v10, %v1089_v6  ;;  %v1498_v56 = vsel %vm10022_vm10, %v1480_v11, %v1088_v18  ;;  %vm14715_vm3 = vcmask 1044480   ;;  %vm14723_vm15 = vmmov %vm14722_vm7 }
 0x1f7   : > { %v1528_v42 = vsel %vm14715_vm3, %v1499_v48, %v1129_v0  ;;  %vm14716_vm2 = vmmov %vm14715_vm3 }
 0x1f8   : > { %v1532_v22 = vsel %vm14716_vm2, %v1500_v53, %v10371_v55  ;;  %vm14717_vm10 = vmmov %vm14716_vm2 }
 0x1f9   : > { %v1524_v21 = vsel %vm14717_vm10, %v1498_v56, %v1128_v51  ;;  %vm14730_vm10 = vcmask 261120  }
 0x1fa   : > { %v1191_v52 = vpop.permute.xlu1 %1190  ;;  %v8530_v8 = vpop.permute.xlu0 %8529 }
 0x1fb   : > { %v8532_v31 = vunpack.i.h.bf16 %v8530_v8  ;;  %v8531_v32 = vunpack.i.l.bf16 %v8530_v8  ;;  %v1201_v25 = vsel %vm1194_vm13, %v1191_v52, %v1193_v28  ;;  %v1200_v55 = vsel %vm1194_vm13, %v10287_v54, %v1191_v52 }
 0x1fd   : > { %v1161_v17 = vsel %vm14712_vm14, %v8531_v32, %v8532_v31  ;;  %v1160_v26 = vsel %vm14713_vm8, %v8492_v50, %v8531_v32  ;;  %v1544_v30 = vsel %vm10058_vm0, %v1532_v22, %v8532_v31  ;;  %vm14724_vm14 = vmmov %vm14720_vm5  ;;  %vm14725_vm8 = vcmask 1046528  }
 0x1fe   : > { %v1543_v34 = vsel %vm10058_vm0, %v1528_v42, %v1161_v17  ;;  %v1542_v50 = vsel %vm10058_vm0, %v1524_v21, %v1160_v26  ;;  %v1576_v58 = vsel %vm14718_vm12, %v1544_v30, %v1193_v28  ;;  %vm14721_vm0 = vmmov %vm14719_vm1 }
 0x1ff   : > { %v1572_v9 = vsel %vm14719_vm1, %v1543_v34, %v1201_v25  ;;  %v1568_v7 = vsel %vm14721_vm0, %v1542_v50, %v1200_v55  ;;  %vm14726_vm4 = vmmov %vm14725_vm8 }
 0x200   : > { %vm14729_vm2 = vmmov %vm14726_vm4 }
 0x201   : > { %vm14731_vm12 = vmmov %vm14730_vm10 }
 0x202   : > { %v1263_v38 = vpop.permute.xlu1 %1262  ;;  %v8535_v37 = vpop.permute.xlu0 %8534  ;;  %vm14734_vm1 = vmmov %vm14722_vm7 }
 0x203   : > { %v8537_v29 = vunpack.i.h.bf16 %v8535_v37  ;;  %v8536_v40 = vunpack.i.l.bf16 %v8535_v37  ;;  %v1273_v45 = vsel %vm14720_vm5, %v1263_v38, %v1265_v39  ;;  %v1272_v8 = vsel %vm14724_vm14, %v10331_v5, %v1263_v38  ;;  %vm14735_vm5 = vmmov %vm14734_vm1 }
 0x204   : > { %vm14736_vm0 = vmmov %vm14734_vm1 }
 0x205   : > { %v1233_v12 = vsel %vm1226_vm6, %v8536_v40, %v8537_v29  ;;  %v1232_v14 = vsel %vm1226_vm6, %v8497_v41, %v8536_v40  ;;  %v1588_v2 = vsel %vm10083_vm9, %v1576_v58, %v8537_v29 }
 0x206   : > { %v1587_v3 = vsel %vm10083_vm9, %v1572_v9, %v1233_v12  ;;  %v1586_v54 = vsel %vm10083_vm9, %v1568_v7, %v1232_v14  ;;  %v1620_v63 = vsel %vm14725_vm8, %v1588_v2, %v1265_v39  ;;  %vm14727_vm9 = vcmask 924672  }
 0x207   : > { %v1616_v35 = vsel %vm14726_vm4, %v1587_v3, %v1273_v45  ;;  %vm14728_vm3 = vmmov %vm14727_vm9  ;;  %v1612_v59 = vsel %vm14729_vm2, %v1586_v54, %v1272_v8 }
 0x20a   : > { %v1648_v46 = vpop.permute.xlu1 %1647  ;;  %v8540_v41 = vpop.permute.xlu0 %8539 }
 0x20b   : > { %v8542_v15 = vunpack.i.h.bf16 %v8540_v41  ;;  %v8541_v28 = vunpack.i.l.bf16 %v8540_v41  ;;  %v1660_v4 = vsel %vm14722_vm7, %v10360_v44, %v1648_v46  ;;  %v1661_v52 = vsel %vm14723_vm15, %v1648_v46, %v1650_v47  ;;  %vm14737_vm7 = vmmov %vm14730_vm10 }
 0x20c   : > { %1730 = vmatpush.bf16.msrb.mxu2 %v1660_v4  ;;  %1744 = vmatpush.bf16.msrb.mxu3 %v1661_v52  ;;  %vm14738_vm15 = vmmov %vm14737_vm7 }
 0x20d   : > { %v1632_v20 = vsel %vm10101_vm11, %v1620_v63, %v8542_v15  ;;  %v1305_v36 = vsel %vm14727_vm9, %v8541_v28, %v8542_v15  ;;  %v1304_v44 = vsel %vm14728_vm3, %v8502_v19, %v8541_v28  ;;  %vm14739_vm14 = vmmov %vm14737_vm7 }
 0x20e   : > { %1655 = vrot.lane.b32.xlu2 %v1632_v20, %s14531_s7  ;;  %v1631_v5 = vsel %vm10101_vm11, %v1616_v35, %v1305_v36  ;;  %v1630_v49 = vsel %vm10101_vm11, %v1612_v59, %v1304_v44  ;;  %vm14733_vm11 = vmmov %vm14730_vm10 }
 0x20f   : > { %1653 = vrot.lane.b32.xlu1 %v1631_v5, %s14531_s7  ;;  %1651 = vrot.lane.b32.xlu0 %v1630_v49, %s14531_s7  ;;  %s14769_s7 = smov 124  }
 0x210   : > { %1731 = vmatpush.bf16.msrb.mxu2 %v10119_v23  ;;  %1745 = vmatpush.bf16.msrb.mxu3 %v10349_v62  ;;  %v1675_v23 = vld [vmem:[%s14732_s11] sm:$0xff]  ;;  %s14796_s11 = smov 115  }
 0x213   : > { %7801 = vmatmul.msk.bf16.vlgmr.msrb.gmra.mxu3 %vm14730_vm10, %v10377_v43  ;;  %7800 = vmatmul.msk.bf16.vlgmr.msrb.gmra.mxu2 %vm14731_vm12, %v10377_v43 }
 0x217   : > { %1684 = vperm.xlu1 %8544, %v1676_v60   ;;  %1679 = vperm.xlu0 %8543, %v1675_v23  }
 0x25e   : > { %v1719_v6 = vpop.f32.mrf.mxu3  ;;  %v1705_v18 = vpop.f32.mrf.mxu2 }
 0x266   : > { %v1721_v31 = vpop.f32.mrf.mxu3  ;;  %v1707_v1 = vpop.f32.mrf.mxu2 }
 0x268   : > { %v1656_v19 = vpop.permute.xlu2 %1655 }
 0x269   : > { %1800 = vmatpush.bf16.msra.mxu3 %v1656_v19 }
 0x26d   : > { %1801 = vmatpush.bf16.msra.mxu3 %v1632_v20 }
 0x270   : > { %7805 = vmatmul.msk.bf16.vlgmr.msra.gmra.mxu3 %vm14733_vm11, %v10377_v43 }
 0x281   : > { %v1654_v62 = vpop.permute.xlu1 %1653  ;;  %v1652_v33 = vpop.permute.xlu0 %1651 }
 0x282   : > { %v1662_v13 = vsel %vm14734_vm1, %v1650_v47, %v1652_v33  ;;  %v1663_v57 = vsel %vm14735_vm5, %v1652_v33, %v1654_v62  ;;  %v1664_v61 = vsel %vm14736_vm0, %v1654_v62, %v1656_v19 }
 0x283   : > { %1758 = vmatpush.bf16.msra.mxu0 %v1662_v13  ;;  %1772 = vmatpush.bf16.msra.mxu1 %v1663_v57 }
 0x284   : > { %1786 = vmatpush.bf16.msra.mxu2 %v1664_v61 }
 0x287   : > { %1759 = vmatpush.bf16.msra.mxu0 %v10353_v16  ;;  %1773 = vmatpush.bf16.msra.mxu1 %v1630_v49 }
 0x288   : > { %1787 = vmatpush.bf16.msra.mxu2 %v1631_v5 }
 0x289   : > { %v10549_v0 = vpop.permute.xlu1 %1684  ;;  %v10554_v48 = vpop.permute.xlu0 %1679 }
 0x28a   : > { %7802 = vmatmul.msk.bf16.vlgmr.msra.gmra.mxu0 %vm14737_vm7, %v10377_v43  ;;  %7803 = vmatmul.msk.bf16.vlgmr.msra.gmra.mxu1 %vm14738_vm15, %v10377_v43  ;;  %v10563_v17 = vadd.f32 %v1707_v1, %v10549_v0  ;;  %v10567_v29 = vadd.f32 %v1721_v31, %v10549_v0  ;;  %v10576_v42 = vadd.f32 %v1705_v18, %v10554_v48 }
 0x28b   : > { %7804 = vmatmul.msk.bf16.vlgmr.msra.gmra.mxu2 %vm14739_vm14, %v10377_v43  ;;  %v10586_v55 = vadd.f32 %v1719_v6, %v10554_v48 }
 0x28c   : > { %v7814_v34 = vmul.f32 -1.442695, %v10563_v17  ;;  %v7815_v30 = vmul.f32 -1.442695, %v10567_v29  ;;  %v7806_v50 = vmul.f32 -1.442695, %v10576_v42 }
 0x28d   : > { %v7807_v15 = vmul.f32 -1.442695, %v10586_v55 }
 0x296   : > { %v10543_v32 = vpop.f32.mrf.mxu3  ;;  %v10547_v24 = vpop.f32.mrf.mxu2 }
 0x29e   : > { %v10545_v39 = vpop.f32.mrf.mxu3  ;;  %v10560_v56 = vpop.f32.mrf.mxu2 }
 0x2f3   : > { %v1803_v16 = vpop.f32.mrf.mxu3 }
 0x2f4   : > { %v10558_v53 = vadd.f32 %v1803_v16, %v10554_v48 }
 0x2f6   : > { %v7813_v26 = vmul.f32 -1.442695, %v10558_v53 }
 0x2fb   : > { %v1805_v10 = vpop.f32.mrf.mxu3 }
 0x2fc   : > { %v10552_v11 = vadd.f32 %v1805_v10, %v10549_v0 }
 0x2fe   : > { %v7821_v43 = vmul.f32 -1.442695, %v10552_v11 }
 0x300   : > { %8577 = vpow2.f32 %v7821_v43 }
 0x301   : > { %8579 = vpow2.f32 %v7813_v26 }
 0x306   : > { %v8578_v21 = vpop.eup %8577 }
 0x307   : > { %v1761_v38 = vpop.f32.mrf.mxu0  ;;  %v1775_v37 = vpop.f32.mrf.mxu1  ;;  %v10583_v12 = vadd.f32 1.0, %v8578_v21 }
 0x308   : > { %v10570_v40 = vadd.f32 %v1761_v38, %v10554_v48  ;;  %v10573_v51 = vadd.f32 %v1775_v37, %v10554_v48  ;;  %v8580_v3 = vpop.eup %8579 }
 0x309   : > { %v10608_v35 = vadd.f32 1.0, %v8580_v3  ;;  %v2108_v31 = vand.u32 2147483648, %v10583_v12  ;;  %vm2102_vm12 = vweird.f32 %v10583_v12 }
 0x30a   : > { %v7810_v22 = vmul.f32 -1.442695, %v10570_v40  ;;  %v7811_v25 = vmul.f32 -1.442695, %v10573_v51 }
 0x30b   : > { %vm1982_vm4 = vweird.f32 %v10608_v35 }
 0x30c   : > { %8581 = vpow2.f32 %v7810_v22 }
 0x30d   : > { %8583 = vpow2.f32 %v7811_v25  ;;  %v1988_v25 = vand.u32 2147483648, %v10608_v35 }
 0x30e   : > { %v1789_v14 = vpop.f32.mrf.mxu2  ;;  %8585 = vpow2.f32 %v7814_v34  ;;  %v2106_v34 = vand.u32 2147483647, %v10583_v12 }
 0x30f   : > { %v10589_v58 = vadd.f32 %v1789_v14, %v10554_v48  ;;  %v1763_v9 = vpop.f32.mrf.mxu0  ;;  %v1777_v47 = vpop.f32.mrf.mxu1  ;;  %8587 = vpow2.f32 %v7815_v30  ;;  %v10650_v30 = vor.u32 1.1754944e-38, %v2108_v31 }
 0x310   : > { %v10592_v45 = vadd.f32 %v1763_v9, %v10549_v0  ;;  %v10595_v2 = vadd.f32 %v1777_v47, %v10549_v0  ;;  %8589 = vpow2.f32 %v7806_v50  ;;  %v1986_v50 = vand.u32 2147483647, %v10608_v35 }
 0x311   : > { %v7812_v7 = vmul.f32 -1.442695, %v10589_v58  ;;  %8591 = vrcp.f32 %v10583_v12 }
 0x312   : > { %v8582_v46 = vpop.eup %8581  ;;  %v7818_v41 = vmul.f32 -1.442695, %v10592_v45  ;;  %v7819_v52 = vmul.f32 -1.442695, %v10595_v2  ;;  %vm10723_vm14 = vcmp.eq.f32.partialorder %v1986_v50, 8.507059e+37 }
 0x313   : > { %v8584_v54 = vpop.eup %8583  ;;  %v10601_v28 = vadd.f32 1.0, %v8582_v46  ;;  %8593 = vpow2.f32 %v7812_v7 }
 0x314   : > { %v10603_v4 = vadd.f32 1.0, %v8584_v54  ;;  %8595 = vpow2.f32 %v7818_v41  ;;  %v8586_v8 = vpop.eup %8585 }
 0x315   : > { %8597 = vrcp.f32 %v10601_v28  ;;  %v8588_v63 = vpop.eup %8587  ;;  %v10612_v5 = vadd.f32 1.0, %v8586_v8  ;;  %v1941_v47 = vand.u32 2147483647, %v10601_v28  ;;  %v1943_v46 = vand.u32 2147483648, %v10601_v28 }
 0x316   : > { %8599 = vrcp.f32 %v10603_v4  ;;  %v1791_v20 = vpop.f32.mrf.mxu2  ;;  %v8590_v36 = vpop.eup %8589  ;;  %v10622_v62 = vadd.f32 1.0, %v8588_v63  ;;  %v1956_v41 = vand.u32 2147483647, %v10603_v4  ;;  %vm1937_vm8 = vweird.f32 %v10601_v28 }
 0x317   : > { %8601 = vpow2.f32 %v7807_v15  ;;  %v10610_v44 = vpop.eup %8591  ;;  %v10615_v49 = vadd.f32 %v1791_v20, %v10549_v0  ;;  %v10640_v43 = vadd.f32 1.0, %v8590_v36  ;;  %v1958_v63 = vand.u32 2147483648, %v10603_v4 }
 0x318   : > { %8603 = vpow2.f32 %v7819_v52  ;;  %v2098_v57 = vmul.f32 %v10610_v44, %v10583_v12  ;;  %v10673_v20 = vor.u32 1.1754944e-38, %v1988_v25  ;;  %vm1952_vm3 = vweird.f32 %v10603_v4 }
 0x319   : > { %v8594_v59 = vpop.eup %8593  ;;  %8605 = vrcp.f32 %v10608_v35  ;;  %v7820_v1 = vmul.f32 -1.442695, %v10615_v49  ;;  %vm10681_vm2 = vcmp.eq.f32.partialorder %v1941_v47, 8.507059e+37  ;;  %vm2103_vm11 = vweird.f32 %v10610_v44 }
 0x31a   : > { %v8596_v60 = vpop.eup %8595  ;;  %v10617_v23 = vadd.f32 1.0, %v8594_v59  ;;  %v2099_v22 = vsub.f32 1.0, %v2098_v57  ;;  %vm10689_vm1 = vcmp.eq.f32.partialorder %v1956_v41, 8.507059e+37  ;;  %v1959_v25 = vor.u32 1.1754944e-38, %v1958_v63 }
 0x31b   : > { %v10620_v19 = vpop.eup %8597  ;;  %v10624_v33 = vadd.f32 1.0, %v8596_v60 }
 0x31c   : > { %v10626_v13 = vpop.eup %8599  ;;  %v1933_v61 = vmul.f32 %v10620_v19, %v10601_v28  ;;  %8607 = vrcp.f32 %v10617_v23  ;;  %v10668_v8 = vmul.f32 %v10610_v44, %v2099_v22  ;;  %vm1938_vm9 = vweird.f32 %v10620_v19 }
 0x31d   : > { %v8602_v6 = vpop.eup %8601  ;;  %8609 = vrcp.f32 %v10612_v5  ;;  %v1948_v18 = vmul.f32 %v10626_v13, %v10603_v4  ;;  %vm1953_vm10 = vweird.f32 %v10626_v13  ;;  %vm10697_vm5 = vmor %vm1937_vm8, %vm1938_vm9  ;;  %v2061_v4 = vand.u32 2147483647, %v10624_v33 }
 0x31e   : > { %v8604_v16 = vpop.eup %8603  ;;  %v1934_v10 = vsub.f32 1.0, %v1933_v61  ;;  %8611 = vrcp.f32 %v10624_v33  ;;  %v10644_v26 = vadd.f32 1.0, %v8602_v6  ;;  %vm10707_vm7 = vmor %vm1952_vm3, %vm1953_vm10  ;;  %v1973_v63 = vand.u32 2147483648, %v10617_v23 }
 0x31f   : > { %8613 = vrcp.f32 %v10622_v62  ;;  %v1949_v38 = vsub.f32 1.0, %v1948_v18  ;;  %v10642_v37 = vpop.eup %8605  ;;  %v10647_v21 = vadd.f32 1.0, %v8604_v16  ;;  %v1944_v18 = vor.u32 1.1754944e-38, %v1943_v46 }
 0x320   : > { %8615 = vpow2.f32 %v7820_v1  ;;  %v1935_v9 = vmul.f32 %v10620_v19, %v1934_v10  ;;  %v1978_v15 = vmul.f32 %v10642_v37, %v10608_v35  ;;  %vm1983_vm0 = vweird.f32 %v10642_v37 }
 0x321   : > { %v1950_v3 = vmul.f32 %v10626_v13, %v1949_v38  ;;  %8617 = vrcp.f32 %v10647_v21  ;;  %vm2057_vm8 = vweird.f32 %v10624_v33  ;;  %vm10734_vm10 = vcmp.eq.f32.partialorder %v2106_v34, 8.507059e+37 }
 0x322   : > { %v10653_v14 = vpop.eup %8607  ;;  %v1936_v57 = vadd.f32 %v10620_v19, %v1935_v9  ;;  %v1979_v16 = vsub.f32 1.0, %v1978_v15  ;;  %v2063_v9 = vand.u32 2147483648, %v10624_v33  ;;  %v1971_v34 = vand.u32 2147483647, %v10617_v23 }
 0x323   : > { %v10659_v7 = vpop.eup %8609  ;;  %v1963_v54 = vmul.f32 %v10653_v14, %v10617_v23  ;;  %v1951_v6 = vadd.f32 %v10626_v13, %v1950_v3  ;;  %vm1968_vm9 = vweird.f32 %v10653_v14  ;;  %v2076_v3 = vand.u32 2147483647, %v10647_v21 }
 0x324   : > { %v8612_v52 = vpop.eup %8611  ;;  %v2101_v35 = vadd.f32 %v10610_v44, %v10668_v8 }
 0x325   : > { %v10675_v36 = vpop.eup %8613  ;;  %v1964_v59 = vsub.f32 1.0, %v1963_v54  ;;  %v2053_v60 = vmul.f32 %v8612_v52, %v10624_v33  ;;  %vm2058_vm15 = vweird.f32 %v8612_v52  ;;  %v1940_v54 = vsel %vm10697_vm5, %v10620_v19, %v1936_v57 }
 0x326   : > { %v8616_v31 = vpop.eup %8615  ;;  %v1955_v15 = vsel %vm10707_vm7, %v10626_v13, %v1951_v6  ;;  %vm10729_vm3 = vmor %vm2057_vm8, %vm2058_vm15  ;;  %v2064_v13 = vor.u32 1.1754944e-38, %v2063_v9  ;;  %v2078_v6 = vand.u32 2147483648, %v10647_v21  ;;  %v1945_v50 = vsel %vm10681_vm2, %v1944_v18, %v1940_v54 }
 0x327   : > { %v2054_v10 = vsub.f32 1.0, %v2053_v60  ;;  %v8618_v38 = vpop.eup %8617  ;;  %v10703_v47 = vadd.f32 1.0, %v8616_v31  ;;  %v1965_v46 = vmul.f32 %v10653_v14, %v1964_v59  ;;  %v1980_v59 = vmul.f32 %v10642_v37, %v1979_v16  ;;  %vm10753_vm2 = vmor %vm1982_vm4, %vm1983_vm0 }
 0x328   : > { %v2068_v41 = vmul.f32 %v8618_v38, %v10647_v21  ;;  %v1960_v33 = vsel %vm10689_vm1, %v1959_v25, %v1955_v15  ;;  %vm2062_vm5 = vcmp.eq.f32.partialorder %v2061_v4, 8.507059e+37  ;;  %vm2073_vm7 = vweird.f32 %v8618_v38  ;;  %vm10777_vm0 = vmor %vm2102_vm12, %vm2103_vm11 }
 0x329   : > { %v2055_v28 = vmul.f32 %v8612_v52, %v2054_v10  ;;  %8619 = vrcp.f32 %v10703_v47  ;;  %v1966_v16 = vadd.f32 %v10653_v14, %v1965_v46  ;;  %vm1967_vm15 = vweird.f32 %v10617_v23 }
 0x32a   : > { %v2069_v57 = vsub.f32 1.0, %v2068_v41  ;;  %v1981_v61 = vadd.f32 %v10642_v37, %v1980_v59  ;;  %v2116_v25 = vmul.f32 %v1945_v50, %v10570_v40  ;;  %v2117_v46 = vmul.f32 %v1960_v33, %v10573_v51  ;;  %vm10761_vm1 = vmor %vm1967_vm15, %vm1968_vm9 }
 0x32b   : > { %v2056_v31 = vadd.f32 %v8612_v52, %v2055_v28  ;;  %vm2072_vm8 = vweird.f32 %v10647_v21  ;;  %v1970_v41 = vsel %vm10761_vm1, %v10653_v14, %v1966_v16  ;;  %v2079_v40 = vor.u32 1.1754944e-38, %v2078_v6 }
 0x32c   : > { %v2070_v9 = vmul.f32 %v8618_v38, %v2069_v57  ;;  %vm2074_vm4 = vmor %vm2072_vm8, %vm2073_vm7  ;;  %v1974_v21 = vor.u32 1.1754944e-38, %v1973_v63  ;;  %vm2077_vm9 = vcmp.eq.f32.partialorder %v2076_v3, 8.507059e+37  ;;  %v1985_v14 = vsel %vm10753_vm2, %v10642_v37, %v1981_v61 }
 0x32d   : > { %v2060_v22 = vsel %vm10729_vm3, %v8612_v52, %v2056_v31  ;;  %vm1972_vm3 = vcmp.eq.f32.partialorder %v1971_v34, 8.507059e+37  ;;  %v10785_v31 = vpack.c.bf16 %v2117_v46, %v2116_v25  ;;  %v2091_v63 = vand.u32 2147483647, %v10703_v47 }
 0x32e   : > { %v2065_v52 = vsel %vm2062_vm5, %v2064_v13, %v2060_v22  ;;  %v2071_v28 = vadd.f32 %v8618_v38, %v2070_v9  ;;  %v1975_v19 = vsel %vm1972_vm3, %v1974_v21, %v1970_v41  ;;  %v2093_v13 = vand.u32 2147483648, %v10703_v47 }
 0x32f   : > { %v8620_v1 = vpop.eup %8619  ;;  %v2124_v8 = vmul.f32 %v2065_v52, %v10592_v45  ;;  %v2105_v45 = vsel %vm10777_vm0, %v10610_v44, %v2101_v35  ;;  %8621 = vrcp.f32 %v10640_v43  ;;  %v1990_v37 = vsel %vm10723_vm14, %v10673_v20, %v1985_v14 }
 0x330   : > { %v2083_v51 = vmul.f32 %v8620_v1, %v10703_v47  ;;  %v2075_v15 = vsel %vm2074_vm4, %v8618_v38, %v2071_v28  ;;  %vm2088_vm12 = vweird.f32 %v8620_v1  ;;  %8623 = vrcp.f32 %v10644_v26 }
 0x331   : > { %v2080_v4 = vsel %vm2077_vm9, %v2079_v40, %v2075_v15  ;;  %vm2087_vm11 = vweird.f32 %v10703_v47  ;;  %v2110_v44 = vsel %vm10734_vm10, %v10650_v30, %v2105_v45  ;;  %v2148_v50 = vunpack.c.l.b16 %v10785_v31 }
 0x332   : > { %v2084_v59 = vsub.f32 1.0, %v2083_v51  ;;  %v2125_v12 = vmul.f32 %v2080_v4, %v10595_v2  ;;  %v2118_v2 = vmul.f32 %v1975_v19, %v10589_v58  ;;  %vm2089_vm5 = vmor %vm2087_vm11, %vm2088_vm12  ;;  %v2094_v16 = vor.u32 1.1754944e-38, %v2093_v13 }
 0x333   : > { %v2119_v60 = vmul.f32 %v1990_v37, %v10558_v53  ;;  %vm2092_vm14 = vcmp.eq.f32.partialorder %v2091_v63, 8.507059e+37  ;;  %v2127_v58 = vmul.f32 %v2110_v44, %v10552_v11  ;;  %v1993_v11 = vmul.f32 %v10659_v7, %v10612_v5 }
 0x334   : > { %v2085_v38 = vmul.f32 %v8620_v1, %v2084_v59  ;;  %v2134_v57 = vpack.c.bf16 %v2125_v12, %v2124_v8  ;;  %v2008_v61 = vmul.f32 %v10675_v36, %v10622_v62  ;;  %vm1997_vm10 = vweird.f32 %v10612_v5 }
 0x335   : > { %v10808_v3 = vpack.c.bf16 %v2119_v60, %v2118_v2  ;;  %v10811_v10 = vpop.eup %8621  ;;  %v1994_v25 = vsub.f32 1.0, %v1993_v11  ;;  %v2001_v35 = vand.u32 2147483647, %v10612_v5  ;;  %v2003_v41 = vand.u32 2147483648, %v10612_v5 }
 0x336   : > { %v2086_v6 = vadd.f32 %v8620_v1, %v2085_v38  ;;  %v2156_v33 = vunpack.c.l.b16 %v2134_v57  ;;  %v10817_v53 = vpop.eup %8623  ;;  %v1873_v18 = vmul.f32 %v10811_v10, %v10640_v43  ;;  %v2009_v46 = vsub.f32 1.0, %v2008_v61 }
 0x337   : > { %v1888_v52 = vmul.f32 %v10817_v53, %v10644_v26  ;;  %v2157_v40 = vunpack.c.h.b16 %v2134_v57  ;;  %v1995_v51 = vmul.f32 %v10659_v7, %v1994_v25  ;;  %vm1998_vm7 = vweird.f32 %v10659_v7 }
 0x338   : > { %v2090_v20 = vsel %vm2089_vm5, %v8620_v1, %v2086_v6  ;;  %v10805_v22 = vpack.c.b16 %v2156_v33, %v2148_v50  ;;  %v1874_v23 = vsub.f32 1.0, %v1873_v18  ;;  %vm2012_vm15 = vweird.f32 %v10622_v62  ;;  %vm10858_vm4 = vmor %vm1997_vm10, %vm1998_vm7 }
 0x339   : > { %v2095_v9 = vsel %vm2092_vm14, %v2094_v16, %v2090_v20  ;;  %v1889_v28 = vsub.f32 1.0, %v1888_v52  ;;  %vm2013_vm2 = vweird.f32 %v10675_v36  ;;  %v2010_v54 = vmul.f32 %v10675_v36, %v2009_v46 }
 0x33a   : > { %v2126_v47 = vmul.f32 %v2095_v9, %v10615_v49  ;;  %2339 = vrot.lane.b32.xlu1 %v10805_v22, %s14541_s10  ;;  %2618 = vrot.lane.b32.xlu2 %v10805_v22, %s14543_s9  ;;  %v2151_v49 = vunpack.c.h.b16 %v10808_v3  ;;  %v1875_v21 = vmul.f32 %v10811_v10, %v1874_v23  ;;  %v2149_v15 = vunpack.c.h.b16 %v10785_v31  ;;  %vm10872_vm3 = vmor %vm2012_vm15, %vm2013_vm2 }
 0x33b   : > { %2370 = vrot.lane.b32.xlu0 %v10805_v22, %s14545_s1  ;;  %v1890_v8 = vmul.f32 %v10817_v53, %v1889_v28  ;;  %v2016_v14 = vand.u32 2147483647, %v10622_v62  ;;  %v2018_v4 = vand.u32 2147483648, %v10622_v62  ;;  %vm1877_vm1 = vweird.f32 %v10640_v43 }
 0x33c   : > { %v10819_v30 = vpack.c.bf16 %v2127_v58, %v2126_v47  ;;  %vm1878_vm8 = vweird.f32 %v10811_v10  ;;  %v1881_v19 = vand.u32 2147483647, %v10640_v43  ;;  %vm1892_vm0 = vweird.f32 %v10644_v26 }
 0x33d   : > { %vm1893_vm9 = vweird.f32 %v10817_v53  ;;  %v10865_v31 = vpack.c.b16 %v2157_v40, %v2149_v15  ;;  %v1996_v12 = vadd.f32 %v10659_v7, %v1995_v51  ;;  %v1883_v13 = vand.u32 2147483648, %v10640_v43  ;;  %vm10881_vm12 = vmor %vm1877_vm1, %vm1878_vm8 }
 0x33e   : > { %v2159_v34 = vunpack.c.h.b16 %v10819_v30  ;;  %v1896_v45 = vand.u32 2147483647, %v10644_v26  ;;  %v1898_v38 = vand.u32 2147483648, %v10644_v26  ;;  %v2011_v63 = vadd.f32 %v10675_v36, %v2010_v54  ;;  %vm10890_vm11 = vmor %vm1892_vm0, %vm1893_vm9 }
 0x33f   : > { %14762 = vst [vmem:[#allocation30_spill] sm:$0xff] %v10865_v31  ;;  %v1876_v37 = vadd.f32 %v10811_v10, %v1875_v21  ;;  %v1891_v62 = vadd.f32 %v10817_v53, %v1890_v8  ;;  %vm2002_vm5 = vcmp.eq.f32.partialorder %v2001_v35, 8.507059e+37  ;;  %v2004_v26 = vor.u32 1.1754944e-38, %v2003_v41 }
 0x340   : > { %v10833_v1 = vpack.c.b16 %v2159_v34, %v2151_v49  ;;  %vm2017_vm14 = vcmp.eq.f32.partialorder %v2016_v14, 8.507059e+37  ;;  %v2019_v2 = vor.u32 1.1754944e-38, %v2018_v4  ;;  %vm1882_vm10 = vcmp.eq.f32.partialorder %v1881_v19, 8.507059e+37 }
 0x341   : > { %v1884_v6 = vor.u32 1.1754944e-38, %v1883_v13  ;;  %vm1897_vm7 = vcmp.eq.f32.partialorder %v1896_v45, 8.507059e+37  ;;  %v1899_v44 = vor.u32 1.1754944e-38, %v1898_v38  ;;  %v2000_v50 = vsel %vm10858_vm4, %v10659_v7, %v1996_v12 }
 0x342   : > { %2525 = vrot.lane.b32.xlu1 %v10805_v22, %s14619_s20  ;;  %2308 = vrot.lane.b32.xlu2 %v10805_v22, %s14535_s23  ;;  %v2015_v33 = vsel %vm10872_vm3, %v10675_v36, %v2011_v63  ;;  %v1880_v16 = vsel %vm10881_vm12, %v10811_v10, %v1876_v37  ;;  %v1895_v60 = vsel %vm10890_vm11, %v10817_v53, %v1891_v62 }
 0x343   : > { %2587 = vrot.lane.b32.xlu0 %v10805_v22, %s14537_s24  ;;  %v2005_v20 = vsel %vm2002_vm5, %v2004_v26, %v2000_v50  ;;  %v2020_v9 = vsel %vm2017_vm14, %v2019_v2, %v2015_v33  ;;  %v1885_v58 = vsel %vm1882_vm10, %v1884_v6, %v1880_v16  ;;  %v1900_v47 = vsel %vm1897_vm7, %v1899_v44, %v1895_v60 }
 0x344   : > { %v2120_v7 = vmul.f32 %v2005_v20, %v10563_v17  ;;  %v2121_v36 = vmul.f32 %v2020_v9, %v10567_v29  ;;  %v2112_v10 = vmul.f32 %v1885_v58, %v10576_v42  ;;  %v2113_v53 = vmul.f32 %v1900_v47, %v10586_v55 }
 0x345   : > { %v10920_v11 = vadd.f32 %v10560_v56, %v10549_v0  ;;  %v10924_v49 = vadd.f32 %v10545_v39, %v10549_v0  ;;  %v10928_v34 = vadd.f32 %v10547_v24, %v10554_v48  ;;  %v10932_v17 = vadd.f32 %v10543_v32, %v10554_v48 }
 0x346   : > { %v2132_v61 = vpack.c.bf16 %v2121_v36, %v2120_v7  ;;  %v2128_v29 = vpack.c.bf16 %v2113_v53, %v2112_v10 }
 0x347   : > { %v7816_v42 = vmul.f32 -1.442695, %v10920_v11  ;;  %v7817_v55 = vmul.f32 -1.442695, %v10924_v49  ;;  %v7808_v39 = vmul.f32 -1.442695, %v10928_v34 }
 0x348   : > { %v2153_v24 = vunpack.c.h.b16 %v2132_v61  ;;  %v7809_v32 = vmul.f32 -1.442695, %v10932_v17  ;;  %v2145_v0 = vunpack.c.h.b16 %v2128_v29  ;;  %v2152_v52 = vunpack.c.l.b16 %v2132_v61 }
 0x349   : > { %8625 = vpow2.f32 %v7816_v42  ;;  %v2144_v25 = vunpack.c.l.b16 %v2128_v29 }
 0x34a   : > { %2246 = vrot.lane.b32.xlu1 %v10805_v22, %s14539_s12  ;;  %2372 = vrot.lane.b32.xlu2 %v10865_v31, %s14545_s1  ;;  %8627 = vpow2.f32 %v7817_v55  ;;  %v10944_v48 = vpack.c.b16 %v2153_v24, %v2145_v0 }
 0x34b   : > { %2556 = vrot.lane.b32.xlu0 %v10805_v22, %s14547_s5  ;;  %8629 = vpow2.f32 %v7808_v39  ;;  %v10956_v40 = vpack.c.b16 %v2152_v52, %v2144_v25 }
 0x34c   : > { %8631 = vpow2.f32 %v7809_v32 }
 0x34f   : > { %v8626_v56 = vpop.eup %8625 }
 0x350   : > { %v8628_v18 = vpop.eup %8627  ;;  %v1866_v28 = vadd.f32 1.0, %v8626_v56 }
 0x351   : > { %v8630_v46 = vpop.eup %8629  ;;  %v10952_v35 = vadd.f32 1.0, %v8628_v18 }
 0x352   : > { %2341 = vrot.lane.b32.xlu1 %v10865_v31, %s14541_s10  ;;  %2494 = vrot.lane.b32.xlu2 %v10805_v22, %s14661_s26  ;;  %v8632_v23 = vpop.eup %8631  ;;  %v10954_v41 = vadd.f32 1.0, %v8630_v46  ;;  %8633 = vrcp.f32 %v1866_v28  ;;  %vm2027_vm15 = vweird.f32 %v1866_v28  ;;  %v2031_v62 = vand.u32 2147483647, %v1866_v28 }
 0x353   : > { %2277 = vrot.lane.b32.xlu0 %v10805_v22, %s14769_s7  ;;  %v10958_v51 = vadd.f32 1.0, %v8632_v23  ;;  %8635 = vrcp.f32 %v10952_v35  ;;  %vm2042_vm1 = vweird.f32 %v10952_v35  ;;  %v2033_v43 = vand.u32 2147483648, %v1866_v28 }
 0x354   : > { %8637 = vrcp.f32 %v10954_v41  ;;  %vm1907_vm4 = vweird.f32 %v10954_v41  ;;  %v2046_v2 = vand.u32 2147483647, %v10952_v35  ;;  %v2048_v6 = vand.u32 2147483648, %v10952_v35 }
 0x355   : > { %8639 = vrcp.f32 %v10958_v51  ;;  %vm1922_vm3 = vweird.f32 %v10958_v51  ;;  %v1913_v16 = vand.u32 2147483648, %v10954_v41  ;;  %v1928_v60 = vand.u32 2147483648, %v10958_v51 }
 0x356   : > { %v1911_v58 = vand.u32 2147483647, %v10954_v41  ;;  %v1926_v7 = vand.u32 2147483647, %v10958_v51  ;;  %vm2032_vm10 = vcmp.eq.f32.partialorder %v2031_v62, 8.507059e+37  ;;  %v2034_v10 = vor.u32 1.1754944e-38, %v2033_v43 }
 0x357   : > { %vm2047_vm7 = vcmp.eq.f32.partialorder %v2046_v2, 8.507059e+37  ;;  %v2049_v53 = vor.u32 1.1754944e-38, %v2048_v6  ;;  %v1914_v42 = vor.u32 1.1754944e-38, %v1913_v16  ;;  %v1929_v55 = vor.u32 1.1754944e-38, %v1928_v60 }
 0x358   : > { %v10969_v54 = vpop.eup %8633 }
 0x359   : > { %v10971_v21 = vpop.eup %8635  ;;  %v2023_v14 = vmul.f32 %v10969_v54, %v1866_v28  ;;  %vm2028_vm2 = vweird.f32 %v10969_v54 }
 0x35a   : > { %2463 = vrot.lane.b32.xlu1 %v10805_v22, %s14770_s22  ;;  %2589 = vrot.lane.b32.xlu2 %v10865_v31, %s14537_s24  ;;  %v10973_v8 = vpop.eup %8637  ;;  %v2038_v4 = vmul.f32 %v10971_v21, %v10952_v35  ;;  %vm2043_vm8 = vweird.f32 %v10971_v21  ;;  %vm11001_vm9 = vmor %vm2027_vm15, %vm2028_vm2  ;;  %vm1912_vm15 = vcmp.eq.f32.partialorder %v1911_v58, 8.507059e+37  ;;  %vm1927_vm2 = vcmp.eq.f32.partialorder %v1926_v7, 8.507059e+37 }
 0x35b   : > { %2620 = vrot.lane.b32.xlu0 %v10865_v31, %s14543_s9  ;;  %v8640_v15 = vpop.eup %8639  ;;  %v1903_v59 = vmul.f32 %v10973_v8, %v10954_v41  ;;  %v2024_v12 = vsub.f32 1.0, %v2023_v14  ;;  %vm1908_vm0 = vweird.f32 %v10973_v8  ;;  %vm11012_vm11 = vmor %vm2042_vm1, %vm2043_vm8  ;;  %vm14786_vm1 = vcmask 990208  }
 0x35c   : > { %v1918_v19 = vmul.f32 %v8640_v15, %v10958_v51  ;;  %v2039_v5 = vsub.f32 1.0, %v2038_v4  ;;  %vm1923_vm12 = vweird.f32 %v8640_v15  ;;  %vm11019_vm5 = vmor %vm1907_vm4, %vm1908_vm0  ;;  %vm14788_vm8 = vcmask 924672  }
 0x35d   : > { %v1904_v13 = vsub.f32 1.0, %v1903_v59  ;;  %v2025_v38 = vmul.f32 %v10969_v54, %v2024_v12  ;;  %vm11029_vm14 = vmor %vm1922_vm3, %vm1923_vm12  ;;  %vm14790_vm4 = vcmask 998400   ;;  %vm14791_vm0 = vcmask 932864  }
 0x35e   : > { %v1919_v45 = vsub.f32 1.0, %v1918_v19  ;;  %v2040_v63 = vmul.f32 %v10971_v21, %v2039_v5  ;;  %vm14793_vm3 = vcmask 1014784   ;;  %vm14797_vm12 = vcmask 1022976  }
 0x35f   : > { %v1905_v37 = vmul.f32 %v10973_v8, %v1904_v13  ;;  %v2026_v44 = vadd.f32 %v10969_v54, %v2025_v38 }
 0x360   : > { %v1920_v57 = vmul.f32 %v8640_v15, %v1919_v45  ;;  %v2041_v50 = vadd.f32 %v10971_v21, %v2040_v63 }
 0x361   : > { %v1906_v20 = vadd.f32 %v10973_v8, %v1905_v37  ;;  %v2030_v61 = vsel %vm11001_vm9, %v10969_v54, %v2026_v44  ;;  %vm14792_vm9 = vcmask 1006592  }
 0x362   : > { %2184 = vrot.lane.b32.xlu2 %v10805_v22, %s14771_s0  ;;  %2364 = vrot.lane.b32.xlu1 %v10944_v48, %s14545_s1  ;;  %v1921_v47 = vadd.f32 %v8640_v15, %v1920_v57  ;;  %v2045_v29 = vsel %vm11012_vm11, %v10971_v21, %v2041_v50  ;;  %v2035_v32 = vsel %vm2032_vm10, %v2034_v10, %v2030_v61  ;;  %vm14800_vm11 = vcmask 957440  }
 0x363   : > { %2215 = vrot.lane.b32.xlu0 %v10805_v22, %s14772_s25  ;;  %v1910_v39 = vsel %vm11019_vm5, %v10973_v8, %v1906_v20  ;;  %v2050_v0 = vsel %vm2047_vm7, %v2049_v53, %v2045_v29  ;;  %v2122_v52 = vmul.f32 %v2035_v32, %v10920_v11  ;;  %vm14801_vm5 = vcmask 1031168  }
 0x364   : > { %v1925_v24 = vsel %vm11029_vm14, %v8640_v15, %v1921_v47  ;;  %v1915_v56 = vsel %vm1912_vm15, %v1914_v42, %v1910_v39  ;;  %v2123_v25 = vmul.f32 %v2050_v0, %v10924_v49  ;;  %vm14802_vm14 = vcmask 965632   ;;  %vm14805_vm15 = vmmov %vm14786_vm1 }
 0x365   : > { %v1930_v18 = vsel %vm1927_vm2, %v1929_v55, %v1925_v24  ;;  %v2114_v46 = vmul.f32 %v1915_v56, %v10928_v34  ;;  %vm14803_vm10 = vcmask 1039360   ;;  %vm14804_vm7 = vcmask 973824  }
 0x366   : > { %v2115_v23 = vmul.f32 %v1930_v18, %v10932_v17  ;;  %v2133_v28 = vpack.c.bf16 %v2123_v25, %v2122_v52  ;;  %vm14807_vm2 = vcmask 982016  }
 0x368   : > { %v2129_v35 = vpack.c.bf16 %v2115_v23, %v2114_v46  ;;  %v2154_v41 = vunpack.c.l.b16 %v2133_v28  ;;  %v2155_v12 = vunpack.c.h.b16 %v2133_v28  ;;  %v2158_v46 = vunpack.c.l.b16 %v10819_v30 }
 0x36a   : > { %2612 = vrot.lane.b32.xlu1 %v10944_v48, %s14543_s9  ;;  %2362 = vrot.lane.b32.xlu2 %v10956_v40, %s14545_s1  ;;  %v2146_v51 = vunpack.c.l.b16 %v2129_v35  ;;  %v2147_v5 = vunpack.c.h.b16 %v2129_v35 }
 0x36b   : > { %2610 = vrot.lane.b32.xlu0 %v10956_v40, %s14543_s9 }
 0x36c   : > { %v11064_v49 = vpack.c.b16 %v2154_v41, %v2146_v51  ;;  %v11118_v45 = vpack.c.b16 %v2155_v12, %v2147_v5  ;;  %v2150_v41 = vunpack.c.l.b16 %v10808_v3 }
 0x36e   : > { %v11248_v12 = vpack.c.b16 %v2158_v46, %v2150_v41 }
 0x370   : > { %14794 = vst [vmem:[#allocation32_spill] sm:$0xff] %v11248_v12 }
 0x372   : > { %2333 = vrot.lane.b32.xlu1 %v10944_v48, %s14541_s10  ;;  %2488 = vrot.lane.b32.xlu2 %v10944_v48, %s14661_s26 }
 0x373   : > { %2331 = vrot.lane.b32.xlu0 %v10956_v40, %s14541_s10 }
 0x37a   : > { %2581 = vrot.lane.b32.xlu1 %v10944_v48, %s14537_s24  ;;  %2207 = vrot.lane.b32.xlu2 %v10956_v40, %s14772_s25 }
 0x37b   : > { %2579 = vrot.lane.b32.xlu0 %v10956_v40, %s14537_s24  ;;  %s14782_s24 = smov 120  }
 0x382   : > { %2302 = vrot.lane.b32.xlu1 %v10944_v48, %s14535_s23  ;;  %2178 = vrot.lane.b32.xlu2 %v10944_v48, %s14771_s0 }
 0x383   : > { %2300 = vrot.lane.b32.xlu0 %v10956_v40, %s14535_s23  ;;  %s14781_s23 = smov 119  }
 0x38a   : > { %2550 = vrot.lane.b32.xlu1 %v10944_v48, %s14547_s5  ;;  %2424 = vrot.lane.b32.xlu2 %v10956_v40, %s14781_s23 }
 0x38b   : > { %2548 = vrot.lane.b32.xlu0 %v10956_v40, %s14547_s5 }
 0x392   : > { %2271 = vrot.lane.b32.xlu1 %v10944_v48, %s14769_s7  ;;  %2395 = vrot.lane.b32.xlu2 %v10944_v48, %s14782_s24 }
 0x393   : > { %2269 = vrot.lane.b32.xlu0 %v10956_v40, %s14769_s7 }
 0x394   : > { %v11062_v11 = vpop.permute.xlu2 %2618 }
 0x39a   : > { %2519 = vrot.lane.b32.xlu1 %v10944_v48, %s14619_s20  ;;  %2366 = vrot.lane.b32.xlu2 %v11064_v49, %s14545_s1 }
 0x39b   : > { %2517 = vrot.lane.b32.xlu0 %v10956_v40, %s14619_s20 }
 0x39c   : > { %v11072_v34 = vpop.permute.xlu2 %2308 }
 0x3a2   : > { %2240 = vrot.lane.b32.xlu1 %v10944_v48, %s14539_s12  ;;  %2614 = vrot.lane.b32.xlu2 %v11064_v49, %s14543_s9 }
 0x3a3   : > { %2238 = vrot.lane.b32.xlu0 %v10956_v40, %s14539_s12  ;;  %s14783_s12 = smov 114  }
 0x3a4   : > { %v11080_v17 = vpop.permute.xlu2 %2372 }
 0x3aa   : > { %2486 = vrot.lane.b32.xlu1 %v10956_v40, %s14661_s26  ;;  %2335 = vrot.lane.b32.xlu2 %v11064_v49, %s14541_s10  ;;  %s14784_s10 = smov 123  }
 0x3ab   : > { %2209 = vrot.lane.b32.xlu0 %v10944_v48, %s14772_s25 }
 0x3ac   : > { %v11088_v54 = vpop.permute.xlu1 %2339  ;;  %v11090_v21 = vpop.permute.xlu2 %2494 }
 0x3ad   : > { %v11092_v8 = vpop.permute.xlu0 %2370 }
 0x3b2   : > { %2457 = vrot.lane.b32.xlu1 %v10944_v48, %s14770_s22  ;;  %2583 = vrot.lane.b32.xlu2 %v11064_v49, %s14783_s12 }
 0x3b3   : > { %2455 = vrot.lane.b32.xlu0 %v10956_v40, %s14770_s22 }
 0x3b4   : > { %v11100_v15 = vpop.permute.xlu1 %2525  ;;  %v11102_v14 = vpop.permute.xlu2 %2589 }
 0x3b5   : > { %v11104_v4 = vpop.permute.xlu0 %2587 }
 0x3ba   : > { %2176 = vrot.lane.b32.xlu1 %v10956_v40, %s14771_s0  ;;  %2304 = vrot.lane.b32.xlu2 %v11064_v49, %s14784_s10 }
 0x3bb   : > { %2426 = vrot.lane.b32.xlu0 %v10944_v48, %s14781_s23 }
 0x3bc   : > { %v11112_v59 = vpop.permute.xlu1 %2246  ;;  %v11114_v19 = vpop.permute.xlu2 %2184 }
 0x3bd   : > { %v11116_v13 = vpop.permute.xlu0 %2556 }
 0x3c2   : > { %2393 = vrot.lane.b32.xlu1 %v10956_v40, %s14782_s24  ;;  %2552 = vrot.lane.b32.xlu2 %v11064_v49, %s14547_s5 }
 0x3c3   : > { %2368 = vrot.lane.b32.xlu0 %v11118_v45, %s14545_s1  ;;  %s14789_s1 = smov 122  }
 0x3c4   : > { %v11126_v38 = vpop.permute.xlu1 %2341  ;;  %v2363_v63 = vpop.permute.xlu2 %2362 }
 0x3c5   : > { %v11128_v37 = vpop.permute.xlu0 %2277 }
 0x3ca   : > { %2616 = vrot.lane.b32.xlu1 %v11118_v45, %s14543_s9  ;;  %2273 = vrot.lane.b32.xlu2 %v11064_v49, %s14769_s7  ;;  %s14787_s9 = smov 125  }
 0x3cb   : > { %2490 = vrot.lane.b32.xlu0 %v11064_v49, %s14661_s26 }
 0x3cc   : > { %v11136_v57 = vpop.permute.xlu1 %2463  ;;  %v11138_v62 = vpop.permute.xlu2 %2488 }
 0x3cd   : > { %v11140_v43 = vpop.permute.xlu0 %2620 }
 0x3ce   : > { %14785 = vst [vmem:[#allocation31_spill] sm:$0xff] %v11140_v43 }
 0x3d2   : > { %2211 = vrot.lane.b32.xlu1 %v11064_v49, %s14772_s25  ;;  %2521 = vrot.lane.b32.xlu2 %v11064_v49, %s14619_s20 }
 0x3d3   : > { %2585 = vrot.lane.b32.xlu0 %v11118_v45, %s14783_s12 }
 0x3d4   : > { %v11148_v26 = vpop.permute.xlu1 %2364  ;;  %v11150_v2 = vpop.permute.xlu2 %2207 }
 0x3d5   : > { %v11152_v6 = vpop.permute.xlu0 %2215  ;;  %v11156_v44 = vsel %vm14786_vm1, %v2363_v63, %v11148_v26  ;;  %vm14808_vm1 = vmmov %vm14788_vm8 }
 0x3d6   : > { %3173 = vmatpush.bf16.msrb.mxu0 %v11156_v44 }
 0x3da   : > { %2306 = vrot.lane.b32.xlu1 %v11118_v45, %s14784_s10  ;;  %2242 = vrot.lane.b32.xlu2 %v11064_v49, %s14787_s9 }
 0x3db   : > { %2180 = vrot.lane.b32.xlu0 %v11064_v49, %s14771_s0 }
 0x3dc   : > { %v11165_v50 = vpop.permute.xlu1 %2612  ;;  %v11167_v33 = vpop.permute.xlu2 %2178 }
 0x3dd   : > { %v2611_v16 = vpop.permute.xlu0 %2610 }
 0x3de   : > { %v2626_v60 = vsel %vm14788_vm8, %v2611_v16, %v11165_v50  ;;  %vm14809_vm8 = vmmov %vm14790_vm4 }
 0x3df   : > { %3187 = vmatpush.bf16.msrb.mxu1 %v2626_v60 }
 0x3e2   : > { %2428 = vrot.lane.b32.xlu1 %v11064_v49, %s14781_s23  ;;  %2337 = vrot.lane.b32.xlu2 %v11118_v45, %s14789_s1 }
 0x3e3   : > { %2275 = vrot.lane.b32.xlu0 %v11118_v45, %s14769_s7 }
 0x3e4   : > { %v11177_v20 = vpop.permute.xlu1 %2333  ;;  %v11179_v9 = vpop.permute.xlu2 %2424 }
 0x3e5   : > { %v2332_v58 = vpop.permute.xlu0 %2331 }
 0x3e6   : > { %v2347_v47 = vsel %vm14790_vm4, %v2332_v58, %v11177_v20  ;;  %vm14810_vm4 = vmmov %vm14791_vm0 }
 0x3e7   : > { %3174 = vmatpush.bf16.msrb.mxu0 %v2347_v47 }
 0x3ea   : > { %2523 = vrot.lane.b32.xlu1 %v11118_v45, %s14619_s20  ;;  %2459 = vrot.lane.b32.xlu2 %v11064_v49, %s14770_s22 }
 0x3eb   : > { %2397 = vrot.lane.b32.xlu0 %v11064_v49, %s14782_s24 }
 0x3ec   : > { %v11189_v7 = vpop.permute.xlu1 %2581  ;;  %v11191_v36 = vpop.permute.xlu2 %2395 }
 0x3ed   : > { %v2580_v10 = vpop.permute.xlu0 %2579 }
 0x3ee   : > { %v11195_v53 = vsel %vm14791_vm0, %v2580_v10, %v11189_v7  ;;  %vm14811_vm0 = vmmov %vm14792_vm9 }
 0x3ef   : > { %3188 = vmatpush.bf16.msrb.mxu1 %v11195_v53 }
 0x3f2   : > { %2492 = vrot.lane.b32.xlu1 %v11118_v45, %s14661_s26  ;;  %2554 = vrot.lane.b32.xlu2 %v11118_v45, %s14547_s5  ;;  %s14795_s5 = smov 121  }
 0x3f3   : > { %2213 = vrot.lane.b32.xlu0 %v11118_v45, %s14772_s25 }
 0x3f4   : > { %v11204_v61 = vpop.permute.xlu1 %2302  ;;  %v11206_v29 = vpop.permute.xlu2 %2366 }
 0x3f5   : > { %v2301_v42 = vpop.permute.xlu0 %2300 }
 0x3f6   : > { %v2316_v55 = vsel %vm14792_vm9, %v2301_v42, %v11204_v61  ;;  %vm14812_vm9 = vmmov %vm14793_vm3 }
 0x3f7   : > { %3175 = vmatpush.bf16.msrb.mxu0 %v2316_v55 }
 0x3fa   : > { %2182 = vrot.lane.b32.xlu1 %v11118_v45, %s14771_s0  ;;  %2244 = vrot.lane.b32.xlu2 %v11118_v45, %s14787_s9 }
 0x3fb   : > { %2399 = vrot.lane.b32.xlu0 %v11118_v45, %s14782_s24 }
 0x3fc   : > { %v11216_v39 = vpop.permute.xlu1 %2550  ;;  %v11218_v24 = vpop.permute.xlu2 %2614 }
 0x3fd   : > { %v2549_v32 = vpop.permute.xlu0 %2548 }
 0x3fe   : > { %v2564_v0 = vsel %vm1226_vm6, %v2549_v32, %v11216_v39 }
 0x3ff   : > { %3189 = vmatpush.bf16.msrb.mxu1 %v2564_v0 }
 0x402   : > { %2432 = vrot.lane.b32.xlu1 %v10805_v22, %s14781_s23  ;;  %2461 = vrot.lane.b32.xlu2 %v11118_v45, %s14770_s22 }
 0x403   : > { %2310 = vrot.lane.b32.xlu0 %v10865_v31, %s14784_s10 }
 0x404   : > { %v11228_v56 = vpop.permute.xlu1 %2271  ;;  %v11230_v18 = vpop.permute.xlu2 %2335 }
 0x405   : > { %v2270_v52 = vpop.permute.xlu0 %2269 }
 0x406   : > { %v2285_v25 = vsel %vm14793_vm3, %v2270_v52, %v11228_v56  ;;  %vm14814_vm3 = vmmov %vm14797_vm12 }
 0x407   : > { %3176 = vmatpush.bf16.msrb.mxu0 %v2285_v25 }
 0x40a   : > { %2401 = vrot.lane.b32.xlu1 %v10805_v22, %s14782_s24  ;;  %2430 = vrot.lane.b32.xlu2 %v11118_v45, %s14781_s23 }
 0x40b   : > { %2279 = vrot.lane.b32.xlu0 %v10865_v31, %s14769_s7 }
 0x40c   : > { %v11241_v23 = vpop.permute.xlu1 %2519  ;;  %v11243_v28 = vpop.permute.xlu2 %2583 }
 0x40d   : > { %v2518_v35 = vpop.permute.xlu0 %2517 }
 0x40e   : > { %v2533_v51 = vsel %vm1194_vm13, %v2518_v35, %v11241_v23 }
 0x40f   : > { %3190 = vmatpush.bf16.msrb.mxu1 %v2533_v51 }
 0x412   : > { %2374 = vrot.lane.b32.xlu1 %v11248_v12, %s14795_s5  ;;  %2558 = vrot.lane.b32.xlu2 %v10865_v31, %s14796_s11 }
 0x413   : > { %2248 = vrot.lane.b32.xlu0 %v10865_v31, %s14787_s9 }
 0x414   : > { %v11256_v30 = vpop.permute.xlu1 %2240  ;;  %v11258_v5 = vpop.permute.xlu2 %2304 }
 0x415   : > { %v2239_v3 = vpop.permute.xlu0 %2238 }
 0x416   : > { %v2254_v63 = vsel %vm14797_vm12, %v2239_v3, %v11256_v30  ;;  %vm14815_vm12 = vmmov %vm14801_vm5 }
 0x417   : > { %3177 = vmatpush.bf16.msrb.mxu0 %v2254_v63 }
 0x41a   : > { %2881 = vrot.lane.b32.xlu1 %v2626_v60, %s14798_s13  ;;  %2527 = vrot.lane.b32.xlu2 %v10865_v31, %s14619_s20 }
 0x41b   : > { %2622 = vrot.lane.b32.xlu0 %v11248_v12, %s14799_s14 }
 0x41c   : > { %v2487_v16 = vpop.permute.xlu1 %2486  ;;  %v11267_v58 = vpop.permute.xlu2 %2552 }
 0x41d   : > { %v11269_v10 = vpop.permute.xlu0 %2209  ;;  %v2502_v42 = vsel %vm14800_vm11, %v2487_v16, %v11138_v62 }
 0x41e   : > { %v2223_v32 = vsel %vm14801_vm5, %v11150_v2, %v11269_v10  ;;  %3191 = vmatpush.bf16.msrb.mxu1 %v2502_v42  ;;  %vm14816_vm5 = vmmov %vm14802_vm14 }
 0x41f   : > { %3178 = vmatpush.bf16.msrb.mxu0 %v2223_v32 }
 0x422   : > { %2737 = vrot.lane.b32.xlu1 %v2347_v47, %s14798_s13  ;;  %2496 = vrot.lane.b32.xlu2 %v10865_v31, %s14661_s26 }
 0x423   : > { %2753 = vrot.lane.b32.xlu0 %v11156_v44, %s14798_s13 }
 0x424   : > { %v11281_v60 = vpop.permute.xlu1 %2457  ;;  %v11283_v52 = vpop.permute.xlu2 %2273 }
 0x425   : > { %v2456_v46 = vpop.permute.xlu0 %2455 }
 0x426   : > { %v2471_v35 = vsel %vm14802_vm14, %v2456_v46, %v11281_v60  ;;  %v2348_v46 = vsel %vm14809_vm8, %v11177_v20, %v11230_v18  ;;  %vm14817_vm14 = vmmov %vm14803_vm10 }
 0x427   : > { %3192 = vmatpush.bf16.msrb.mxu1 %v2471_v35 }
 0x42a   : > { %2849 = vrot.lane.b32.xlu1 %v2564_v0, %s14798_s13  ;;  %2865 = vrot.lane.b32.xlu2 %v11195_v53, %s14798_s13  ;;  %v2379_v53 = vsel %vm14805_vm15, %v11148_v26, %v11206_v29  ;;  %v2627_v26 = vsel %vm14808_vm1, %v11165_v50, %v11218_v24  ;;  %v2317_v50 = vsel %vm14811_vm0, %v11204_v61, %v11258_v5  ;;  %v8167_v61 = vld [vmem:[%s14806_s3 + $0x4] sm:$0xf]  ;;  %vm14821_vm1 = vcmask 982016  }
 0x42b   : > { %2721 = vrot.lane.b32.xlu0 %v2316_v55, %s14798_s13  ;;  %v7824_v55 = vld [vmem:[%s14806_s3] sm:$0xf] }
 0x42c   : > { %v2177_v2 = vpop.permute.xlu1 %2176  ;;  %v11291_v47 = vpop.permute.xlu2 %2521 }
 0x42d   : > { %v11293_v44 = vpop.permute.xlu0 %2426  ;;  %v2192_v41 = vsel %vm14803_vm10, %v2177_v2, %v11167_v33  ;;  %v2596_v2 = vsel %vm14810_vm4, %v11189_v7, %v11243_v28  ;;  %v2286_v7 = vsel %vm14812_vm9, %v11228_v56, %v11283_v52  ;;  %vm14818_vm10 = vmmov %vm14805_vm15  ;;  %vm14823_vm4 = vcmask 924672  }
 0x42e   : > { %3179 = vmatpush.bf16.msrb.mxu0 %v2192_v41  ;;  %v2440_v3 = vsel %vm14804_vm7, %v11179_v9, %v11293_v44  ;;  %v8169_v9 = vld [vmem:[%s14806_s3 + $0xc] sm:$0xf0]  ;;  %vm14819_vm15 = vmmov %vm14809_vm8 }
 0x42f   : > { %3193 = vmatpush.bf16.msrb.mxu1 %v2440_v3  ;;  %vm14822_vm8 = vmmov %vm14812_vm9  ;;  %vm14825_vm9 = vcmask 932864  }
 0x432   : > { %2689 = vrot.lane.b32.xlu1 %v2254_v63, %s14798_s13  ;;  %2705 = vrot.lane.b32.xlu2 %v2285_v25, %s14798_s13  ;;  %v11315_v25 = vor.u32 %v8169_v9, %v7824_v55 }
 0x433   : > { %2833 = vrot.lane.b32.xlu0 %v2533_v51, %s14798_s13  ;;  %3180 = vmatpush.bf16.msrb.mxu0 %v10956_v40 }
 0x434   : > { %v2394_v0 = vpop.permute.xlu1 %2393  ;;  %v11313_v63 = vpop.permute.xlu2 %2242 }
 0x435   : > { %v11317_v51 = vpop.permute.xlu0 %2368  ;;  %v11321_v16 = vsel %vm14807_vm2, %v2394_v0, %v11191_v36  ;;  %v2255_v56 = vsel %vm14814_vm3, %v11256_v30, %v11313_v63  ;;  %vm14820_vm2 = vmmov %vm14811_vm0 }
 0x436   : > { %3194 = vmatpush.bf16.msrb.mxu1 %v11321_v16  ;;  %3181 = vmatmul.bf16.vlgmr.msrb.gmra.mxu0 %v11315_v25  ;;  %vm14824_vm0 = vmmov %vm14814_vm3 }
 0x437   : > { %3229 = vmatpush.bf16.msra.mxu0 %v2379_v53  ;;  %vm14826_vm3 = vmmov %vm14815_vm12 }
 0x43a   : > { %3243 = vmatpush.bf16.msra.mxu1 %v2627_v26  ;;  %2673 = vrot.lane.b32.xlu1 %v2223_v32, %s14798_s13  ;;  %v2565_v32 = vsel %vm1226_vm6, %v11216_v39, %v11267_v58  ;;  %v2534_v39 = vsel %vm1194_vm13, %v11241_v23, %v11291_v47 }
 0x43b   : > { %3230 = vmatpush.bf16.msra.mxu0 %v2348_v46  ;;  %2657 = vrot.lane.b32.xlu2 %v2192_v41, %s14798_s13 }
 0x43c   : > { %2817 = vrot.lane.b32.xlu0 %v2502_v42, %s14798_s13  ;;  %v11340_v55 = vpop.permute.xlu1 %2616  ;;  %v11342_v20 = vpop.permute.xlu2 %2337  ;;  %v7826_v42 = vld [vmem:[%s14806_s3 + $0x10] sm:$0xf0] }
 0x43d   : > { %v11344_v9 = vpop.permute.xlu0 %2490  ;;  %v11358_v41 = vor.u32 %v8167_v61, %v7826_v42 }
 0x43e   : > { %3244 = vmatpush.bf16.msra.mxu1 %v2596_v2  ;;  %v2503_v23 = vsel %vm14800_vm11, %v11138_v62, %v11344_v9 }
 0x43f   : > { %3231 = vmatpush.bf16.msra.mxu0 %v2317_v50  ;;  %14813 = vst [vmem:[#allocation33_spill] sm:$0xff] %v11358_v41  ;;  %3195 = vmatmul.bf16.vlgmr.msrb.gmra.mxu1 %v11358_v41 }
 0x442   : > { %3245 = vmatpush.bf16.msra.mxu1 %v2565_v32  ;;  %2785 = vrot.lane.b32.xlu1 %v2440_v3, %s14798_s13 }
 0x443   : > { %3232 = vmatpush.bf16.msra.mxu0 %v2286_v7  ;;  %2883 = vrot.lane.b32.xlu2 %v2627_v26, %s14798_s13 }
 0x444   : > { %2801 = vrot.lane.b32.xlu0 %v2471_v35, %s14798_s13  ;;  %v2212_v0 = vpop.permute.xlu1 %2211  ;;  %v11369_v27 = vpop.permute.xlu2 %2459 }
 0x445   : > { %v11372_v3 = vpop.permute.xlu0 %2585  ;;  %v2224_v26 = vsel %vm14815_vm12, %v11269_v10, %v2212_v0  ;;  %v2472_v30 = vsel %vm14816_vm5, %v11281_v60, %v11369_v27  ;;  %v2380_v60 = vsel %vm14818_vm10, %v11206_v29, %v11317_v51  ;;  %vm14827_vm12 = vmmov %vm14817_vm14 }
 0x446   : > { %3246 = vmatpush.bf16.msra.mxu1 %v2534_v39 }
 0x447   : > { %3233 = vmatpush.bf16.msra.mxu0 %v2255_v56 }
 0x44a   : > { %3247 = vmatpush.bf16.msra.mxu1 %v2503_v23  ;;  %2755 = vrot.lane.b32.xlu1 %v2379_v53, %s14798_s13 }
 0x44b   : > { %3234 = vmatpush.bf16.msra.mxu0 %v2224_v26  ;;  %2739 = vrot.lane.b32.xlu2 %v2348_v46, %s14798_s13 }
 0x44c   : > { %2867 = vrot.lane.b32.xlu0 %v2596_v2, %s14798_s13  ;;  %v11385_v35 = vpop.permute.xlu1 %2306  ;;  %v11387_v10 = vpop.permute.xlu2 %2554 }
 0x44d   : > { %v2181_v61 = vpop.permute.xlu0 %2180  ;;  %v2318_v29 = vsel %vm14820_vm2, %v11258_v5, %v11385_v35  ;;  %v2628_v5 = vsel %vm14823_vm4, %v11218_v24, %v11340_v55 }
 0x44e   : > { %3248 = vmatpush.bf16.msra.mxu1 %v2472_v30  ;;  %v2193_v62 = vsel %vm14817_vm14, %v11167_v33, %v2181_v61  ;;  %vm14828_vm14 = vmmov %vm14818_vm10 }
 0x44f   : > { %3235 = vmatpush.bf16.msra.mxu0 %v2193_v62  ;;  %vm14829_vm10 = vmmov %vm14804_vm7 }
 0x452   : > { %2723 = vrot.lane.b32.xlu1 %v2317_v50, %s14798_s13  ;;  %v2349_v50 = vsel %vm14819_vm15, %v11230_v18, %v11342_v20 }
 0x453   : > { %2851 = vrot.lane.b32.xlu2 %v2565_v32, %s14798_s13  ;;  %3236 = vmatpush.bf16.msra.mxu0 %v10944_v48 }
 0x454   : > { %2707 = vrot.lane.b32.xlu0 %v2286_v7, %s14798_s13  ;;  %v2429_v53 = vpop.permute.xlu1 %2428  ;;  %v11398_v46 = vpop.permute.xlu2 %2244 }
 0x455   : > { %v11400_v2 = vpop.permute.xlu0 %2275  ;;  %v2441_v33 = vsel %vm14804_vm7, %v11293_v44, %v2429_v53  ;;  %vm14830_vm7 = vmmov %vm14819_vm15 }
 0x456   : > { %3249 = vmatpush.bf16.msra.mxu1 %v2441_v33  ;;  %3237 = vmatmul.bf16.vlgmr.msra.gmra.mxu0 %v11315_v25  ;;  %v11426_v42 = vsel %vm14822_vm8, %v11283_v52, %v11400_v2  ;;  %v2597_v52 = vsel %vm14825_vm9, %v11243_v28, %v11372_v3  ;;  %vm14831_vm15 = vmmov %vm14821_vm1 }
 0x457   : > { %3285 = vmatpush.bf16.msrb.mxu0 %v2380_v60 }
 0x45a   : > { %2835 = vrot.lane.b32.xlu1 %v2534_v39, %s14798_s13 }
 0x45b   : > { %3286 = vmatpush.bf16.msrb.mxu0 %v2349_v50  ;;  %2691 = vrot.lane.b32.xlu2 %v2255_v56, %s14798_s13 }
 0x45c   : > { %2757 = vrot.lane.b32.xlu0 %v2380_v60, %s14798_s13  ;;  %v11414_v44 = vpop.permute.xlu1 %2523  ;;  %v11416_v32 = vpop.permute.xlu2 %2461 }
 0x45d   : > { %v2398_v7 = vpop.permute.xlu0 %2397  ;;  %v11462_v28 = vsel %vm1194_vm13, %v11291_v47, %v11414_v44  ;;  %v11486_v47 = vsel %vm14816_vm5, %v11369_v27, %v11416_v32 }
 0x45e   : > { %v11420_v18 = vsel %vm14821_vm1, %v11191_v36, %v2398_v7  ;;  %v11438_v36 = vsel %vm14824_vm0, %v11313_v63, %v11398_v46  ;;  %v2566_v63 = vsel %vm1226_vm6, %v11267_v58, %v11387_v10  ;;  %vm14832_vm1 = vmmov %vm14823_vm4 }
 0x45f   : > { %3287 = vmatpush.bf16.msrb.mxu0 %v2318_v29  ;;  %3250 = vmatpush.bf16.msra.mxu1 %v11420_v18  ;;  %vm14834_vm4 = vmmov %vm14825_vm9 }
 0x460   : > { %vm14836_vm9 = vmmov %vm14826_vm3 }
 0x462   : > { %2819 = vrot.lane.b32.xlu1 %v2503_v23, %s14798_s13  ;;  %3251 = vmatmul.bf16.vlgmr.msra.gmra.mxu1 %v11358_v41 }
 0x463   : > { %3288 = vmatpush.bf16.msrb.mxu0 %v11426_v42  ;;  %3299 = vmatpush.bf16.msrb.mxu1 %v2628_v5 }
 0x464   : > { %2885 = vrot.lane.b32.xlu2 %v2628_v5, %s14798_s13  ;;  %2741 = vrot.lane.b32.xlu0 %v2349_v50, %s14798_s13  ;;  %v11445_v24 = vpop.permute.xlu1 %2492  ;;  %v11447_v39 = vpop.permute.xlu2 %2430  ;;  %v11571_v5 = vsel %vm1226_vm6, %v11387_v10, %v11116_v13 }
 0x465   : > { %v2214_v56 = vpop.permute.xlu0 %2213  ;;  %v11504_v27 = vsel %vm14829_vm10, %v2429_v53, %v11447_v39 }
 0x466   : > { %v11450_v23 = vsel %vm14826_vm3, %v2212_v0, %v2214_v56  ;;  %vm14837_vm3 = vmmov %vm14827_vm12 }
 0x467   : > { %3289 = vmatpush.bf16.msrb.mxu0 %v11438_v36  ;;  %3300 = vmatpush.bf16.msrb.mxu1 %v2597_v52 }
 0x46a   : > { %2803 = vrot.lane.b32.xlu1 %v2472_v30, %s14798_s13 }
 0x46b   : > { %3290 = vmatpush.bf16.msrb.mxu0 %v11450_v23  ;;  %3301 = vmatpush.bf16.msrb.mxu1 %v2566_v63 }
 0x46c   : > { %2675 = vrot.lane.b32.xlu2 %v2224_v26, %s14798_s13  ;;  %2659 = vrot.lane.b32.xlu0 %v2193_v62, %s14798_s13  ;;  %v2183_v0 = vpop.permute.xlu1 %2182  ;;  %v11465_v60 = vpop.permute.xlu2 %2558  ;;  %v11476_v26 = vsel %vm14800_vm11, %v11344_v9, %v11445_v24  ;;  %v11491_v9 = vsel %vm14828_vm14, %v11317_v51, %v11092_v8  ;;  %v11509_v51 = vsel %vm14830_vm7, %v11342_v20, %v11088_v54 }
 0x46d   : > { %v11467_v58 = vpop.permute.xlu0 %2399  ;;  %v11470_v50 = vsel %vm14827_vm12, %v2181_v61, %v2183_v0  ;;  %v11525_v20 = vsel %vm14820_vm2, %v11385_v35, %v11072_v34  ;;  %v11544_v35 = vsel %vm14822_vm8, %v11400_v2, %v11128_v37  ;;  %v11563_v2 = vsel %vm14824_vm0, %v11398_v46, %v11112_v59  ;;  %vm14838_vm12 = vmmov %vm14800_vm11 }
 0x46e   : > { %v11520_v53 = vsel %vm14831_vm15, %v2398_v7, %v11467_v58  ;;  %v11586_v46 = vsel %vm1194_vm13, %v11414_v44, %v11100_v15  ;;  %v11597_v10 = vsel %vm14837_vm3, %v2183_v0, %v11114_v19  ;;  %v11603_v44 = vsel %vm14838_vm12, %v11445_v24, %v11090_v21  ;;  %vm14840_vm11 = vmmov %vm14816_vm5 }
 0x46f   : > { %3302 = vmatpush.bf16.msrb.mxu1 %v11462_v28  ;;  %3291 = vmatpush.bf16.msrb.mxu0 %v11470_v50  ;;  %vm14841_vm5 = vmmov %vm14828_vm14 }
 0x470   : > { %v11619_v0 = vsel %vm14841_vm5, %v11092_v8, %v11080_v17  ;;  %vm14842_vm14 = vmmov %vm14829_vm10 }
 0x471   : > { %vm14843_vm10 = vmmov %vm14830_vm7 }
 0x472   : > { %2725 = vrot.lane.b32.xlu1 %v2318_v29, %s14798_s13  ;;  %v11534_v29 = vsel %vm14832_vm1, %v11340_v55, %v11062_v11  ;;  %v11551_v55 = vsel %vm14834_vm4, %v11372_v3, %v11104_v4  ;;  %v11640_v24 = vsel %vm14843_vm10, %v11088_v54, %v11126_v38  ;;  %vm14844_vm7 = vmmov %vm14831_vm15 }
 0x473   : > { %3303 = vmatpush.bf16.msrb.mxu1 %v11476_v26  ;;  %3292 = vmatpush.bf16.msrb.mxu0 %v11064_v49  ;;  %vm14846_vm15 = vmmov %vm14820_vm2 }
 0x474   : > { %2869 = vrot.lane.b32.xlu2 %v2597_v52, %s14798_s13  ;;  %2853 = vrot.lane.b32.xlu0 %v2566_v63, %s14798_s13  ;;  %v11495_v30 = vpop.permute.xlu1 %2432  ;;  %v11497_v61 = vpop.permute.xlu2 %2527  ;;  %v11580_v63 = vsel %vm14836_vm9, %v2214_v56, %v11152_v6  ;;  %vm14847_vm2 = vmmov %vm14832_vm1 }
 0x475   : > { %v11499_v62 = vpop.permute.xlu0 %2310  ;;  %v11635_v8 = vsel %vm14842_vm14, %v11447_v39, %v11495_v30  ;;  %v11661_v54 = vsel %vm14847_vm2, %v11062_v11, %v11140_v43  ;;  %vm14848_vm1 = vmmov %vm14822_vm8 }
 0x476   : > { %3293 = vmatmul.bf16.vlgmr.msrb.gmra.mxu0 %v11315_v25  ;;  %v11654_v39 = vsel %vm14846_vm15, %v11072_v34, %v11499_v62  ;;  %vm14849_vm8 = vmmov %vm14834_vm4  ;;  %vm14850_vm4 = vcmask 916480  }
 0x477   : > { %3304 = vmatpush.bf16.msrb.mxu1 %v11486_v47  ;;  %3341 = vmatpush.bf16.msra.mxu0 %v11491_v9  ;;  %v11682_v43 = vsel %vm14849_vm8, %v11104_v4, %v11102_v14  ;;  %vm14851_vm9 = vmmov %vm14838_vm12 }
 0x478   : > { %vm14853_vm3 = vmmov %vm14850_vm4 }
 0x479   : > { %vm14854_vm12 = vmmov %vm14853_vm3 }
 0x47a   : > { %2217 = vrot.lane.b32.xlu1 %v10865_v31, %s14772_s25  ;;  %vm14856_vm5 = vmmov %vm14853_vm3 }
 0x47b   : > { %3305 = vmatpush.bf16.msrb.mxu1 %v11504_v27  ;;  %3342 = vmatpush.bf16.msra.mxu0 %v11509_v51  ;;  %vm14857_vm14 = vmmov %vm14853_vm3 }
 0x47c   : > { %2787 = vrot.lane.b32.xlu2 %v2441_v33, %s14798_s13  ;;  %2641 = vrot.lane.b32.xlu0 %v10956_v40, %s14798_s13  ;;  %v11529_v33 = vpop.permute.xlu1 %2401  ;;  %v11536_v40 = vpop.permute.xlu2 %2496  ;;  %vm14858_vm10 = vmmov %vm14853_vm3 }
 0x47d   : > { %14833 = vst [vmem:[#allocation34_spill] sm:$0xff] %v11536_v40  ;;  %v11538_v7 = vpop.permute.xlu0 %2279  ;;  %vm14860_vm15 = vmmov %vm14853_vm3 }
 0x47e   : > { %vm14861_vm2 = vmmov %vm14853_vm3 }
 0x47f   : > { %3306 = vmatpush.bf16.msrb.mxu1 %v11520_v53  ;;  %3343 = vmatpush.bf16.msra.mxu0 %v11525_v20 }
 0x482   : > { %3307 = vmatmul.bf16.vlgmr.msrb.gmra.mxu1 %v11358_v41  ;;  %2643 = vrot.lane.b32.xlu1 %v10944_v48, %s14798_s13 }
 0x483   : > { %3355 = vmatpush.bf16.msra.mxu1 %v11534_v29  ;;  %3344 = vmatpush.bf16.msra.mxu0 %v11544_v35 }
 0x484   : > { %2343 = vrot.lane.b32.xlu2 %v11248_v12, %s14789_s1  ;;  %2465 = vrot.lane.b32.xlu0 %v10865_v31, %s14770_s22  ;;  %v11566_v3 = vpop.permute.xlu1 %2374  ;;  %v11573_v52 = vpop.permute.xlu2 %2865 }
 0x485   : > { %14835 = vst [vmem:[#allocation35_spill] sm:$0xff] %v11566_v3  ;;  %v11575_v48 = vpop.permute.xlu0 %2248 }
 0x487   : > { %3356 = vmatpush.bf16.msra.mxu1 %v11551_v55  ;;  %3345 = vmatpush.bf16.msra.mxu0 %v11563_v2 }
 0x48a   : > { %2591 = vrot.lane.b32.xlu1 %v11248_v12, %s14783_s12 }
 0x48b   : > { %3357 = vmatpush.bf16.msra.mxu1 %v11571_v5  ;;  %3346 = vmatpush.bf16.msra.mxu0 %v11580_v63 }
 0x48c   : > { %2709 = vrot.lane.b32.xlu2 %v11426_v42, %s14798_s13  ;;  %2771 = vrot.lane.b32.xlu0 %v11420_v18, %s14798_s13  ;;  %v2882_v56 = vpop.permute.xlu1 %2881  ;;  %v11605_v3 = vpop.permute.xlu2 %2705  ;;  %v11614_v18 = vsel %vm14840_vm11, %v11416_v32, %v11136_v57  ;;  %vm14855_vm11 = vmmov %vm14853_vm3 }
 0x48d   : > { %v11607_v42 = vpop.permute.xlu0 %2622 }
 0x48e   : > { %14839 = vst [vmem:[#allocation36_spill] sm:$0xff] %v11607_v42  ;;  %v11649_v42 = vsel %vm14844_vm7, %v11467_v58, %v11529_v33  ;;  %v11673_v58 = vsel %vm14848_vm1, %v11128_v37, %v11538_v7  ;;  %v11690_v37 = vsel %vm14824_vm0, %v11112_v59, %v11575_v48  ;;  %vm14859_vm7 = vmmov %vm14853_vm3 }
 0x48f   : > { %3358 = vmatpush.bf16.msra.mxu1 %v11586_v46  ;;  %3347 = vmatpush.bf16.msra.mxu0 %v11597_v10  ;;  %14845 = vst [vmem:[#allocation37_spill] sm:$0xff] %v11649_v42  ;;  %vm14862_vm1 = vmmov %vm14861_vm2 }
 0x490   : > { %vm14863_vm8 = vmmov %vm14862_vm1 }
 0x491   : > { %vm14865_vm0 = vmmov %vm14862_vm1 }
 0x492   : > { %2837 = vrot.lane.b32.xlu1 %v11462_v28, %s14798_s13 }
 0x493   : > { %3359 = vmatpush.bf16.msra.mxu1 %v11603_v44  ;;  %3348 = vmatpush.bf16.msra.mxu0 %v11118_v45 }
 0x494   : > { %2769 = vrot.lane.b32.xlu2 %v11321_v16, %s14798_s13  ;;  %2312 = vrot.lane.b32.xlu0 %v11248_v12, %s14784_s10  ;;  %v11630_v32 = vpop.permute.xlu1 %2737 }
 0x495   : > { %v11642_v16 = vpop.permute.xlu2 %2657  ;;  %v2754_v28 = vpop.permute.xlu0 %2753 }
 0x496   : > { %3349 = vmatmul.bf16.vlgmr.msra.gmra.mxu0 %v11315_v25 }
 0x497   : > { %3360 = vmatpush.bf16.msra.mxu1 %v11614_v18  ;;  %3397 = vmatpush.bf16.msrb.mxu0 %v11619_v0 }
 0x49a   : > { %2693 = vrot.lane.b32.xlu1 %v11438_v36, %s14798_s13 }
 0x49b   : > { %3361 = vmatpush.bf16.msra.mxu1 %v11635_v8  ;;  %3398 = vmatpush.bf16.msrb.mxu0 %v11640_v24 }
 0x49c   : > { %2186 = vrot.lane.b32.xlu2 %v10865_v31, %s14771_s0  ;;  %2434 = vrot.lane.b32.xlu0 %v10865_v31, %s14781_s23  ;;  %v2850_v34 = vpop.permute.xlu1 %2849 }
 0x49d   : > { %v2722_v11 = vpop.permute.xlu0 %2721 }
 0x49f   : > { %3362 = vmatpush.bf16.msra.mxu1 %v11649_v42  ;;  %3399 = vmatpush.bf16.msrb.mxu0 %v11654_v39  ;;  %v11675_v42 = vpop.permute.xlu2 %2883 }
 0x4a0   : > { %v3002_v36 = vsel %vm14850_vm4, %v2882_v56, %v11675_v42  ;;  %vm14864_vm4 = vmmov %vm14862_vm1 }
 0x4a1   : > { %3215 = vmatpush.bf16.msrb.mxu3 %v3002_v36 }
 0x4a2   : > { %3363 = vmatmul.bf16.vlgmr.msra.gmra.mxu1 %v11358_v41  ;;  %v11696_v41 = vsel %vm1226_vm6, %v11116_v13, %v11465_v60  ;;  %2560 = vrot.lane.b32.xlu1 %v11248_v12, %s14796_s11  ;;  %v11710_v13 = vsel %vm1194_vm13, %v11100_v15, %v11497_v61 }
 0x4a3   : > { %3411 = vmatpush.bf16.msrb.mxu1 %v11661_v54  ;;  %3400 = vmatpush.bf16.msrb.mxu0 %v11673_v58 }
 0x4a4   : > { %2759 = vrot.lane.b32.xlu2 %v11491_v9, %s14798_s13  ;;  %2887 = vrot.lane.b32.xlu0 %v11534_v29, %s14798_s13  ;;  %v2690_v4 = vpop.permute.xlu1 %2689  ;;  %v11716_v9 = vsel %vm14851_vm9, %v11090_v21, %v11536_v40  ;;  %vm14866_vm9 = vcmask 1031168  }
 0x4a5   : > { %v2834_v56 = vpop.permute.xlu0 %2833  ;;  %14852 = vst [vmem:[#allocation38_spill] sm:$0xff] %v11716_v9 }
 0x4a7   : > { %3412 = vmatpush.bf16.msrb.mxu1 %v11682_v43  ;;  %3401 = vmatpush.bf16.msrb.mxu0 %v11690_v37  ;;  %v11705_v59 = vpop.permute.xlu2 %2739 }
 0x4aa   : > { %2281 = vrot.lane.b32.xlu1 %v11248_v12, %s14769_s7 }
 0x4ab   : > { %3413 = vmatpush.bf16.msrb.mxu1 %v11696_v41 }
 0x4ac   : > { %2821 = vrot.lane.b32.xlu2 %v11476_v26, %s14798_s13  ;;  %2743 = vrot.lane.b32.xlu0 %v11509_v51, %s14798_s13  ;;  %v2674_v15 = vpop.permute.xlu1 %2673 }
 0x4ae   : > { %v2818_v36 = vpop.permute.xlu0 %2817 }
 0x4af   : > { %3414 = vmatpush.bf16.msrb.mxu1 %v11710_v13  ;;  %v11725_v29 = vpop.permute.xlu2 %2851 }
 0x4b2   : > { %2403 = vrot.lane.b32.xlu1 %v10865_v31, %s14782_s24 }
 0x4b3   : > { %3415 = vmatpush.bf16.msrb.mxu1 %v11716_v9 }
 0x4b4   : > { %2677 = vrot.lane.b32.xlu2 %v11450_v23, %s14798_s13  ;;  %2805 = vrot.lane.b32.xlu0 %v11486_v47, %s14798_s13  ;;  %v2786_v21 = vpop.permute.xlu1 %2785 }
 0x4b6   : > { %v2802_v51 = vpop.permute.xlu0 %2801 }
 0x4b7   : > { %v11733_v26 = vpop.permute.xlu2 %2691 }
 0x4ba   : > { %2871 = vrot.lane.b32.xlu1 %v11551_v55, %s14798_s13  ;;  %v2939_v55 = vsel %vm14855_vm11, %v11630_v32, %v11705_v59  ;;  %vm14869_vm11 = vcmask 965632  }
 0x4bc   : > { %2529 = vrot.lane.b32.xlu2 %v11248_v12, %s14619_s20  ;;  %2376 = vrot.lane.b32.xlu0 %v10833_v1, %s14795_s5  ;;  %v11741_v23 = vpop.permute.xlu1 %2755 }
 0x4bd   : > { %v2946_v47 = vsel %vm14853_vm3, %v2754_v28, %v11741_v23  ;;  %v2988_v28 = vsel %vm14856_vm5, %v2850_v34, %v11725_v29  ;;  %vm14867_vm3 = vmmov %vm14865_vm0 }
 0x4be   : > { %v11745_v31 = vpop.permute.xlu0 %2867  ;;  %3201 = vmatpush.bf16.msrb.mxu2 %v2946_v47  ;;  %vm14870_vm5 = vmmov %vm14865_vm0 }
 0x4bf   : > { %v11743_v9 = vpop.permute.xlu2 %2885  ;;  %v2995_v40 = vsel %vm14854_vm12, %v11573_v52, %v11745_v31  ;;  %vm14868_vm12 = vcmask 1039360  }
 0x4c0   : > { %3216 = vmatpush.bf16.msrb.mxu3 %v2995_v40 }
 0x4c2   : > { %3202 = vmatpush.bf16.msrb.mxu2 %v2939_v55  ;;  %2661 = vrot.lane.b32.xlu1 %v11470_v50, %s14798_s13 }
 0x4c4   : > { %2250 = vrot.lane.b32.xlu2 %v11248_v12, %s14787_s9  ;;  %2498 = vrot.lane.b32.xlu0 %v11248_v12, %s14661_s26  ;;  %v11763_v52 = vpop.permute.xlu1 %2723 }
 0x4c5   : > { %3217 = vmatpush.bf16.msrb.mxu3 %v2988_v28  ;;  %v2932_v32 = vsel %vm14857_vm14, %v2722_v11, %v11763_v52  ;;  %v2918_v28 = vsel %vm14859_vm7, %v2690_v4, %v11733_v26  ;;  %vm14871_vm14 = vmmov %vm14865_vm0 }
 0x4c6   : > { %v11767_v47 = vpop.permute.xlu0 %2707  ;;  %3203 = vmatpush.bf16.msrb.mxu2 %v2932_v32  ;;  %vm14874_vm7 = vmmov %vm14865_vm0 }
 0x4c7   : > { %v11765_v40 = vpop.permute.xlu2 %2675  ;;  %v2925_v50 = vsel %vm14858_vm10, %v11605_v3, %v11767_v47  ;;  %vm14873_vm10 = vcmask 990208  }
 0x4ca   : > { %3204 = vmatpush.bf16.msrb.mxu2 %v2925_v50  ;;  %2624 = vrot.lane.b32.xlu1 %v10833_v1, %s14799_s14 }
 0x4cc   : > { %2727 = vrot.lane.b32.xlu2 %v11525_v20, %s14798_s13  ;;  %2855 = vrot.lane.b32.xlu0 %v11571_v5, %s14798_s13  ;;  %v11780_v34 = vpop.permute.xlu1 %2835  ;;  %v2911_v20 = vsel %vm14861_vm2, %v2674_v15, %v11765_v40  ;;  %vm14876_vm2 = vmmov %vm14865_vm0 }
 0x4cd   : > { %v2981_v3 = vsel %vm14860_vm15, %v2834_v56, %v11780_v34  ;;  %vm14875_vm15 = vmmov %vm14865_vm0 }
 0x4ce   : > { %v11784_v11 = vpop.permute.xlu0 %2757  ;;  %3205 = vmatpush.bf16.msrb.mxu2 %v2918_v28  ;;  %3218 = vmatpush.bf16.msrb.mxu3 %v2981_v3 }
 0x4cf   : > { %v11782_v55 = vpop.permute.xlu2 %2869 }
 0x4d2   : > { %3206 = vmatpush.bf16.msrb.mxu2 %v2911_v20  ;;  %2219 = vrot.lane.b32.xlu1 %v11248_v12, %s14772_s25 }
 0x4d4   : > { %2789 = vrot.lane.b32.xlu2 %v11504_v27, %s14798_s13  ;;  %2645 = vrot.lane.b32.xlu0 %v11064_v49, %s14798_s13  ;;  %v11798_v5 = vpop.permute.xlu1 %2819 }
 0x4d5   : > { %v2974_v32 = vsel %vm14862_vm1, %v2818_v36, %v11798_v5  ;;  %vm14877_vm1 = vcmask 998400  }
 0x4d6   : > { %v11802_v56 = vpop.permute.xlu0 %2741  ;;  %3219 = vmatpush.bf16.msrb.mxu3 %v2974_v32 }
 0x4d7   : > { %v11800_v4 = vpop.permute.xlu2 %2787 }
 0x4da   : > { %2711 = vrot.lane.b32.xlu1 %v11544_v35, %s14798_s13  ;;  %v2960_v35 = vsel %vm14865_vm0, %v2786_v21, %v11800_v4 }
 0x4dc   : > { %2345 = vrot.lane.b32.xlu2 %v10833_v1, %s14789_s1  ;;  %2593 = vrot.lane.b32.xlu0 %v10833_v1, %s14783_s12  ;;  %v11812_v49 = vpop.permute.xlu1 %2803 }
 0x4dd   : > { %v2967_v50 = vsel %vm14863_vm8, %v2802_v51, %v11812_v49  ;;  %vm14878_vm8 = vmmov %vm14865_vm0 }
 0x4de   : > { %v11816_v15 = vpop.permute.xlu0 %2659  ;;  %3220 = vmatpush.bf16.msrb.mxu3 %v2967_v50 }
 0x4df   : > { %v11814_v27 = vpop.permute.xlu2 %2343  ;;  %v2904_v36 = vsel %vm14864_vm4, %v11642_v16, %v11816_v15  ;;  %vm14879_vm4 = vmmov %vm14865_vm0  ;;  %vm14880_vm0 = vcmask 1006592  }
 0x4e0   : > { %3207 = vmatpush.bf16.msrb.mxu2 %v2904_v36 }
 0x4e2   : > { %3221 = vmatpush.bf16.msrb.mxu3 %v2960_v35  ;;  %2773 = vrot.lane.b32.xlu1 %v11520_v53, %s14798_s13 }
 0x4e4   : > { %2467 = vrot.lane.b32.xlu2 %v11248_v12, %s14770_s22  ;;  %2188 = vrot.lane.b32.xlu0 %v11248_v12, %s14771_s0  ;;  %v11831_v51 = vpop.permute.xlu1 %2725 }
 0x4e6   : > { %v11835_v16 = vpop.permute.xlu0 %2853 }
 0x4e7   : > { %v11833_v28 = vpop.permute.xlu2 %2709 }
 0x4ea   : > { %2314 = vrot.lane.b32.xlu1 %v10833_v1, %s14784_s10 }
 0x4ec   : > { %2839 = vrot.lane.b32.xlu2 %v11586_v46, %s14798_s13  ;;  %2761 = vrot.lane.b32.xlu0 %v11619_v0, %s14798_s13  ;;  %v11843_v21 = vpop.permute.xlu1 %2217 }
 0x4ed   : > { %v11848_v20 = vsel %vm14866_vm9, %v11152_v6, %v11843_v21  ;;  %vm14881_vm9 = vmmov %vm14876_vm2 }
 0x4ee   : > { %v2642_v3 = vpop.permute.xlu0 %2641  ;;  %3402 = vmatpush.bf16.msrb.mxu0 %v11848_v20 }
 0x4ef   : > { %v2770_v53 = vpop.permute.xlu2 %2769 }
 0x4f2   : > { %2436 = vrot.lane.b32.xlu1 %v11248_v12, %s14781_s23 }
 0x4f4   : > { %2695 = vrot.lane.b32.xlu2 %v11563_v2, %s14798_s13  ;;  %2823 = vrot.lane.b32.xlu0 %v11603_v44, %s14798_s13  ;;  %v11857_v46 = vpop.permute.xlu1 %2643  ;;  %v2947_v44 = vsel %vm14870_vm5, %v11741_v23, %v11784_v11  ;;  %vm14885_vm5 = vmmov %vm14876_vm2 }
 0x4f5   : > { %v2897_v6 = vsel %vm14867_vm3, %v2642_v3, %v11857_v46  ;;  %v11914_v3 = vsel %vm14877_vm1, %v11126_v38, %v11814_v27  ;;  %v2996_v38 = vsel %vm14879_vm4, %v11745_v31, %v11782_v55  ;;  %vm14882_vm3 = vmmov %vm14876_vm2  ;;  %vm14893_vm1 = vcmask 924672  }
 0x4f6   : > { %v11861_v32 = vpop.permute.xlu0 %2465  ;;  %3208 = vmatpush.bf16.msrb.mxu2 %v2897_v6  ;;  %vm14897_vm4 = vmmov %vm14882_vm3 }
 0x4f7   : > { %v11859_v0 = vpop.permute.xlu2 %2186  ;;  %v11874_v2 = vsel %vm14869_vm11, %v11136_v57, %v11861_v32  ;;  %v14872_v57 = vld [vmem:[#allocation35_spill] sm:$0xff]  ;;  %vm14884_vm11 = vcmask 973824  }
 0x4f8   : > { %v11868_v50 = vsel %vm14868_vm12, %v11114_v19, %v11859_v0  ;;  %3416 = vmatpush.bf16.msrb.mxu1 %v11874_v2  ;;  %v2940_v19 = vsel %vm14871_vm14, %v11705_v59, %v11802_v56  ;;  %v11893_v23 = vsel %vm14873_vm10, %v11080_v17, %v14872_v57  ;;  %v2933_v17 = vsel %vm14875_vm15, %v11763_v52, %v11831_v51  ;;  %vm14883_vm12 = vmmov %vm14876_vm2 }
 0x4f9   : > { %3403 = vmatpush.bf16.msrb.mxu0 %v11868_v50  ;;  %v3003_v59 = vsel %vm14876_vm2, %v11675_v42, %v11743_v9  ;;  %v2926_v42 = vsel %vm14878_vm8, %v11767_v47, %v11833_v28  ;;  %v2989_v47 = vsel %vm14881_vm9, %v11725_v29, %v11835_v16  ;;  %vm14886_vm14 = vmmov %vm14876_vm2  ;;  %vm14887_vm10 = vcmask 1014784  }
 0x4fa   : > { %3257 = vmatpush.bf16.msra.mxu2 %v2947_v44  ;;  %2889 = vrot.lane.b32.xlu1 %v11661_v54, %s14798_s13  ;;  %vm14889_vm15 = vmmov %vm14876_vm2  ;;  %vm14890_vm2 = vcmask 982016   ;;  %vm14895_vm8 = vcmask 932864   ;;  %vm14901_vm9 = vcmask 957440  }
 0x4fc   : > { %2562 = vrot.lane.b32.xlu2 %v10833_v1, %s14796_s11  ;;  %2679 = vrot.lane.b32.xlu0 %v11580_v63, %s14798_s13  ;;  %v11896_v36 = vpop.permute.xlu1 %2591 }
 0x4fd   : > { %3404 = vmatpush.bf16.msrb.mxu0 %v10805_v22 }
 0x4fe   : > { %3258 = vmatpush.bf16.msra.mxu2 %v2940_v19  ;;  %v11900_v54 = vpop.permute.xlu0 %2771 }
 0x4ff   : > { %v11898_v35 = vpop.permute.xlu2 %2759  ;;  %v2953_v63 = vsel %vm14874_vm7, %v2770_v53, %v11900_v54  ;;  %vm14888_vm7 = vcmask 1022976  }
 0x500   : > { %3405 = vmatmul.bf16.vlgmr.msrb.gmra.mxu0 %v11315_v25  ;;  %3222 = vmatpush.bf16.msrb.mxu3 %v2953_v63 }
 0x501   : > { %3453 = vmatpush.bf16.msra.mxu0 %v11893_v23 }
 0x502   : > { %3259 = vmatpush.bf16.msra.mxu2 %v2933_v17  ;;  %2745 = vrot.lane.b32.xlu1 %v11640_v24, %s14798_s13 }
 0x504   : > { %3271 = vmatpush.bf16.msra.mxu3 %v3003_v59  ;;  %2283 = vrot.lane.b32.xlu2 %v10833_v1, %s14769_s7  ;;  %v11929_v52 = vpop.permute.xlu1 %2837 }
 0x505   : > { %3454 = vmatpush.bf16.msra.mxu0 %v11914_v3  ;;  %2531 = vrot.lane.b32.xlu0 %v10833_v1, %s14619_s20  ;;  %v2982_v31 = vsel %vm14882_vm3, %v11780_v34, %v11929_v52 }
 0x506   : > { %3260 = vmatpush.bf16.msra.mxu2 %v2926_v42  ;;  %v11933_v6 = vpop.permute.xlu0 %2312  ;;  %v14892_v42 = vld [vmem:[#allocation31_spill] sm:$0xff] }
 0x507   : > { %v11931_v53 = vpop.permute.xlu2 %2821  ;;  %v11938_v24 = vsel %vm14880_vm0, %v11499_v62, %v11933_v6  ;;  %vm14899_vm0 = vmmov %vm14882_vm3  ;;  %vm14903_vm3 = vcmask 965632  }
 0x508   : > { %3272 = vmatpush.bf16.msra.mxu3 %v2996_v38  ;;  %v2975_v34 = vsel %vm14885_vm5, %v11798_v5, %v11931_v53  ;;  %vm14906_vm5 = vmmov %vm14899_vm0 }
 0x509   : > { %3455 = vmatpush.bf16.msra.mxu0 %v11938_v24 }
 0x50a   : > { %2807 = vrot.lane.b32.xlu1 %v11614_v18, %s14798_s13 }
 0x50c   : > { %3273 = vmatpush.bf16.msra.mxu3 %v2989_v47  ;;  %2405 = vrot.lane.b32.xlu2 %v11248_v12, %s14782_s24  ;;  %v11957_v29 = vpop.permute.xlu1 %2693  ;;  %v7832_v47 = vld [vmem:[%s14806_s3 + $0x8] sm:$0xf] }
 0x50d   : > { %2252 = vrot.lane.b32.xlu0 %v10833_v1, %s14787_s9  ;;  %v2919_v19 = vsel %vm14883_vm12, %v11733_v26, %v11957_v29  ;;  %vm14904_vm12 = vmmov %vm14899_vm0 }
 0x50e   : > { %v11955_v44 = vpop.permute.xlu0 %2434  ;;  %3261 = vmatpush.bf16.msra.mxu2 %v2919_v19  ;;  %v2600_v19 = vsel %vm14895_vm8, %v11102_v14, %v11896_v36  ;;  %vm14913_vm8 = vmmov %vm14899_vm0 }
 0x50f   : > { %v11953_v62 = vpop.permute.xlu2 %2677  ;;  %v11965_v18 = vsel %vm14884_vm11, %v11495_v30, %v11955_v44  ;;  %vm14905_vm11 = vcmask 1031168  }
 0x510   : > { %3274 = vmatpush.bf16.msra.mxu3 %v2982_v31  ;;  %3417 = vmatpush.bf16.msrb.mxu1 %v11965_v18  ;;  %v2912_v30 = vsel %vm14886_vm14, %v11765_v40, %v11953_v62  ;;  %vm14907_vm14 = vmmov %vm14899_vm0 }
 0x512   : > { %2663 = vrot.lane.b32.xlu1 %v11597_v10, %s14798_s13  ;;  %3262 = vmatpush.bf16.msra.mxu2 %v2912_v30 }
 0x514   : > { %3275 = vmatpush.bf16.msra.mxu3 %v2975_v34  ;;  %2873 = vrot.lane.b32.xlu2 %v11682_v43, %s14798_s13  ;;  %v11984_v5 = vpop.permute.xlu1 %2560 }
 0x515   : > { %2500 = vrot.lane.b32.xlu0 %v10833_v1, %s14661_s26 }
 0x516   : > { %v11982_v63 = vpop.permute.xlu0 %2887 }
 0x517   : > { %v11980_v26 = vpop.permute.xlu2 %2529 }
 0x518   : > { %v2538_v14 = vsel %vm1194_vm13, %v11497_v61, %v11980_v26  ;;  %v8168_v61 = vld [vmem:[%s14806_s3 + $0xc] sm:$0xf] }
 0x51a   : > { %2791 = vrot.lane.b32.xlu1 %v11635_v8, %s14798_s13 }
 0x51c   : > { %2729 = vrot.lane.b32.xlu2 %v11654_v39, %s14798_s13  ;;  %v11996_v40 = vpop.permute.xlu1 %2281 }
 0x51d   : > { %2221 = vrot.lane.b32.xlu0 %v10833_v1, %s14772_s25  ;;  %v12001_v17 = vsel %vm14887_vm10, %v11538_v7, %v11996_v40  ;;  %vm14908_vm10 = vmmov %vm14899_vm0 }
 0x51e   : > { %v11994_v10 = vpop.permute.xlu0 %2743  ;;  %3456 = vmatpush.bf16.msra.mxu0 %v12001_v17 }
 0x51f   : > { %v11992_v43 = vpop.permute.xlu2 %2250 }
 0x520   : > { %v12013_v8 = vsel %vm14888_vm7, %v11575_v48, %v11992_v43  ;;  %v14891_v48 = vld [vmem:[#allocation36_spill] sm:$0xff]  ;;  %vm14909_vm7 = vmmov %vm14899_vm0 }
 0x521   : > { %v2631_v38 = vsel %vm14893_vm1, %v14892_v42, %v14891_v48  ;;  %v14898_v42 = vld [vmem:[#allocation33_spill] sm:$0xff]  ;;  %vm14912_vm1 = vmmov %vm14899_vm0 }
 0x522   : > { %2647 = vrot.lane.b32.xlu1 %v11118_v45, %s14798_s13  ;;  %3457 = vmatpush.bf16.msra.mxu0 %v12013_v8 }
 0x524   : > { %2857 = vrot.lane.b32.xlu2 %v11696_v41, %s14798_s13  ;;  %v12018_v39 = vpop.permute.xlu1 %2403 }
 0x525   : > { %2469 = vrot.lane.b32.xlu0 %v10833_v1, %s14770_s22  ;;  %v12028_v45 = vsel %vm14890_vm2, %v11529_v33, %v12018_v39  ;;  %v14894_v33 = vld [vmem:[#allocation37_spill] sm:$0xff]  ;;  %vm14911_vm2 = vcmask 1039360  }
 0x526   : > { %v12020_v59 = vpop.permute.xlu0 %2805  ;;  %3418 = vmatpush.bf16.msrb.mxu1 %v12028_v45 }
 0x527   : > { %v12016_v7 = vpop.permute.xlu2 %2727  ;;  %v2968_v41 = vsel %vm14889_vm15, %v11812_v49, %v12020_v59  ;;  %v8170_v49 = vld [vmem:[%s14806_s3 + $0x14] sm:$0xf0]  ;;  %vm14910_vm15 = vmmov %vm14899_vm0 }
 0x528   : > { %3276 = vmatpush.bf16.msra.mxu3 %v2968_v41  ;;  %v12040_v31 = vor.u32 %v8170_v49, %v7832_v47  ;;  %v12065_v47 = vsel %vm1226_vm6, %v11465_v60, %v11984_v5 }
 0x529   : > { %3419 = vmatmul.bf16.vlgmr.msrb.gmra.mxu1 %v14898_v42 }
 0x52a   : > { %3467 = vmatpush.bf16.msra.mxu1 %v2631_v38  ;;  %3209 = vmatmul.bf16.vlgmr.msrb.gmra.mxu2 %v12040_v31 }
 0x52b   : > { %2775 = vrot.lane.b32.xlu1 %v14894_v33, %s14798_s13  ;;  %v14900_v33 = vld [vmem:[#allocation34_spill] sm:$0xff] }
 0x52c   : > { %2713 = vrot.lane.b32.xlu2 %v11673_v58, %s14798_s13  ;;  %v12054_v30 = vpop.permute.xlu1 %2871 }
 0x52d   : > { %2190 = vrot.lane.b32.xlu0 %v10833_v1, %s14771_s0 }
 0x52e   : > { %3468 = vmatpush.bf16.msra.mxu1 %v2600_v19  ;;  %v12056_v41 = vpop.permute.xlu0 %2376 }
 0x52f   : > { %v12052_v34 = vpop.permute.xlu2 %2789 }
 0x530   : > { %14896 = vst [vmem:[#allocation35_spill] sm:$0xff] %v12052_v34  ;;  %v2961_v58 = vsel %vm14897_vm4, %v11800_v4, %v12052_v34  ;;  %vm14914_vm4 = vmmov %vm14899_vm0 }
 0x531   : > { %3277 = vmatpush.bf16.msra.mxu3 %v2961_v58 }
 0x532   : > { %3469 = vmatpush.bf16.msra.mxu1 %v12065_v47 }
 0x533   : > { %2697 = vrot.lane.b32.xlu1 %v11690_v37, %s14798_s13  ;;  %v7834_v37 = vld [vmem:[%s14806_s3 + $0x18] sm:$0xf0]  ;;  %s14961_s3 = sld [smem:[#allocation56_spill]] }
 0x534   : > { %2841 = vrot.lane.b32.xlu2 %v11710_v13, %s14798_s13  ;;  %v12079_v60 = vpop.permute.xlu1 %2661  ;;  %v12098_v12 = vor.u32 %v8168_v61, %v7834_v37 }
 0x535   : > { %2438 = vrot.lane.b32.xlu0 %v10833_v1, %s14781_s23  ;;  %v2905_v13 = vsel %vm14899_vm0, %v11816_v15, %v12079_v60  ;;  %v14902_v15 = vld [vmem:[#allocation38_spill] sm:$0xff]  ;;  %vm14916_vm0 = vcmask 990208  }
 0x536   : > { %3470 = vmatpush.bf16.msra.mxu1 %v2538_v14  ;;  %v12081_v49 = vpop.permute.xlu0 %2498  ;;  %3263 = vmatpush.bf16.msra.mxu2 %v2905_v13 }
 0x537   : > { %v12077_v4 = vpop.permute.xlu2 %2345  ;;  %v12089_v58 = vsel %vm14901_vm9, %v14900_v33, %v12081_v49  ;;  %3223 = vmatmul.bf16.vlgmr.msrb.gmra.mxu3 %v12098_v12  ;;  %vm14917_vm9 = vmmov %vm14912_vm1 }
 0x53a   : > { %3471 = vmatpush.bf16.msra.mxu1 %v12089_v58 }
 0x53b   : > { %2825 = vrot.lane.b32.xlu1 %v14902_v15, %s14798_s13  ;;  %v2934_v15 = vsel %vm14908_vm10, %v11831_v51, %v12016_v7  ;;  %vm14923_vm10 = vcmask 1014784  }
 0x53c   : > { %2763 = vrot.lane.b32.xlu2 %v11893_v23, %s14798_s13  ;;  %v12109_v33 = vpop.permute.xlu1 %2624 }
 0x53d   : > { %2681 = vrot.lane.b32.xlu0 %v11848_v20, %s14798_s13 }
 0x53e   : > { %v12111_v34 = vpop.permute.xlu0 %2855 }
 0x53f   : > { %v12107_v13 = vpop.permute.xlu2 %2467 }
 0x540   : > { %v12116_v61 = vsel %vm14903_vm3, %v11861_v32, %v12107_v13  ;;  %vm14918_vm3 = vcmask 998400  }
 0x541   : > { %3472 = vmatpush.bf16.msra.mxu1 %v12116_v61 }
 0x543   : > { %2747 = vrot.lane.b32.xlu1 %v11914_v3, %s14798_s13 }
 0x544   : > { %2891 = vrot.lane.b32.xlu2 %v2631_v38, %s14798_s13  ;;  %v12126_v23 = vpop.permute.xlu1 %2219 }
 0x545   : > { %2809 = vrot.lane.b32.xlu0 %v11874_v2, %s14798_s13  ;;  %v12136_v38 = vsel %vm14905_vm11, %v11843_v21, %v12126_v23  ;;  %v2948_v2 = vsel %vm14906_vm5, %v11784_v11, %v11898_v35  ;;  %v2941_v21 = vsel %vm14907_vm14, %v11802_v56, %v11994_v10  ;;  %vm14920_vm11 = vcmask 1006592   ;;  %vm14922_vm14 = vmmov %vm14912_vm1 }
 0x546   : > { %v12128_v37 = vpop.permute.xlu0 %2645  ;;  %3458 = vmatpush.bf16.msra.mxu0 %v12136_v38  ;;  %vm14921_vm5 = vcmask 973824  }
 0x547   : > { %v12124_v20 = vpop.permute.xlu2 %2839  ;;  %v2898_v32 = vsel %vm14904_vm12, %v11857_v46, %v12128_v37  ;;  %vm14919_vm12 = vmmov %vm14912_vm1 }
 0x548   : > { %3264 = vmatpush.bf16.msra.mxu2 %v2898_v32 }
 0x54b   : > { %3265 = vmatmul.bf16.vlgmr.msra.gmra.mxu2 %v12040_v31  ;;  %2875 = vrot.lane.b32.xlu1 %v2600_v19, %s14798_s13 }
 0x54c   : > { %3313 = vmatpush.bf16.msrb.mxu2 %v2948_v2  ;;  %2407 = vrot.lane.b32.xlu2 %v10833_v1, %s14782_s24  ;;  %v12153_v3 = vpop.permute.xlu1 %2711 }
 0x54d   : > { %2731 = vrot.lane.b32.xlu0 %v11938_v24, %s14798_s13  ;;  %v2927_v56 = vsel %vm14909_vm7, %v11833_v28, %v12153_v3  ;;  %vm14924_vm7 = vcmask 924672  }
 0x54e   : > { %v12155_v11 = vpop.permute.xlu0 %2593 }
 0x54f   : > { %v12151_v46 = vpop.permute.xlu2 %2695 }
 0x550   : > { %3314 = vmatpush.bf16.msrb.mxu2 %v2941_v21  ;;  %v2920_v28 = vsel %vm14912_vm1, %v11957_v29, %v12151_v46 }
 0x553   : > { %2793 = vrot.lane.b32.xlu1 %v11965_v18, %s14798_s13  ;;  %v3004_v18 = vsel %vm14913_vm8, %v11743_v9, %v11982_v63  ;;  %v2384_v9 = vsel %vm14916_vm0, %v14872_v57, %v12056_v41 }
 0x554   : > { %3315 = vmatpush.bf16.msrb.mxu2 %v2934_v15  ;;  %2665 = vrot.lane.b32.xlu2 %v11868_v50, %s14798_s13  ;;  %v12171_v19 = vpop.permute.xlu1 %2773 }
 0x555   : > { %2649 = vrot.lane.b32.xlu0 %v10805_v22, %s14798_s13  ;;  %v2954_v50 = vsel %vm14910_vm15, %v11900_v54, %v12171_v19  ;;  %v14915_v54 = vld [vmem:[#allocation30_spill] sm:$0xff]  ;;  %vm14925_vm15 = vcmask 982016  }
 0x556   : > { %v12173_v51 = vpop.permute.xlu0 %2188  ;;  %3278 = vmatpush.bf16.msra.mxu3 %v2954_v50 }
 0x557   : > { %v12169_v24 = vpop.permute.xlu2 %2562  ;;  %v2197_v22 = vsel %vm14911_vm2, %v11859_v0, %v12173_v51  ;;  %v2997_v0 = vsel %vm14914_vm4, %v11782_v55, %v12054_v30  ;;  %v2353_v55 = vsel %vm14918_vm3, %v11814_v27, %v12077_v4  ;;  %vm14926_vm2 = vmmov %vm14912_vm1  ;;  %vm14927_vm1 = vcmask 932864  }
 0x558   : > { %3316 = vmatpush.bf16.msrb.mxu2 %v2927_v56  ;;  %3459 = vmatpush.bf16.msra.mxu0 %v2197_v22  ;;  %v2601_v21 = vsel %vm14927_vm1, %v11896_v36, %v12155_v11  ;;  %vm14928_vm8 = vmmov %vm14926_vm2  ;;  %vm14929_vm4 = vcmask 1022976  }
 0x559   : > { %3279 = vmatmul.bf16.vlgmr.msra.gmra.mxu3 %v12098_v12  ;;  %vm14930_vm0 = vmmov %vm14926_vm2 }
 0x55a   : > { %3327 = vmatpush.bf16.msrb.mxu3 %v3004_v18  ;;  %vm14933_vm3 = vmmov %vm14930_vm0 }
 0x55b   : > { %2715 = vrot.lane.b32.xlu1 %v12001_v17, %s14798_s13  ;;  %v2990_v17 = vsel %vm14917_vm9, %v11835_v16, %v12111_v34  ;;  %v2983_v16 = vsel %vm14919_vm12, %v11929_v52, %v12124_v20  ;;  %vm14931_vm9 = vcmask 957440   ;;  %vm14934_vm12 = vcmask 1031168   ;;  %vm14942_vm1 = vmmov %vm14930_vm0 }
 0x55c   : > { %3317 = vmatpush.bf16.msrb.mxu2 %v2920_v28  ;;  %2859 = vrot.lane.b32.xlu2 %v12065_v47, %s14798_s13  ;;  %v12202_v47 = vpop.permute.xlu1 %2314 }
 0x55d   : > { %2843 = vrot.lane.b32.xlu0 %v2538_v14, %s14798_s13  ;;  %3460 = vmatpush.bf16.msra.mxu0 %v14915_v54  ;;  %v2322_v57 = vsel %vm14920_vm11, %v11933_v6, %v12202_v47  ;;  %vm14935_vm11 = vmmov %vm14930_vm0 }
 0x55e   : > { %3328 = vmatpush.bf16.msrb.mxu3 %v2997_v0  ;;  %v12204_v32 = vpop.permute.xlu0 %2761 }
 0x55f   : > { %v12200_v29 = vpop.permute.xlu2 %2283 }
 0x560   : > { %3461 = vmatmul.bf16.vlgmr.msra.gmra.mxu0 %v11315_v25  ;;  %v2291_v6 = vsel %vm14923_vm10, %v11996_v40, %v12200_v29  ;;  %vm14938_vm10 = vmmov %vm14930_vm0 }
 0x561   : > { %3509 = vmatpush.bf16.msrb.mxu0 %v2384_v9 }
 0x562   : > { %3329 = vmatpush.bf16.msrb.mxu3 %v2990_v17 }
 0x563   : > { %2699 = vrot.lane.b32.xlu1 %v12013_v8, %s14798_s13 }
 0x564   : > { %2777 = vrot.lane.b32.xlu2 %v12028_v45, %s14798_s13  ;;  %v12227_v14 = vpop.permute.xlu1 %2436 }
 0x565   : > { %3510 = vmatpush.bf16.msrb.mxu0 %v2353_v55  ;;  %2827 = vrot.lane.b32.xlu0 %v12089_v58, %s14798_s13  ;;  %v2445_v8 = vsel %vm14921_vm5, %v11955_v44, %v12227_v14  ;;  %v2632_v58 = vsel %vm14924_vm7, %v14891_v48, %v12109_v33  ;;  %vm14936_vm5 = vcmask 965632   ;;  %vm14939_vm7 = vmmov %vm14930_vm0 }
 0x566   : > { %3330 = vmatpush.bf16.msrb.mxu3 %v2983_v16  ;;  %v12229_v45 = vpop.permute.xlu0 %2823  ;;  %3473 = vmatpush.bf16.msra.mxu1 %v2445_v8 }
 0x567   : > { %v12225_v27 = vpop.permute.xlu2 %2405  ;;  %v2976_v52 = vsel %vm14922_vm14, %v11931_v53, %v12229_v45  ;;  %vm14937_vm14 = vmmov %vm14930_vm0 }
 0x568   : > { %v2414_v53 = vsel %vm14925_vm15, %v12018_v39, %v12225_v27  ;;  %vm14940_vm15 = vcmask 1039360  }
 0x569   : > { %3511 = vmatpush.bf16.msrb.mxu0 %v2322_v57 }
 0x56a   : > { %3331 = vmatpush.bf16.msrb.mxu3 %v2976_v52  ;;  %3474 = vmatpush.bf16.msra.mxu1 %v2414_v53  ;;  %v2949_v52 = vsel %vm14937_vm14, %v11898_v35, %v12204_v32  ;;  %vm14952_vm14 = vmmov %vm14942_vm1 }
 0x56b   : > { %2893 = vrot.lane.b32.xlu1 %v2632_v58, %s14798_s13 }
 0x56c   : > { %2765 = vrot.lane.b32.xlu2 %v2384_v9, %s14798_s13  ;;  %v12251_v40 = vpop.permute.xlu1 %2889 }
 0x56d   : > { %3512 = vmatpush.bf16.msrb.mxu0 %v2291_v6  ;;  %2749 = vrot.lane.b32.xlu0 %v2353_v55, %s14798_s13 }
 0x56e   : > { %3523 = vmatpush.bf16.msrb.mxu1 %v2632_v58  ;;  %v12253_v2 = vpop.permute.xlu0 %2679 }
 0x56f   : > { %v12249_v44 = vpop.permute.xlu2 %2873  ;;  %v2913_v48 = vsel %vm14926_vm2, %v11953_v62, %v12253_v2  ;;  %3475 = vmatmul.bf16.vlgmr.msra.gmra.mxu1 %v14898_v42  ;;  %v2570_v62 = vsel %vm1226_vm6, %v11984_v5, %v12169_v24  ;;  %vm14941_vm2 = vmmov %vm14930_vm0 }
 0x570   : > { %3318 = vmatpush.bf16.msrb.mxu2 %v2913_v48  ;;  %v3005_v48 = vsel %vm14942_vm1, %v11982_v63, %v12251_v40 }
 0x572   : > { %3524 = vmatpush.bf16.msrb.mxu1 %v2601_v21 }
 0x573   : > { %2811 = vrot.lane.b32.xlu1 %v12116_v61, %s14798_s13 }
 0x574   : > { %2683 = vrot.lane.b32.xlu2 %v12136_v38, %s14798_s13  ;;  %v12272_v15 = vpop.permute.xlu1 %2745 }
 0x575   : > { %2667 = vrot.lane.b32.xlu0 %v2197_v22, %s14798_s13 }
 0x576   : > { %3525 = vmatpush.bf16.msrb.mxu1 %v2570_v62 }
 0x577   : > { %v12270_v39 = vpop.permute.xlu2 %2729  ;;  %v12274_v56 = vpop.permute.xlu0 %2531 }
 0x578   : > { %v2539_v36 = vsel %vm1194_vm13, %v11980_v26, %v12274_v56 }
 0x57a   : > { %3526 = vmatpush.bf16.msrb.mxu1 %v2539_v36 }
 0x57b   : > { %2733 = vrot.lane.b32.xlu1 %v2322_v57, %s14798_s13 }
 0x57c   : > { %2877 = vrot.lane.b32.xlu2 %v2601_v21, %s14798_s13  ;;  %v12284_v5 = vpop.permute.xlu1 %2807 }
 0x57d   : > { %2861 = vrot.lane.b32.xlu0 %v2570_v62, %s14798_s13  ;;  %v2969_v50 = vsel %vm14928_vm8, %v12020_v59, %v12284_v5  ;;  %vm14944_vm8 = vmmov %vm14930_vm0 }
 0x57e   : > { %3332 = vmatpush.bf16.msrb.mxu3 %v2969_v50 }
 0x57f   : > { %v12282_v61 = vpop.permute.xlu2 %2857  ;;  %v12286_v38 = vpop.permute.xlu0 %2252 }
 0x580   : > { %v2260_v26 = vsel %vm14929_vm4, %v11992_v43, %v12286_v38  ;;  %vm14945_vm4 = vmmov %vm14930_vm0 }
 0x581   : > { %3513 = vmatpush.bf16.msrb.mxu0 %v2260_v26 }
 0x583   : > { %2651 = vrot.lane.b32.xlu1 %v14915_v54, %s14798_s13 }
 0x584   : > { %2795 = vrot.lane.b32.xlu2 %v2445_v8, %s14798_s13  ;;  %v12300_v28 = vpop.permute.xlu1 %2663 }
 0x585   : > { %2779 = vrot.lane.b32.xlu0 %v2414_v53, %s14798_s13  ;;  %v2906_v59 = vsel %vm14930_vm0, %v12079_v60, %v12300_v28  ;;  %v14932_v60 = vld [vmem:[#allocation35_spill] sm:$0xff]  ;;  %vm14946_vm0 = vcmask 973824  }
 0x586   : > { %3319 = vmatpush.bf16.msrb.mxu2 %v2906_v59 }
 0x587   : > { %v12298_v22 = vpop.permute.xlu2 %2713  ;;  %v12302_v18 = vpop.permute.xlu0 %2500 }
 0x588   : > { %v2508_v43 = vsel %vm14931_vm9, %v12081_v49, %v12302_v18  ;;  %vm14947_vm9 = vmmov %vm14942_vm1 }
 0x589   : > { %3527 = vmatpush.bf16.msrb.mxu1 %v2508_v43 }
 0x58b   : > { %2845 = vrot.lane.b32.xlu1 %v2539_v36, %s14798_s13 }
 0x58c   : > { %2717 = vrot.lane.b32.xlu2 %v2291_v6, %s14798_s13  ;;  %v12318_v9 = vpop.permute.xlu1 %2791 }
 0x58d   : > { %2767 = vrot.lane.b32.xlu0 %v12056_v41, %s14798_s13  ;;  %v2962_v17 = vsel %vm14933_vm3, %v14932_v60, %v12318_v9  ;;  %vm14948_vm3 = vmmov %vm14942_vm1 }
 0x58e   : > { %3333 = vmatpush.bf16.msrb.mxu3 %v2962_v17 }
 0x58f   : > { %v12314_v0 = vpop.permute.xlu2 %2841  ;;  %v12316_v54 = vpop.permute.xlu0 %2221 }
 0x590   : > { %v2229_v49 = vsel %vm14934_vm12, %v12126_v23, %v12316_v54  ;;  %vm14949_vm12 = vcmask 982016  }
 0x591   : > { %3514 = vmatpush.bf16.msrb.mxu0 %v2229_v49 }
 0x593   : > { %2829 = vrot.lane.b32.xlu1 %v2508_v43, %s14798_s13  ;;  %v3142_v43 = vld [vmem:[%s14960_s4 + $0x8] sm:$0xff] }
 0x594   : > { %2701 = vrot.lane.b32.xlu2 %v2260_v26, %s14798_s13  ;;  %v12333_v57 = vpop.permute.xlu1 %2647 }
 0x595   : > { %2685 = vrot.lane.b32.xlu0 %v2229_v49, %s14798_s13  ;;  %v2899_v8 = vsel %vm14935_vm11, %v12128_v37, %v12333_v57  ;;  %vm14950_vm11 = vmmov %vm14942_vm1 }
 0x596   : > { %3320 = vmatpush.bf16.msrb.mxu2 %v2899_v8 }
 0x597   : > { %v12329_v55 = vpop.permute.xlu2 %2763  ;;  %v12331_v16 = vpop.permute.xlu0 %2469 }
 0x598   : > { %v2477_v23 = vsel %vm14936_vm5, %v12107_v13, %v12331_v16  ;;  %v2942_v13 = vsel %vm14938_vm10, %v11994_v10, %v12272_v15  ;;  %v2935_v10 = vsel %vm14941_vm2, %v12016_v7, %v12270_v39  ;;  %v2998_v7 = vsel %vm14945_vm4, %v12054_v30, %v12249_v44  ;;  %vm14951_vm5 = vmmov %vm14942_vm1 }
 0x599   : > { %3528 = vmatpush.bf16.msrb.mxu1 %v2477_v23  ;;  %3321 = vmatmul.bf16.vlgmr.msrb.gmra.mxu2 %v12040_v31  ;;  %v2991_v30 = vsel %vm14948_vm3, %v12111_v34, %v12282_v61  ;;  %vm14953_vm10 = vmmov %vm14942_vm1 }
 0x59a   : > { %3369 = vmatpush.bf16.msra.mxu2 %v2949_v52  ;;  %vm14956_vm2 = vmmov %vm14942_vm1 }
 0x59b   : > { %2751 = vrot.lane.b32.xlu1 %v12077_v4, %s14798_s13  ;;  %vm14958_vm4 = vmmov %vm14942_vm1 }
 0x59c   : > { %2895 = vrot.lane.b32.xlu2 %v12109_v33, %s14798_s13 }
 0x59d   : > { %2879 = vrot.lane.b32.xlu0 %v12155_v11, %s14798_s13  ;;  %v12358_v6 = vpop.permute.xlu1 %2775 }
 0x59e   : > { %3370 = vmatpush.bf16.msra.mxu2 %v2942_v13  ;;  %v2955_v58 = vsel %vm14939_vm7, %v12171_v19, %v12358_v6  ;;  %v14943_v19 = vld [vmem:[#allocation32_spill] sm:$0xff]  ;;  %vm14954_vm7 = vmmov %vm14942_vm1 }
 0x59f   : > { %v12354_v37 = vpop.permute.xlu2 %2891  ;;  %v12356_v35 = vpop.permute.xlu0 %2190  ;;  %3334 = vmatpush.bf16.msrb.mxu3 %v2955_v58 }
 0x5a0   : > { %v2198_v53 = vsel %vm14940_vm15, %v12173_v51, %v12356_v35  ;;  %v2928_v51 = vsel %vm14944_vm8, %v12153_v3, %v12298_v22  ;;  %vm14955_vm15 = vmmov %vm14942_vm1 }
 0x5a1   : > { %3515 = vmatpush.bf16.msrb.mxu0 %v2198_v53  ;;  %vm14957_vm8 = vmmov %vm14942_vm1 }
 0x5a2   : > { %3371 = vmatpush.bf16.msra.mxu2 %v2935_v10  ;;  %3335 = vmatmul.bf16.vlgmr.msrb.gmra.mxu3 %v12098_v12 }
 0x5a3   : > { %3383 = vmatpush.bf16.msra.mxu3 %v3005_v48  ;;  %2669 = vrot.lane.b32.xlu1 %v2198_v53, %s14798_s13 }
 0x5a4   : > { %2813 = vrot.lane.b32.xlu2 %v2477_v23, %s14798_s13 }
 0x5a5   : > { %3516 = vmatpush.bf16.msrb.mxu0 %v14943_v19  ;;  %v12387_v62 = vpop.permute.xlu1 %2697 }
 0x5a6   : > { %3372 = vmatpush.bf16.msra.mxu2 %v2928_v51  ;;  %v2921_v3 = vsel %vm14947_vm9, %v12151_v46, %v12387_v62  ;;  %v2984_v46 = vsel %vm14950_vm11, %v12124_v20, %v12314_v0 }
 0x5a7   : > { %3384 = vmatpush.bf16.msra.mxu3 %v2998_v7  ;;  %v12382_v63 = vpop.permute.xlu2 %2407  ;;  %v12385_v21 = vpop.permute.xlu0 %2438 }
 0x5a8   : > { %v2446_v36 = vsel %vm14946_vm0, %v12227_v14, %v12385_v21  ;;  %3517 = vmatmul.bf16.vlgmr.msrb.gmra.mxu0 %v11315_v25  ;;  %vm14959_vm0 = vmmov %vm14942_vm1 }
 0x5a9   : > { %3565 = vmatpush.bf16.msra.mxu0 %v12056_v41  ;;  %2797 = vrot.lane.b32.xlu0 %v2446_v36, %s14798_s13  ;;  %v2415_v41 = vsel %vm14949_vm12, %v12225_v27, %v12382_v63  ;;  %vm14962_vm9 = vmmov %vm14959_vm0 }
 0x5aa   : > { %3529 = vmatpush.bf16.msrb.mxu1 %v2446_v36  ;;  %3373 = vmatpush.bf16.msra.mxu2 %v2921_v3  ;;  %vm14963_vm3 = vmmov %vm14959_vm0 }
 0x5ab   : > { %3385 = vmatpush.bf16.msra.mxu3 %v2991_v30  ;;  %2863 = vrot.lane.b32.xlu1 %v12169_v24, %s14798_s13  ;;  %vm14964_vm12 = vmmov %vm14959_vm0 }
 0x5ac   : > { %2735 = vrot.lane.b32.xlu2 %v12202_v47, %s14798_s13  ;;  %vm14965_vm11 = vmmov %vm14959_vm0 }
 0x5ad   : > { %3566 = vmatpush.bf16.msra.mxu0 %v12077_v4  ;;  %v12417_v14 = vpop.permute.xlu1 %2825 }
 0x5ae   : > { %3530 = vmatpush.bf16.msrb.mxu1 %v2415_v41  ;;  %v2977_v50 = vsel %vm14952_vm14, %v12229_v45, %v12417_v14  ;;  %vm14967_vm14 = vmmov %vm14959_vm0 }
 0x5af   : > { %3386 = vmatpush.bf16.msra.mxu3 %v2984_v46  ;;  %v12412_v34 = vpop.permute.xlu2 %2665  ;;  %v12415_v4 = vpop.permute.xlu0 %2681 }
 0x5b0   : > { %v2914_v27 = vsel %vm14951_vm5, %v12253_v2, %v12415_v4  ;;  %vm14966_vm5 = vmmov %vm14959_vm0 }
 0x5b1   : > { %3567 = vmatpush.bf16.msra.mxu0 %v12202_v47  ;;  %3531 = vmatmul.bf16.vlgmr.msrb.gmra.mxu1 %v14898_v42 }
 0x5b2   : > { %3579 = vmatpush.bf16.msra.mxu1 %v12109_v33  ;;  %2719 = vrot.lane.b32.xlu0 %v12200_v29, %s14798_s13  ;;  %v2907_v33 = vsel %vm14953_vm10, %v12300_v28, %v12412_v34  ;;  %vm14968_vm10 = vmmov %vm14959_vm0 }
 0x5b3   : > { %3374 = vmatpush.bf16.msra.mxu2 %v2914_v27  ;;  %3387 = vmatpush.bf16.msra.mxu3 %v2977_v50 }
 0x5b4   : > { %2653 = vrot.lane.b32.xlu2 %v14943_v19, %s14798_s13  ;;  %2781 = vrot.lane.b32.xlu1 %v2415_v41, %s14798_s13 }
 0x5b5   : > { %3568 = vmatpush.bf16.msra.mxu0 %v12200_v29 }
 0x5b6   : > { %3580 = vmatpush.bf16.msra.mxu1 %v12155_v11  ;;  %v12442_v11 = vpop.permute.xlu1 %2747 }
 0x5b7   : > { %3375 = vmatpush.bf16.msra.mxu2 %v2907_v33  ;;  %v12437_v20 = vpop.permute.xlu2 %2859  ;;  %v12440_v47 = vpop.permute.xlu0 %2809 }
 0x5b8   : > { %v2970_v29 = vsel %vm14954_vm7, %v12284_v5, %v12440_v47  ;;  %v2992_v49 = vsel %vm14965_vm11, %v12282_v61, %v12437_v20  ;;  %vm14969_vm7 = vmmov %vm14959_vm0 }
 0x5b9   : > { %3569 = vmatpush.bf16.msra.mxu0 %v12286_v38  ;;  %3388 = vmatpush.bf16.msra.mxu3 %v2970_v29  ;;  %vm14978_vm11 = vmmov %vm14959_vm0 }
 0x5ba   : > { %3581 = vmatpush.bf16.msra.mxu1 %v12169_v24  ;;  %2703 = vrot.lane.b32.xlu0 %v12286_v38, %s14798_s13 }
 0x5bc   : > { %2847 = vrot.lane.b32.xlu2 %v12274_v56, %s14798_s13  ;;  %2831 = vrot.lane.b32.xlu1 %v12302_v18, %s14798_s13 }
 0x5bd   : > { %3570 = vmatpush.bf16.msra.mxu0 %v12316_v54 }
 0x5be   : > { %3582 = vmatpush.bf16.msra.mxu1 %v12274_v56  ;;  %v12461_v2 = vpop.permute.xlu1 %2875 }
 0x5bf   : > { %v12456_v24 = vpop.permute.xlu2 %2777  ;;  %v12459_v45 = vpop.permute.xlu0 %2731  ;;  %v2999_v60 = vsel %vm14963_vm3, %v12249_v44, %v12461_v2  ;;  %vm14976_vm3 = vmmov %vm14959_vm0 }
 0x5c1   : > { %3571 = vmatpush.bf16.msra.mxu0 %v12356_v35 }
 0x5c2   : > { %3583 = vmatpush.bf16.msra.mxu1 %v12302_v18  ;;  %2815 = vrot.lane.b32.xlu0 %v12331_v16, %s14798_s13  ;;  %v3006_v18 = vsel %vm14959_vm0, %v12251_v40, %v12354_v37  ;;  %v3141_v40 = vld [vmem:[%s14960_s4] sm:$0xff] }
 0x5c4   : > { %2687 = vrot.lane.b32.xlu2 %v12316_v54, %s14798_s13  ;;  %2671 = vrot.lane.b32.xlu1 %v12356_v35, %s14798_s13 }
 0x5c5   : > { %3572 = vmatpush.bf16.msra.mxu0 %v10833_v1 }
 0x5c6   : > { %3584 = vmatpush.bf16.msra.mxu1 %v12331_v16  ;;  %v2794_v38 = vpop.permute.xlu1 %2793 }
 0x5c7   : > { %v12473_v56 = vpop.permute.xlu2 %2765  ;;  %v12475_v5 = vpop.permute.xlu0 %2649  ;;  %v2963_v28 = vsel %vm14956_vm2, %v12318_v9, %v2794_v38  ;;  %vm14971_vm2 = vmmov %vm14959_vm0 }
 0x5c8   : > { %3573 = vmatmul.bf16.vlgmr.msra.gmra.mxu0 %v11315_v25  ;;  %v2900_v26 = vsel %vm14955_vm15, %v12333_v57, %v12475_v5  ;;  %v2950_v25 = vsel %vm14942_vm1, %v12204_v32, %v12329_v55  ;;  %3389 = vmatpush.bf16.msra.mxu3 %v2963_v28  ;;  %v2943_v32 = vsel %vm14958_vm4, %v12272_v15, %v12442_v11  ;;  %vm14970_vm15 = vmmov %vm14959_vm0  ;;  %v12627_v28 = vpop.f32.mrf.mxu0 }
 0x5c9   : > { %3376 = vmatpush.bf16.msra.mxu2 %v2900_v26  ;;  %v2936_v15 = vsel %vm14962_vm9, %v12270_v39, %v12459_v45  ;;  %vm14972_vm1 = vmmov %vm14959_vm0  ;;  %v2951_v3 = vsel %vm14959_vm0, %v12329_v55, %v12473_v56 }
 0x5ca   : > { %3585 = vmatpush.bf16.msra.mxu1 %v12385_v21  ;;  %2655 = vrot.lane.b32.xlu0 %v10833_v1, %s14798_s13  ;;  %v2956_v1 = vsel %vm14957_vm8, %v12358_v6, %v12456_v24  ;;  %vm14973_vm8 = vmmov %vm14959_vm0 }
 0x5cb   : > { %vm14974_vm4 = vmmov %vm14959_vm0 }
 0x5cc   : > { %3377 = vmatmul.bf16.vlgmr.msra.gmra.mxu2 %v12040_v31  ;;  %2799 = vrot.lane.b32.xlu2 %v12385_v21, %s14798_s13  ;;  %vm14975_vm9 = vmmov %vm14959_vm0 }
 0x5cd   : > { %3425 = vmatpush.bf16.msrb.mxu2 %v2950_v25  ;;  %2783 = vrot.lane.b32.xlu1 %v12382_v63, %s14798_s13 }
 0x5ce   : > { %3586 = vmatpush.bf16.msra.mxu1 %v12382_v63  ;;  %3390 = vmatpush.bf16.msra.mxu3 %v2956_v1  ;;  %v12508_v54 = vpop.permute.xlu1 %2715 }
 0x5cf   : > { %v12503_v59 = vpop.permute.xlu2 %2683  ;;  %v12510_v9 = vpop.permute.xlu0 %2843  ;;  %v2929_v17 = vsel %vm14964_vm12, %v12298_v22, %v12508_v54  ;;  %vm14977_vm12 = vmmov %vm14959_vm0 }
 0x5d0   : > { %v2985_v8 = vsel %vm14967_vm14, %v12314_v0, %v12510_v9  ;;  %v2915_v22 = vsel %vm14968_vm10, %v12415_v4, %v12503_v59  ;;  %vm14980_vm14 = vmmov %vm14959_vm0 }
 0x5d1   : > { %3587 = vmatmul.bf16.vlgmr.msra.gmra.mxu1 %v14898_v42  ;;  %3426 = vmatpush.bf16.msrb.mxu2 %v2943_v32  ;;  %v8576_v42 = vld [vmem:[%s14961_s3] ss:$0 sm:$0xff]  ;;  %vm14981_vm10 = vmmov %vm14959_vm0  ;;  %v3753_v32 = vld [vmem:[#allocation10 + $0xf0] sm:$0xff] }
 0x5d2   : > { %3439 = vmatpush.bf16.msrb.mxu3 %v3006_v18  ;;  %3150 = vperm.xlu0 %8543, %v3142_v43   ;;  %v3785_v18 = vld [vmem:[#allocation10 + $0x1f0] sm:$0xff] }
 0x5d3   : > { %3391 = vmatmul.bf16.vlgmr.msra.gmra.mxu3 %v12098_v12  ;;  %3978 = vmatpush.msrb.mxu0 %v3753_v32 }
 0x5d4   : > { %3145 = vperm.xlu2 %8545, %v3141_v40   ;;  %4001 = vmatpush.msrb.mxu1 %v3785_v18  ;;  %v3783_v40 = vld [vmem:[#allocation10 + $0x1e0] sm:$0xff] }
 0x5d5   : > { %3427 = vmatpush.bf16.msrb.mxu2 %v2936_v15  ;;  %3672 = vperm.xlu1 %8544, %v8576_v42  }
 0x5d6   : > { %3440 = vmatpush.bf16.msrb.mxu3 %v2999_v60  ;;  %v2700_v57 = vpop.permute.xlu1 %2699  ;;  %v3749_v60 = vld [vmem:[#allocation10 + $0xd0] sm:$0xff]  ;;  %4002 = vmatpush.msrb.mxu1 %v3783_v40 }
 0x5d7   : > { %v12531_v16 = vpop.permute.xlu2 %2877  ;;  %v2828_v39 = vpop.permute.xlu0 %2827  ;;  %v2922_v44 = vsel %vm14966_vm5, %v12387_v62, %v2700_v57  ;;  %vm14979_vm5 = vmmov %vm14959_vm0 }
 0x5d8   : > { %v2978_v61 = vsel %vm14969_vm7, %v12417_v14, %v2828_v39  ;;  %v3000_v46 = vsel %vm14977_vm12, %v12461_v2, %v12531_v16  ;;  %vm14982_vm7 = vmmov %vm14959_vm0 }
 0x5d9   : > { %3428 = vmatpush.bf16.msrb.mxu2 %v2929_v17  ;;  %v12645_v17 = vpop.f32.mrf.mxu2  ;;  %vm14990_vm12 = vmmov %vm14959_vm0 }
 0x5da   : > { %3441 = vmatpush.bf16.msrb.mxu3 %v2992_v49 }
 0x5dd   : > { %3429 = vmatpush.bf16.msrb.mxu2 %v2922_v44  ;;  %v12651_v44 = vpop.f32.mrf.mxu3 }
 0x5de   : > { %3442 = vmatpush.bf16.msrb.mxu3 %v2985_v8  ;;  %v12545_v52 = vpop.permute.xlu1 %2893  ;;  %v12654_v8 = vpop.f32.mrf.mxu0 }
 0x5df   : > { %v12543_v23 = vpop.permute.xlu2 %2795  ;;  %v12547_v13 = vpop.permute.xlu0 %2749  ;;  %v3007_v30 = vsel %vm14975_vm9, %v12354_v37, %v12545_v52  ;;  %vm14988_vm9 = vmmov %vm14959_vm0 }
 0x5e0   : > { %v2964_v10 = vsel %vm14972_vm1, %v2794_v38, %v12543_v23  ;;  %v2944_v41 = vsel %vm14976_vm3, %v12442_v11, %v12547_v13  ;;  %vm14985_vm1 = vmmov %vm14959_vm0 }
 0x5e1   : > { %3430 = vmatpush.bf16.msrb.mxu2 %v2915_v22  ;;  %vm14989_vm3 = vmmov %vm14959_vm0  ;;  %v3747_v22 = vld [vmem:[#allocation10 + $0xc0] sm:$0xff] }
 0x5e2   : > { %3443 = vmatpush.bf16.msrb.mxu3 %v2978_v61  ;;  %v3779_v61 = vld [vmem:[#allocation10 + $0x1c0] sm:$0xff] }
 0x5e6   : > { %v2812_v6 = vpop.permute.xlu1 %2811 }
 0x5e7   : > { %v12549_v35 = vpop.permute.xlu2 %2717  ;;  %v2668_v0 = vpop.permute.xlu0 %2667  ;;  %v2971_v53 = vsel %vm14971_vm2, %v12440_v47, %v2812_v6  ;;  %vm14984_vm2 = vmmov %vm14959_vm0 }
 0x5e8   : > { %v2908_v58 = vsel %vm14970_vm15, %v12412_v34, %v2668_v0  ;;  %3444 = vmatpush.bf16.msrb.mxu3 %v2971_v53  ;;  %v2930_v27 = vsel %vm14980_vm14, %v12508_v54, %v12549_v35  ;;  %vm14983_vm15 = vmmov %vm14959_vm0  ;;  %v3751_v54 = vld [vmem:[#allocation10 + $0xe0] sm:$0xff] }
 0x5e9   : > { %3431 = vmatpush.bf16.msrb.mxu2 %v2908_v58  ;;  %3979 = vmatpush.msrb.mxu0 %v3751_v54  ;;  %v3743_v58 = vld [vmem:[#allocation10 + $0xa0] sm:$0xff]  ;;  %vm14993_vm14 = vmmov %vm14959_vm0 }
 0x5ea   : > { %v3775_v53 = vld [vmem:[#allocation10 + $0x1a0] sm:$0xff] }
 0x5eb   : > { %3980 = vmatpush.msrb.mxu0 %v3749_v60 }
 0x5ec   : > { %3445 = vmatpush.bf16.msrb.mxu3 %v2964_v10 }
 0x5ed   : > { %3981 = vmatpush.msrb.mxu0 %v3747_v22 }
 0x5ee   : > { %v12559_v19 = vpop.permute.xlu1 %2733 }
 0x5ef   : > { %v12557_v48 = vpop.permute.xlu2 %2701  ;;  %v12561_v51 = vpop.permute.xlu0 %2861  ;;  %v2937_v4 = vsel %vm14978_vm11, %v12459_v45, %v12559_v19  ;;  %vm14991_vm11 = vmmov %vm14959_vm0 }
 0x5f0   : > { %v2993_v14 = vsel %vm14979_vm5, %v12437_v20, %v12561_v51  ;;  %v2923_v29 = vsel %vm14983_vm15, %v2700_v57, %v12557_v48  ;;  %vm14992_vm5 = vmmov %vm14959_vm0 }
 0x5f1   : > { %vm14996_vm15 = vmmov %vm14959_vm0 }
 0x5f6   : > { %v2652_v63 = vpop.permute.xlu1 %2651 }
 0x5f7   : > { %v12563_v7 = vpop.permute.xlu2 %2895  ;;  %v12565_v21 = vpop.permute.xlu0 %2779  ;;  %v2901_v62 = vsel %vm14973_vm8, %v12475_v5, %v2652_v63  ;;  %vm14986_vm8 = vmmov %vm14959_vm0 }
 0x5f8   : > { %v2957_v36 = vsel %vm14974_vm4, %v12456_v24, %v12565_v21  ;;  %3432 = vmatpush.bf16.msrb.mxu2 %v2901_v62  ;;  %vm14987_vm4 = vmmov %vm14959_vm0  ;;  %v3741_v62 = vld [vmem:[#allocation10 + $0x90] sm:$0xff] }
 0x5f9   : > { %3446 = vmatpush.bf16.msrb.mxu3 %v2957_v36 }
 0x5fb   : > { %3433 = vmatmul.bf16.vlgmr.msrb.gmra.mxu2 %v12040_v31 }
 0x5fc   : > { %3481 = vmatpush.bf16.msra.mxu2 %v2951_v3  ;;  %3447 = vmatmul.bf16.vlgmr.msrb.gmra.mxu3 %v12098_v12  ;;  %v12670_v3 = vpop.f32.mrf.mxu2 }
 0x5fd   : > { %3495 = vmatpush.bf16.msra.mxu3 %v3007_v30 }
 0x5fe   : > { %v12588_v34 = vpop.permute.xlu1 %2845 }
 0x5ff   : > { %v12586_v55 = vpop.permute.xlu2 %2813  ;;  %v12590_v37 = vpop.permute.xlu0 %2767  ;;  %v2986_v50 = vsel %vm14981_vm10, %v12510_v9, %v12588_v34  ;;  %vm14994_vm10 = vmmov %vm14959_vm0 }
 0x600   : > { %3482 = vmatpush.bf16.msra.mxu2 %v2944_v41  ;;  %v2972_v45 = vsel %vm14985_vm1, %v2812_v6, %v12586_v55  ;;  %v2952_v15 = vsel %vm14988_vm9, %v12473_v56, %v12590_v37  ;;  %v3777_v6 = vld [vmem:[#allocation10 + $0x1b0] sm:$0xff]  ;;  %vm14998_vm1 = vmmov %vm14959_vm0 }
 0x601   : > { %3496 = vmatpush.bf16.msra.mxu3 %v3000_v46  ;;  %v3773_v41 = vld [vmem:[#allocation10 + $0x190] sm:$0xff]  ;;  %v3739_v46 = vld [vmem:[#allocation10 + $0x80] sm:$0xff]  ;;  %vm15001_vm9 = vmmov %vm14959_vm0 }
 0x604   : > { %3483 = vmatpush.bf16.msra.mxu2 %v2937_v4  ;;  %v3008_v4 = vsel %vm14993_vm14, %v12545_v52, %v12563_v7  ;;  %vm3965_vm14 = vcmask 539648  }
 0x605   : > { %3497 = vmatpush.bf16.msra.mxu3 %v2993_v14  ;;  %v12681_v14 = vpop.f32.mrf.mxu3 }
 0x606   : > { %v12606_v47 = vpop.permute.xlu1 %2829 }
 0x607   : > { %v12604_v33 = vpop.permute.xlu2 %2735  ;;  %v2979_v11 = vsel %vm14982_vm7, %v2828_v39, %v12606_v47  ;;  %v12610_v20 = vpop.permute.xlu0 %2685  ;;  %v3781_v39 = vld [vmem:[#allocation10 + $0x1d0] sm:$0xff]  ;;  %vm14995_vm7 = vmmov %vm14959_vm0 }
 0x608   : > { %3484 = vmatpush.bf16.msra.mxu2 %v2930_v27  ;;  %v2916_v24 = vsel %vm14984_vm2, %v12503_v59, %v12610_v20  ;;  %v12633_v59 = vpop.f32.mrf.mxu1  ;;  %4003 = vmatpush.msrb.mxu1 %v3781_v39  ;;  %v3771_v27 = vld [vmem:[#allocation10 + $0x180] sm:$0xff]  ;;  %vm14997_vm2 = vmmov %vm14959_vm0  ;;  %v3266_v39 = vpop.f32.mrf.mxu2 }
 0x609   : > { %3498 = vmatpush.bf16.msra.mxu3 %v2986_v50  ;;  %v3737_v50 = vld [vmem:[#allocation10 + $0x70] sm:$0xff] }
 0x60a   : > { %4004 = vmatpush.msrb.mxu1 %v3779_v61 }
 0x60c   : > { %3485 = vmatpush.bf16.msra.mxu2 %v2923_v29  ;;  %4005 = vmatpush.msrb.mxu1 %v3777_v6  ;;  %v3769_v29 = vld [vmem:[#allocation10 + $0x170] sm:$0xff] }
 0x60d   : > { %3499 = vmatpush.bf16.msra.mxu3 %v2979_v11  ;;  %v3238_v11 = vpop.f32.mrf.mxu0  ;;  %v3729_v6 = vld [vmem:[#allocation10 + $0x30] sm:$0xff] }
 0x60e   : > { %v12621_v5 = vpop.permute.xlu1 %2751  ;;  %4006 = vmatpush.msrb.mxu1 %v3775_v53 }
 0x60f   : > { %v12619_v2 = vpop.permute.xlu2 %2653  ;;  %v12623_v38 = vpop.permute.xlu0 %2879  ;;  %v2945_v56 = vsel %vm14989_vm3, %v12547_v13, %v12621_v5  ;;  %vm15002_vm3 = vmmov %vm14959_vm0 }
 0x610   : > { %3486 = vmatpush.bf16.msra.mxu2 %v2916_v24  ;;  %v2902_v9 = vsel %vm14987_vm4, %v2652_v63, %v12619_v2  ;;  %v12661_v10 = vpop.f32.mrf.mxu1  ;;  %v2938_v63 = vsel %vm14990_vm12, %v12559_v19, %v12604_v33  ;;  %4007 = vmatpush.msrb.mxu1 %v3773_v41  ;;  %v3001_v52 = vsel %vm14995_vm7, %v12531_v16, %v12623_v38  ;;  %v3735_v24 = vld [vmem:[#allocation10 + $0x60] sm:$0xff]  ;;  %v3765_v16 = vld [vmem:[#allocation10 + $0x150] sm:$0xff]  ;;  %vm15000_vm4 = vmmov %vm14959_vm0 }
 0x611   : > { %3500 = vmatpush.bf16.msra.mxu3 %v2972_v45  ;;  %vm15003_vm12 = vmmov %vm14959_vm0 }
 0x612   : > { %4008 = vmatpush.msrb.mxu1 %v3771_v27  ;;  %v3757_v27 = vld [vmem:[#allocation10 + $0x110] sm:$0xff] }
 0x614   : > { %4009 = vmatpush.msrb.mxu1 %v3769_v29  ;;  %v3268_v29 = vpop.f32.mrf.mxu2 }
 0x616   : > { %v12629_v25 = vpop.permute.xlu1 %2669 }
 0x617   : > { %v12625_v26 = vpop.permute.xlu2 %2847  ;;  %v2909_v1 = vsel %vm14986_vm8, %v2668_v0, %v12629_v25  ;;  %vm14999_vm8 = vmmov %vm14959_vm0 }
 0x618   : > { %3487 = vmatpush.bf16.msra.mxu2 %v2909_v1  ;;  %v3767_v1 = vld [vmem:[#allocation10 + $0x160] sm:$0xff]  ;;  %v3252_v32 = vpop.f32.mrf.mxu1 }
 0x619   : > { %4010 = vmatpush.msrb.mxu1 %v3767_v1 }
 0x61b   : > { %v12635_v43 = vpop.permute.xlu0 %2797  ;;  %4011 = vmatpush.msrb.mxu1 %v3765_v16 }
 0x61c   : > { %v2965_v42 = vsel %vm14959_vm0, %v12543_v23, %v12635_v43  ;;  %3488 = vmatpush.bf16.msra.mxu2 %v2902_v9  ;;  %v3745_v23 = vld [vmem:[#allocation10 + $0xb0] sm:$0xff] }
 0x61d   : > { %3501 = vmatpush.bf16.msra.mxu3 %v2965_v42  ;;  %3982 = vmatpush.msrb.mxu0 %v3745_v23  ;;  %v3733_v9 = vld [vmem:[#allocation10 + $0x50] sm:$0xff] }
 0x61e   : > { %v12649_v57 = vpop.permute.xlu1 %2863 }
 0x61f   : > { %v12647_v49 = vpop.permute.xlu2 %2687  ;;  %3489 = vmatmul.bf16.vlgmr.msra.gmra.mxu2 %v12040_v31  ;;  %3983 = vmatpush.msrb.mxu0 %v3743_v58  ;;  %v2994_v40 = vsel %vm14997_vm2, %v12561_v51, %v12649_v57  ;;  %v3761_v58 = vld [vmem:[#allocation10 + $0x130] sm:$0xff]  ;;  %v3240_v51 = vpop.f32.mrf.mxu0 }
 0x620   : > { %3537 = vmatpush.bf16.msrb.mxu2 %v2952_v15  ;;  %v2917_v42 = vsel %vm14996_vm15, %v12610_v20, %v12647_v49  ;;  %v3280_v20 = vpop.f32.mrf.mxu3 }
 0x621   : > { %3984 = vmatpush.msrb.mxu0 %v3741_v62  ;;  %v3727_v62 = vld [vmem:[#allocation10 + $0x20] sm:$0xff] }
 0x623   : > { %3985 = vmatpush.msrb.mxu0 %v3739_v46  ;;  %v3759_v46 = vld [vmem:[#allocation10 + $0x120] sm:$0xff] }
 0x624   : > { %3538 = vmatpush.bf16.msrb.mxu2 %v2945_v56  ;;  %v12659_v0 = vpop.permute.xlu0 %2719  ;;  %v3763_v56 = vld [vmem:[#allocation10 + $0x140] sm:$0xff] }
 0x625   : > { %v2931_v19 = vsel %vm14992_vm5, %v12549_v35, %v12659_v0  ;;  %3986 = vmatpush.msrb.mxu0 %v3737_v50  ;;  %4012 = vmatpush.msrb.mxu1 %v3763_v56  ;;  %v3723_v50 = vld [vmem:[#allocation10] sm:$0xff] }
 0x626   : > { %v12668_v36 = vpop.permute.xlu1 %2781 }
 0x627   : > { %v12666_v13 = vpop.permute.xlu2 %2799  ;;  %v2958_v30 = vsel %vm14991_vm11, %v12565_v21, %v12668_v36  ;;  %3987 = vmatpush.msrb.mxu0 %v3735_v24  ;;  %4013 = vmatpush.msrb.mxu1 %v3761_v58  ;;  %vm15004_vm11 = vcmask 1041408  }
 0x628   : > { %3539 = vmatpush.bf16.msrb.mxu2 %v2938_v63  ;;  %3502 = vmatpush.bf16.msra.mxu3 %v2958_v30  ;;  %v2987_v63 = vsel %vm14998_vm1, %v12588_v34, %v12625_v26  ;;  %vm15005_vm5 = vmmov %vm15004_vm11 }
 0x629   : > { %3988 = vmatpush.msrb.mxu0 %v3733_v9  ;;  %4014 = vmatpush.msrb.mxu1 %v3759_v46 }
 0x62b   : > { %3503 = vmatmul.bf16.vlgmr.msra.gmra.mxu3 %v12098_v12  ;;  %4015 = vmatpush.msrb.mxu1 %v3757_v27 }
 0x62c   : > { %3540 = vmatpush.bf16.msrb.mxu2 %v2931_v19  ;;  %3551 = vmatpush.bf16.msrb.mxu3 %v3008_v4  ;;  %v12683_v21 = vpop.permute.xlu0 %2703  ;;  %v3725_v19 = vld [vmem:[#allocation10 + $0x10] sm:$0xff]  ;;  %v3254_v4 = vpop.f32.mrf.mxu1 }
 0x62d   : > { %v2924_v35 = vsel %vm14994_vm10, %v12557_v48, %v12683_v21 }
 0x62e   : > { %v12694_v18 = vpop.permute.xlu1 %2831 }
 0x62f   : > { %v12692_v45 = vpop.permute.xlu2 %3145  ;;  %v2980_v34 = vsel %vm15000_vm4, %v12606_v47, %v12694_v18 }
 0x630   : > { %3541 = vmatpush.bf16.msrb.mxu2 %v2924_v35  ;;  %3552 = vmatpush.bf16.msrb.mxu3 %v3001_v52  ;;  %v3183_v54 = vadd.f32 %v12627_v28, %v12692_v45  ;;  %v3239_v48 = vadd.f32 %v3238_v11, %v12692_v45  ;;  %v3731_v28 = vld [vmem:[#allocation10 + $0x40] sm:$0xff]  ;;  %v3294_v52 = vpop.f32.mrf.mxu0 }
 0x631   : > { %3989 = vmatpush.msrb.mxu0 %v3731_v28  ;;  %v3755_v35 = vld [vmem:[#allocation10 + $0x100] sm:$0xff] }
 0x632   : > { %v3197_v15 = vadd.f32 %v12633_v59, %v3183_v54  ;;  %v3253_v60 = vadd.f32 %v3252_v32, %v3239_v48  ;;  %4016 = vmatpush.msrb.mxu1 %v3755_v35  ;;  %v3282_v32 = vpop.f32.mrf.mxu3  ;;  %v2966_v54 = vsel %vm15002_vm3, %v12635_v43, %v12666_v13 }
 0x633   : > { %3990 = vmatpush.msrb.mxu0 %v3729_v6 }
 0x634   : > { %3542 = vmatpush.bf16.msrb.mxu2 %v2917_v42  ;;  %3553 = vmatpush.bf16.msrb.mxu3 %v2994_v40  ;;  %v12706_v22 = vpop.permute.xlu0 %2815  ;;  %v3211_v61 = vadd.f32 %v12645_v17, %v3197_v15  ;;  %v3267_v23 = vadd.f32 %v3266_v39, %v3253_v60 }
 0x635   : > { %3991 = vmatpush.msrb.mxu0 %v3727_v62  ;;  %v2973_v47 = vsel %vm15001_vm9, %v12586_v55, %v12706_v22  ;;  %v3308_v55 = vpop.f32.mrf.mxu1 }
 0x636   : > { %v3225_v59 = vadd.f32 %v12651_v44, %v3211_v61  ;;  %v3281_v53 = vadd.f32 %v3280_v20, %v3267_v23  ;;  %v12713_v41 = vpop.permute.xlu1 %2671  ;;  %v3295_v23 = vadd.f32 %v3294_v52, %v12692_v45 }
 0x637   : > { %v2910_v44 = vsel %vm14999_vm8, %v12629_v25, %v12713_v41  ;;  %3992 = vmatpush.msrb.mxu0 %v3725_v19 }
 0x638   : > { %3554 = vmatpush.bf16.msrb.mxu3 %v2987_v63  ;;  %v3621_v30 = vmax.f32 %v3225_v59, 1e-06  ;;  %v3622_v17 = vmax.f32 %v3281_v53, 1e-06  ;;  %3543 = vmatpush.bf16.msrb.mxu2 %v2910_v44  ;;  %v3296_v56 = vpop.f32.mrf.mxu0  ;;  %v3881_v59 = vld [vmem:[#allocation10 + $0x4f0] sm:$0xff]  ;;  %v3309_v53 = vadd.f32 %v3308_v55, %v3295_v23 }
 0x639   : > { %3993 = vmatpush.msrb.mxu0 %v3723_v50  ;;  %v3869_v55 = vld [vmem:[#allocation10 + $0x490] sm:$0xff] }
 0x63a   : > { %8641 = vlog2.f32 %v3621_v30  ;;  %v3336_v20 = vpop.f32.mrf.mxu3 }
 0x63b   : > { %8643 = vlog2.f32 %v3622_v17  ;;  %4070 = vmatpush.msra.mxu0 %v3881_v59  ;;  %v3875_v17 = vld [vmem:[#allocation10 + $0x4c0] sm:$0xff] }
 0x63c   : > { %3555 = vmatpush.bf16.msrb.mxu3 %v2980_v34  ;;  %v12721_v11 = vpop.permute.xlu0 %2655 }
 0x63d   : > { %v2903_v25 = vsel %vm14959_vm0, %v12619_v2, %v12721_v11  ;;  %v3310_v58 = vpop.f32.mrf.mxu1 }
 0x63e   : > { %3544 = vmatpush.bf16.msrb.mxu2 %v2903_v25  ;;  %v3871_v25 = vld [vmem:[#allocation10 + $0x4a0] sm:$0xff] }
 0x63f   : > { %v12730_v24 = vpop.permute.xlu1 %2783 }
 0x640   : > { %3556 = vmatpush.bf16.msrb.mxu3 %v2973_v47  ;;  %v8642_v1 = vpop.eup %8641  ;;  %v2959_v42 = vsel %vm15003_vm12, %v12668_v36, %v12730_v24  ;;  %v3350_v46 = vpop.f32.mrf.mxu0 }
 0x641   : > { %3545 = vmatmul.bf16.vlgmr.msrb.gmra.mxu2 %v12040_v31  ;;  %v8644_v2 = vpop.eup %8643 }
 0x642   : > { %3593 = vmatpush.bf16.msra.mxu2 %v12590_v37  ;;  %v3638_v37 = vmul.f32 0.6931472, %v8642_v1  ;;  %v3640_v9 = vmul.f32 0.6931472, %v8644_v2  ;;  %v3817_v1 = vld [vmem:[#allocation10 + $0x2f0] sm:$0xff] }
 0x644   : > { %3557 = vmatpush.bf16.msrb.mxu3 %v2966_v54  ;;  %v12737_v48 = vpop.permute.xlu0 %3150 }
 0x645   : > { %v3185_v16 = vadd.f32 %v12654_v8, %v12737_v48  ;;  %v3241_v40 = vadd.f32 %v3240_v51, %v12737_v48  ;;  %v710_v8 = vld [vmem:[%s14961_s3] sm:$0x1]  ;;  %v3297_v19 = vadd.f32 %v3296_v56, %v12737_v48  ;;  %v3364_v35 = vpop.f32.mrf.mxu1  ;;  %v3809_v56 = vld [vmem:[#allocation10 + $0x2b0] sm:$0xff] }
 0x646   : > { %3594 = vmatpush.bf16.msra.mxu2 %v12621_v5  ;;  %v3322_v5 = vpop.f32.mrf.mxu2  ;;  %8645 = vrcp.f32 %v710_v8 }
 0x647   : > { %v3199_v43 = vadd.f32 %v12661_v10, %v3185_v16  ;;  %v12748_v15 = vpop.permute.xlu1 %3672  ;;  %v3255_v60 = vadd.f32 %v3254_v4, %v3241_v40  ;;  %v3323_v44 = vadd.f32 %v3322_v5, %v3309_v53  ;;  %v3351_v4 = vadd.f32 %v3350_v46, %v12692_v45  ;;  %v3867_v40 = vld [vmem:[#allocation10 + $0x480] sm:$0xff]  ;;  %v3813_v5 = vld [vmem:[#allocation10 + $0x2d0] sm:$0xff] }
 0x648   : > { %3558 = vmatpush.bf16.msrb.mxu3 %v2959_v42  ;;  %v3675_v39 = vmul.f32 %v12748_v15, %v3638_v37  ;;  %v3676_v36 = vmul.f32 %v12748_v15, %v3640_v9  ;;  %v3311_v47 = vadd.f32 %v3310_v58, %v3297_v19  ;;  %v3801_v46 = vld [vmem:[#allocation10 + $0x270] sm:$0xff] }
 0x649   : > { %v3213_v28 = vadd.f32 %v12670_v3, %v3199_v43  ;;  %v3365_v52 = vadd.f32 %v3364_v35, %v3351_v4  ;;  %v3841_v19 = vld [vmem:[#allocation10 + $0x3b0] sm:$0xff] }
 0x64a   : > { %3595 = vmatpush.bf16.msra.mxu2 %v12604_v33  ;;  %v3269_v33 = vadd.f32 %v3268_v29, %v3255_v60  ;;  %v3693_v10 = vmul.f32 1.442695, %v3676_v36  ;;  %v3337_v29 = vadd.f32 %v3336_v20, %v3323_v44  ;;  %v3865_v60 = vld [vmem:[#allocation10 + $0x470] sm:$0xff]  ;;  %v3859_v44 = vld [vmem:[#allocation10 + $0x440] sm:$0xff] }
 0x64b   : > { %3559 = vmatmul.bf16.vlgmr.msrb.gmra.mxu3 %v12098_v12  ;;  %v3227_v61 = vadd.f32 %v12681_v14, %v3213_v28  ;;  %v3857_v4 = vld [vmem:[#allocation10 + $0x430] sm:$0xff] }
 0x64c   : > { %3607 = vmatpush.bf16.msra.mxu3 %v12563_v7  ;;  %v3691_v7 = vmul.f32 1.442695, %v3675_v39  ;;  %v3283_v6 = vadd.f32 %v3282_v32, %v3269_v33  ;;  %v8646_v14 = vpop.eup %8645  ;;  %v3623_v37 = vmax.f32 %v3337_v29, 1e-06  ;;  %v3863_v39 = vld [vmem:[#allocation10 + $0x460] sm:$0xff]  ;;  %v3837_v29 = vld [vmem:[#allocation10 + $0x390] sm:$0xff] }
 0x64d   : > { %v3629_v3 = vmax.f32 %v3227_v61, 1e-06  ;;  %v12766_v30 = vperm.slane %v8646_v14, 0  ;;  %v3366_v61 = vpop.f32.mrf.mxu1 }
 0x64e   : > { %3596 = vmatpush.bf16.msra.mxu2 %v12659_v0  ;;  %8647 = vpow2.f32 %v3691_v7  ;;  %v3630_v51 = vmax.f32 %v3283_v6, 1e-06  ;;  %v3879_v0 = vld [vmem:[#allocation10 + $0x4e0] sm:$0xff]  ;;  %v3324_v63 = vpop.f32.mrf.mxu2  ;;  %v3861_v7 = vld [vmem:[#allocation10 + $0x450] sm:$0xff] }
 0x64f   : > { %8649 = vpow2.f32 %v3693_v10  ;;  %4071 = vmatpush.msra.mxu0 %v3879_v0  ;;  %4357 = vperm.xlu2 %8545, %v12766_v30   ;;  %v3325_v9 = vadd.f32 %v3324_v63, %v3311_v47  ;;  %v3805_v0 = vld [vmem:[#allocation10 + $0x290] sm:$0xff]  ;;  %v3795_v47 = vld [vmem:[#allocation10 + $0x240] sm:$0xff] }
 0x650   : > { %3608 = vmatpush.bf16.msra.mxu3 %v12623_v38  ;;  %8651 = vlog2.f32 %v3629_v3  ;;  %v3877_v38 = vld [vmem:[#allocation10 + $0x4d0] sm:$0xff]  ;;  %v3847_v3 = vld [vmem:[#allocation10 + $0x3e0] sm:$0xff] }
 0x651   : > { %8653 = vlog2.f32 %v3630_v51  ;;  %4072 = vmatpush.msra.mxu0 %v3877_v38  ;;  %v3845_v63 = vld [vmem:[#allocation10 + $0x3d0] sm:$0xff] }
 0x652   : > { %3597 = vmatpush.bf16.msra.mxu2 %v12683_v21 }
 0x653   : > { %4073 = vmatpush.msra.mxu0 %v3875_v17  ;;  %v3843_v17 = vld [vmem:[#allocation10 + $0x3c0] sm:$0xff] }
 0x654   : > { %3609 = vmatpush.bf16.msra.mxu3 %v12649_v57  ;;  %v12763_v62 = vpop.eup %8647  ;;  %v3338_v57 = vpop.f32.mrf.mxu3 }
 0x655   : > { %v12768_v21 = vpop.eup %8649  ;;  %3994 = vmatmul.f32.vlgmr.msrb.gmra.mxu0 %v12763_v62  ;;  %v3339_v8 = vadd.f32 %v3338_v57, %v3325_v9  ;;  %v3799_v57 = vld [vmem:[#allocation10 + $0x260] sm:$0xff] }
 0x656   : > { %3598 = vmatpush.bf16.msra.mxu2 %v12647_v49  ;;  %4017 = vmatmul.f32.vlgmr.msrb.gmra.mxu1 %v12768_v21  ;;  %v3873_v49 = vld [vmem:[#allocation10 + $0x4b0] sm:$0xff]  ;;  %v8652_v34 = vpop.eup %8651  ;;  %v3378_v32 = vpop.f32.mrf.mxu2  ;;  %v3791_v9 = vld [vmem:[#allocation10 + $0x220] sm:$0xff] }
 0x657   : > { %v8654_v27 = vpop.eup %8653  ;;  %v3654_v50 = vmul.f32 0.6931472, %v8652_v34  ;;  %4074 = vmatpush.msra.mxu0 %v3873_v49  ;;  %v3379_v43 = vadd.f32 %v3378_v32, %v3365_v52  ;;  %v3631_v23 = vmax.f32 %v3339_v8, 1e-06  ;;  %v3829_v8 = vld [vmem:[#allocation10 + $0x350] sm:$0xff] }
 0x658   : > { %3610 = vmatpush.bf16.msra.mxu3 %v12625_v26  ;;  %v3656_v26 = vmul.f32 0.6931472, %v8654_v27 }
 0x659   : > { %v3683_v2 = vmul.f32 %v12748_v15, %v3654_v50  ;;  %4075 = vmatpush.msra.mxu0 %v3871_v25  ;;  %v3797_v50 = vld [vmem:[#allocation10 + $0x250] sm:$0xff]  ;;  %v3855_v25 = vld [vmem:[#allocation10 + $0x420] sm:$0xff] }
 0x65a   : > { %3599 = vmatpush.bf16.msra.mxu2 %v12713_v41  ;;  %v3684_v54 = vmul.f32 %v12748_v15, %v3656_v26  ;;  %v3853_v26 = vld [vmem:[#allocation10 + $0x410] sm:$0xff] }
 0x65b   : > { %v3707_v41 = vmul.f32 1.442695, %v3683_v2  ;;  %4076 = vmatpush.msra.mxu0 %v3869_v55  ;;  %v3851_v55 = vld [vmem:[#allocation10 + $0x400] sm:$0xff] }
 0x65c   : > { %3611 = vmatpush.bf16.msra.mxu3 %v12694_v18  ;;  %v3392_v16 = vpop.f32.mrf.mxu3  ;;  %v3815_v18 = vld [vmem:[#allocation10 + $0x2e0] sm:$0xff]  ;;  %v3709_v42 = vmul.f32 1.442695, %v3684_v54  ;;  %v3793_v54 = vld [vmem:[#allocation10 + $0x230] sm:$0xff] }
 0x65d   : > { %8655 = vpow2.f32 %v3707_v41  ;;  %4077 = vmatpush.msra.mxu0 %v3867_v40  ;;  %v3393_v36 = vadd.f32 %v3392_v16, %v3379_v43  ;;  %v3833_v41 = vld [vmem:[#allocation10 + $0x370] sm:$0xff]  ;;  %v3784_v40 = vld [vmem:[#allocation10 + $0x1e8] sm:$0xff] }
 0x65e   : > { %3600 = vmatpush.bf16.msra.mxu2 %v12721_v11  ;;  %8657 = vpow2.f32 %v3709_v42  ;;  %v3352_v11 = vpop.f32.mrf.mxu0  ;;  %v3380_v20 = vpop.f32.mrf.mxu2  ;;  %v3913_v16 = vld [vmem:[#allocation10 + $0x5f0] sm:$0xff]  ;;  %v3831_v42 = vld [vmem:[#allocation10 + $0x360] sm:$0xff] }
 0x65f   : > { %8659 = vlog2.f32 %v3623_v37  ;;  %v3353_v28 = vadd.f32 %v3352_v11, %v12737_v48  ;;  %4078 = vmatpush.msra.mxu0 %v3865_v60  ;;  %v3624_v6 = vmax.f32 %v3393_v36, 1e-06  ;;  %v3786_v37 = vld [vmem:[#allocation10 + $0x1f8] sm:$0xff]  ;;  %4093 = vmatpush.msra.mxu1 %v3913_v16  ;;  %v3911_v60 = vld [vmem:[#allocation10 + $0x5e0] sm:$0xff]  ;;  %v3764_v16 = vld [vmem:[#allocation10 + $0x148] sm:$0xff] }
 0x660   : > { %3612 = vmatpush.bf16.msra.mxu3 %v12706_v22  ;;  %v3811_v22 = vld [vmem:[#allocation10 + $0x2c0] sm:$0xff]  ;;  %8661 = vlog2.f32 %v3631_v23 }
 0x661   : > { %3601 = vmatmul.bf16.vlgmr.msra.gmra.mxu2 %v12040_v31  ;;  %v3849_v31 = vld [vmem:[#allocation10 + $0x3f0] sm:$0xff]  ;;  %4079 = vmatpush.msra.mxu0 %v3863_v39  ;;  %v3367_v58 = vadd.f32 %v3366_v61, %v3353_v28  ;;  %8663 = vlog2.f32 %v3624_v6  ;;  %v3782_v39 = vld [vmem:[#allocation10 + $0x1d8] sm:$0xff] }
 0x662   : > { %4024 = vmatpush.msrb.mxu2 %v3817_v1  ;;  %v3835_v1 = vld [vmem:[#allocation10 + $0x380] sm:$0xff]  ;;  %4094 = vmatpush.msra.mxu1 %v3911_v60  ;;  %v3909_v28 = vld [vmem:[#allocation10 + $0x5d0] sm:$0xff]  ;;  %v3778_v6 = vld [vmem:[#allocation10 + $0x1b8] sm:$0xff] }
 0x663   : > { %v12785_v33 = vpop.eup %8655  ;;  %4080 = vmatpush.msra.mxu0 %v3861_v7  ;;  %v3381_v53 = vadd.f32 %v3380_v20, %v3367_v58  ;;  %v3827_v7 = vld [vmem:[#allocation10 + $0x340] sm:$0xff]  ;;  %v3905_v58 = vld [vmem:[#allocation10 + $0x5b0] sm:$0xff] }
 0x664   : > { %4025 = vmatpush.msrb.mxu2 %v3815_v18  ;;  %3613 = vmatpush.bf16.msra.mxu3 %v12666_v13  ;;  %v12787_v10 = vpop.eup %8657  ;;  %v3807_v13 = vld [vmem:[#allocation10 + $0x2a0] sm:$0xff]  ;;  %v3394_v59 = vpop.f32.mrf.mxu3 }
 0x665   : > { %3997 = vmatmul.f32.gmra.mxu0 %v12785_v33  ;;  %4020 = vmatmul.f32.gmra.mxu1 %v12787_v10  ;;  %v8660_v51 = vpop.eup %8659  ;;  %v3395_v14 = vadd.f32 %v3394_v59, %v3381_v53  ;;  %v3420_v59 = vpop.f32.mrf.mxu1  ;;  %v3903_v53 = vld [vmem:[#allocation10 + $0x5a0] sm:$0xff] }
 0x666   : > { %4026 = vmatpush.msrb.mxu2 %v3813_v5  ;;  %v3642_v38 = vmul.f32 0.6931472, %v8660_v51  ;;  %4081 = vmatpush.msra.mxu0 %v3859_v44  ;;  %v8662_v27 = vpop.eup %8661  ;;  %v3789_v5 = vld [vmem:[#allocation10 + $0x210] sm:$0xff]  ;;  %v3406_v36 = vpop.f32.mrf.mxu0 }
 0x667   : > { %v3632_v49 = vmax.f32 %v3395_v14, 1e-06  ;;  %v8664_v35 = vpop.eup %8663  ;;  %v3658_v52 = vmul.f32 0.6931472, %v8662_v27  ;;  %v3407_v61 = vadd.f32 %v3406_v36, %v12692_v45  ;;  %4095 = vmatpush.msra.mxu1 %v3909_v28  ;;  %v3825_v51 = vld [vmem:[#allocation10 + $0x330] sm:$0xff]  ;;  %v3774_v14 = vld [vmem:[#allocation10 + $0x198] sm:$0xff] }
 0x668   : > { %4027 = vmatpush.msrb.mxu2 %v3811_v22  ;;  %3614 = vmatpush.bf16.msra.mxu3 %v12730_v24  ;;  %v3803_v24 = vld [vmem:[#allocation10 + $0x280] sm:$0xff]  ;;  %v3677_v34 = vmul.f32 %v12748_v15, %v3642_v38  ;;  %v3644_v32 = vmul.f32 0.6931472, %v8664_v35  ;;  %v3758_v28 = vld [vmem:[#allocation10 + $0x118] sm:$0xff] }
 0x669   : > { %4082 = vmatpush.msra.mxu0 %v3857_v4  ;;  %8665 = vlog2.f32 %v3632_v49  ;;  %v3685_v18 = vmul.f32 %v12748_v15, %v3658_v52  ;;  %v3787_v22 = vld [vmem:[#allocation10 + $0x200] sm:$0xff]  ;;  %v3768_v52 = vld [vmem:[#allocation10 + $0x168] sm:$0xff] }
 0x66a   : > { %4028 = vmatpush.msrb.mxu2 %v3809_v56  ;;  %v3695_v2 = vmul.f32 1.442695, %v3677_v34  ;;  %v3678_v43 = vmul.f32 %v12748_v15, %v3644_v32  ;;  %v3780_v56 = vld [vmem:[#allocation10 + $0x1c8] sm:$0xff]  ;;  %v3899_v4 = vld [vmem:[#allocation10 + $0x580] sm:$0xff] }
 0x66b   : > { %3615 = vmatmul.bf16.vlgmr.msra.gmra.mxu3 %v12098_v12  ;;  %v3839_v12 = vld [vmem:[#allocation10 + $0x3a0] sm:$0xff]  ;;  %4083 = vmatpush.msra.mxu0 %v3855_v25  ;;  %v3711_v23 = vmul.f32 1.442695, %v3685_v18 }
 0x66c   : > { %4047 = vmatpush.msrb.mxu3 %v3849_v31  ;;  %4029 = vmatpush.msrb.mxu2 %v3807_v13  ;;  %8667 = vpow2.f32 %v3695_v2  ;;  %v3907_v31 = vld [vmem:[#allocation10 + $0x5c0] sm:$0xff]  ;;  %v3697_v20 = vmul.f32 1.442695, %v3678_v43 }
 0x66d   : > { %4084 = vmatpush.msra.mxu0 %v3853_v26  ;;  %4096 = vmatpush.msra.mxu1 %v3907_v31  ;;  %8669 = vpow2.f32 %v3711_v23  ;;  %v3895_v2 = vld [vmem:[#allocation10 + $0x560] sm:$0xff]  ;;  %v3422_v32 = vpop.f32.mrf.mxu1 }
 0x66e   : > { %4048 = vmatpush.msrb.mxu3 %v3847_v3  ;;  %4030 = vmatpush.msrb.mxu2 %v3805_v0  ;;  %v3776_v0 = vld [vmem:[#allocation10 + $0x1a8] sm:$0xff]  ;;  %8671 = vpow2.f32 %v3697_v20  ;;  %v3408_v34 = vpop.f32.mrf.mxu0  ;;  %v3818_v20 = vld [vmem:[#allocation10 + $0x2f8] sm:$0xff] }
 0x66f   : > { %4085 = vmatpush.msra.mxu0 %v3851_v55  ;;  %v8666_v11 = vpop.eup %8665  ;;  %4097 = vmatpush.msra.mxu1 %v3905_v58 }
 0x670   : > { %4049 = vmatpush.msrb.mxu3 %v3845_v63  ;;  %4031 = vmatpush.msrb.mxu2 %v3803_v24  ;;  %v3660_v13 = vmul.f32 0.6931472, %v8666_v11  ;;  %v3823_v63 = vld [vmem:[#allocation10 + $0x320] sm:$0xff]  ;;  %v3421_v24 = vadd.f32 %v3420_v59, %v3407_v61  ;;  %v3760_v11 = vld [vmem:[#allocation10 + $0x128] sm:$0xff] }
 0x671   : > { %4185 = vmatpush.msrb.mxu0 %v3786_v37  ;;  %4098 = vmatpush.msra.mxu1 %v3903_v53  ;;  %v3883_v61 = vld [vmem:[#allocation10 + $0x500] sm:$0xff]  ;;  %v3812_v53 = vld [vmem:[#allocation10 + $0x2c8] sm:$0xff] }
 0x672   : > { %4050 = vmatpush.msrb.mxu3 %v3843_v17  ;;  %4032 = vmatpush.msrb.mxu2 %v3801_v46  ;;  %v12797_v3 = vpop.eup %8667  ;;  %v3686_v38 = vmul.f32 %v12748_v15, %v3660_v13  ;;  %v3901_v17 = vld [vmem:[#allocation10 + $0x590] sm:$0xff]  ;;  %v3816_v13 = vld [vmem:[#allocation10 + $0x2e8] sm:$0xff] }
 0x673   : > { %4186 = vmatpush.msrb.mxu0 %v3784_v40  ;;  %v3821_v46 = vld [vmem:[#allocation10 + $0x310] sm:$0xff]  ;;  %4099 = vmatpush.msra.mxu1 %v3901_v17  ;;  %v12801_v25 = vpop.eup %8669  ;;  %v3762_v40 = vld [vmem:[#allocation10 + $0x138] sm:$0xff] }
 0x674   : > { %4051 = vmatpush.msrb.mxu3 %v3841_v19  ;;  %4033 = vmatpush.msrb.mxu2 %v3799_v57  ;;  %v3772_v57 = vld [vmem:[#allocation10 + $0x188] sm:$0xff]  ;;  %v3713_v27 = vmul.f32 1.442695, %v3686_v38  ;;  %v12804_v26 = vpop.eup %8671  ;;  %v3910_v17 = vld [vmem:[#allocation10 + $0x5d8] sm:$0xff] }
 0x675   : > { %4187 = vmatpush.msrb.mxu0 %v3782_v39  ;;  %4100 = vmatpush.msra.mxu1 %v3899_v4  ;;  %v3887_v39 = vld [vmem:[#allocation10 + $0x520] sm:$0xff]  ;;  %v3912_v38 = vld [vmem:[#allocation10 + $0x5e8] sm:$0xff]  ;;  %v3906_v4 = vld [vmem:[#allocation10 + $0x5b8] sm:$0xff] }
 0x676   : > { %4052 = vmatpush.msrb.mxu3 %v3839_v12  ;;  %4034 = vmatpush.msrb.mxu2 %v3797_v50  ;;  %v3819_v12 = vld [vmem:[#allocation10 + $0x300] sm:$0xff]  ;;  %v3770_v50 = vld [vmem:[#allocation10 + $0x178] sm:$0xff]  ;;  %8673 = vpow2.f32 %v3713_v27  ;;  %v3904_v27 = vld [vmem:[#allocation10 + $0x5a8] sm:$0xff] }
 0x677   : > { %4188 = vmatpush.msrb.mxu0 %v3780_v56  ;;  %v3885_v56 = vld [vmem:[#allocation10 + $0x510] sm:$0xff] }
 0x678   : > { %4053 = vmatpush.msrb.mxu3 %v3837_v29  ;;  %4035 = vmatpush.msrb.mxu2 %v3795_v47  ;;  %v3409_v29 = vadd.f32 %v3408_v34, %v12737_v48  ;;  %v3897_v47 = vld [vmem:[#allocation10 + $0x570] sm:$0xff] }
 0x679   : > { %4189 = vmatpush.msrb.mxu0 %v3778_v6  ;;  %4101 = vmatpush.msra.mxu1 %v3897_v47 }
 0x67a   : > { %4054 = vmatpush.msrb.mxu3 %v3835_v1  ;;  %4036 = vmatpush.msrb.mxu2 %v3793_v54  ;;  %v3766_v54 = vld [vmem:[#allocation10 + $0x158] sm:$0xff]  ;;  %v3423_v55 = vadd.f32 %v3422_v32, %v3409_v29  ;;  %v3462_v29 = vpop.f32.mrf.mxu0  ;;  %v3937_v32 = vld [vmem:[#allocation10 + $0x6b0] sm:$0xff] }
 0x67b   : > { %4190 = vmatpush.msrb.mxu0 %v3776_v0  ;;  %4102 = vmatpush.msra.mxu1 %v3895_v2  ;;  %v3914_v0 = vld [vmem:[#allocation10 + $0x5f8] sm:$0xff]  ;;  %v3463_v47 = vadd.f32 %v3462_v29, %v12692_v45  ;;  %v3800_v2 = vld [vmem:[#allocation10 + $0x268] sm:$0xff]  ;;  %v3961_v29 = vld [vmem:[#allocation10 + $0x770] sm:$0xff] }
 0x67c   : > { %4055 = vmatpush.msrb.mxu3 %v3833_v41  ;;  %4037 = vmatpush.msrb.mxu2 %v3791_v9  ;;  %v3893_v41 = vld [vmem:[#allocation10 + $0x550] sm:$0xff]  ;;  %v12808_v60 = vpop.eup %8673 }
 0x67d   : > { %4191 = vmatpush.msrb.mxu0 %v3774_v14  ;;  %4103 = vmatpush.msra.mxu1 %v3893_v41  ;;  %v3810_v14 = vld [vmem:[#allocation10 + $0x2b8] sm:$0xff]  ;;  %v3935_v41 = vld [vmem:[#allocation10 + $0x6a0] sm:$0xff] }
 0x67e   : > { %4056 = vmatpush.msrb.mxu3 %v3831_v42  ;;  %4038 = vmatpush.msrb.mxu2 %v3789_v5  ;;  %v3434_v44 = vpop.f32.mrf.mxu2  ;;  %v3891_v42 = vld [vmem:[#allocation10 + $0x540] sm:$0xff]  ;;  %v3889_v5 = vld [vmem:[#allocation10 + $0x530] sm:$0xff] }
 0x67f   : > { %v3448_v19 = vpop.f32.mrf.mxu3  ;;  %v3435_v49 = vadd.f32 %v3434_v44, %v3421_v24  ;;  %4192 = vmatpush.msrb.mxu0 %v3772_v57  ;;  %4104 = vmatpush.msra.mxu1 %v3891_v42  ;;  %v3908_v44 = vld [vmem:[#allocation10 + $0x5c8] sm:$0xff]  ;;  %v3806_v57 = vld [vmem:[#allocation10 + $0x298] sm:$0xff]  ;;  %v3933_v42 = vld [vmem:[#allocation10 + $0x690] sm:$0xff] }
 0x680   : > { %4057 = vmatpush.msrb.mxu3 %v3829_v8  ;;  %4039 = vmatpush.msrb.mxu2 %v3787_v22 }
 0x681   : > { %4040 = vmatmul.f32.vlgmr.msrb.gmra.mxu2 %v12797_v3  ;;  %v3449_v35 = vadd.f32 %v3448_v19, %v3435_v49  ;;  %4193 = vmatpush.msrb.mxu0 %v3770_v50  ;;  %v3945_v19 = vld [vmem:[#allocation10 + $0x6f0] sm:$0xff]  ;;  %v3943_v49 = vld [vmem:[#allocation10 + $0x6e0] sm:$0xff] }
 0x682   : > { %4058 = vmatpush.msrb.mxu3 %v3827_v7  ;;  %4105 = vmatpush.msra.mxu1 %v3889_v5  ;;  %v3756_v7 = vld [vmem:[#allocation10 + $0x108] sm:$0xff]  ;;  %v3941_v50 = vld [vmem:[#allocation10 + $0x6d0] sm:$0xff] }
 0x683   : > { %v3625_v1 = vmax.f32 %v3449_v35, 1e-06  ;;  %4194 = vmatpush.msrb.mxu0 %v3768_v52  ;;  %4116 = vmatpush.msra.mxu2 %v3945_v19  ;;  %v3802_v35 = vld [vmem:[#allocation10 + $0x278] sm:$0xff]  ;;  %v3896_v5 = vld [vmem:[#allocation10 + $0x568] sm:$0xff] }
 0x684   : > { %4059 = vmatpush.msrb.mxu3 %v3825_v51  ;;  %4106 = vmatpush.msra.mxu1 %v3887_v39  ;;  %v3814_v51 = vld [vmem:[#allocation10 + $0x2d8] sm:$0xff] }
 0x685   : > { %8675 = vlog2.f32 %v3625_v1  ;;  %4195 = vmatpush.msrb.mxu0 %v3766_v54  ;;  %4117 = vmatpush.msra.mxu2 %v3943_v49  ;;  %v3902_v52 = vld [vmem:[#allocation10 + $0x598] sm:$0xff]  ;;  %v3939_v1 = vld [vmem:[#allocation10 + $0x6c0] sm:$0xff]  ;;  %v3917_v49 = vld [vmem:[#allocation10 + $0x610] sm:$0xff] }
 0x686   : > { %4060 = vmatpush.msrb.mxu3 %v3823_v63  ;;  %v3436_v37 = vpop.f32.mrf.mxu2  ;;  %4107 = vmatpush.msra.mxu1 %v3885_v56  ;;  %v3798_v54 = vld [vmem:[#allocation10 + $0x258] sm:$0xff]  ;;  %v3892_v56 = vld [vmem:[#allocation10 + $0x548] sm:$0xff] }
 0x687   : > { %v3450_v9 = vpop.f32.mrf.mxu3  ;;  %v3437_v18 = vadd.f32 %v3436_v37, %v3423_v55  ;;  %4196 = vmatpush.msrb.mxu0 %v3764_v16  ;;  %4118 = vmatpush.msra.mxu2 %v3941_v50  ;;  %v3900_v55 = vld [vmem:[#allocation10 + $0x588] sm:$0xff]  ;;  %v3476_v37 = vpop.f32.mrf.mxu1  ;;  %v3894_v39 = vld [vmem:[#allocation10 + $0x558] sm:$0xff]  ;;  %v3915_v50 = vld [vmem:[#allocation10 + $0x600] sm:$0xff] }
 0x688   : > { %4061 = vmatpush.msrb.mxu3 %v3821_v46  ;;  %4108 = vmatpush.msra.mxu1 %v3883_v61  ;;  %v3808_v46 = vld [vmem:[#allocation10 + $0x2a8] sm:$0xff]  ;;  %v3477_v16 = vadd.f32 %v3476_v37, %v3463_v47  ;;  %v3850_v47 = vld [vmem:[#allocation10 + $0x3f8] sm:$0xff] }
 0x689   : > { %4043 = vmatmul.f32.gmra.mxu2 %v12801_v25  ;;  %v3451_v43 = vadd.f32 %v3450_v9, %v3437_v18  ;;  %4197 = vmatpush.msrb.mxu0 %v3762_v40  ;;  %v3796_v9 = vld [vmem:[#allocation10 + $0x248] sm:$0xff]  ;;  %v3898_v18 = vld [vmem:[#allocation10 + $0x578] sm:$0xff] }
 0x68a   : > { %4062 = vmatpush.msrb.mxu3 %v3819_v12  ;;  %4208 = vmatpush.msrb.mxu1 %v3818_v20  ;;  %v3804_v12 = vld [vmem:[#allocation10 + $0x288] sm:$0xff] }
 0x68b   : > { %4063 = vmatmul.f32.vlgmr.msrb.gmra.mxu3 %v12804_v26  ;;  %v8676_v8 = vpop.eup %8675  ;;  %v3633_v22 = vmax.f32 %v3451_v43, 1e-06  ;;  %4198 = vmatpush.msrb.mxu0 %v3760_v11  ;;  %v3794_v43 = vld [vmem:[#allocation10 + $0x238] sm:$0xff]  ;;  %v3931_v11 = vld [vmem:[#allocation10 + $0x680] sm:$0xff] }
 0x68c   : > { %v3646_v36 = vmul.f32 0.6931472, %v8676_v8  ;;  %4209 = vmatpush.msrb.mxu1 %v3816_v13  ;;  %4119 = vmatpush.msra.mxu2 %v3939_v1  ;;  %v3792_v8 = vld [vmem:[#allocation10 + $0x228] sm:$0xff]  ;;  %v3890_v13 = vld [vmem:[#allocation10 + $0x538] sm:$0xff]  ;;  %v3959_v1 = vld [vmem:[#allocation10 + $0x760] sm:$0xff] }
 0x68d   : > { %8677 = vlog2.f32 %v3633_v22  ;;  %4199 = vmatpush.msrb.mxu0 %v3758_v28  ;;  %v3790_v28 = vld [vmem:[#allocation10 + $0x218] sm:$0xff] }
 0x68e   : > { %v3679_v31 = vmul.f32 %v12748_v15, %v3646_v36  ;;  %4210 = vmatpush.msrb.mxu1 %v3814_v51  ;;  %4120 = vmatpush.msra.mxu2 %v3937_v32  ;;  %v3929_v36 = vld [vmem:[#allocation10 + $0x670] sm:$0xff]  ;;  %v3888_v51 = vld [vmem:[#allocation10 + $0x528] sm:$0xff] }
 0x68f   : > { %4200 = vmatpush.msrb.mxu0 %v3756_v7  ;;  %v3464_v7 = vpop.f32.mrf.mxu0 }
 0x690   : > { %v3699_v23 = vmul.f32 1.442695, %v3679_v31  ;;  %4211 = vmatpush.msrb.mxu1 %v3812_v53  ;;  %4121 = vmatpush.msra.mxu2 %v3935_v41  ;;  %v3927_v31 = vld [vmem:[#allocation10 + $0x660] sm:$0xff]  ;;  %v3846_v41 = vld [vmem:[#allocation10 + $0x3d8] sm:$0xff] }
 0x692   : > { %8679 = vpow2.f32 %v3699_v23  ;;  %4212 = vmatpush.msrb.mxu1 %v3810_v14  ;;  %4122 = vmatpush.msra.mxu2 %v3933_v42  ;;  %v3465_v23 = vadd.f32 %v3464_v7, %v12737_v48  ;;  %v3949_v7 = vld [vmem:[#allocation10 + $0x710] sm:$0xff] }
 0x693   : > { %4066 = vmatmul.f32.gmra.mxu3 %v12808_v60  ;;  %v8678_v6 = vpop.eup %8677 }
 0x694   : > { %v3662_v58 = vmul.f32 0.6931472, %v8678_v6  ;;  %4213 = vmatpush.msrb.mxu1 %v3808_v46  ;;  %4123 = vmatpush.msra.mxu2 %v3931_v11  ;;  %v3925_v6 = vld [vmem:[#allocation10 + $0x650] sm:$0xff]  ;;  %v3842_v11 = vld [vmem:[#allocation10 + $0x3b8] sm:$0xff] }
 0x695   : > { %v3921_v46 = vld [vmem:[#allocation10 + $0x630] sm:$0xff] }
 0x696   : > { %v3687_v59 = vmul.f32 %v12748_v15, %v3662_v58  ;;  %4214 = vmatpush.msrb.mxu1 %v3806_v57  ;;  %4124 = vmatpush.msra.mxu2 %v3929_v36 }
 0x697   : > { %v3518_v32 = vpop.f32.mrf.mxu0 }
 0x698   : > { %v12813_v63 = vpop.eup %8679  ;;  %v3715_v24 = vmul.f32 1.442695, %v3687_v59  ;;  %4215 = vmatpush.msrb.mxu1 %v3804_v12  ;;  %4125 = vmatpush.msra.mxu2 %v3927_v31  ;;  %v3478_v59 = vpop.f32.mrf.mxu1  ;;  %v3944_v31 = vld [vmem:[#allocation10 + $0x6e8] sm:$0xff] }
 0x699   : > { %4086 = vmatmul.f32.vlgmr.msra.gmra.mxu0 %v12813_v63  ;;  %v3479_v53 = vadd.f32 %v3478_v59, %v3465_v23  ;;  %v3942_v23 = vld [vmem:[#allocation10 + $0x6d8] sm:$0xff]  ;;  %v3940_v59 = vld [vmem:[#allocation10 + $0x6c8] sm:$0xff] }
 0x69a   : > { %8681 = vpow2.f32 %v3715_v24  ;;  %4277 = vmatpush.msra.mxu0 %v3914_v0  ;;  %4216 = vmatpush.msrb.mxu1 %v3802_v35  ;;  %v3886_v24 = vld [vmem:[#allocation10 + $0x518] sm:$0xff] }
 0x69b   : > { %4126 = vmatpush.msra.mxu2 %v3925_v6  ;;  %v3754_v6 = vld [vmem:[#allocation10 + $0xf8] sm:$0xff] }
 0x69c   : > { %4278 = vmatpush.msra.mxu0 %v3912_v38  ;;  %4217 = vmatpush.msrb.mxu1 %v3800_v2  ;;  %v3923_v38 = vld [vmem:[#allocation10 + $0x640] sm:$0xff]  ;;  %v3848_v2 = vld [vmem:[#allocation10 + $0x3e8] sm:$0xff] }
 0x69d   : > { %4127 = vmatpush.msra.mxu2 %v3923_v38  ;;  %v3834_v38 = vld [vmem:[#allocation10 + $0x378] sm:$0xff] }
 0x69e   : > { %4279 = vmatpush.msra.mxu0 %v3910_v17  ;;  %4218 = vmatpush.msrb.mxu1 %v3798_v54  ;;  %v3884_v17 = vld [vmem:[#allocation10 + $0x508] sm:$0xff]  ;;  %v3519_v54 = vadd.f32 %v3518_v32, %v12692_v45  ;;  %v3930_v32 = vld [vmem:[#allocation10 + $0x678] sm:$0xff] }
 0x69f   : > { %4128 = vmatpush.msra.mxu2 %v3921_v46  ;;  %v3752_v46 = vld [vmem:[#allocation10 + $0xe8] sm:$0xff] }
 0x6a0   : > { %v12816_v34 = vpop.eup %8681  ;;  %4280 = vmatpush.msra.mxu0 %v3908_v44  ;;  %4219 = vmatpush.msrb.mxu1 %v3796_v9  ;;  %v3532_v42 = vpop.f32.mrf.mxu1 }
 0x6a1   : > { %4089 = vmatmul.f32.gmra.mxu0 %v12816_v34 }
 0x6a2   : > { %4281 = vmatpush.msra.mxu0 %v3906_v4  ;;  %v3490_v40 = vpop.f32.mrf.mxu2  ;;  %4220 = vmatpush.msrb.mxu1 %v3794_v43 }
 0x6a3   : > { %v3491_v22 = vadd.f32 %v3490_v40, %v3477_v16  ;;  %v3955_v16 = vld [vmem:[#allocation10 + $0x740] sm:$0xff]  ;;  %v3533_v40 = vadd.f32 %v3532_v42, %v3519_v54  ;;  %v3826_v54 = vld [vmem:[#allocation10 + $0x338] sm:$0xff] }
 0x6a4   : > { %4282 = vmatpush.msra.mxu0 %v3904_v27  ;;  %4221 = vmatpush.msrb.mxu1 %v3792_v8  ;;  %v3963_v27 = vld [vmem:[#allocation10 + $0x780] sm:$0x3]  ;;  %v3742_v42 = vld [vmem:[#allocation10 + $0x98] sm:$0xff] }
 0x6a5   : > { %7838 = vmatpush.msk.msra.mxu3 %vm15004_vm11, %v3963_v27  ;;  %v3830_v27 = vld [vmem:[#allocation10 + $0x358] sm:$0xff] }
 0x6a6   : > { %4283 = vmatpush.msra.mxu0 %v3902_v52  ;;  %4222 = vmatpush.msrb.mxu1 %v3790_v28 }
 0x6a7   : > { %4147 = vmatpush.msra.mxu3 %v3961_v29 }
 0x6a8   : > { %4284 = vmatpush.msra.mxu0 %v3900_v55  ;;  %v3957_v55 = vld [vmem:[#allocation10 + $0x750] sm:$0xff] }
 0x6a9   : > { %4201 = vmatmul.f32.vlgmr.msrb.gmra.mxu0 %v12768_v21  ;;  %v3788_v21 = vld [vmem:[#allocation10 + $0x208] sm:$0xff]  ;;  %4148 = vmatpush.msra.mxu3 %v3959_v1 }
 0x6aa   : > { %4285 = vmatpush.msra.mxu0 %v3898_v18  ;;  %4223 = vmatpush.msrb.mxu1 %v3788_v21  ;;  %v3492_v0 = vpop.f32.mrf.mxu2  ;;  %v3844_v18 = vld [vmem:[#allocation10 + $0x3c8] sm:$0xff]  ;;  %v3838_v21 = vld [vmem:[#allocation10 + $0x398] sm:$0xff] }
 0x6ab   : > { %v3493_v14 = vadd.f32 %v3492_v0, %v3479_v53  ;;  %4149 = vmatpush.msra.mxu3 %v3957_v55 }
 0x6ac   : > { %4286 = vmatpush.msra.mxu0 %v3896_v5  ;;  %v3953_v5 = vld [vmem:[#allocation10 + $0x730] sm:$0xff] }
 0x6ad   : > { %4150 = vmatpush.msra.mxu3 %v3955_v16  ;;  %v3928_v16 = vld [vmem:[#allocation10 + $0x668] sm:$0xff] }
 0x6ae   : > { %v3504_v61 = vpop.f32.mrf.mxu3  ;;  %4287 = vmatpush.msra.mxu0 %v3894_v39  ;;  %v3951_v39 = vld [vmem:[#allocation10 + $0x720] sm:$0xff] }
 0x6af   : > { %v3505_v20 = vadd.f32 %v3504_v61, %v3491_v22  ;;  %v3946_v22 = vld [vmem:[#allocation10 + $0x6f8] sm:$0xff]  ;;  %4151 = vmatpush.msra.mxu3 %v3953_v5 }
 0x6b0   : > { %4288 = vmatpush.msra.mxu0 %v3892_v56  ;;  %v3840_v56 = vld [vmem:[#allocation10 + $0x3a8] sm:$0xff]  ;;  %v3822_v5 = vld [vmem:[#allocation10 + $0x318] sm:$0xff] }
 0x6b1   : > { %v3626_v58 = vmax.f32 %v3505_v20, 1e-06  ;;  %4204 = vmatmul.f32.gmra.mxu0 %v12787_v10  ;;  %v3919_v10 = vld [vmem:[#allocation10 + $0x620] sm:$0xff]  ;;  %4152 = vmatpush.msra.mxu3 %v3951_v39  ;;  %v3820_v39 = vld [vmem:[#allocation10 + $0x308] sm:$0xff] }
 0x6b2   : > { %4289 = vmatpush.msra.mxu0 %v3890_v13  ;;  %4129 = vmatpush.msra.mxu2 %v3919_v10  ;;  %v3947_v20 = vld [vmem:[#allocation10 + $0x700] sm:$0xff]  ;;  %v3836_v13 = vld [vmem:[#allocation10 + $0x388] sm:$0xff] }
 0x6b3   : > { %8683 = vlog2.f32 %v3626_v58  ;;  %4153 = vmatpush.msra.mxu3 %v3949_v7  ;;  %v3520_v58 = vpop.f32.mrf.mxu0  ;;  %v3936_v10 = vld [vmem:[#allocation10 + $0x6a8] sm:$0xff] }
 0x6b4   : > { %4290 = vmatpush.msra.mxu0 %v3888_v51  ;;  %4130 = vmatpush.msra.mxu2 %v3917_v49  ;;  %v3521_v0 = vadd.f32 %v3520_v58, %v12737_v48  ;;  %v3750_v49 = vld [vmem:[#allocation10 + $0xd8] sm:$0xff] }
 0x6b5   : > { %4154 = vmatpush.msra.mxu3 %v3947_v20 }
 0x6b6   : > { %v3506_v44 = vpop.f32.mrf.mxu3  ;;  %4291 = vmatpush.msra.mxu0 %v3886_v24  ;;  %4131 = vmatpush.msra.mxu2 %v3915_v50  ;;  %v3938_v24 = vld [vmem:[#allocation10 + $0x6b8] sm:$0xff] }
 0x6b7   : > { %v3507_v19 = vadd.f32 %v3506_v44, %v3493_v14  ;;  %4162 = vmatpush.msrb.mxu3 %v3754_v6  ;;  %v3534_v44 = vpop.f32.mrf.mxu1  ;;  %v3918_v6 = vld [vmem:[#allocation10 + $0x618] sm:$0xff] }
 0x6b8   : > { %4292 = vmatpush.msra.mxu0 %v3884_v17  ;;  %4231 = vmatpush.msrb.mxu2 %v3850_v47  ;;  %v3932_v47 = vld [vmem:[#allocation10 + $0x688] sm:$0xff] }
 0x6b9   : > { %v8684_v57 = vpop.eup %8683  ;;  %v3634_v4 = vmax.f32 %v3507_v19, 1e-06  ;;  %4163 = vmatpush.msrb.mxu3 %v3752_v46  ;;  %v3728_v46 = vld [vmem:[#allocation10 + $0x28] sm:$0xff] }
 0x6ba   : > { %v3648_v12 = vmul.f32 0.6931472, %v8684_v57  ;;  %4232 = vmatpush.msrb.mxu2 %v3848_v2  ;;  %v3832_v57 = vld [vmem:[#allocation10 + $0x368] sm:$0xff]  ;;  %v3746_v2 = vld [vmem:[#allocation10 + $0xb8] sm:$0xff] }
 0x6bb   : > { %8685 = vlog2.f32 %v3634_v4  ;;  %v3535_v4 = vadd.f32 %v3534_v44, %v3521_v0  ;;  %4164 = vmatpush.msrb.mxu3 %v3750_v49 }
 0x6bc   : > { %v3680_v35 = vmul.f32 %v12748_v15, %v3648_v12  ;;  %4233 = vmatpush.msrb.mxu2 %v3846_v41  ;;  %v3934_v12 = vld [vmem:[#allocation10 + $0x698] sm:$0xff] }
 0x6be   : > { %v3701_v52 = vmul.f32 1.442695, %v3680_v35  ;;  %4234 = vmatpush.msrb.mxu2 %v3844_v18  ;;  %v3748_v35 = vld [vmem:[#allocation10 + $0xc8] sm:$0xff] }
 0x6bf   : > { %4165 = vmatpush.msrb.mxu3 %v3748_v35  ;;  %v3824_v18 = vld [vmem:[#allocation10 + $0x328] sm:$0xff] }
 0x6c0   : > { %8687 = vpow2.f32 %v3701_v52  ;;  %4235 = vmatpush.msrb.mxu2 %v3842_v11  ;;  %v3828_v52 = vld [vmem:[#allocation10 + $0x348] sm:$0xff] }
 0x6c1   : > { %v8686_v37 = vpop.eup %8685  ;;  %4166 = vmatpush.msrb.mxu3 %v3746_v2  ;;  %v3740_v11 = vld [vmem:[#allocation10 + $0x88] sm:$0xff] }
 0x6c2   : > { %v3664_v9 = vmul.f32 0.6931472, %v8686_v37  ;;  %4236 = vmatpush.msrb.mxu2 %v3840_v56  ;;  %v3744_v37 = vld [vmem:[#allocation10 + $0xa8] sm:$0xff]  ;;  %v3574_v56 = vpop.f32.mrf.mxu0 }
 0x6c3   : > { %4167 = vmatpush.msrb.mxu3 %v3744_v37  ;;  %v3575_v20 = vadd.f32 %v3574_v56, %v12692_v45  ;;  %v3730_v45 = vld [vmem:[#allocation10 + $0x38] sm:$0xff]  ;;  %v3952_v2 = vld [vmem:[#allocation10 + $0x728] sm:$0xff] }
 0x6c4   : > { %v3688_v43 = vmul.f32 %v12748_v15, %v3664_v9  ;;  %v3546_v8 = vpop.f32.mrf.mxu2  ;;  %4237 = vmatpush.msrb.mxu2 %v3838_v21  ;;  %v3588_v21 = vpop.f32.mrf.mxu1  ;;  %v3872_v56 = vld [vmem:[#allocation10 + $0x4a8] sm:$0xff] }
 0x6c5   : > { %v3547_v61 = vadd.f32 %v3546_v8, %v3533_v40  ;;  %4168 = vmatpush.msrb.mxu3 %v3742_v42 }
 0x6c6   : > { %v8688_v36 = vpop.eup %8687  ;;  %v3717_v28 = vmul.f32 1.442695, %v3688_v43  ;;  %4238 = vmatpush.msrb.mxu2 %v3836_v13  ;;  %v3926_v43 = vld [vmem:[#allocation10 + $0x658] sm:$0xff] }
 0x6c7   : > { %4109 = vmatmul.f32.vlgmr.msra.gmra.mxu1 %v8688_v36  ;;  %4293 = vmatmul.f32.vlgmr.msra.gmra.mxu0 %v8688_v36  ;;  %v3922_v36 = vld [vmem:[#allocation10 + $0x638] sm:$0xff] }
 0x6c8   : > { %4300 = vmatpush.msra.mxu1 %v3946_v22  ;;  %8689 = vpow2.f32 %v3717_v28  ;;  %4239 = vmatpush.msrb.mxu2 %v3834_v38  ;;  %v3924_v22 = vld [vmem:[#allocation10 + $0x648] sm:$0xff]  ;;  %v3589_v38 = vadd.f32 %v3588_v21, %v3575_v20  ;;  %v3866_v21 = vld [vmem:[#allocation10 + $0x478] sm:$0xff] }
 0x6c9   : > { %4169 = vmatpush.msrb.mxu3 %v3740_v11  ;;  %v3882_v11 = vld [vmem:[#allocation10 + $0x4f8] sm:$0xff]  ;;  %v3864_v20 = vld [vmem:[#allocation10 + $0x468] sm:$0xff] }
 0x6ca   : > { %4301 = vmatpush.msra.mxu1 %v3944_v31  ;;  %4240 = vmatpush.msrb.mxu2 %v3832_v57  ;;  %v3736_v31 = vld [vmem:[#allocation10 + $0x68] sm:$0xff]  ;;  %v3576_v44 = vpop.f32.mrf.mxu0 }
 0x6cc   : > { %4302 = vmatpush.msra.mxu1 %v3942_v23  ;;  %v3548_v19 = vpop.f32.mrf.mxu2  ;;  %4241 = vmatpush.msrb.mxu2 %v3830_v27  ;;  %v3734_v23 = vld [vmem:[#allocation10 + $0x58] sm:$0xff]  ;;  %v3590_v49 = vpop.f32.mrf.mxu1 }
 0x6cd   : > { %v3549_v50 = vadd.f32 %v3548_v19, %v3535_v4  ;;  %v3726_v4 = vld [vmem:[#allocation10 + $0x18] sm:$0xff] }
 0x6ce   : > { %v3560_v51 = vpop.f32.mrf.mxu3  ;;  %v8690_v14 = vpop.eup %8689  ;;  %4303 = vmatpush.msra.mxu1 %v3940_v59  ;;  %4242 = vmatpush.msrb.mxu2 %v3828_v52  ;;  %v3732_v59 = vld [vmem:[#allocation10 + $0x48] sm:$0xff]  ;;  %v3954_v52 = vld [vmem:[#allocation10 + $0x738] sm:$0xff] }
 0x6cf   : > { %v3561_v53 = vadd.f32 %v3560_v51, %v3547_v61  ;;  %4112 = vmatmul.f32.gmra.mxu1 %v8690_v14  ;;  %4296 = vmatmul.f32.gmra.mxu0 %v8690_v14  ;;  %v3920_v61 = vld [vmem:[#allocation10 + $0x628] sm:$0xff] }
 0x6d0   : > { %4304 = vmatpush.msra.mxu1 %v3938_v24  ;;  %4243 = vmatpush.msrb.mxu2 %v3826_v54  ;;  %v3964_v51 = vld [vmem:[#allocation10 + $0x788] sm:$0x3] }
 0x6d1   : > { %v3627_v17 = vmax.f32 %v3561_v53, 1e-06  ;;  %v3916_v24 = vld [vmem:[#allocation10 + $0x608] sm:$0xff] }
 0x6d2   : > { %4305 = vmatpush.msra.mxu1 %v3936_v10  ;;  %4244 = vmatpush.msrb.mxu2 %v3824_v18  ;;  %v3960_v14 = vld [vmem:[#allocation10 + $0x768] sm:$0xff]  ;;  %v3958_v10 = vld [vmem:[#allocation10 + $0x758] sm:$0xff] }
 0x6d3   : > { %8691 = vlog2.f32 %v3627_v17 }
 0x6d4   : > { %4306 = vmatpush.msra.mxu1 %v3934_v12  ;;  %4245 = vmatpush.msrb.mxu2 %v3822_v5  ;;  %v3956_v12 = vld [vmem:[#allocation10 + $0x748] sm:$0xff] }
 0x6d6   : > { %v3562_v29 = vpop.f32.mrf.mxu3  ;;  %4307 = vmatpush.msra.mxu1 %v3932_v47  ;;  %4246 = vmatpush.msrb.mxu2 %v3820_v39  ;;  %v3880_v39 = vld [vmem:[#allocation10 + $0x4e8] sm:$0xff] }
 0x6d7   : > { %v3563_v1 = vadd.f32 %v3562_v29, %v3549_v50  ;;  %4224 = vmatmul.f32.vlgmr.msrb.gmra.mxu1 %v12797_v3  ;;  %v3738_v3 = vld [vmem:[#allocation10 + $0x78] sm:$0xff]  ;;  %v3577_v50 = vadd.f32 %v3576_v44, %v12737_v48  ;;  %v3724_v29 = vld [vmem:[#allocation10 + $0x8] sm:$0xff] }
 0x6d8   : > { %4308 = vmatpush.msra.mxu1 %v3930_v32  ;;  %4170 = vmatpush.msrb.mxu3 %v3738_v3  ;;  %v3948_v48 = vld [vmem:[#allocation10 + $0x708] sm:$0xff] }
 0x6d9   : > { %v8692_v55 = vpop.eup %8691  ;;  %v3635_v41 = vmax.f32 %v3563_v1, 1e-06  ;;  %v3591_v1 = vadd.f32 %v3590_v49, %v3577_v50  ;;  %v3876_v3 = vld [vmem:[#allocation10 + $0x4c8] sm:$0xff] }
 0x6da   : > { %v3650_v9 = vmul.f32 0.6931472, %v8692_v55  ;;  %4309 = vmatpush.msra.mxu1 %v3928_v16  ;;  %4171 = vmatpush.msrb.mxu3 %v3736_v31  ;;  %v3950_v55 = vld [vmem:[#allocation10 + $0x718] sm:$0xff]  ;;  %v8964_v31 = vld [vmem:[%s14960_s4 + $0x8] sm:$0xff] }
 0x6db   : > { %8693 = vlog2.f32 %v3635_v41 }
 0x6dc   : > { %v3681_v40 = vmul.f32 %v12748_v15, %v3650_v9  ;;  %4310 = vmatpush.msra.mxu1 %v3926_v43  ;;  %4172 = vmatpush.msrb.mxu3 %v3734_v23  ;;  %v9324_v23 = vmov 2  }
 0x6dd   : > { %8548 = vset.pattern.permute.xlu2 %v9324_v23 }
 0x6de   : > { %v3703_v8 = vmul.f32 1.442695, %v3681_v40  ;;  %4311 = vmatpush.msra.mxu1 %v3924_v22  ;;  %4173 = vmatpush.msrb.mxu3 %v3732_v59  ;;  %v3856_v59 = vld [vmem:[#allocation10 + $0x428] sm:$0xff] }
 0x6df   : > { %4227 = vmatmul.f32.gmra.mxu1 %v12801_v25  ;;  %v3962_v25 = vld [vmem:[#allocation10 + $0x778] sm:$0xff] }
 0x6e0   : > { %8695 = vpow2.f32 %v3703_v8  ;;  %4312 = vmatpush.msra.mxu1 %v3922_v36  ;;  %4174 = vmatpush.msrb.mxu3 %v3730_v45  ;;  %v3874_v36 = vld [vmem:[#allocation10 + $0x4b8] sm:$0xff] }
 0x6e1   : > { %v8694_v28 = vpop.eup %8693 }
 0x6e2   : > { %v3666_v7 = vmul.f32 0.6931472, %v8694_v28  ;;  %4313 = vmatpush.msra.mxu1 %v3920_v61  ;;  %4175 = vmatpush.msrb.mxu3 %v3728_v46  ;;  %v9323_v28 = vmov 1   ;;  %v3868_v61 = vld [vmem:[#allocation10 + $0x488] sm:$0xff] }
 0x6e3   : > { %8546 = vset.pattern.permute.xlu0 %v9323_v28  ;;  %8547 = vset.pattern.permute.xlu1 %v9323_v28 }
 0x6e4   : > { %v3689_v13 = vmul.f32 %v12748_v15, %v3666_v7  ;;  %v3602_v58 = vpop.f32.mrf.mxu2  ;;  %4314 = vmatpush.msra.mxu1 %v3918_v6  ;;  %4176 = vmatpush.msrb.mxu3 %v3726_v4  ;;  %v3870_v7 = vld [vmem:[#allocation10 + $0x498] sm:$0xff]  ;;  %v15006_v6 = vmov 0  }
 0x6e5   : > { %v3603_v17 = vadd.f32 %v3602_v58, %v3589_v38  ;;  %4377 = vperm.xlu1 %8547, %v8964_v31   ;;  %v3860_v58 = vld [vmem:[#allocation10 + $0x448] sm:$0xff] }
 0x6e6   : > { %v8696_v0 = vpop.eup %8695  ;;  %v3719_v53 = vmul.f32 1.442695, %v3689_v13  ;;  %4315 = vmatpush.msra.mxu1 %v3916_v24  ;;  %4177 = vmatpush.msrb.mxu3 %v3724_v29  ;;  %v3862_v13 = vld [vmem:[#allocation10 + $0x458] sm:$0xff]  ;;  %v4018_v24 = vpop.f32.mrf.mxu1 }
 0x6e7   : > { %4132 = vmatmul.f32.vlgmr.msra.gmra.mxu2 %v8696_v0  ;;  %4316 = vmatmul.f32.vlgmr.msra.gmra.mxu1 %v8696_v0  ;;  %v3852_v0 = vld [vmem:[#allocation10 + $0x408] sm:$0xff] }
 0x6e8   : > { %8697 = vpow2.f32 %v3719_v53  ;;  %7841 = vmatpush.msk.msra.mxu2 %vm15005_vm5, %v3964_v51  ;;  %v3858_v51 = vld [vmem:[#allocation10 + $0x438] sm:$0xff]  ;;  %v3995_v53 = vpop.f32.mrf.mxu0 }
 0x6ea   : > { %4331 = vmatpush.msra.mxu2 %v3962_v25 }
 0x6ec   : > { %4332 = vmatpush.msra.mxu2 %v3960_v14  ;;  %v3604_v47 = vpop.f32.mrf.mxu2 }
 0x6ed   : > { %v3605_v32 = vadd.f32 %v3604_v47, %v3591_v1  ;;  %8549 = vset.pattern.permute.xlu1 %v9324_v23 }
 0x6ee   : > { %v3616_v19 = vpop.f32.mrf.mxu3  ;;  %v8698_v27 = vpop.eup %8697  ;;  %4333 = vmatpush.msra.mxu2 %v3958_v10  ;;  %4389 = vperm.xlu1 %8549, %v8964_v31   ;;  %v4019_v10 = vadd.f32 %v4018_v24, %v3995_v53 }
 0x6ef   : > { %v3617_v57 = vadd.f32 %v3616_v19, %v3603_v17  ;;  %4135 = vmatmul.f32.gmra.mxu2 %v8698_v27  ;;  %4319 = vmatmul.f32.gmra.mxu1 %v8698_v27  ;;  %v4021_v14 = vpop.f32.mrf.mxu1 }
 0x6f0   : > { %4334 = vmatpush.msra.mxu2 %v3956_v12  ;;  %v3998_v45 = vpop.f32.mrf.mxu0 }
 0x6f1   : > { %v3628_v35 = vmax.f32 %v3617_v57, 1e-06  ;;  %v4022_v57 = vadd.f32 %v4021_v14, %v3998_v45 }
 0x6f2   : > { %4335 = vmatpush.msra.mxu2 %v3954_v52 }
 0x6f3   : > { %8699 = vlog2.f32 %v3628_v35 }
 0x6f4   : > { %4336 = vmatpush.msra.mxu2 %v3952_v2 }
 0x6f6   : > { %v3618_v54 = vpop.f32.mrf.mxu3  ;;  %4337 = vmatpush.msra.mxu2 %v3950_v55  ;;  %8551 = vset.pattern.permute.xlu1 %v15006_v6 }
 0x6f7   : > { %v3619_v41 = vadd.f32 %v3618_v54, %v3605_v32  ;;  %4247 = vmatmul.f32.vlgmr.msrb.gmra.mxu2 %v12804_v26  ;;  %v3878_v26 = vld [vmem:[#allocation10 + $0x4d8] sm:$0xff] }
 0x6f8   : > { %4338 = vmatpush.msra.mxu2 %v3948_v48 }
 0x6f9   : > { %v8700_v37 = vpop.eup %8699  ;;  %v3636_v9 = vmax.f32 %v3619_v41, 1e-06 }
 0x6fa   : > { %v3652_v16 = vmul.f32 0.6931472, %v8700_v37 }
 0x6fb   : > { %8701 = vlog2.f32 %v3636_v9 }
 0x6fc   : > { %v3682_v18 = vmul.f32 %v12748_v15, %v3652_v16 }
 0x6fe   : > { %v3705_v42 = vmul.f32 1.442695, %v3682_v18 }
 0x6ff   : > { %4250 = vmatmul.f32.gmra.mxu2 %v12808_v60  ;;  %v8963_v60 = vld [vmem:[%s14960_s4] sm:$0xff]  ;;  %s15033_s4 = sld [smem:[#allocation45_spill]] }
 0x700   : > { %8703 = vpow2.f32 %v3705_v42  ;;  %4373 = vperm.xlu0 %8546, %v8963_v60   ;;  %4385 = vperm.xlu2 %8548, %v8963_v60  }
 0x701   : > { %v8702_v40 = vpop.eup %8701 }
 0x702   : > { %v3668_v43 = vmul.f32 0.6931472, %v8702_v40 }
 0x704   : > { %v3690_v5 = vmul.f32 %v12748_v15, %v3668_v43  ;;  %v4041_v25 = vpop.f32.mrf.mxu2 }
 0x705   : > { %v4042_v4 = vadd.f32 %v4041_v25, %v4019_v10 }
 0x706   : > { %v8704_v8 = vpop.eup %8703  ;;  %v3721_v22 = vmul.f32 1.442695, %v3690_v5 }
 0x707   : > { %7839 = vmatmul.msk.f32.vlgmr.msra.gmra.mxu3 %vm3965_vm14, %v8704_v8  ;;  %7842 = vmatmul.msk.f32.vlgmr.msra.gmra.mxu2 %vm3965_vm14, %v8704_v8 }
 0x708   : > { %8705 = vpow2.f32 %v3721_v22  ;;  %4254 = vmatpush.msra.mxu3 %v3882_v11  ;;  %8550 = vset.pattern.permute.xlu0 %v15006_v6 }
 0x709   : > { %8552 = vset.pattern.permute.xlu2 %v15006_v6 }
 0x70a   : > { %4255 = vmatpush.msra.mxu3 %v3880_v39  ;;  %v4358_v39 = vpop.permute.xlu2 %4357 }
 0x70c   : > { %4256 = vmatpush.msra.mxu3 %v3878_v26 }
 0x70e   : > { %v8706_v15 = vpop.eup %8705  ;;  %4257 = vmatpush.msra.mxu3 %v3876_v3  ;;  %v4064_v38 = vpop.f32.mrf.mxu3 }
 0x70f   : > { %7840 = vmatmul.msk.f32.gmra.mxu3 %vm3965_vm14, %v8706_v15  ;;  %7843 = vmatmul.msk.f32.gmra.mxu2 %vm3965_vm14, %v8706_v15  ;;  %v4065_v27 = vadd.f32 %v4064_v38, %v4042_v4 }
 0x710   : > { %4258 = vmatpush.msra.mxu3 %v3874_v36 }
 0x712   : > { %4259 = vmatpush.msra.mxu3 %v3872_v56 }
 0x714   : > { %4260 = vmatpush.msra.mxu3 %v3870_v7 }
 0x716   : > { %4261 = vmatpush.msra.mxu3 %v3868_v61  ;;  %v4067_v17 = vpop.f32.mrf.mxu3  ;;  %v4087_v46 = vpop.f32.mrf.mxu0 }
 0x717   : > { %4178 = vmatmul.f32.vlgmr.msrb.gmra.mxu3 %v12763_v62  ;;  %v3854_v62 = vld [vmem:[#allocation10 + $0x418] sm:$0xff] }
 0x718   : > { %4262 = vmatpush.msra.mxu3 %v3866_v21 }
 0x71a   : > { %4263 = vmatpush.msra.mxu3 %v3864_v20 }
 0x71c   : > { %4264 = vmatpush.msra.mxu3 %v3862_v13 }
 0x71e   : > { %4265 = vmatpush.msra.mxu3 %v3860_v58 }
 0x71f   : > { %4181 = vmatmul.f32.gmra.mxu3 %v12785_v33  ;;  %v4044_v33 = vpop.f32.mrf.mxu2 }
 0x720   : > { %4266 = vmatpush.msra.mxu3 %v3858_v51  ;;  %v4045_v12 = vadd.f32 %v4044_v33, %v4022_v57 }
 0x722   : > { %4267 = vmatpush.msra.mxu3 %v3856_v59  ;;  %v4068_v50 = vadd.f32 %v4067_v17, %v4045_v12 }
 0x724   : > { %4268 = vmatpush.msra.mxu3 %v3854_v62 }
 0x726   : > { %4269 = vmatpush.msra.mxu3 %v3852_v0 }
 0x727   : > { %4270 = vmatmul.f32.vlgmr.msra.gmra.mxu3 %v12813_v63  ;;  %v4090_v63 = vpop.f32.mrf.mxu0 }
 0x728   : > { %v4091_v29 = vadd.f32 %v4090_v63, %v4068_v50 }
 0x72f   : > { %4273 = vmatmul.f32.gmra.mxu3 %v12816_v34  ;;  %v4088_v34 = vadd.f32 %v4087_v46, %v4065_v27  ;;  %v4202_v48 = vpop.f32.mrf.mxu0 }
 0x737   : > { %v4205_v43 = vpop.f32.mrf.mxu0 }
 0x744   : > { %v4110_v44 = vpop.f32.mrf.mxu1  ;;  %v4294_v7 = vpop.f32.mrf.mxu0 }
 0x745   : > { %v4111_v47 = vadd.f32 %v4110_v44, %v4088_v34 }
 0x74c   : > { %v4113_v35 = vpop.f32.mrf.mxu1  ;;  %v4297_v17 = vpop.f32.mrf.mxu0 }
 0x74d   : > { %v4114_v1 = vadd.f32 %v4113_v35, %v4091_v29 }
 0x754   : > { %v4225_v37 = vpop.f32.mrf.mxu1 }
 0x757   : > { %v4378_v62 = vpop.permute.xlu1 %4377 }
 0x75a   : > { %v4386_v10 = vpop.permute.xlu2 %4385 }
 0x75c   : > { %v4228_v11 = vpop.f32.mrf.mxu1 }
 0x760   : > { %v4390_v12 = vpop.permute.xlu1 %4389 }
 0x764   : > { %v4317_v13 = vpop.f32.mrf.mxu1 }
 0x76a   : > { %v4133_v19 = vpop.f32.mrf.mxu2 }
 0x76b   : > { %v4134_v2 = vadd.f32 %v4133_v19, %v4111_v47 }
 0x76c   : > { %v4320_v19 = vpop.f32.mrf.mxu1 }
 0x772   : > { %v4136_v52 = vpop.f32.mrf.mxu2  ;;  %v4374_v38 = vpop.permute.xlu0 %4373 }
 0x773   : > { %v4137_v54 = vadd.f32 %v4136_v52, %v4114_v1 }
 0x77a   : > { %v4248_v9 = vpop.f32.mrf.mxu2 }
 0x782   : > { %v4251_v26 = vpop.f32.mrf.mxu2 }
 0x78a   : > { %v4156_v49 = vpop.f32.mrf.mxu3  ;;  %v4340_v59 = vpop.f32.mrf.mxu2 }
 0x78b   : > { %v4157_v55 = vadd.f32 %v4156_v49, %v4134_v2 }
 0x78d   : > { %8707 = vlog2.f32 %v4157_v55 }
 0x792   : > { %v4159_v32 = vpop.f32.mrf.mxu3  ;;  %v4343_v49 = vpop.f32.mrf.mxu2 }
 0x793   : > { %v4160_v41 = vadd.f32 %v4159_v32, %v4137_v54  ;;  %v8708_v18 = vpop.eup %8707 }
 0x794   : > { %v4347_v40 = vmul.f32 0.6931472, %v8708_v18 }
 0x795   : > { %8709 = vlog2.f32 %v4160_v41 }
 0x796   : > { %v4360_v3 = vmul.f32 %v4358_v39, %v4347_v40 }
 0x798   : > { %v4364_v60 = vmul.f32 1.442695, %v4360_v3 }
 0x79a   : > { %v4179_v16 = vpop.f32.mrf.mxu3  ;;  %8711 = vpow2.f32 %v4364_v60 }
 0x79b   : > { %v8710_v42 = vpop.eup %8709  ;;  %v4203_v5 = vadd.f32 %v4202_v48, %v4179_v16 }
 0x79c   : > { %v4351_v8 = vmul.f32 0.6931472, %v8710_v42 }
 0x79d   : > { %v4226_v36 = vadd.f32 %v4225_v37, %v4203_v5 }
 0x79e   : > { %v4362_v15 = vmul.f32 %v4358_v39, %v4351_v8 }
 0x79f   : > { %v4249_v31 = vadd.f32 %v4248_v9, %v4226_v36 }
 0x7a0   : > { %v4368_v61 = vmul.f32 1.442695, %v4362_v15  ;;  %v8712_v25 = vpop.eup %8711 }
 0x7a1   : > { %v4380_v46 = vmul.f32 %v8712_v25, %v4374_v38 }
 0x7a2   : > { %v4182_v22 = vpop.f32.mrf.mxu3  ;;  %8713 = vpow2.f32 %v4368_v61 }
 0x7a3   : > { %v4206_v56 = vadd.f32 %v4205_v43, %v4182_v22  ;;  %v12860_v63 = vadd.f32 %v4386_v10, %v4380_v46 }
 0x7a5   : > { %v4229_v58 = vadd.f32 %v4228_v11, %v4206_v56  ;;  %v7844_v47 = vmul.f32 -1.442695, %v12860_v63 }
 0x7a7   : > { %v4252_v24 = vadd.f32 %v4251_v26, %v4229_v58 }
 0x7a8   : > { %v8714_v33 = vpop.eup %8713 }
 0x7a9   : > { %v4382_v57 = vmul.f32 %v8714_v33, %v4378_v62 }
 0x7aa   : > { %v4271_v21 = vpop.f32.mrf.mxu3 }
 0x7ab   : > { %v4272_v20 = vadd.f32 %v4271_v21, %v4249_v31  ;;  %v12862_v35 = vadd.f32 %v4390_v12, %v4382_v57 }
 0x7ad   : > { %v4295_v51 = vadd.f32 %v4294_v7, %v4272_v20  ;;  %v7846_v1 = vmul.f32 -1.442695, %v12862_v35 }
 0x7af   : > { %v4318_v0 = vadd.f32 %v4317_v13, %v4295_v51 }
 0x7b1   : > { %v4341_v53 = vadd.f32 %v4340_v59, %v4318_v0 }
 0x7b2   : > { %v4274_v45 = vpop.f32.mrf.mxu3 }
 0x7b3   : > { %8715 = vlog2.f32 %v4341_v53  ;;  %v4275_v14 = vadd.f32 %v4274_v45, %v4252_v24 }
 0x7b5   : > { %v4298_v44 = vadd.f32 %v4297_v17, %v4275_v14 }
 0x7b7   : > { %v4321_v4 = vadd.f32 %v4320_v19, %v4298_v44 }
 0x7b9   : > { %v8716_v27 = vpop.eup %8715  ;;  %v4344_v50 = vadd.f32 %v4343_v49, %v4321_v4 }
 0x7ba   : > { %v4349_v34 = vmul.f32 0.6931472, %v8716_v27 }
 0x7bb   : > { %8717 = vlog2.f32 %v4344_v50 }
 0x7bc   : > { %v4361_v29 = vmul.f32 %v4358_v39, %v4349_v34 }
 0x7be   : > { %v4366_v52 = vmul.f32 1.442695, %v4361_v29 }
 0x7c0   : > { %8719 = vpow2.f32 %v4366_v52 }
 0x7c1   : > { %v8718_v2 = vpop.eup %8717  ;;  %8721 = vpow2.f32 %v7844_v47 }
 0x7c2   : > { %v4353_v32 = vmul.f32 0.6931472, %v8718_v2  ;;  %8723 = vpow2.f32 %v7846_v1 }
 0x7c4   : > { %v4363_v54 = vmul.f32 %v4358_v39, %v4353_v32 }
 0x7c6   : > { %v8720_v55 = vpop.eup %8719  ;;  %v4370_v41 = vmul.f32 1.442695, %v4363_v54 }
 0x7c7   : > { %v8722_v48 = vpop.eup %8721  ;;  %v4381_v37 = vmul.f32 %v8720_v55, %v4374_v38 }
 0x7c8   : > { %8725 = vpow2.f32 %v4370_v41  ;;  %v8724_v9 = vpop.eup %8723  ;;  %v4408_v18 = vadd.f32 1.0, %v8722_v48 }
 0x7c9   : > { %v12866_v16 = vadd.f32 %v4386_v10, %v4381_v37  ;;  %v4410_v40 = vadd.f32 1.0, %v8724_v9 }
 0x7ca   : > { %vm4417_vm2 = vweird.f32 %v4408_v18  ;;  %v4421_v25 = vand.u32 2147483647, %v4408_v18  ;;  %v4423_v38 = vand.u32 2147483648, %v4408_v18 }
 0x7cb   : > { %v7845_v42 = vmul.f32 -1.442695, %v12866_v16  ;;  %vm4447_vm0 = vweird.f32 %v4410_v40  ;;  %v4453_v44 = vand.u32 2147483648, %v4410_v40  ;;  %v4451_v57 = vand.u32 2147483647, %v4410_v40 }
 0x7cc   : > { %vm4422_vm3 = vcmp.eq.f32.partialorder %v4421_v25, 8.507059e+37  ;;  %v4424_v49 = vor.u32 1.1754944e-38, %v4423_v38 }
 0x7cd   : > { %8727 = vpow2.f32 %v7845_v42  ;;  %v4454_v52 = vor.u32 1.1754944e-38, %v4453_v44  ;;  %vm4452_vm5 = vcmp.eq.f32.partialorder %v4451_v57, 8.507059e+37 }
 0x7ce   : > { %v8726_v43 = vpop.eup %8725  ;;  %8729 = vrcp.f32 %v4408_v18 }
 0x7cf   : > { %v4383_v5 = vmul.f32 %v8726_v43, %v4378_v62  ;;  %8731 = vrcp.f32 %v4410_v40 }
 0x7d1   : > { %v12869_v11 = vadd.f32 %v4390_v12, %v4383_v5 }
 0x7d3   : > { %v8728_v8 = vpop.eup %8727  ;;  %v7847_v22 = vmul.f32 -1.442695, %v12869_v11 }
 0x7d4   : > { %v8730_v39 = vpop.eup %8729  ;;  %v4409_v26 = vadd.f32 1.0, %v8728_v8 }
 0x7d5   : > { %8733 = vpow2.f32 %v7847_v22  ;;  %v8732_v3 = vpop.eup %8731  ;;  %v4413_v36 = vmul.f32 %v8730_v39, %v4408_v18  ;;  %vm4418_vm7 = vweird.f32 %v8730_v39 }
 0x7d6   : > { %8735 = vrcp.f32 %v4409_v26  ;;  %v4443_v15 = vmul.f32 %v8732_v3, %v4410_v40  ;;  %v4438_v59 = vand.u32 2147483648, %v4409_v26  ;;  %vm4432_vm15 = vweird.f32 %v4409_v26  ;;  %vm12879_vm4 = vmor %vm4417_vm2, %vm4418_vm7 }
 0x7d7   : > { %v4414_v56 = vsub.f32 1.0, %v4413_v36  ;;  %v4436_v53 = vand.u32 2147483647, %v4409_v26  ;;  %vm4448_vm8 = vweird.f32 %v8732_v3  ;;  %vm15011_vm2 = vcmask 924672  }
 0x7d8   : > { %v4444_v61 = vsub.f32 1.0, %v4443_v15  ;;  %v4439_v19 = vor.u32 1.1754944e-38, %v4438_v59  ;;  %vm4449_vm12 = vmor %vm4447_vm0, %vm4448_vm8  ;;  %vm15013_vm8 = vcmask 998400   ;;  %vm15015_vm0 = vcmask 932864  }
 0x7d9   : > { %v4415_v20 = vmul.f32 %v8730_v39, %v4414_v56  ;;  %vm4437_vm9 = vcmp.eq.f32.partialorder %v4436_v53, 8.507059e+37 }
 0x7da   : > { %v4445_v58 = vmul.f32 %v8732_v3, %v4444_v61 }
 0x7db   : > { %v8734_v60 = vpop.eup %8733  ;;  %v4416_v62 = vadd.f32 %v8730_v39, %v4415_v20 }
 0x7dc   : > { %v8736_v31 = vpop.eup %8735  ;;  %v4411_v7 = vadd.f32 1.0, %v8734_v60  ;;  %v4446_v14 = vadd.f32 %v8732_v3, %v4445_v58 }
 0x7dd   : > { %v4428_v21 = vmul.f32 %v8736_v31, %v4409_v26  ;;  %vm4433_vm10 = vweird.f32 %v8736_v31  ;;  %v4420_v10 = vsel %vm12879_vm4, %v8730_v39, %v4416_v62  ;;  %vm15014_vm4 = vmmov %vm15011_vm2 }
 0x7de   : > { %8737 = vrcp.f32 %v4411_v7  ;;  %vm12872_vm1 = vmor %vm4432_vm15, %vm4433_vm10  ;;  %v4468_v27 = vand.u32 2147483648, %v4411_v7  ;;  %v4450_v50 = vsel %vm4449_vm12, %v8732_v3, %v4446_v14  ;;  %v4466_v29 = vand.u32 2147483647, %v4411_v7 }
 0x7df   : > { %v4429_v13 = vsub.f32 1.0, %v4428_v21  ;;  %v4425_v47 = vsel %vm4422_vm3, %v4424_v49, %v4420_v10  ;;  %vm4462_vm14 = vweird.f32 %v4411_v7  ;;  %v4455_v32 = vsel %vm4452_vm5, %v4454_v52, %v4450_v50 }
 0x7e0   : > { %v4469_v54 = vor.u32 1.1754944e-38, %v4468_v27  ;;  %v4472_v55 = vmul.f32 %v4425_v47, %v12860_v63  ;;  %vm4467_vm7 = vcmp.eq.f32.partialorder %v4466_v29, 8.507059e+37  ;;  %v4474_v37 = vmul.f32 %v4455_v32, %v12862_v35 }
 0x7e1   : > { %v4430_v51 = vmul.f32 %v8736_v31, %v4429_v13  ;;  %vm4490_vm15 = vcmask 7168   ;;  %vm15017_vm3 = vcmask 1014784   ;;  %vm15018_vm12 = vcmask 1022976  }
 0x7e2   : > { %vm15020_vm5 = vcmask 965632  }
 0x7e3   : > { %v4431_v0 = vadd.f32 %v8736_v31, %v4430_v51 }
 0x7e4   : > { %v8738_v24 = vpop.eup %8737 }
 0x7e5   : > { %v4435_v33 = vsel %vm12872_vm1, %v8736_v31, %v4431_v0  ;;  %v4458_v17 = vmul.f32 %v8738_v24, %v4411_v7  ;;  %vm4463_vm11 = vweird.f32 %v8738_v24  ;;  %vm15012_vm1 = vcmask 990208  }
 0x7e6   : > { %v4440_v12 = vsel %vm4437_vm9, %v4439_v19, %v4435_v33  ;;  %vm4464_vm10 = vmor %vm4462_vm14, %vm4463_vm11  ;;  %vm15016_vm9 = vcmask 1006592   ;;  %vm15019_vm11 = vcmask 957440   ;;  %vm15021_vm14 = vcmask 1031168  }
 0x7e7   : > { %v4459_v4 = vsub.f32 1.0, %v4458_v17  ;;  %v4473_v2 = vmul.f32 %v4440_v12, %v12866_v16 }
 0x7e9   : > { %v4460_v34 = vmul.f32 %v8738_v24, %v4459_v4  ;;  %v4476_v18 = vpack.c.bf16 %v4473_v2, %v4472_v55 }
 0x7eb   : > { %v4461_v1 = vadd.f32 %v8738_v24, %v4460_v34  ;;  %v4481_v40 = vunpack.c.h.b16 %v4476_v18  ;;  %v4480_v5 = vunpack.c.l.b16 %v4476_v18 }
 0x7ed   : > { %v4465_v41 = vsel %vm4464_vm10, %v8738_v24, %v4461_v1  ;;  %vm15022_vm10 = vcmask 1039360  }
 0x7ee   : > { %v4470_v48 = vsel %vm4467_vm7, %v4469_v54, %v4465_v41  ;;  %vm12993_vm7 = vmneg %vm4490_vm15 }
 0x7ef   : > { %v4475_v9 = vmul.f32 %v4470_v48, %v12869_v11 }
 0x7f1   : > { %v4477_v42 = vpack.c.bf16 %v4475_v9, %v4474_v37 }
 0x7f3   : > { %v4483_v43 = vunpack.c.h.b16 %v4477_v42  ;;  %v4482_v8 = vunpack.c.l.b16 %v4477_v42 }
 0x7f5   : > { %v4485_v22 = vpack.c.b16 %v4483_v43, %v4481_v40  ;;  %v4484_v16 = vpack.c.b16 %v4482_v8, %v4480_v5 }
 0x7f7   : > { %4488 = vrot.lane.b32.xlu0 %v4485_v22, %s14568_s28  ;;  %4486 = vrot.lane.b32.xlu2 %v4484_v16, %s14568_s28  ;;  %s708_s28 = scalar_lea.vmem [#allocation16], %s7793_s19 }
 0x851   : > { %v12891_v63 = vpop.permute.xlu2 %4486 }
 0x852   : > { %v4495_v35 = vsel %vm4490_vm15, 0, %v12891_v63 }
 0x853   : > { %4538 = vrot.lane.b32.xlu2 %v4495_v35, %s14789_s1  ;;  %4601 = vrot.lane.b32.xlu0 %v4495_v35, %s14799_s14 }
 0x854   : > { %4545 = vrot.lane.b32.xlu1 %v4495_v35, %s14795_s5 }
 0x85b   : > { %4587 = vrot.lane.b32.xlu2 %v4495_v35, %s14796_s11  ;;  %4531 = vrot.lane.b32.xlu0 %v4495_v35, %s14784_s10 }
 0x85c   : > { %4594 = vrot.lane.b32.xlu1 %v4495_v35, %s14783_s12 }
 0x863   : > { %4517 = vrot.lane.b32.xlu2 %v4495_v35, %s14787_s9  ;;  %4580 = vrot.lane.b32.xlu0 %v4495_v35, %s14619_s20 }
 0x864   : > { %4524 = vrot.lane.b32.xlu1 %v4495_v35, %s14769_s7 }
 0x869   : > { %v4489_v11 = vpop.permute.xlu0 %4488 }
 0x86a   : > { %v4491_v39 = vsel %vm4490_vm15, %v12891_v63, %v4489_v11  ;;  %v7850_v11 = vld [vmem:[%s15027_s15] sm:$0xf] }
 0x86b   : > { %4566 = vrot.lane.b32.xlu2 %v4495_v35, %s14770_s22  ;;  %4510 = vrot.lane.b32.xlu0 %v4495_v35, %s14772_s25  ;;  %v12913_v26 = vsel %vm15011_vm2, %v4491_v39, 0  ;;  %vm15025_vm2 = vcmask 973824   ;;  %v8173_v39 = vld [vmem:[%s15027_s15 + $0xc] sm:$0xf0] }
 0x86c   : > { %4573 = vrot.lane.b32.xlu1 %v4495_v35, %s14661_s26 }
 0x873   : > { %4552 = vrot.lane.b32.xlu2 %v4495_v35, %s14782_s24  ;;  %4559 = vrot.lane.b32.xlu0 %v4495_v35, %s14781_s23 }
 0x874   : > { %4503 = vrot.lane.b32.xlu1 %v4495_v35, %s14771_s0 }
 0x87b   : > { %4608 = vrot.lane.b32.xlu2 %v4495_v35, %s14798_s13  ;;  %4540 = vrot.lane.b32.xlu0 %v12913_v26, %s14789_s1 }
 0x87c   : > { %4603 = vrot.lane.b32.xlu1 %v12913_v26, %s14799_s14 }
 0x883   : > { %4589 = vrot.lane.b32.xlu0 %v12913_v26, %s14796_s11  ;;  %4547 = vrot.lane.b32.xlu2 %v12913_v26, %s14795_s5 }
 0x884   : > { %4533 = vrot.lane.b32.xlu1 %v12913_v26, %s14784_s10 }
 0x88b   : > { %4519 = vrot.lane.b32.xlu0 %v12913_v26, %s14787_s9  ;;  %4596 = vrot.lane.b32.xlu2 %v12913_v26, %s14783_s12 }
 0x88c   : > { %4582 = vrot.lane.b32.xlu1 %v12913_v26, %s14619_s20 }
 0x893   : > { %4568 = vrot.lane.b32.xlu0 %v12913_v26, %s14770_s22  ;;  %4526 = vrot.lane.b32.xlu2 %v12913_v26, %s14769_s7 }
 0x894   : > { %4512 = vrot.lane.b32.xlu1 %v12913_v26, %s14772_s25 }
 0x89b   : > { %4554 = vrot.lane.b32.xlu0 %v12913_v26, %s14782_s24  ;;  %4575 = vrot.lane.b32.xlu2 %v12913_v26, %s14661_s26 }
 0x89c   : > { %4561 = vrot.lane.b32.xlu1 %v12913_v26, %s14781_s23 }
 0x8a3   : > { %4505 = vrot.lane.b32.xlu2 %v12913_v26, %s14771_s0 }
 0x8ad   : > { %v4539_v3 = vpop.permute.xlu2 %4538 }
 0x8b5   : > { %v4588_v36 = vpop.permute.xlu2 %4587 }
 0x8bd   : > { %v4518_v15 = vpop.permute.xlu2 %4517 }
 0x8c5   : > { %v4567_v60 = vpop.permute.xlu2 %4566  ;;  %v4602_v56 = vpop.permute.xlu0 %4601 }
 0x8c6   : > { %v4546_v31 = vpop.permute.xlu1 %4545 }
 0x8cd   : > { %v12946_v7 = vpop.permute.xlu2 %4552  ;;  %v4532_v61 = vpop.permute.xlu0 %4531 }
 0x8ce   : > { %v4595_v21 = vpop.permute.xlu1 %4594 }
 0x8d5   : > { %v12948_v20 = vpop.permute.xlu2 %4608  ;;  %v4581_v13 = vpop.permute.xlu0 %4580 }
 0x8d6   : > { %v4525_v58 = vpop.permute.xlu1 %4524 }
 0x8dd   : > { %v4511_v51 = vpop.permute.xlu0 %4510  ;;  %v12950_v59 = vpop.permute.xlu2 %4547 }
 0x8de   : > { %v4574_v62 = vpop.permute.xlu1 %4573  ;;  %4638 = vrot.lane.b32.xlu2 %v12950_v59, %s14798_s13  ;;  %v12956_v0 = vsel %vm15012_vm1, %v4546_v31, %v12950_v59  ;;  %vm15026_vm1 = vcmask 982016  }
 0x8df   : > { %4792 = vmatpush.bf16.msrb.mxu2 %v12956_v0 }
 0x8e5   : > { %v4560_v53 = vpop.permute.xlu0 %4559  ;;  %v12959_v24 = vpop.permute.xlu2 %4596 }
 0x8e6   : > { %v4504_v25 = vpop.permute.xlu1 %4503  ;;  %4666 = vrot.lane.b32.xlu2 %v12959_v24, %s14798_s13  ;;  %v4598_v46 = vsel %vm15015_vm0, %v4595_v21, %v12959_v24 }
 0x8ed   : > { %v4541_v38 = vpop.permute.xlu0 %4540  ;;  %v12963_v45 = vpop.permute.xlu2 %4526 }
 0x8ee   : > { %v4604_v14 = vpop.permute.xlu1 %4603  ;;  %4634 = vrot.lane.b32.xlu0 %v4541_v38, %s14798_s13  ;;  %4626 = vrot.lane.b32.xlu2 %v12963_v45, %s14798_s13  ;;  %v4542_v33 = vsel %vm15013_vm8, %v4539_v3, %v4541_v38  ;;  %v4528_v49 = vsel %vm15017_vm3, %v4525_v58, %v12963_v45  ;;  %v8171_v3 = vld [vmem:[%s15027_s15 + $0x4] sm:$0xf]  ;;  %vm15028_vm8 = vcmask 916480   ;;  %v8177_v58 = vld [vmem:[%s15027_s15 + $0x2c] sm:$0xf0] }
 0x8ef   : > { %4670 = vrot.lane.b32.xlu1 %v4604_v14, %s14798_s13  ;;  %4793 = vmatpush.bf16.msrb.mxu2 %v4542_v33  ;;  %v4605_v17 = vsel %vm15014_vm4, %v4602_v56, %v4604_v14  ;;  %vm15029_vm4 = vmmov %vm15028_vm8 }
 0x8f0   : > { %4811 = vmatpush.bf16.msrb.mxu3 %v4605_v17  ;;  %vm15030_vm0 = vmmov %vm15029_vm4 }
 0x8f1   : > { %vm15032_vm3 = vmmov %vm15030_vm0 }
 0x8f4   : > { %4812 = vmatpush.bf16.msrb.mxu3 %v4598_v46 }
 0x8f5   : > { %v4590_v44 = vpop.permute.xlu0 %4589  ;;  %v4576_v19 = vpop.permute.xlu2 %4575 }
 0x8f6   : > { %v4534_v10 = vpop.permute.xlu1 %4533  ;;  %4662 = vrot.lane.b32.xlu0 %v4590_v44, %s14798_s13  ;;  %4654 = vrot.lane.b32.xlu2 %v4576_v19, %s14798_s13  ;;  %v4591_v57 = vsel %vm1226_vm6, %v4588_v36, %v4590_v44  ;;  %v4577_v47 = vsel %vm15019_vm11, %v4574_v62, %v4576_v19  ;;  %v7852_v36 = vld [vmem:[%s15027_s15 + $0x10] sm:$0xf0]  ;;  %vm15035_vm11 = vmmov %vm15030_vm0 }
 0x8f7   : > { %4630 = vrot.lane.b32.xlu1 %v4534_v10, %s14798_s13  ;;  %v4535_v4 = vsel %vm15016_vm9, %v4532_v61, %v4534_v10  ;;  %v7868_v62 = vld [vmem:[%s15027_s15 + $0x30] sm:$0xf0]  ;;  %vm15031_vm9 = vmmov %vm15030_vm0 }
 0x8f8   : > { %4794 = vmatpush.bf16.msrb.mxu2 %v4535_v4  ;;  %4813 = vmatpush.bf16.msrb.mxu3 %v4591_v57 }
 0x8fc   : > { %4795 = vmatpush.bf16.msrb.mxu2 %v4528_v49 }
 0x8fd   : > { %v4520_v12 = vpop.permute.xlu0 %4519  ;;  %v4506_v27 = vpop.permute.xlu2 %4505 }
 0x8fe   : > { %v4583_v50 = vpop.permute.xlu1 %4582  ;;  %4622 = vrot.lane.b32.xlu0 %v4520_v12, %s14798_s13  ;;  %4614 = vrot.lane.b32.xlu2 %v4506_v27, %s14798_s13  ;;  %v4521_v34 = vsel %vm15018_vm12, %v4518_v15, %v4520_v12  ;;  %v4507_v54 = vsel %vm15022_vm10, %v4504_v25, %v4506_v27  ;;  %v7855_v15 = vor.u32 %v8171_v3, %v7852_v36  ;;  %vm15034_vm12 = vmmov %vm15030_vm0  ;;  %v8172_v36 = vld [vmem:[%s15027_s15 + $0xc] sm:$0xf] }
 0x8ff   : > { %4658 = vrot.lane.b32.xlu1 %v4583_v50, %s14798_s13  ;;  %v4584_v29 = vsel %vm1194_vm13, %v4581_v13, %v4583_v50  ;;  %v7866_v13 = vld [vmem:[%s15027_s15 + $0x20] sm:$0xf]  ;;  %vm15038_vm10 = vmmov %vm15030_vm0 }
 0x900   : > { %4796 = vmatpush.bf16.msrb.mxu2 %v4521_v34  ;;  %4814 = vmatpush.bf16.msrb.mxu3 %v4584_v29 }
 0x904   : > { %4815 = vmatpush.bf16.msrb.mxu3 %v4577_v47 }
 0x905   : > { %v4569_v52 = vpop.permute.xlu0 %4568 }
 0x906   : > { %v4513_v1 = vpop.permute.xlu1 %4512  ;;  %4650 = vrot.lane.b32.xlu0 %v4569_v52, %s14798_s13  ;;  %4632 = vrot.lane.b32.xlu2 %v4542_v33, %s14798_s13  ;;  %v4570_v2 = vsel %vm15020_vm5, %v4567_v60, %v4569_v52  ;;  %vm15036_vm5 = vmmov %vm15030_vm0 }
 0x907   : > { %4618 = vrot.lane.b32.xlu1 %v4513_v1, %s14798_s13  ;;  %v4514_v32 = vsel %vm15021_vm14, %v4511_v51, %v4513_v1  ;;  %v7867_v51 = vor.u32 %v8177_v58, %v7866_v13  ;;  %vm15037_vm14 = vmmov %vm15030_vm0 }
 0x908   : > { %4797 = vmatpush.bf16.msrb.mxu2 %v4514_v32  ;;  %4816 = vmatpush.bf16.msrb.mxu3 %v4570_v2 }
 0x90c   : > { %4798 = vmatpush.bf16.msrb.mxu2 %v4507_v54 }
 0x90d   : > { %v4555_v37 = vpop.permute.xlu0 %4554 }
 0x90e   : > { %v4562_v41 = vpop.permute.xlu1 %4561  ;;  %4668 = vrot.lane.b32.xlu0 %v4605_v17, %s14798_s13  ;;  %4660 = vrot.lane.b32.xlu2 %v4591_v57, %s14798_s13  ;;  %v4556_v9 = vsel %vm15026_vm1, %v12946_v7, %v4555_v37  ;;  %vm15040_vm1 = vmmov %vm15030_vm0 }
 0x90f   : > { %4646 = vrot.lane.b32.xlu1 %v4562_v41, %s14798_s13  ;;  %v4563_v48 = vsel %vm15025_vm2, %v4560_v53, %v4562_v41  ;;  %vm15039_vm2 = vmmov %vm15030_vm0 }
 0x910   : > { %7881 = vmatpush.bf16.msk.msrb.mxu2 %vm12993_vm7, %v12891_v63  ;;  %4817 = vmatpush.bf16.msrb.mxu3 %v4563_v48 }
 0x914   : > { %4868 = vmatpush.bf16.msra.mxu2 %v12950_v59  ;;  %4818 = vmatpush.bf16.msrb.mxu3 %v4556_v9  ;;  %v8175_v59 = vld [vmem:[%s15027_s15 + $0x24] sm:$0xf] }
 0x916   : > { %4628 = vrot.lane.b32.xlu0 %v4535_v4, %s14798_s13  ;;  %4620 = vrot.lane.b32.xlu2 %v4521_v34, %s14798_s13 }
 0x917   : > { %4636 = vrot.lane.b32.xlu1 %v12956_v0, %s14798_s13  ;;  %4819 = vmatmul.bf16.vlgmr.msrb.gmra.mxu3 %v7855_v15  ;;  %v7871_v0 = vor.u32 %v8175_v59, %v7868_v62 }
 0x918   : > { %4869 = vmatpush.bf16.msra.mxu2 %v4541_v38  ;;  %4887 = vmatpush.bf16.msra.mxu3 %v4604_v14 }
 0x91c   : > { %4870 = vmatpush.bf16.msra.mxu2 %v4534_v10  ;;  %4888 = vmatpush.bf16.msra.mxu3 %v12959_v24 }
 0x91e   : > { %4656 = vrot.lane.b32.xlu0 %v4584_v29, %s14798_s13  ;;  %4648 = vrot.lane.b32.xlu2 %v4570_v2, %s14798_s13 }
 0x91f   : > { %4664 = vrot.lane.b32.xlu1 %v4598_v46, %s14798_s13 }
 0x920   : > { %4871 = vmatpush.bf16.msra.mxu2 %v12963_v45  ;;  %4889 = vmatpush.bf16.msra.mxu3 %v4590_v44 }
 0x924   : > { %4872 = vmatpush.bf16.msra.mxu2 %v4520_v12  ;;  %4890 = vmatpush.bf16.msra.mxu3 %v4583_v50  ;;  %v4729_v12 = vld [vmem:[%s15033_s4 + $0x8] sm:$0xff] }
 0x926   : > { %4616 = vrot.lane.b32.xlu0 %v4514_v32, %s14798_s13  ;;  %4642 = vrot.lane.b32.xlu2 %v4555_v37, %s14798_s13 }
 0x927   : > { %4624 = vrot.lane.b32.xlu1 %v4528_v49, %s14798_s13  ;;  %4824 = vmatmul.bf16.gmra.mxu3 %v7871_v0 }
 0x928   : > { %4873 = vmatpush.bf16.msra.mxu2 %v4513_v1  ;;  %4891 = vmatpush.bf16.msra.mxu3 %v4576_v19  ;;  %v4731_v19 = vld [vmem:[%s15033_s4 + $0x18] sm:$0xff] }
 0x92c   : > { %4874 = vmatpush.bf16.msra.mxu2 %v4506_v27  ;;  %4892 = vmatpush.bf16.msra.mxu3 %v4569_v52 }
 0x92e   : > { %4644 = vrot.lane.b32.xlu0 %v4563_v48, %s14798_s13 }
 0x92f   : > { %4652 = vrot.lane.b32.xlu1 %v4577_v47, %s14798_s13 }
 0x930   : > { %4875 = vmatpush.bf16.msra.mxu2 %v12913_v26  ;;  %4893 = vmatpush.bf16.msra.mxu3 %v4562_v41 }
 0x934   : > { %4894 = vmatpush.bf16.msra.mxu3 %v4555_v37 }
 0x936   : > { %4610 = vrot.lane.b32.xlu0 %v12913_v26, %s14798_s13  ;;  %v7851_v26 = vor.u32 %v8173_v39, %v7850_v11  ;;  %v7858_v11 = vld [vmem:[%s15027_s15 + $0x8] sm:$0xf]  ;;  %v8174_v39 = vld [vmem:[%s15027_s15 + $0x14] sm:$0xf0] }
 0x937   : > { %4612 = vrot.lane.b32.xlu1 %v4507_v54, %s14798_s13  ;;  %4895 = vmatmul.bf16.vlgmr.msra.gmra.mxu3 %v7855_v15  ;;  %v4730_v54 = vld [vmem:[%s15033_s4 + $0x10] sm:$0xff]  ;;  %v7859_v3 = vor.u32 %v8174_v39, %v7858_v11  ;;  %v7860_v15 = vld [vmem:[%s15027_s15 + $0x18] sm:$0xf0] }
 0x938   : > { %v13026_v18 = vpop.permute.xlu2 %4638  ;;  %4800 = vmatmul.bf16.vlgmr.msrb.gmra.mxu2 %v7851_v26  ;;  %v7863_v58 = vor.u32 %v8172_v36, %v7860_v15 }
 0x93e   : > { %4744 = vperm.xlu0 %8550, %v4730_v54  }
 0x93f   : > { %4640 = vrot.lane.b32.xlu1 %v4556_v9, %s14798_s13  ;;  %s8235_s13 = sshll.u32 %s9447_s21, 6 }
 0x940   : > { %v13028_v42 = vpop.permute.xlu2 %4666 }
 0x947   : > { %4749 = vperm.xlu1 %8551, %v4731_v19   ;;  %4900 = vmatmul.bf16.gmra.mxu3 %v7871_v0 }
 0x948   : > { %v13034_v5 = vpop.permute.xlu2 %4626  ;;  %4805 = vmatmul.bf16.gmra.mxu2 %v7867_v51 }
 0x94f   : > { %4739 = vperm.xlu1 %8551, %v4729_v12  }
 0x950   : > { %v13042_v63 = vpop.permute.xlu2 %4654 }
 0x958   : > { %v13062_v31 = vpop.permute.xlu2 %4614  ;;  %4876 = vmatmul.bf16.vlgmr.msra.gmra.mxu2 %v7851_v26 }
 0x960   : > { %v13030_v40 = vpop.permute.xlu0 %4634  ;;  %v4633_v53 = vpop.permute.xlu2 %4632 }
 0x961   : > { %v13032_v43 = vpop.permute.xlu1 %4670  ;;  %v4678_v45 = vsel %vm15030_vm0, %v4633_v53, %v13030_v40 }
 0x968   : > { %v13036_v8 = vpop.permute.xlu0 %4662  ;;  %v4661_v14 = vpop.permute.xlu2 %4660  ;;  %4881 = vmatmul.bf16.gmra.mxu2 %v7867_v51  ;;  %v8178_v51 = vld [vmem:[%s15027_s15 + $0x34] sm:$0xf0] }
 0x969   : > { %v13038_v22 = vpop.permute.xlu1 %4630  ;;  %v4685_v10 = vsel %vm15034_vm12, %v4661_v14, %v13036_v8 }
 0x970   : > { %v13040_v16 = vpop.permute.xlu0 %4622  ;;  %v4621_v4 = vpop.permute.xlu2 %4620 }
 0x971   : > { %v13044_v35 = vpop.permute.xlu1 %4658  ;;  %v4675_v34 = vsel %vm15037_vm14, %v4621_v4, %v13040_v16 }
 0x978   : > { %v13058_v60 = vpop.permute.xlu0 %4650  ;;  %v4649_v2 = vpop.permute.xlu2 %4648 }
 0x979   : > { %v13060_v56 = vpop.permute.xlu1 %4618  ;;  %v4682_v32 = vsel %vm15040_vm1, %v4649_v2, %v13058_v60 }
 0x980   : > { %v4669_v7 = vpop.permute.xlu0 %4668 }
 0x981   : > { %v4687_v61 = vsel %vm15028_vm8, %v4669_v7, %v13032_v43  ;;  %v13066_v21 = vpop.permute.xlu1 %4646  ;;  %vm15041_vm8 = vmmov %vm15030_vm0  ;;  %v4643_v7 = vpop.permute.xlu2 %4642 }
 0x982   : > { %4849 = vmatpush.bf16.msrb.mxu1 %v4687_v61 }
 0x988   : > { %v4629_v24 = vpop.permute.xlu0 %4628 }
 0x989   : > { %v4637_v25 = vpop.permute.xlu1 %4636  ;;  %v4677_v46 = vsel %vm15031_vm9, %v4629_v24, %v13038_v22  ;;  %vm15043_vm9 = vmmov %vm15030_vm0 }
 0x98a   : > { %v4679_v38 = vsel %vm15029_vm4, %v4637_v25, %v13026_v18  ;;  %vm15042_vm4 = vmmov %vm15030_vm0 }
 0x98b   : > { %4830 = vmatpush.bf16.msrb.mxu0 %v4679_v38 }
 0x98f   : > { %4831 = vmatpush.bf16.msrb.mxu0 %v4678_v45 }
 0x990   : > { %v4657_v33 = vpop.permute.xlu0 %4656 }
 0x991   : > { %v4665_v17 = vpop.permute.xlu1 %4664  ;;  %v4684_v50 = vsel %vm15036_vm5, %v4657_v33, %v13044_v35 }
 0x992   : > { %v4686_v44 = vsel %vm15032_vm3, %v4665_v17, %v13028_v42 }
 0x993   : > { %4832 = vmatpush.bf16.msrb.mxu0 %v4677_v46  ;;  %4850 = vmatpush.bf16.msrb.mxu1 %v4686_v44 }
 0x997   : > { %4851 = vmatpush.bf16.msrb.mxu1 %v4685_v10 }
 0x998   : > { %v4617_v57 = vpop.permute.xlu0 %4616 }
 0x999   : > { %v4625_v49 = vpop.permute.xlu1 %4624  ;;  %v4674_v52 = vsel %vm15038_vm10, %v4617_v57, %v13060_v56 }
 0x99a   : > { %v4676_v27 = vsel %vm15035_vm11, %v4625_v49, %v13034_v5 }
 0x99b   : > { %4833 = vmatpush.bf16.msrb.mxu0 %v4676_v27  ;;  %4852 = vmatpush.bf16.msrb.mxu1 %v4684_v50 }
 0x99f   : > { %4834 = vmatpush.bf16.msrb.mxu0 %v4675_v34 }
 0x9a0   : > { %v4645_v29 = vpop.permute.xlu0 %4644 }
 0x9a1   : > { %v4653_v47 = vpop.permute.xlu1 %4652  ;;  %v4681_v37 = vsel %vm15042_vm4, %v4645_v29, %v13066_v21 }
 0x9a2   : > { %v4683_v1 = vsel %vm15039_vm2, %v4653_v47, %v13042_v63 }
 0x9a3   : > { %4835 = vmatpush.bf16.msrb.mxu0 %v4674_v52  ;;  %4853 = vmatpush.bf16.msrb.mxu1 %v4683_v1 }
 0x9a7   : > { %4854 = vmatpush.bf16.msrb.mxu1 %v4682_v32 }
 0x9a8   : > { %v4611_v9 = vpop.permute.xlu0 %4610 }
 0x9a9   : > { %v4613_v41 = vpop.permute.xlu1 %4612  ;;  %v4672_v26 = vsel %vm15030_vm0, %v12948_v20, %v4611_v9  ;;  %v4728_v20 = vld [vmem:[%s15033_s4] sm:$0xff] }
 0x9aa   : > { %v4673_v48 = vsel %vm15041_vm8, %v4613_v41, %v13062_v31  ;;  %4734 = vperm.xlu2 %8552, %v4728_v20  }
 0x9ab   : > { %4836 = vmatpush.bf16.msrb.mxu0 %v4673_v48  ;;  %4855 = vmatpush.bf16.msrb.mxu1 %v4681_v37 }
 0x9af   : > { %4837 = vmatpush.bf16.msrb.mxu0 %v4672_v26 }
 0x9b0   : > { %v4745_v4 = vpop.permute.xlu0 %4744 }
 0x9b1   : > { %v4641_v61 = vpop.permute.xlu1 %4640 }
 0x9b2   : > { %4838 = vmatmul.bf16.vlgmr.msrb.gmra.mxu0 %v7859_v3  ;;  %v4680_v13 = vsel %vm15043_vm9, %v4641_v61, %v4643_v7 }
 0x9b3   : > { %4906 = vmatpush.bf16.msra.mxu0 %v13026_v18  ;;  %4856 = vmatpush.bf16.msrb.mxu1 %v4680_v13  ;;  %v7874_v18 = vld [vmem:[%s15027_s15 + $0x28] sm:$0xf] }
 0x9b6   : > { %4857 = vmatmul.bf16.vlgmr.msrb.gmra.mxu1 %v7863_v58 }
 0x9b7   : > { %4907 = vmatpush.bf16.msra.mxu0 %v13030_v40  ;;  %4925 = vmatpush.bf16.msra.mxu1 %v13032_v43  ;;  %v7875_v40 = vor.u32 %v8178_v51, %v7874_v18  ;;  %v8176_v43 = vld [vmem:[%s15027_s15 + $0x2c] sm:$0xf] }
 0x9bb   : > { %4908 = vmatpush.bf16.msra.mxu0 %v13038_v22  ;;  %4926 = vmatpush.bf16.msra.mxu1 %v13028_v42  ;;  %v7876_v42 = vld [vmem:[%s15027_s15 + $0x38] sm:$0xf0]  ;;  %s15087_s15 = sld [smem:[#allocation48_spill]] }
 0x9bc   : > { %v7879_v22 = vor.u32 %v8176_v43, %v7876_v42 }
 0x9bf   : > { %4909 = vmatpush.bf16.msra.mxu0 %v13034_v5  ;;  %4927 = vmatpush.bf16.msra.mxu1 %v13036_v8  ;;  %v4801_v5 = vpop.f32.mrf.mxu2  ;;  %v4820_v8 = vpop.f32.mrf.mxu3 }
 0x9c2   : > { %4843 = vmatmul.bf16.gmra.mxu0 %v7875_v40 }
 0x9c3   : > { %4910 = vmatpush.bf16.msra.mxu0 %v13040_v16  ;;  %4928 = vmatpush.bf16.msra.mxu1 %v13044_v35 }
 0x9c6   : > { %4862 = vmatmul.bf16.gmra.mxu1 %v7879_v22 }
 0x9c7   : > { %4911 = vmatpush.bf16.msra.mxu0 %v13060_v56  ;;  %4929 = vmatpush.bf16.msra.mxu1 %v13042_v63  ;;  %v4803_v16 = vpop.f32.mrf.mxu2  ;;  %v4822_v35 = vpop.f32.mrf.mxu3 }
 0x9c8   : > { %v13159_v56 = vpop.permute.xlu1 %4749 }
 0x9cb   : > { %4912 = vmatpush.bf16.msra.mxu0 %v13062_v31  ;;  %4930 = vmatpush.bf16.msra.mxu1 %v13058_v60 }
 0x9cf   : > { %4913 = vmatpush.bf16.msra.mxu0 %v4611_v9  ;;  %4931 = vmatpush.bf16.msra.mxu1 %v13066_v21  ;;  %v4806_v63 = vpop.f32.mrf.mxu2  ;;  %v4825_v31 = vpop.f32.mrf.mxu3 }
 0x9d0   : > { %v4740_v53 = vpop.permute.xlu1 %4739  ;;  %v4807_v50 = vadd.f32 %v4806_v63, %v4745_v4 }
 0x9d1   : > { %v4804_v38 = vadd.f32 %v4803_v16, %v4740_v53 }
 0x9d2   : > { %4914 = vmatmul.bf16.vlgmr.msra.gmra.mxu0 %v7859_v3  ;;  %v4826_v52 = vadd.f32 %v4825_v31, %v4807_v50 }
 0x9d3   : > { %4932 = vmatpush.bf16.msra.mxu1 %v4643_v7  ;;  %v4823_v17 = vadd.f32 %v4822_v35, %v4804_v38 }
 0x9d6   : > { %4933 = vmatmul.bf16.vlgmr.msra.gmra.mxu1 %v7863_v58 }
 0x9d7   : > { %v4808_v21 = vpop.f32.mrf.mxu2  ;;  %v4827_v14 = vpop.f32.mrf.mxu3 }
 0x9d8   : > { %v4809_v2 = vadd.f32 %v4808_v21, %v13159_v56 }
 0x9da   : > { %v4828_v11 = vadd.f32 %v4827_v14, %v4809_v2 }
 0x9df   : > { %v4877_v10 = vpop.f32.mrf.mxu2  ;;  %v4896_v34 = vpop.f32.mrf.mxu3 }
 0x9e2   : > { %4919 = vmatmul.bf16.gmra.mxu0 %v7875_v40 }
 0x9e6   : > { %4938 = vmatmul.bf16.gmra.mxu1 %v7879_v22 }
 0x9e7   : > { %v4879_v32 = vpop.f32.mrf.mxu2  ;;  %v4898_v39 = vpop.f32.mrf.mxu3 }
 0x9e8   : > { %v4880_v13 = vadd.f32 %v4879_v32, %v4740_v53 }
 0x9ea   : > { %v4899_v42 = vadd.f32 %v4898_v39, %v4880_v13 }
 0x9ef   : > { %v4882_v40 = vpop.f32.mrf.mxu2  ;;  %v4901_v16 = vpop.f32.mrf.mxu3 }
 0xa04   : > { %v4735_v62 = vpop.permute.xlu2 %4734 }
 0xa05   : > { %v4802_v60 = vadd.f32 %v4801_v5, %v4735_v62  ;;  %v4878_v47 = vadd.f32 %v4877_v10, %v4735_v62  ;;  %v4883_v5 = vadd.f32 %v4882_v40, %v4745_v4 }
 0xa07   : > { %v4821_v25 = vadd.f32 %v4820_v8, %v4802_v60  ;;  %v4897_v54 = vadd.f32 %v4896_v34, %v4878_v47 }
 0xa2f   : > { %v4839_v59 = vpop.f32.mrf.mxu0 }
 0xa30   : > { %v4840_v33 = vadd.f32 %v4839_v59, %v4821_v25 }
 0xa33   : > { %v4858_v0 = vpop.f32.mrf.mxu1 }
 0xa34   : > { %v13161_v19 = vadd.f32 %v4858_v0, %v4840_v33  ;;  %v4902_v0 = vadd.f32 %v4901_v16, %v4883_v5 }
 0xa36   : > { %v7882_v12 = vmul.f32 -1.442695, %v13161_v19 }
 0xa37   : > { %v4841_v24 = vpop.f32.mrf.mxu0 }
 0xa38   : > { %v4842_v44 = vadd.f32 %v4841_v24, %v4823_v17  ;;  %8739 = vpow2.f32 %v7882_v12  ;;  %v4903_v12 = vpop.f32.mrf.mxu3 }
 0xa3b   : > { %v4860_v45 = vpop.f32.mrf.mxu1 }
 0xa3c   : > { %v13163_v57 = vadd.f32 %v4860_v45, %v4842_v44  ;;  %v4884_v45 = vpop.f32.mrf.mxu2 }
 0xa3d   : > { %v4885_v44 = vadd.f32 %v4884_v45, %v13159_v56 }
 0xa3e   : > { %v7884_v27 = vmul.f32 -1.442695, %v13163_v57  ;;  %v8740_v48 = vpop.eup %8739 }
 0xa3f   : > { %v4844_v46 = vpop.f32.mrf.mxu0  ;;  %v13168_v26 = vadd.f32 1.0, %v8740_v48 }
 0xa40   : > { %8741 = vpow2.f32 %v7884_v27  ;;  %v4845_v41 = vadd.f32 %v4844_v46, %v4826_v52 }
 0xa41   : > { %8743 = vrcp.f32 %v13168_v26  ;;  %vm4981_vm3 = vweird.f32 %v13168_v26  ;;  %v4985_v48 = vand.u32 2147483647, %v13168_v26 }
 0xa43   : > { %v4863_v49 = vpop.f32.mrf.mxu1  ;;  %vm13229_vm10 = vcmp.eq.f32.partialorder %v4985_v48, 8.507059e+37 }
 0xa44   : > { %v13170_v3 = vadd.f32 %v4863_v49, %v4845_v41 }
 0xa46   : > { %v8742_v9 = vpop.eup %8741  ;;  %v7886_v18 = vmul.f32 -1.442695, %v13170_v3 }
 0xa47   : > { %v4846_v29 = vpop.f32.mrf.mxu0  ;;  %v13172_v15 = vadd.f32 1.0, %v8742_v9  ;;  %v13183_v63 = vpop.eup %8743 }
 0xa48   : > { %v4847_v7 = vadd.f32 %v4846_v29, %v4828_v11  ;;  %v4977_v25 = vmul.f32 %v13183_v63, %v13168_v26  ;;  %vm4982_vm12 = vweird.f32 %v13183_v63 }
 0xa49   : > { %8745 = vrcp.f32 %v13172_v15  ;;  %v5015_v11 = vand.u32 2147483647, %v13172_v15  ;;  %v5017_v16 = vand.u32 2147483648, %v13172_v15  ;;  %vm13247_vm1 = vmor %vm4981_vm3, %vm4982_vm12  ;;  %vm5011_vm8 = vweird.f32 %v13172_v15 }
 0xa4a   : > { %v4978_v4 = vsub.f32 1.0, %v4977_v25 }
 0xa4b   : > { %v4865_v1 = vpop.f32.mrf.mxu1  ;;  %vm5016_vm0 = vcmp.eq.f32.partialorder %v5015_v11, 8.507059e+37 }
 0xa4c   : > { %v13176_v20 = vadd.f32 %v4865_v1, %v4847_v7  ;;  %v4904_v1 = vadd.f32 %v4903_v12, %v4885_v44  ;;  %v4979_v56 = vmul.f32 %v13183_v63, %v4978_v4 }
 0xa4e   : > { %v7888_v22 = vmul.f32 -1.442695, %v13176_v20 }
 0xa4f   : > { %v4915_v37 = vpop.f32.mrf.mxu0  ;;  %v13187_v62 = vpop.eup %8745 }
 0xa50   : > { %v4916_v36 = vadd.f32 %v4915_v37, %v4897_v54  ;;  %v5007_v38 = vmul.f32 %v13187_v62, %v13172_v15  ;;  %v4987_v37 = vand.u32 2147483648, %v13168_v26  ;;  %vm5012_vm5 = vweird.f32 %v13187_v62 }
 0xa51   : > { %vm13260_vm4 = vmor %vm5011_vm8, %vm5012_vm5 }
 0xa52   : > { %v5008_v49 = vsub.f32 1.0, %v5007_v38 }
 0xa53   : > { %v4934_v61 = vpop.f32.mrf.mxu1 }
 0xa54   : > { %v13174_v58 = vadd.f32 %v4934_v61, %v4916_v36  ;;  %v5009_v32 = vmul.f32 %v13187_v62, %v5008_v49  ;;  %v4980_v61 = vadd.f32 %v13183_v63, %v4979_v56 }
 0xa56   : > { %v7883_v51 = vmul.f32 -1.442695, %v13174_v58  ;;  %v5010_v13 = vadd.f32 %v13187_v62, %v5009_v32 }
 0xa57   : > { %v4917_v43 = vpop.f32.mrf.mxu0 }
 0xa58   : > { %8747 = vpow2.f32 %v7883_v51  ;;  %v4918_v8 = vadd.f32 %v4917_v43, %v4899_v42  ;;  %v5014_v38 = vsel %vm13260_vm4, %v13187_v62, %v5010_v13 }
 0xa59   : > { %8749 = vpow2.f32 %v7886_v18 }
 0xa5a   : > { %8751 = vpow2.f32 %v7888_v22 }
 0xa5b   : > { %v4936_v35 = vpop.f32.mrf.mxu1 }
 0xa5c   : > { %v13185_v59 = vadd.f32 %v4936_v35, %v4918_v8  ;;  %v4988_v8 = vor.u32 1.1754944e-38, %v4987_v37 }
 0xa5e   : > { %v8748_v31 = vpop.eup %8747  ;;  %v7885_v60 = vmul.f32 -1.442695, %v13185_v59 }
 0xa5f   : > { %v13190_v53 = vadd.f32 1.0, %v8748_v31  ;;  %v4920_v24 = vpop.f32.mrf.mxu0  ;;  %v8750_v21 = vpop.eup %8749 }
 0xa60   : > { %8753 = vpow2.f32 %v7885_v60  ;;  %v4921_v14 = vadd.f32 %v4920_v24, %v4902_v0  ;;  %v8752_v33 = vpop.eup %8751  ;;  %v13197_v17 = vadd.f32 1.0, %v8750_v21  ;;  %v4984_v21 = vsel %vm13247_vm1, %v13183_v63, %v4980_v61 }
 0xa61   : > { %8755 = vrcp.f32 %v13190_v53  ;;  %v13202_v50 = vadd.f32 1.0, %v8752_v33  ;;  %v5002_v18 = vand.u32 2147483648, %v13190_v53  ;;  %vm4996_vm14 = vweird.f32 %v13190_v53 }
 0xa62   : > { %8757 = vrcp.f32 %v13197_v17  ;;  %v5000_v43 = vand.u32 2147483647, %v13190_v53  ;;  %v5018_v63 = vor.u32 1.1754944e-38, %v5017_v16  ;;  %v4989_v44 = vsel %vm13229_vm10, %v4988_v8, %v4984_v21 }
 0xa63   : > { %v4939_v46 = vpop.f32.mrf.mxu1  ;;  %v5003_v15 = vor.u32 1.1754944e-38, %v5002_v18  ;;  %v5077_v26 = vand.u32 2147483648, %v13202_v50 }
 0xa64   : > { %v13200_v10 = vadd.f32 %v4939_v46, %v4921_v14  ;;  %vm5001_vm9 = vcmp.eq.f32.partialorder %v5000_v43, 8.507059e+37  ;;  %v5019_v12 = vsel %vm5016_vm0, %v5018_v63, %v5014_v38  ;;  %v5075_v38 = vand.u32 2147483647, %v13202_v50 }
 0xa66   : > { %v8754_v27 = vpop.eup %8753  ;;  %v7887_v34 = vmul.f32 -1.442695, %v13200_v10 }
 0xa67   : > { %v8756_v29 = vpop.eup %8755  ;;  %v13206_v47 = vadd.f32 1.0, %v8754_v27  ;;  %v4922_v52 = vpop.f32.mrf.mxu0 }
 0xa68   : > { %v4992_v2 = vmul.f32 %v8756_v29, %v13190_v53  ;;  %8759 = vpow2.f32 %v7887_v34  ;;  %v4923_v41 = vadd.f32 %v4922_v52, %v4904_v1  ;;  %vm4997_vm11 = vweird.f32 %v8756_v29  ;;  %v13220_v7 = vpop.eup %8757 }
 0xa69   : > { %8761 = vrcp.f32 %v13206_v47  ;;  %vm13235_vm2 = vmor %vm4996_vm14, %vm4997_vm11  ;;  %v5037_v25 = vmul.f32 %v13220_v7, %v13197_v17  ;;  %v5032_v46 = vand.u32 2147483648, %v13206_v47  ;;  %v5030_v49 = vand.u32 2147483647, %v13206_v47 }
 0xa6a   : > { %8763 = vrcp.f32 %v13202_v50  ;;  %v4993_v54 = vsub.f32 1.0, %v4992_v2  ;;  %vm5026_vm12 = vweird.f32 %v13206_v47  ;;  %v5096_v1 = vmul.f32 %v4989_v44, %v13161_v19 }
 0xa6b   : > { %v4941_v9 = vpop.f32.mrf.mxu1  ;;  %v5038_v27 = vsub.f32 1.0, %v5037_v25  ;;  %v5033_v56 = vor.u32 1.1754944e-38, %v5032_v46  ;;  %vm5031_vm5 = vcmp.eq.f32.partialorder %v5030_v49, 8.507059e+37  ;;  %vm5042_vm1 = vweird.f32 %v13220_v7 }
 0xa6c   : > { %v4994_v39 = vmul.f32 %v8756_v29, %v4993_v54  ;;  %v13218_v36 = vadd.f32 %v4941_v9, %v4923_v41  ;;  %v5098_v54 = vmul.f32 %v5019_v12, %v13163_v57  ;;  %v5078_v44 = vor.u32 1.1754944e-38, %v5077_v26 }
 0xa6d   : > { %v5039_v37 = vmul.f32 %v13220_v7, %v5038_v27 }
 0xa6e   : > { %v8760_v51 = vpop.eup %8759  ;;  %v4995_v40 = vadd.f32 %v8756_v29, %v4994_v39  ;;  %v7889_v42 = vmul.f32 -1.442695, %v13218_v36 }
 0xa6f   : > { %v8762_v22 = vpop.eup %8761  ;;  %v13239_v31 = vadd.f32 1.0, %v8760_v51  ;;  %v5040_v18 = vadd.f32 %v13220_v7, %v5039_v37  ;;  %v5045_v51 = vand.u32 2147483647, %v13197_v17 }
 0xa70   : > { %v13241_v0 = vpop.eup %8763  ;;  %v4999_v53 = vsel %vm13235_vm2, %v8756_v29, %v4995_v40  ;;  %v5022_v24 = vmul.f32 %v8762_v22, %v13206_v47  ;;  %8765 = vpow2.f32 %v7889_v42  ;;  %vm5027_vm3 = vweird.f32 %v8762_v22 }
 0xa71   : > { %8767 = vrcp.f32 %v13239_v31  ;;  %v5067_v14 = vmul.f32 %v13241_v0, %v13202_v50  ;;  %v5004_v33 = vsel %vm5001_vm9, %v5003_v15, %v4999_v53  ;;  %vm5028_vm11 = vmor %vm5026_vm12, %vm5027_vm3  ;;  %vm5056_vm14 = vweird.f32 %v13239_v31 }
 0xa72   : > { %v5023_v45 = vsub.f32 1.0, %v5022_v24  ;;  %v5097_v34 = vmul.f32 %v5004_v33, %v13174_v58  ;;  %v5062_v57 = vand.u32 2147483648, %v13239_v31  ;;  %vm5041_vm2 = vweird.f32 %v13197_v17 }
 0xa73   : > { %v5068_v2 = vsub.f32 1.0, %v5067_v14  ;;  %v5060_v13 = vand.u32 2147483647, %v13239_v31  ;;  %vm5072_vm4 = vweird.f32 %v13241_v0  ;;  %vm13310_vm9 = vmor %vm5041_vm2, %vm5042_vm1  ;;  %vm5071_vm3 = vweird.f32 %v13202_v50 }
 0xa74   : > { %v5024_v4 = vmul.f32 %v8762_v22, %v5023_v45  ;;  %v5104_v47 = vpack.c.bf16 %v5097_v34, %v5096_v1  ;;  %v5063_v60 = vor.u32 1.1754944e-38, %v5062_v57  ;;  %v5044_v15 = vsel %vm13310_vm9, %v13220_v7, %v5040_v18 }
 0xa75   : > { %v5069_v11 = vmul.f32 %v13241_v0, %v5068_v2  ;;  %vm5061_vm0 = vcmp.eq.f32.partialorder %v5060_v13, 8.507059e+37  ;;  %vm5046_vm12 = vcmp.eq.f32.partialorder %v5045_v51, 8.507059e+37  ;;  %vm15061_vm9 = vcmask 990208  }
 0xa76   : > { %v8766_v62 = vpop.eup %8765  ;;  %v5025_v29 = vadd.f32 %v8762_v22, %v5024_v4  ;;  %v5113_v43 = vunpack.c.h.b16 %v5104_v47  ;;  %v5112_v35 = vunpack.c.l.b16 %v5104_v47 }
 0xa77   : > { %v8768_v52 = vpop.eup %8767  ;;  %v13279_v32 = vadd.f32 1.0, %v8766_v62  ;;  %v5070_v16 = vadd.f32 %v13241_v0, %v5069_v11 }
 0xa78   : > { %v5029_v41 = vsel %vm5028_vm11, %v8762_v22, %v5025_v29  ;;  %v5052_v48 = vmul.f32 %v8768_v52, %v13239_v31  ;;  %vm5057_vm10 = vweird.f32 %v8768_v52  ;;  %vm5073_vm11 = vmor %vm5071_vm3, %vm5072_vm4  ;;  %vm15059_vm4 = vcmask 924672  }
 0xa79   : > { %v5034_v58 = vsel %vm5031_vm5, %v5033_v56, %v5029_v41  ;;  %8769 = vrcp.f32 %v13279_v32  ;;  %vm13297_vm8 = vmor %vm5056_vm14, %vm5057_vm10  ;;  %v5092_v14 = vand.u32 2147483648, %v13279_v32  ;;  %v5074_v33 = vsel %vm5073_vm11, %v13241_v0, %v5070_v16 }
 0xa7a   : > { %v5099_v19 = vmul.f32 %v5034_v58, %v13185_v59  ;;  %v5053_v9 = vsub.f32 1.0, %v5052_v48  ;;  %v5047_v59 = vand.u32 2147483648, %v13197_v17  ;;  %v5090_v46 = vand.u32 2147483647, %v13279_v32  ;;  %vm15062_vm3 = vmmov %vm15061_vm9 }
 0xa7b   : > { %vm5076_vm14 = vcmp.eq.f32.partialorder %v5075_v38, 8.507059e+37  ;;  %vm5086_vm10 = vweird.f32 %v13279_v32  ;;  %v5093_v27 = vor.u32 1.1754944e-38, %v5092_v14  ;;  %v5371_v38 = vld [vmem:[%s15058_s16 + $0x10] sm:$0xff]  ;;  %vm15064_vm11 = vcmask 1022976  }
 0xa7c   : > { %v5105_v39 = vpack.c.bf16 %v5099_v19, %v5098_v54  ;;  %v5054_v61 = vmul.f32 %v8768_v52, %v5053_v9  ;;  %v5048_v17 = vor.u32 1.1754944e-38, %v5047_v59  ;;  %v5079_v12 = vsel %vm5076_vm14, %v5078_v44, %v5074_v33  ;;  %v5372_v33 = vld [vmem:[%s15058_s16 + $0x18] sm:$0xff]  ;;  %vm15066_vm14 = vmmov %vm15064_vm11 }
 0xa7d   : > { %vm5091_vm1 = vcmp.eq.f32.partialorder %v5090_v46, 8.507059e+37  ;;  %v5102_v29 = vmul.f32 %v5079_v12, %v13176_v20 }
 0xa7e   : > { %v5114_v42 = vunpack.c.l.b16 %v5105_v39  ;;  %v5115_v22 = vunpack.c.h.b16 %v5105_v39  ;;  %v5055_v5 = vadd.f32 %v8768_v52, %v5054_v61  ;;  %v5049_v50 = vsel %vm5046_vm12, %v5048_v17, %v5044_v15  ;;  %v5369_v15 = vld [vmem:[%s15057_s29] sm:$0xff] }
 0xa7f   : > { %v8770_v8 = vpop.eup %8769  ;;  %v5100_v62 = vmul.f32 %v5049_v50, %v13170_v3  ;;  %vm15063_vm12 = vcmask 998400  }
 0xa80   : > { %v5059_v53 = vsel %vm13297_vm8, %v8768_v52, %v5055_v5  ;;  %v5082_v31 = vmul.f32 %v8770_v8, %v13279_v32  ;;  %v5121_v24 = vpack.c.b16 %v5115_v22, %v5113_v43  ;;  %v5120_v25 = vpack.c.b16 %v5114_v42, %v5112_v35 }
 0xa81   : > { %v5064_v63 = vsel %vm5061_vm0, %v5063_v60, %v5059_v53  ;;  %vm5087_vm5 = vweird.f32 %v8770_v8  ;;  %vm5140_vm8 = vcmask 687104   ;;  %vm15060_vm0 = vmmov %vm15059_vm4 }
 0xa82   : > { %v5083_v45 = vsub.f32 1.0, %v5082_v31  ;;  %5126 = vrot.lane.b32.xlu2 %v5121_v24, %s15056_s30  ;;  %5124 = vrot.lane.b32.xlu1 %v5120_v25, %s15056_s30  ;;  %v5101_v4 = vmul.f32 %v5064_v63, %v13200_v10  ;;  %vm5088_vm2 = vmor %vm5086_vm10, %vm5087_vm5  ;;  %vm15067_vm10 = vcmask 1006592  }
 0xa83   : > { %vm15065_vm5 = vmmov %vm15063_vm12 }
 0xa84   : > { %v5084_v7 = vmul.f32 %v8770_v8, %v5083_v45  ;;  %v5106_v52 = vpack.c.bf16 %v5101_v4, %v5100_v62  ;;  %v5370_v45 = vld [vmem:[%s15058_s16 + $0x8] sm:$0xff] }
 0xa86   : > { %v5085_v49 = vadd.f32 %v8770_v8, %v5084_v7  ;;  %v5116_v56 = vunpack.c.l.b16 %v5106_v52  ;;  %v5117_v54 = vunpack.c.h.b16 %v5106_v52  ;;  %v8965_v7 = vld [vmem:[%s14961_s3] ss:$0 sm:$0xff] }
 0xa88   : > { %v5089_v34 = vsel %vm5088_vm2, %v8770_v8, %v5085_v49  ;;  %vm15068_vm2 = vcmask 1031168  }
 0xa89   : > { %v5094_v0 = vsel %vm5091_vm1, %v5093_v27, %v5089_v34  ;;  %vm15069_vm1 = vcmask 957440  }
 0xa8a   : > { %v5103_v1 = vmul.f32 %v5094_v0, %v13218_v36 }
 0xa8c   : > { %v5107_v2 = vpack.c.bf16 %v5103_v1, %v5102_v29 }
 0xa8e   : > { %v5118_v10 = vunpack.c.l.b16 %v5107_v2  ;;  %v5119_v41 = vunpack.c.h.b16 %v5107_v2 }
 0xa90   : > { %v5123_v48 = vpack.c.b16 %v5119_v41, %v5117_v54  ;;  %v5122_v32 = vpack.c.b16 %v5118_v10, %v5116_v56 }
 0xa92   : > { %5130 = vrot.lane.b32.xlu0 %v5123_v48, %s15056_s30  ;;  %5128 = vrot.lane.b32.xlu2 %v5122_v32, %s15056_s30 }
 0xadc   : > { %v5127_v20 = vpop.permute.xlu2 %5126 }
 0xaec   : > { %v13387_v47 = vpop.permute.xlu2 %5128 }
 0xaed   : > { %v5138_v19 = vsel %vm4490_vm15, 0, %v13387_v47 }
 0xaf4   : > { %v13334_v3 = vpop.permute.xlu1 %5124 }
 0xaf5   : > { %v13338_v37 = vsel %vm4490_vm15, 0, %v13334_v3  ;;  %v5132_v36 = vsel %vm4490_vm15, %v13334_v3, %v5127_v20 }
 0xaf6   : > { %5165 = vrot.lane.b32.xlu2 %v13338_v37, %s14772_s25  ;;  %5235 = vrot.lane.b32.xlu0 %v13338_v37, %s14795_s5  ;;  %v13361_v58 = vsel %vm5140_vm8, %v5132_v36, 0 }
 0xaf7   : > { %5179 = vrot.lane.b32.xlu1 %v13338_v37, %s14787_s9 }
 0xafe   : > { %5291 = vrot.lane.b32.xlu2 %v13338_v37, %s14661_s26  ;;  %5221 = vrot.lane.b32.xlu0 %v13338_v37, %s14789_s1 }
 0xaff   : > { %5207 = vrot.lane.b32.xlu1 %v13338_v37, %s14784_s10 }
 0xb04   : > { %v5131_v9 = vpop.permute.xlu0 %5130 }
 0xb05   : > { %v5133_v57 = vsel %vm4490_vm15, %v13387_v47, %v5131_v9 }
 0xb06   : > { %5333 = vrot.lane.b32.xlu2 %v13338_v37, %s14783_s12  ;;  %5347 = vrot.lane.b32.xlu0 %v13338_v37, %s14799_s14  ;;  %v13416_v39 = vsel %vm5140_vm8, %v5133_v57, 0  ;;  %vm15070_vm8 = vmmov %vm15067_vm10 }
 0xb07   : > { %5193 = vrot.lane.b32.xlu1 %v13338_v37, %s14769_s7 }
 0xb0e   : > { %5319 = vrot.lane.b32.xlu2 %v13338_v37, %s14796_s11  ;;  %5151 = vrot.lane.b32.xlu0 %v13338_v37, %s14771_s0 }
 0xb0f   : > { %5237 = vrot.lane.b32.xlu1 %v13361_v58, %s14795_s5 }
 0xb16   : > { %5277 = vrot.lane.b32.xlu0 %v13338_v37, %s14770_s22  ;;  %5181 = vrot.lane.b32.xlu2 %v13361_v58, %s14787_s9 }
 0xb17   : > { %5223 = vrot.lane.b32.xlu1 %v13361_v58, %s14789_s1 }
 0xb1e   : > { %5263 = vrot.lane.b32.xlu0 %v13338_v37, %s14781_s23  ;;  %5209 = vrot.lane.b32.xlu2 %v13361_v58, %s14784_s10 }
 0xb1f   : > { %5349 = vrot.lane.b32.xlu1 %v13361_v58, %s14799_s14 }
 0xb26   : > { %5167 = vrot.lane.b32.xlu0 %v13361_v58, %s14772_s25  ;;  %5195 = vrot.lane.b32.xlu2 %v13361_v58, %s14769_s7 }
 0xb27   : > { %5153 = vrot.lane.b32.xlu1 %v13361_v58, %s14771_s0 }
 0xb2e   : > { %5293 = vrot.lane.b32.xlu0 %v13361_v58, %s14661_s26  ;;  %5239 = vrot.lane.b32.xlu2 %v5138_v19, %s14795_s5 }
 0xb2f   : > { %5279 = vrot.lane.b32.xlu1 %v13361_v58, %s14770_s22 }
 0xb36   : > { %5335 = vrot.lane.b32.xlu0 %v13361_v58, %s14783_s12  ;;  %5169 = vrot.lane.b32.xlu2 %v5138_v19, %s14772_s25 }
 0xb37   : > { %5265 = vrot.lane.b32.xlu1 %v13361_v58, %s14781_s23 }
 0xb3e   : > { %5321 = vrot.lane.b32.xlu0 %v13361_v58, %s14796_s11  ;;  %5211 = vrot.lane.b32.xlu2 %v5138_v19, %s14784_s10 }
 0xb3f   : > { %5225 = vrot.lane.b32.xlu1 %v5138_v19, %s14789_s1 }
 0xb46   : > { %5183 = vrot.lane.b32.xlu0 %v5138_v19, %s14787_s9  ;;  %5337 = vrot.lane.b32.xlu2 %v5138_v19, %s14783_s12 }
 0xb47   : > { %5351 = vrot.lane.b32.xlu1 %v5138_v19, %s14799_s14 }
 0xb4e   : > { %5295 = vrot.lane.b32.xlu0 %v5138_v19, %s14661_s26  ;;  %5323 = vrot.lane.b32.xlu2 %v5138_v19, %s14796_s11 }
 0xb4f   : > { %5155 = vrot.lane.b32.xlu1 %v5138_v19, %s14771_s0 }
 0xb50   : > { %v13411_v11 = vpop.permute.xlu2 %5165 }
 0xb56   : > { %5267 = vrot.lane.b32.xlu0 %v5138_v19, %s14781_s23  ;;  %5227 = vrot.lane.b32.xlu2 %v13416_v39, %s14789_s1 }
 0xb57   : > { %5281 = vrot.lane.b32.xlu1 %v5138_v19, %s14770_s22 }
 0xb58   : > { %v13422_v61 = vpop.permute.xlu2 %5291 }
 0xb5e   : > { %5241 = vrot.lane.b32.xlu0 %v13416_v39, %s14795_s5  ;;  %5353 = vrot.lane.b32.xlu2 %v13416_v39, %s14799_s14 }
 0xb5f   : > { %5197 = vrot.lane.b32.xlu1 %v5138_v19, %s14769_s7 }
 0xb60   : > { %v13429_v13 = vpop.permute.xlu2 %5333 }
 0xb66   : > { %5171 = vrot.lane.b32.xlu0 %v13416_v39, %s14772_s25  ;;  %5157 = vrot.lane.b32.xlu2 %v13416_v39, %s14771_s0 }
 0xb67   : > { %5185 = vrot.lane.b32.xlu1 %v13416_v39, %s14787_s9 }
 0xb68   : > { %v13437_v18 = vpop.permute.xlu2 %5319  ;;  %v13439_v51 = vpop.permute.xlu0 %5235 }
 0xb69   : > { %v13441_v59 = vpop.permute.xlu1 %5179 }
 0xb6e   : > { %5213 = vrot.lane.b32.xlu0 %v13416_v39, %s14784_s10  ;;  %5283 = vrot.lane.b32.xlu2 %v13416_v39, %s14770_s22 }
 0xb6f   : > { %5297 = vrot.lane.b32.xlu1 %v13416_v39, %s14661_s26 }
 0xb70   : > { %v13449_v40 = vpop.permute.xlu0 %5221  ;;  %v13451_v43 = vpop.permute.xlu2 %5181 }
 0xb71   : > { %v13453_v42 = vpop.permute.xlu1 %5207 }
 0xb76   : > { %5339 = vrot.lane.b32.xlu0 %v13416_v39, %s14783_s12  ;;  %5199 = vrot.lane.b32.xlu2 %v13416_v39, %s14769_s7 }
 0xb77   : > { %5253 = vrot.lane.b32.xlu1 %v5138_v19, %s14782_s24 }
 0xb78   : > { %v13460_v22 = vpop.permute.xlu0 %5347  ;;  %v13462_v5 = vpop.permute.xlu2 %5209 }
 0xb79   : > { %v13464_v8 = vpop.permute.xlu1 %5193 }
 0xb7e   : > { %5325 = vrot.lane.b32.xlu0 %v13416_v39, %s14796_s11  ;;  %5249 = vrot.lane.b32.xlu2 %v13338_v37, %s14782_s24 }
 0xb7f   : > { %5269 = vrot.lane.b32.xlu1 %v13416_v39, %s14781_s23 }
 0xb80   : > { %v13472_v16 = vpop.permute.xlu0 %5151  ;;  %v13474_v35 = vpop.permute.xlu2 %5195 }
 0xb81   : > { %v13476_v60 = vpop.permute.xlu1 %5237 }
 0xb82   : > { %v5243_v36 = vsel %vm15062_vm3, %v13439_v51, %v13476_v60  ;;  %v5187_v51 = vsel %vm15066_vm14, %v13441_v59, %v13451_v43  ;;  %v5215_v59 = vsel %vm15070_vm8, %v13453_v42, %v13462_v5  ;;  %vm15074_vm3 = vcmask 932864  }
 0xb83   : > { %vm15078_vm14 = vmmov %vm15074_vm3 }
 0xb86   : > { %5309 = vrot.lane.b32.xlu0 %v5138_v19, %s14619_s20  ;;  %5255 = vrot.lane.b32.xlu2 %v13416_v39, %s14782_s24 }
 0xb87   : > { %5311 = vrot.lane.b32.xlu1 %v13416_v39, %s14619_s20 }
 0xb88   : > { %v13483_v53 = vpop.permute.xlu0 %5277  ;;  %v13485_v31 = vpop.permute.xlu2 %5239 }
 0xb89   : > { %v13487_v24 = vpop.permute.xlu1 %5223 }
 0xb8e   : > { %5251 = vrot.lane.b32.xlu0 %v13361_v58, %s14782_s24  ;;  %5307 = vrot.lane.b32.xlu2 %v13361_v58, %s14619_s20 }
 0xb8f   : > { %5305 = vrot.lane.b32.xlu1 %v13338_v37, %s14619_s20 }
 0xb90   : > { %v13495_v21 = vpop.permute.xlu0 %5263  ;;  %v13497_v26 = vpop.permute.xlu2 %5169 }
 0xb91   : > { %v13499_v25 = vpop.permute.xlu1 %5349 }
 0xb92   : > { %v5355_v2 = vsel %vm15060_vm0, %v13460_v22, %v13499_v25  ;;  %vm15072_vm0 = vmmov %vm15069_vm1 }
 0xb96   : > { %5375 = vperm.xlu0 %8550, %v5369_v15   ;;  %5385 = vperm.xlu2 %8552, %v5371_v38  }
 0xb97   : > { %5380 = vperm.xlu1 %8551, %v5370_v45  }
 0xb98   : > { %v13510_v17 = vpop.permute.xlu0 %5167  ;;  %v13512_v63 = vpop.permute.xlu2 %5211 }
 0xb99   : > { %v13514_v14 = vpop.permute.xlu1 %5153 }
 0xb9e   : > { %8553 = vset.pattern.permute.xlu0 %v9323_v28  ;;  %8554 = vset.pattern.permute.xlu2 %v9323_v28 }
 0xb9f   : > { %5390 = vperm.xlu1 %8551, %v5372_v33   ;;  %5610 = vperm.xlu0 %8553, %v8965_v7  }
 0xba0   : > { %v13524_v46 = vpop.permute.xlu0 %5293  ;;  %v13526_v50 = vpop.permute.xlu2 %5337  ;;  %5745 = vperm.xlu2 %8554, %v12766_v30  }
 0xba1   : > { %v13529_v44 = vpop.permute.xlu1 %5279 }
 0xba7   : > { %8555 = vset.pattern.permute.xlu1 %v9323_v28  ;;  %8556 = vset.pattern.permute.xlu0 %v9324_v23 }
 0xba8   : > { %v13533_v4 = vpop.permute.xlu0 %5335  ;;  %v13535_v49 = vpop.permute.xlu2 %5323  ;;  %5769 = vperm.xlu1 %8555, %v5371_v38   ;;  %5789 = vperm.xlu0 %8556, %v5371_v38  }
 0xba9   : > { %v13537_v12 = vpop.permute.xlu1 %5265  ;;  %5773 = vperm.xlu2 %8554, %v5372_v33  }
 0xbb0   : > { %v13539_v27 = vpop.permute.xlu0 %5321  ;;  %v13541_v62 = vpop.permute.xlu2 %5227  ;;  %8557 = vset.pattern.permute.xlu1 %v9324_v23  ;;  %5785 = vperm.xlu0 %8556, %v5370_v45  }
 0xbb1   : > { %v5226_v34 = vpop.permute.xlu1 %5225  ;;  %5793 = vperm.xlu1 %8557, %v5372_v33   ;;  %5761 = vperm.xlu2 %8554, %v5369_v15  }
 0xbb2   : > { %v5230_v22 = vsel %vm15063_vm12, %v5226_v34, %v13541_v62  ;;  %vm15075_vm12 = vcmask 1039360  }
 0xbb8   : > { %v5184_v0 = vpop.permute.xlu0 %5183  ;;  %v13544_v29 = vpop.permute.xlu2 %5353  ;;  %8560 = vset.pattern.permute.xlu0 %v15006_v6 }
 0xbb9   : > { %v5352_v52 = vpop.permute.xlu1 %5351  ;;  %8558 = vset.pattern.permute.xlu1 %v9323_v28  ;;  %8559 = vset.pattern.permute.xlu2 %v9324_v23 }
 0xbba   : > { %v5356_v1 = vsel %vm15059_vm4, %v5352_v52, %v13544_v29  ;;  %5765 = vperm.xlu1 %8558, %v5370_v45   ;;  %5781 = vperm.xlu2 %8559, %v5369_v15   ;;  %vm15071_vm4 = vmmov %vm15068_vm2 }
 0xbbb   : > { %5490 = vmatpush.bf16.msrb.mxu1 %v5356_v1 }
 0xbbf   : > { %5491 = vmatpush.bf16.msrb.mxu1 %v5355_v2 }
 0xbc0   : > { %v5296_v56 = vpop.permute.xlu0 %5295  ;;  %v13558_v48 = vpop.permute.xlu2 %5157 }
 0xbc1   : > { %v5156_v54 = vpop.permute.xlu1 %5155 }
 0xbc2   : > { %8561 = vset.pattern.permute.xlu1 %v15006_v6  ;;  %8562 = vset.pattern.permute.xlu2 %v15006_v6 }
 0xbc8   : > { %v13556_v10 = vpop.permute.xlu0 %5267  ;;  %v13567_v9 = vpop.permute.xlu2 %5283 }
 0xbc9   : > { %v5282_v41 = vpop.permute.xlu1 %5281 }
 0xbd0   : > { %v5242_v32 = vpop.permute.xlu0 %5241  ;;  %v13593_v34 = vpop.permute.xlu2 %5199 }
 0xbd1   : > { %v5198_v37 = vpop.permute.xlu1 %5197  ;;  %v5244_v20 = vsel %vm15061_vm9, %v13485_v31, %v5242_v32  ;;  %v5229_v31 = vsel %vm15065_vm5, %v13449_v40, %v13487_v24  ;;  %vm15073_vm9 = vcmask 1014784  }
 0xbd2   : > { %5452 = vmatpush.bf16.msrb.mxu3 %v5244_v20  ;;  %v5202_v1 = vsel %vm15073_vm9, %v5198_v37, %v13593_v34  ;;  %vm15077_vm5 = vmmov %vm15073_vm9 }
 0xbd3   : > { %v5201_v37 = vsel %vm15077_vm5, %v13464_v8, %v13474_v35 }
 0xbd6   : > { %5453 = vmatpush.bf16.msrb.mxu3 %v5243_v36 }
 0xbd8   : > { %v13565_v19 = vpop.permute.xlu0 %5171  ;;  %v5250_v20 = vpop.permute.xlu2 %5249 }
 0xbd9   : > { %v13569_v57 = vpop.permute.xlu1 %5185  ;;  %v5174_v7 = vsel %vm15068_vm2, %v13497_v26, %v13565_v19  ;;  %v5299_v26 = vsel %vm15072_vm0, %v13422_v61, %v13524_v46  ;;  %v8179_v61 = vld [vmem:[#allocation7 + $0x4] sm:$0xf] }
 0xbda   : > { %v5188_v15 = vsel %vm15064_vm11, %v5184_v0, %v13569_v57  ;;  %5454 = vmatpush.bf16.msrb.mxu3 %v5230_v22  ;;  %vm15076_vm11 = vcmask 965632  }
 0xbdb   : > { %5433 = vmatpush.bf16.msrb.mxu2 %v5188_v15  ;;  %v5286_v2 = vsel %vm15076_vm11, %v5282_v41, %v13567_v9  ;;  %vm15080_vm2 = vmmov %vm15076_vm11 }
 0xbdc   : > { %v5285_v41 = vsel %vm15080_vm2, %v13483_v53, %v13529_v44  ;;  %v7892_v53 = vld [vmem:[#allocation7] sm:$0xf] }
 0xbde   : > { %5455 = vmatpush.bf16.msrb.mxu3 %v5229_v31 }
 0xbdf   : > { %5434 = vmatpush.bf16.msrb.mxu2 %v5187_v51  ;;  %v8183_v51 = vld [vmem:[#allocation7 + $0x24] sm:$0xf] }
 0xbe0   : > { %v13581_v38 = vpop.permute.xlu0 %5213  ;;  %v13652_v31 = vpop.permute.xlu2 %5255 }
 0xbe1   : > { %v13583_v45 = vpop.permute.xlu1 %5297  ;;  %v5216_v33 = vsel %vm15067_vm10, %v13512_v63, %v13581_v38  ;;  %v5173_v63 = vsel %vm15071_vm4, %v13411_v11, %v13510_v17  ;;  %v5160_v11 = vsel %vm15075_vm12, %v5156_v54, %v13558_v48  ;;  %vm15079_vm10 = vmmov %vm15075_vm12  ;;  %vm5662_vm4 = vcmask 572416  }
 0xbe2   : > { %5456 = vmatpush.bf16.msrb.mxu3 %v5216_v33  ;;  %v5300_v40 = vsel %vm15069_vm1, %v5296_v56, %v13583_v45  ;;  %v7894_v56 = vld [vmem:[#allocation7 + $0x10] sm:$0xf0]  ;;  %v5159_v54 = vsel %vm15079_vm10, %v13472_v16, %v13514_v14  ;;  %vm15081_vm1 = vcmask 973824  }
 0xbe3   : > { %5435 = vmatpush.bf16.msrb.mxu2 %v5174_v7  ;;  %5471 = vmatpush.bf16.msrb.mxu0 %v5300_v40  ;;  %v13621_v36 = vor.u32 %v8179_v61, %v7894_v56  ;;  %vm15082_vm8 = vmmov %vm15081_vm1  ;;  %v7910_v33 = vld [vmem:[#allocation7 + $0x30] sm:$0xf0]  ;;  %v7902_v7 = vld [vmem:[#allocation7 + $0x18] sm:$0xf0] }
 0xbe4   : > { %v5271_v15 = vsel %vm15082_vm8, %v13495_v21, %v13537_v12  ;;  %v7913_v55 = vor.u32 %v8183_v51, %v7910_v33 }
 0xbe6   : > { %5457 = vmatpush.bf16.msrb.mxu3 %v5215_v59 }
 0xbe7   : > { %5436 = vmatpush.bf16.msrb.mxu2 %v5173_v63  ;;  %5472 = vmatpush.bf16.msrb.mxu0 %v5299_v26 }
 0xbe8   : > { %v13604_v0 = vpop.permute.xlu0 %5339  ;;  %v5308_v59 = vpop.permute.xlu2 %5307 }
 0xbe9   : > { %v5254_v52 = vpop.permute.xlu1 %5253  ;;  %v5342_v42 = vsel %vm15074_vm3, %v13526_v50, %v13604_v0  ;;  %v5341_v50 = vsel %vm15078_vm14, %v13429_v13, %v13533_v4 }
 0xbea   : > { %5458 = vmatpush.bf16.msrb.mxu3 %v5202_v1  ;;  %5492 = vmatpush.bf16.msrb.mxu1 %v5342_v42  ;;  %v7908_v1 = vld [vmem:[#allocation7 + $0x20] sm:$0xf]  ;;  %v8185_v42 = vld [vmem:[#allocation7 + $0x2c] sm:$0xf0] }
 0xbeb   : > { %5437 = vmatpush.bf16.msrb.mxu2 %v5160_v11  ;;  %5473 = vmatpush.bf16.msrb.mxu0 %v5286_v2  ;;  %v5640_v2 = vld [vmem:[#allocation11 + $0x18] sm:$0xff] }
 0xbee   : > { %5459 = vmatpush.bf16.msrb.mxu3 %v5201_v37  ;;  %5493 = vmatpush.bf16.msrb.mxu1 %v5341_v50  ;;  %v5639_v37 = vld [vmem:[#allocation11 + $0x10] sm:$0xff]  ;;  %v5638_v50 = vld [vmem:[#allocation11 + $0x8] sm:$0xff] }
 0xbef   : > { %5438 = vmatpush.bf16.msrb.mxu2 %v5159_v54  ;;  %5474 = vmatpush.bf16.msrb.mxu0 %v5285_v41  ;;  %v5637_v41 = vld [vmem:[#allocation11] sm:$0xff] }
 0xbf0   : > { %v13629_v8 = vpop.permute.xlu0 %5325 }
 0xbf1   : > { %v13631_v22 = vpop.permute.xlu1 %5269  ;;  %v5328_v13 = vsel %vm1226_vm6, %v13535_v49, %v13629_v8  ;;  %5460 = vmatmul.bf16.vlgmr.msrb.gmra.mxu3 %v13621_v36  ;;  %v5327_v49 = vsel %vm1226_vm6, %v13437_v18, %v13539_v27  ;;  %vm15083_vm6 = vcmask 982016  }
 0xbf2   : > { %5528 = vmatpush.bf16.msra.mxu3 %v5242_v32  ;;  %v5272_v16 = vsel %vm15081_vm1, %v13556_v10, %v13631_v22  ;;  %5494 = vmatpush.bf16.msrb.mxu1 %v5328_v13  ;;  %v8181_v32 = vld [vmem:[#allocation7 + $0xc] sm:$0xf0] }
 0xbf3   : > { %7923 = vmatpush.bf16.msk.msrb.mxu2 %vm12993_vm7, %v13387_v47  ;;  %5475 = vmatpush.bf16.msrb.mxu0 %v5272_v16  ;;  %v13650_v10 = vor.u32 %v8181_v32, %v7892_v53 }
 0xbf6   : > { %5529 = vmatpush.bf16.msra.mxu3 %v13476_v60  ;;  %5495 = vmatpush.bf16.msrb.mxu1 %v5327_v49  ;;  %v5258_v60 = vsel %vm15083_vm6, %v5254_v52, %v13652_v31 }
 0xbf7   : > { %7925 = vmatpush.bf16.msk.msrb.mxu2 %vm12993_vm7, %v13334_v3  ;;  %5476 = vmatpush.bf16.msrb.mxu0 %v5271_v15  ;;  %v7900_v3 = vld [vmem:[#allocation7 + $0x8] sm:$0xf]  ;;  %vm15084_vm7 = vmmov %vm15083_vm6 }
 0xbf8   : > { %v5310_v47 = vpop.permute.xlu0 %5309 }
 0xbf9   : > { %v13659_v18 = vpop.permute.xlu1 %5311 }
 0xbfa   : > { %5530 = vmatpush.bf16.msra.mxu3 %v13541_v62  ;;  %5441 = vmatmul.bf16.vlgmr.msrb.gmra.mxu2 %v13650_v10  ;;  %v5314_v21 = vsel %vm1194_vm13, %v5310_v47, %v13659_v18  ;;  %v8182_v62 = vld [vmem:[#allocation7 + $0x14] sm:$0xf0] }
 0xbfb   : > { %5509 = vmatpush.bf16.msra.mxu2 %v13569_v57  ;;  %5477 = vmatpush.bf16.msrb.mxu0 %v5258_v60  ;;  %v8180_v57 = vld [vmem:[#allocation7 + $0xc] sm:$0xf]  ;;  %v7901_v52 = vor.u32 %v8182_v62, %v7900_v3  ;;  %v13702_v60 = vpop.permute.xlu2 %5385 }
 0xbfc   : > { %5496 = vmatpush.bf16.msrb.mxu1 %v5314_v21 }
 0xbfe   : > { %5531 = vmatpush.bf16.msra.mxu3 %v13487_v24  ;;  %v7905_v24 = vor.u32 %v8180_v57, %v7902_v7 }
 0xbff   : > { %5510 = vmatpush.bf16.msra.mxu2 %v13451_v43 }
 0xc00   : > { %v5252_v40 = vpop.permute.xlu0 %5251 }
 0xc01   : > { %v5306_v63 = vpop.permute.xlu1 %5305  ;;  %v5257_v26 = vsel %vm15084_vm7, %v5250_v20, %v5252_v40  ;;  %5465 = vmatmul.bf16.gmra.mxu3 %v7913_v55 }
 0xc02   : > { %5532 = vmatpush.bf16.msra.mxu3 %v13581_v38  ;;  %5478 = vmatpush.bf16.msrb.mxu0 %v5257_v26  ;;  %v5313_v43 = vsel %vm1194_vm13, %v5306_v63, %v5308_v59  ;;  %v5644_v38 = vld [vmem:[#allocation11 + $0x38] sm:$0xff]  ;;  %v5661_v26 = vld [vmem:[#allocation11 + $0xc0] sm:$0x3f]  ;;  %vm15085_vm13 = vcmask 1045504  }
 0xc03   : > { %5511 = vmatpush.bf16.msra.mxu2 %v13565_v19  ;;  %5497 = vmatpush.bf16.msrb.mxu1 %v5313_v43  ;;  %v7909_v19 = vor.u32 %v8185_v42, %v7908_v1  ;;  %v5660_v1 = vld [vmem:[#allocation11 + $0xb8] sm:$0xff] }
 0xc05   : > { %5479 = vmatmul.bf16.vlgmr.msrb.gmra.mxu0 %v7901_v52 }
 0xc06   : > { %5547 = vmatpush.bf16.msra.mxu0 %v13583_v45  ;;  %5533 = vmatpush.bf16.msra.mxu3 %v13462_v5  ;;  %v7916_v5 = vld [vmem:[#allocation7 + $0x28] sm:$0xf]  ;;  %v5643_v45 = vld [vmem:[#allocation11 + $0x30] sm:$0xff] }
 0xc07   : > { %5512 = vmatpush.bf16.msra.mxu2 %v13510_v17  ;;  %5566 = vmatpush.bf16.msra.mxu1 %v13544_v29  ;;  %v8186_v17 = vld [vmem:[#allocation7 + $0x34] sm:$0xf0]  ;;  %v7918_v29 = vld [vmem:[#allocation7 + $0x38] sm:$0xf0] }
 0xc08   : > { %5498 = vmatmul.bf16.vlgmr.msrb.gmra.mxu1 %v7905_v24  ;;  %v13696_v61 = vpop.permute.xlu0 %5375 }
 0xc09   : > { %v13699_v13 = vpop.permute.xlu1 %5380 }
 0xc0a   : > { %5548 = vmatpush.bf16.msra.mxu0 %v13524_v46  ;;  %5534 = vmatpush.bf16.msra.mxu3 %v13593_v34  ;;  %v8184_v46 = vld [vmem:[#allocation7 + $0x2c] sm:$0xf]  ;;  %v5642_v34 = vld [vmem:[#allocation11 + $0x28] sm:$0xff] }
 0xc0b   : > { %5513 = vmatpush.bf16.msra.mxu2 %v13558_v48  ;;  %5567 = vmatpush.bf16.msra.mxu1 %v13499_v25  ;;  %v7917_v25 = vor.u32 %v8186_v17, %v7916_v5  ;;  %v7921_v48 = vor.u32 %v8184_v46, %v7918_v29  ;;  %v5659_v46 = vld [vmem:[#allocation11 + $0xb0] sm:$0xff] }
 0xc0c   : > { %5446 = vmatmul.bf16.gmra.mxu2 %v7909_v19 }
 0xc0e   : > { %5549 = vmatpush.bf16.msra.mxu0 %v13567_v9  ;;  %5535 = vmatpush.bf16.msra.mxu3 %v13474_v35  ;;  %v5650_v35 = vld [vmem:[#allocation11 + $0x68] sm:$0xff] }
 0xc0f   : > { %5514 = vmatpush.bf16.msra.mxu2 %v13514_v14  ;;  %5568 = vmatpush.bf16.msra.mxu1 %v13604_v0  ;;  %v5649_v14 = vld [vmem:[#allocation11 + $0x60] sm:$0xff] }
 0xc10   : > { %v5641_v0 = vld [vmem:[#allocation11 + $0x20] sm:$0xff] }
 0xc11   : > { %5536 = vmatmul.bf16.vlgmr.msra.gmra.mxu3 %v13621_v36  ;;  %v13705_v62 = vpop.permute.xlu0 %5610  ;;  %v13709_v42 = vpop.permute.xlu1 %5390 }
 0xc12   : > { %5550 = vmatpush.bf16.msra.mxu0 %v13529_v44  ;;  %v5648_v44 = vld [vmem:[#allocation11 + $0x58] sm:$0xff]  ;;  %7926 = vmatpush.msk.msrb.mxu3 %vm15085_vm13, %v5661_v26 }
 0xc13   : > { %5515 = vmatpush.bf16.msra.mxu2 %v13416_v39  ;;  %5569 = vmatpush.bf16.msra.mxu1 %v13533_v4  ;;  %v5651_v39 = vld [vmem:[#allocation11 + $0x70] sm:$0xff] }
 0xc14   : > { %v5647_v4 = vld [vmem:[#allocation11 + $0x50] sm:$0xff]  ;;  %5715 = vmatpush.msrb.mxu3 %v5660_v1 }
 0xc15   : > { %5484 = vmatmul.bf16.gmra.mxu0 %v7917_v25 }
 0xc16   : > { %5551 = vmatpush.bf16.msra.mxu0 %v13631_v22  ;;  %5716 = vmatpush.msrb.mxu3 %v5659_v46 }
 0xc17   : > { %5516 = vmatpush.bf16.msra.mxu2 %v13361_v58  ;;  %5570 = vmatpush.bf16.msra.mxu1 %v13629_v8  ;;  %v5652_v58 = vld [vmem:[#allocation11 + $0x78] sm:$0xff] }
 0xc18   : > { %5503 = vmatmul.bf16.gmra.mxu1 %v7921_v48 }
 0xc1a   : > { %5552 = vmatpush.bf16.msra.mxu0 %v13537_v12  ;;  %v5646_v12 = vld [vmem:[#allocation11 + $0x48] sm:$0xff] }
 0xc1b   : > { %5571 = vmatpush.bf16.msra.mxu1 %v13539_v27  ;;  %5678 = vmatpush.msrb.mxu2 %v5652_v58  ;;  %v5645_v27 = vld [vmem:[#allocation11 + $0x40] sm:$0xff]  ;;  %v5658_v58 = vld [vmem:[#allocation11 + $0xa8] sm:$0xff] }
 0xc1c   : > { %5517 = vmatmul.bf16.vlgmr.msra.gmra.mxu2 %v13650_v10  ;;  %5717 = vmatpush.msrb.mxu3 %v5658_v58 }
 0xc1d   : > { %5679 = vmatpush.msrb.mxu2 %v5651_v39 }
 0xc1e   : > { %5553 = vmatpush.bf16.msra.mxu0 %v13652_v31 }
 0xc1f   : > { %5572 = vmatpush.bf16.msra.mxu1 %v13659_v18  ;;  %5680 = vmatpush.msrb.mxu2 %v5650_v35 }
 0xc21   : > { %5541 = vmatmul.bf16.gmra.mxu3 %v7913_v55  ;;  %5681 = vmatpush.msrb.mxu2 %v5649_v14 }
 0xc22   : > { %5554 = vmatpush.bf16.msra.mxu0 %v5252_v40 }
 0xc23   : > { %5573 = vmatpush.bf16.msra.mxu1 %v5308_v59  ;;  %5682 = vmatpush.msrb.mxu2 %v5648_v44 }
 0xc25   : > { %5555 = vmatmul.bf16.vlgmr.msra.gmra.mxu0 %v7901_v52  ;;  %5683 = vmatpush.msrb.mxu2 %v5647_v4  ;;  %v5657_v4 = vld [vmem:[#allocation11 + $0xa0] sm:$0xff] }
 0xc26   : > { %5718 = vmatpush.msrb.mxu3 %v5657_v4 }
 0xc27   : > { %5684 = vmatpush.msrb.mxu2 %v5646_v12 }
 0xc28   : > { %5574 = vmatmul.bf16.vlgmr.msra.gmra.mxu1 %v7905_v24 }
 0xc29   : > { %5685 = vmatpush.msrb.mxu2 %v5645_v27 }
 0xc2b   : > { %5686 = vmatpush.msrb.mxu2 %v5644_v38 }
 0xc2c   : > { %5522 = vmatmul.bf16.gmra.mxu2 %v7909_v19 }
 0xc2d   : > { %5687 = vmatpush.msrb.mxu2 %v5643_v45  ;;  %v5656_v45 = vld [vmem:[#allocation11 + $0x98] sm:$0xff] }
 0xc2e   : > { %5719 = vmatpush.msrb.mxu3 %v5656_v45 }
 0xc2f   : > { %5688 = vmatpush.msrb.mxu2 %v5642_v34 }
 0xc31   : > { %5689 = vmatpush.msrb.mxu2 %v5641_v0 }
 0xc33   : > { %5690 = vmatpush.msrb.mxu2 %v5640_v2  ;;  %v5655_v2 = vld [vmem:[#allocation11 + $0x90] sm:$0xff] }
 0xc34   : > { %5720 = vmatpush.msrb.mxu3 %v5655_v2 }
 0xc35   : > { %5560 = vmatmul.bf16.gmra.mxu0 %v7917_v25  ;;  %5691 = vmatpush.msrb.mxu2 %v5639_v37 }
 0xc37   : > { %5692 = vmatpush.msrb.mxu2 %v5638_v50  ;;  %v5654_v50 = vld [vmem:[#allocation11 + $0x88] sm:$0xff] }
 0xc38   : > { %5579 = vmatmul.bf16.gmra.mxu1 %v7921_v48  ;;  %5721 = vmatpush.msrb.mxu3 %v5654_v50 }
 0xc39   : > { %5693 = vmatpush.msrb.mxu2 %v5637_v41 }
 0xc74   : > { %v5461_v9 = vpop.f32.mrf.mxu3 }
 0xc7c   : > { %v5463_v11 = vpop.f32.mrf.mxu3 }
 0xc7d   : > { %v5442_v56 = vpop.f32.mrf.mxu2 }
 0xc7e   : > { %v5443_v20 = vadd.f32 %v5442_v56, %v13696_v61 }
 0xc80   : > { %v5462_v36 = vadd.f32 %v5461_v9, %v5443_v20 }
 0xc82   : > { %v5480_v54 = vpop.f32.mrf.mxu0 }
 0xc83   : > { %v5481_v8 = vadd.f32 %v5480_v54, %v5462_v36 }
 0xc84   : > { %v5466_v49 = vpop.f32.mrf.mxu3 }
 0xc85   : > { %v5499_v22 = vpop.f32.mrf.mxu1  ;;  %v5444_v53 = vpop.f32.mrf.mxu2 }
 0xc86   : > { %v5500_v16 = vadd.f32 %v5499_v22, %v5481_v8  ;;  %v5445_v32 = vadd.f32 %v5444_v53, %v13699_v13  ;;  %v5653_v8 = vld [vmem:[#allocation11 + $0x80] sm:$0xff] }
 0xc87   : > { %5722 = vmatpush.msrb.mxu3 %v5653_v8 }
 0xc88   : > { %v5585_v15 = vmax.f32 %v5500_v16, 1e-06  ;;  %v5464_v10 = vadd.f32 %v5463_v11, %v5445_v32 }
 0xc8a   : > { %8771 = vlog2.f32 %v5585_v15  ;;  %v5482_v31 = vpop.f32.mrf.mxu0 }
 0xc8b   : > { %v5483_v47 = vadd.f32 %v5482_v31, %v5464_v10 }
 0xc8c   : > { %v5468_v7 = vpop.f32.mrf.mxu3 }
 0xc8d   : > { %v5501_v18 = vpop.f32.mrf.mxu1 }
 0xc8e   : > { %v5502_v21 = vadd.f32 %v5501_v18, %v5483_v47 }
 0xc8f   : > { %v5447_v51 = vpop.f32.mrf.mxu2 }
 0xc90   : > { %v5448_v33 = vadd.f32 %v5447_v51, %v13702_v60  ;;  %v8772_v55 = vpop.eup %8771  ;;  %v5587_v3 = vmax.f32 %v5502_v21, 1e-06 }
 0xc91   : > { %v5594_v57 = vmul.f32 0.6931472, %v8772_v55 }
 0xc92   : > { %8773 = vlog2.f32 %v5587_v3  ;;  %v5467_v40 = vadd.f32 %v5466_v49, %v5448_v33  ;;  %v5485_v63 = vpop.f32.mrf.mxu0 }
 0xc93   : > { %v5613_v59 = vmul.f32 %v13705_v62, %v5594_v57 }
 0xc94   : > { %v5486_v52 = vadd.f32 %v5485_v63, %v5467_v40  ;;  %v5537_v35 = vpop.f32.mrf.mxu3 }
 0xc95   : > { %v5504_v43 = vpop.f32.mrf.mxu1  ;;  %v5621_v24 = vmul.f32 1.442695, %v5613_v59 }
 0xc96   : > { %v5505_v19 = vadd.f32 %v5504_v43, %v5486_v52 }
 0xc97   : > { %v5449_v5 = vpop.f32.mrf.mxu2  ;;  %8775 = vpow2.f32 %v5621_v24 }
 0xc98   : > { %v5450_v17 = vadd.f32 %v5449_v5, %v13709_v42  ;;  %v8774_v29 = vpop.eup %8773  ;;  %v5589_v25 = vmax.f32 %v5505_v19, 1e-06 }
 0xc99   : > { %v5598_v48 = vmul.f32 0.6931472, %v8774_v29 }
 0xc9a   : > { %8777 = vlog2.f32 %v5589_v25  ;;  %v5469_v39 = vadd.f32 %v5468_v7, %v5450_v17  ;;  %v5487_v14 = vpop.f32.mrf.mxu0 }
 0xc9b   : > { %v5615_v44 = vmul.f32 %v13705_v62, %v5598_v48 }
 0xc9c   : > { %v5488_v12 = vadd.f32 %v5487_v14, %v5469_v39 }
 0xc9d   : > { %v5506_v27 = vpop.f32.mrf.mxu1  ;;  %v8776_v9 = vpop.eup %8775  ;;  %v5625_v38 = vmul.f32 1.442695, %v5615_v44 }
 0xc9e   : > { %v5507_v34 = vadd.f32 %v5506_v27, %v5488_v12  ;;  %5694 = vmatmul.f32.vlgmr.msrb.gmra.mxu2 %v8776_v9 }
 0xc9f   : > { %v5518_v0 = vpop.f32.mrf.mxu2  ;;  %8779 = vpow2.f32 %v5625_v38 }
 0xca0   : > { %v5519_v11 = vadd.f32 %v5518_v0, %v13696_v61  ;;  %v8778_v56 = vpop.eup %8777  ;;  %v5591_v20 = vmax.f32 %v5507_v34, 1e-06  ;;  %v5539_v61 = vpop.f32.mrf.mxu3 }
 0xca1   : > { %v5602_v37 = vmul.f32 0.6931472, %v8778_v56 }
 0xca2   : > { %8781 = vlog2.f32 %v5591_v20  ;;  %v5538_v36 = vadd.f32 %v5537_v35, %v5519_v11  ;;  %v5556_v41 = vpop.f32.mrf.mxu0 }
 0xca3   : > { %v5617_v54 = vmul.f32 %v13705_v62, %v5602_v37 }
 0xca4   : > { %v5557_v22 = vadd.f32 %v5556_v41, %v5538_v36 }
 0xca5   : > { %v5575_v16 = vpop.f32.mrf.mxu1  ;;  %v8780_v53 = vpop.eup %8779  ;;  %v5629_v32 = vmul.f32 1.442695, %v5617_v54 }
 0xca6   : > { %v5576_v49 = vadd.f32 %v5575_v16, %v5557_v22  ;;  %5697 = vmatmul.f32.gmra.mxu2 %v8780_v53  ;;  %v5746_v22 = vpop.permute.xlu2 %5745 }
 0xca7   : > { %v5520_v15 = vpop.f32.mrf.mxu2  ;;  %8783 = vpow2.f32 %v5629_v32 }
 0xca8   : > { %v5521_v10 = vadd.f32 %v5520_v15, %v13699_v13  ;;  %v8782_v31 = vpop.eup %8781  ;;  %v5586_v47 = vmax.f32 %v5576_v49, 1e-06  ;;  %v5542_v63 = vpop.f32.mrf.mxu3 }
 0xca9   : > { %v5606_v18 = vmul.f32 0.6931472, %v8782_v31 }
 0xcaa   : > { %8785 = vlog2.f32 %v5586_v47  ;;  %v5540_v21 = vadd.f32 %v5539_v61, %v5521_v10  ;;  %v5558_v33 = vpop.f32.mrf.mxu0  ;;  %v5770_v10 = vpop.permute.xlu1 %5769 }
 0xcab   : > { %v5619_v51 = vmul.f32 %v13705_v62, %v5606_v18 }
 0xcac   : > { %v5559_v55 = vadd.f32 %v5558_v33, %v5540_v21 }
 0xcad   : > { %v5577_v3 = vpop.f32.mrf.mxu1  ;;  %v8784_v57 = vpop.eup %8783  ;;  %v5633_v7 = vmul.f32 1.442695, %v5619_v51 }
 0xcae   : > { %v5578_v40 = vadd.f32 %v5577_v3, %v5559_v55  ;;  %5700 = vmatmul.f32.gmra.mxu2 %v8784_v57  ;;  %v13727_v61 = vpop.permute.xlu2 %5773 }
 0xcaf   : > { %v5523_v59 = vpop.f32.mrf.mxu2  ;;  %8787 = vpow2.f32 %v5633_v7 }
 0xcb0   : > { %v5524_v26 = vadd.f32 %v5523_v59, %v13702_v60  ;;  %v8786_v13 = vpop.eup %8785  ;;  %v5588_v52 = vmax.f32 %v5578_v40, 1e-06  ;;  %v5544_v14 = vpop.f32.mrf.mxu3 }
 0xcb1   : > { %v5596_v43 = vmul.f32 0.6931472, %v8786_v13 }
 0xcb2   : > { %8789 = vlog2.f32 %v5588_v52  ;;  %v5543_v24 = vadd.f32 %v5542_v63, %v5524_v26  ;;  %v5561_v19 = vpop.f32.mrf.mxu0  ;;  %v5794_v40 = vpop.permute.xlu1 %5793 }
 0xcb3   : > { %v5614_v1 = vmul.f32 %v13705_v62, %v5596_v43  ;;  %v5790_v63 = vpop.permute.xlu0 %5789 }
 0xcb4   : > { %v5562_v5 = vadd.f32 %v5561_v19, %v5543_v24 }
 0xcb5   : > { %v5580_v17 = vpop.f32.mrf.mxu1  ;;  %v8788_v46 = vpop.eup %8787  ;;  %v5623_v29 = vmul.f32 1.442695, %v5614_v1 }
 0xcb6   : > { %v5581_v25 = vadd.f32 %v5580_v17, %v5562_v5  ;;  %5703 = vmatmul.f32.gmra.mxu2 %v8788_v46  ;;  %v5762_v21 = vpop.permute.xlu2 %5761 }
 0xcb7   : > { %v5525_v48 = vpop.f32.mrf.mxu2  ;;  %8791 = vpow2.f32 %v5623_v29 }
 0xcb8   : > { %v5526_v58 = vadd.f32 %v5525_v48, %v13709_v42  ;;  %v8790_v39 = vpop.eup %8789  ;;  %v5590_v60 = vmax.f32 %v5581_v25, 1e-06 }
 0xcb9   : > { %v5600_v35 = vmul.f32 0.6931472, %v8790_v39 }
 0xcba   : > { %8793 = vlog2.f32 %v5590_v60  ;;  %v5545_v44 = vadd.f32 %v5544_v14, %v5526_v58  ;;  %v5563_v12 = vpop.f32.mrf.mxu0  ;;  %v5766_v48 = vpop.permute.xlu1 %5765 }
 0xcbb   : > { %v5616_v4 = vmul.f32 %v13705_v62, %v5600_v35  ;;  %v5786_v60 = vpop.permute.xlu0 %5785 }
 0xcbc   : > { %v5564_v27 = vadd.f32 %v5563_v12, %v5545_v44 }
 0xcbd   : > { %v8792_v9 = vpop.eup %8791  ;;  %v5627_v38 = vmul.f32 1.442695, %v5616_v4  ;;  %v5582_v45 = vpop.f32.mrf.mxu1 }
 0xcbe   : > { %v5583_v34 = vadd.f32 %v5582_v45, %v5564_v27  ;;  %7927 = vmatmul.msk.f32.vlgmr.msrb.gmra.mxu3 %vm5662_vm4, %v8792_v9  ;;  %v5782_v52 = vpop.permute.xlu2 %5781 }
 0xcbf   : > { %8795 = vpow2.f32 %v5627_v38 }
 0xcc0   : > { %v8794_v0 = vpop.eup %8793  ;;  %v5592_v42 = vmax.f32 %v5583_v34, 1e-06 }
 0xcc1   : > { %v5604_v11 = vmul.f32 0.6931472, %v8794_v0 }
 0xcc2   : > { %8797 = vlog2.f32 %v5592_v42 }
 0xcc3   : > { %v5618_v2 = vmul.f32 %v13705_v62, %v5604_v11 }
 0xcc5   : > { %v8796_v56 = vpop.eup %8795  ;;  %v5631_v20 = vmul.f32 1.442695, %v5618_v2 }
 0xcc6   : > { %7928 = vmatmul.msk.f32.gmra.mxu3 %vm5662_vm4, %v8796_v56 }
 0xcc7   : > { %8799 = vpow2.f32 %v5631_v20 }
 0xcc8   : > { %v8798_v37 = vpop.eup %8797 }
 0xcc9   : > { %v5608_v50 = vmul.f32 0.6931472, %v8798_v37 }
 0xccb   : > { %v5620_v36 = vmul.f32 %v13705_v62, %v5608_v50 }
 0xccd   : > { %v8800_v54 = vpop.eup %8799  ;;  %v5635_v41 = vmul.f32 1.442695, %v5620_v36 }
 0xcce   : > { %7929 = vmatmul.msk.f32.gmra.mxu3 %vm5662_vm4, %v8800_v54 }
 0xccf   : > { %8801 = vpow2.f32 %v5635_v41 }
 0xcd5   : > { %v8802_v8 = vpop.eup %8801 }
 0xcd6   : > { %7930 = vmatmul.msk.f32.gmra.mxu3 %vm5662_vm4, %v8802_v8 }
 0xd21   : > { %v5695_v16 = vpop.f32.mrf.mxu2 }
 0xd29   : > { %v5698_v49 = vpop.f32.mrf.mxu2 }
 0xd31   : > { %v5701_v51 = vpop.f32.mrf.mxu2 }
 0xd39   : > { %v5704_v24 = vpop.f32.mrf.mxu2 }
 0xd41   : > { %v5724_v53 = vpop.f32.mrf.mxu3 }
 0xd42   : > { %v5725_v32 = vadd.f32 %v5724_v53, %v5695_v16 }
 0xd44   : > { %8803 = vlog2.f32 %v5725_v32 }
 0xd49   : > { %v5727_v15 = vpop.f32.mrf.mxu3 }
 0xd4a   : > { %v8804_v31 = vpop.eup %8803  ;;  %v5728_v62 = vadd.f32 %v5727_v15, %v5698_v49 }
 0xd4b   : > { %v5737_v47 = vmul.f32 0.6931472, %v8804_v31 }
 0xd4c   : > { %8805 = vlog2.f32 %v5728_v62 }
 0xd4d   : > { %v5748_v18 = vmul.f32 %v5746_v22, %v5737_v47 }
 0xd4f   : > { %v5752_v33 = vmul.f32 1.442695, %v5748_v18 }
 0xd51   : > { %8807 = vpow2.f32 %v5752_v33  ;;  %v5730_v55 = vpop.f32.mrf.mxu3 }
 0xd52   : > { %v8806_v3 = vpop.eup %8805  ;;  %v5731_v57 = vadd.f32 %v5730_v55, %v5701_v51 }
 0xd53   : > { %v5739_v7 = vmul.f32 0.6931472, %v8806_v3 }
 0xd54   : > { %8809 = vlog2.f32 %v5731_v57 }
 0xd55   : > { %v5749_v59 = vmul.f32 %v5746_v22, %v5739_v7 }
 0xd57   : > { %v8808_v26 = vpop.eup %8807  ;;  %v5754_v13 = vmul.f32 1.442695, %v5749_v59 }
 0xd58   : > { %v5776_v43 = vmul.f32 %v8808_v26, %v5762_v21 }
 0xd59   : > { %8811 = vpow2.f32 %v5754_v13  ;;  %v5733_v1 = vpop.f32.mrf.mxu3 }
 0xd5a   : > { %v8810_v19 = vpop.eup %8809  ;;  %v5734_v5 = vadd.f32 %v5733_v1, %v5704_v24  ;;  %v5796_v17 = vadd.f32 %v5782_v52, %v5776_v43 }
 0xd5b   : > { %v5741_v46 = vmul.f32 0.6931472, %v8810_v19 }
 0xd5c   : > { %8813 = vlog2.f32 %v5734_v5  ;;  %v7931_v29 = vmul.f32 -1.442695, %v5796_v17 }
 0xd5d   : > { %v5750_v25 = vmul.f32 %v5746_v22, %v5741_v46 }
 0xd5e   : > { %8815 = vpow2.f32 %v7931_v29 }
 0xd5f   : > { %v8812_v58 = vpop.eup %8811  ;;  %v5756_v39 = vmul.f32 1.442695, %v5750_v25 }
 0xd60   : > { %v5777_v35 = vmul.f32 %v8812_v58, %v5766_v48 }
 0xd61   : > { %8817 = vpow2.f32 %v5756_v39 }
 0xd62   : > { %v8814_v14 = vpop.eup %8813  ;;  %v5797_v44 = vadd.f32 %v5786_v60, %v5777_v35 }
 0xd63   : > { %v5743_v4 = vmul.f32 0.6931472, %v8814_v14 }
 0xd64   : > { %v8816_v12 = vpop.eup %8815  ;;  %v7932_v27 = vmul.f32 -1.442695, %v5797_v44 }
 0xd65   : > { %v5751_v9 = vmul.f32 %v5746_v22, %v5743_v4  ;;  %v5812_v38 = vadd.f32 1.0, %v8816_v12 }
 0xd66   : > { %8819 = vpow2.f32 %v7932_v27 }
 0xd67   : > { %v8818_v45 = vpop.eup %8817  ;;  %v5758_v34 = vmul.f32 1.442695, %v5751_v9  ;;  %8821 = vrcp.f32 %v5812_v38  ;;  %v5827_v22 = vand.u32 2147483648, %v5812_v38  ;;  %vm5821_vm9 = vweird.f32 %v5812_v38 }
 0xd68   : > { %v5778_v0 = vmul.f32 %v8818_v45, %v5770_v10  ;;  %v5825_v32 = vand.u32 2147483647, %v5812_v38 }
 0xd69   : > { %8823 = vpow2.f32 %v5758_v34 }
 0xd6a   : > { %v13729_v42 = vadd.f32 %v5790_v63, %v5778_v0  ;;  %vm5826_vm12 = vcmp.eq.f32.partialorder %v5825_v32, 8.507059e+37 }
 0xd6c   : > { %v8820_v11 = vpop.eup %8819  ;;  %v7933_v2 = vmul.f32 -1.442695, %v13729_v42 }
 0xd6d   : > { %v8822_v56 = vpop.eup %8821  ;;  %v5813_v20 = vadd.f32 1.0, %v8820_v11 }
 0xd6e   : > { %8825 = vpow2.f32 %v7933_v2  ;;  %v5817_v37 = vmul.f32 %v8822_v56, %v5812_v38  ;;  %vm5822_vm0 = vweird.f32 %v8822_v56 }
 0xd6f   : > { %v8824_v50 = vpop.eup %8823  ;;  %8827 = vrcp.f32 %v5813_v20  ;;  %vm5823_vm3 = vmor %vm5821_vm9, %vm5822_vm0  ;;  %v5842_v21 = vand.u32 2147483648, %v5813_v20  ;;  %v5840_v33 = vand.u32 2147483647, %v5813_v20  ;;  %vm5836_vm5 = vweird.f32 %v5813_v20 }
 0xd70   : > { %v5779_v36 = vmul.f32 %v8824_v50, %v13727_v61  ;;  %v5818_v54 = vsub.f32 1.0, %v5817_v37  ;;  %v5828_v61 = vor.u32 1.1754944e-38, %v5827_v22  ;;  %vm5902_vm9 = vcmask 408576  }
 0xd71   : > { %vm5841_vm10 = vcmp.eq.f32.partialorder %v5840_v33, 8.507059e+37 }
 0xd72   : > { %v5819_v41 = vmul.f32 %v8822_v56, %v5818_v54  ;;  %v13733_v8 = vadd.f32 %v5794_v40, %v5779_v36  ;;  %v5843_v40 = vor.u32 1.1754944e-38, %v5842_v21 }
 0xd74   : > { %v8826_v16 = vpop.eup %8825  ;;  %v5820_v53 = vadd.f32 %v8822_v56, %v5819_v41  ;;  %v7934_v49 = vmul.f32 -1.442695, %v13733_v8 }
 0xd75   : > { %v8828_v15 = vpop.eup %8827  ;;  %v5814_v10 = vadd.f32 1.0, %v8826_v16 }
 0xd76   : > { %v5824_v31 = vsel %vm5823_vm3, %v8822_v56, %v5820_v53  ;;  %v5832_v62 = vmul.f32 %v8828_v15, %v5813_v20  ;;  %8829 = vpow2.f32 %v7934_v49  ;;  %vm5837_vm11 = vweird.f32 %v8828_v15 }
 0xd77   : > { %8831 = vrcp.f32 %v5814_v10  ;;  %v5829_v18 = vsel %vm5826_vm12, %v5828_v61, %v5824_v31  ;;  %vm5838_vm14 = vmor %vm5836_vm5, %vm5837_vm11  ;;  %vm5851_vm1 = vweird.f32 %v5814_v10  ;;  %v5857_v5 = vand.u32 2147483648, %v5814_v10 }
 0xd78   : > { %v5833_v47 = vsub.f32 1.0, %v5832_v62  ;;  %v5876_v3 = vmul.f32 %v5829_v18, %v5796_v17  ;;  %v5855_v46 = vand.u32 2147483647, %v5814_v10 }
 0xd79   : > { %v5858_v35 = vor.u32 1.1754944e-38, %v5857_v5 }
 0xd7a   : > { %v5834_v51 = vmul.f32 %v8828_v15, %v5833_v47  ;;  %v5880_v43 = vpack.c.bf16 %v5876_v3, %v5876_v3  ;;  %vm5856_vm6 = vcmp.eq.f32.partialorder %v5855_v46, 8.507059e+37 }
 0xd7c   : > { %v8830_v55 = vpop.eup %8829  ;;  %v5835_v57 = vadd.f32 %v8828_v15, %v5834_v51  ;;  %v5888_v29 = vunpack.c.l.b16 %v5880_v43 }
 0xd7d   : > { %v8832_v7 = vpop.eup %8831  ;;  %v5815_v59 = vadd.f32 1.0, %v8830_v55 }
 0xd7e   : > { %v5847_v63 = vmul.f32 %v8832_v7, %v5814_v10  ;;  %v5839_v26 = vsel %vm5838_vm14, %v8828_v15, %v5835_v57  ;;  %vm5852_vm2 = vweird.f32 %v8832_v7  ;;  %v6022_v57 = vld [vmem:[%s15086_s2 + $0x38] sm:$0xff] }
 0xd7f   : > { %v5844_v13 = vsel %vm5841_vm10, %v5843_v40, %v5839_v26  ;;  %8833 = vrcp.f32 %v5815_v59  ;;  %vm5853_vm8 = vmor %vm5851_vm1, %vm5852_vm2  ;;  %v5872_v4 = vand.u32 2147483648, %v5815_v59  ;;  %v5870_v27 = vand.u32 2147483647, %v5815_v59  ;;  %v6015_v26 = vld [vmem:[%s15086_s2] sm:$0xff] }
 0xd80   : > { %v5848_v52 = vsub.f32 1.0, %v5847_v63  ;;  %v5877_v24 = vmul.f32 %v5844_v13, %v5797_v44  ;;  %vm5866_vm13 = vweird.f32 %v5815_v59  ;;  %v6020_v63 = vld [vmem:[%s15086_s2 + $0x28] sm:$0xff] }
 0xd81   : > { %v5873_v45 = vor.u32 1.1754944e-38, %v5872_v4  ;;  %vm5871_vm0 = vcmp.eq.f32.partialorder %v5870_v27, 8.507059e+37  ;;  %v7945_v4 = vld [vmem:[%s15087_s15 + $0x8] sm:$0xf]  ;;  %v8188_v27 = vld [vmem:[%s15087_s15 + $0xc] sm:$0xf] }
 0xd82   : > { %v5849_v1 = vmul.f32 %v8832_v7, %v5848_v52  ;;  %v5881_v19 = vpack.c.bf16 %v5877_v24, %v5877_v24 }
 0xd84   : > { %v5850_v17 = vadd.f32 %v8832_v7, %v5849_v1  ;;  %v5889_v25 = vunpack.c.l.b16 %v5881_v19  ;;  %v6019_v19 = vld [vmem:[%s15086_s2 + $0x20] sm:$0xff] }
 0xd85   : > { %v8834_v48 = vpop.eup %8833 }
 0xd86   : > { %v5854_v58 = vsel %vm5853_vm8, %v8832_v7, %v5850_v17  ;;  %v5892_v39 = vpack.c.b16 %v5889_v25, %v5888_v29  ;;  %v5862_v60 = vmul.f32 %v8834_v48, %v5815_v59  ;;  %vm5867_vm7 = vweird.f32 %v8834_v48  ;;  %v6021_v17 = vld [vmem:[%s15086_s2 + $0x30] sm:$0xff] }
 0xd87   : > { %v5859_v44 = vsel %vm5856_vm6, %v5858_v35, %v5854_v58  ;;  %vm5868_vm4 = vmor %vm5866_vm13, %vm5867_vm7  ;;  %v6017_v29 = vld [vmem:[%s15086_s2 + $0x10] sm:$0xff] }
 0xd88   : > { %5894 = vrot.lane.b32.xlu2 %v5892_v39, %s15056_s30  ;;  %v5863_v14 = vsub.f32 1.0, %v5862_v60  ;;  %v5878_v9 = vmul.f32 %v5859_v44, %v13729_v42  ;;  %v8189_v58 = vld [vmem:[%s15087_s15 + $0xc] sm:$0xf0]  ;;  %v8187_v39 = vld [vmem:[%s15087_s15 + $0x4] sm:$0xf] }
 0xd89   : > { %v7939_v60 = vld [vmem:[%s15087_s15 + $0x10] sm:$0xf0] }
 0xd8a   : > { %v5864_v12 = vmul.f32 %v8834_v48, %v5863_v14  ;;  %v5882_v11 = vpack.c.bf16 %v5878_v9, %v5878_v9  ;;  %v7942_v44 = vor.u32 %v8187_v39, %v7939_v60  ;;  %v7947_v9 = vld [vmem:[%s15087_s15 + $0x18] sm:$0xf0] }
 0xd8c   : > { %v5865_v38 = vadd.f32 %v8834_v48, %v5864_v12  ;;  %v5890_v20 = vunpack.c.l.b16 %v5882_v11  ;;  %v8190_v12 = vld [vmem:[%s15087_s15 + $0x14] sm:$0xf0]  ;;  %v6016_v11 = vld [vmem:[%s15086_s2 + $0x8] sm:$0xff] }
 0xd8e   : > { %v5869_v34 = vsel %vm5868_vm4, %v8834_v48, %v5865_v38  ;;  %v7937_v48 = vld [vmem:[%s15087_s15] sm:$0xf] }
 0xd8f   : > { %v5874_v0 = vsel %vm5871_vm0, %v5873_v45, %v5869_v34  ;;  %v7938_v35 = vor.u32 %v8189_v58, %v7937_v48  ;;  %v7946_v45 = vor.u32 %v8190_v12, %v7945_v4 }
 0xd90   : > { %v5879_v2 = vmul.f32 %v5874_v0, %v13733_v8  ;;  %v7950_v0 = vor.u32 %v8188_v27, %v7947_v9 }
 0xd92   : > { %v5883_v56 = vpack.c.bf16 %v5879_v2, %v5879_v2  ;;  %v6018_v2 = vld [vmem:[%s15086_s2 + $0x18] sm:$0xff]  ;;  %s15093_s2 = sld [smem:[#allocation57_spill]] }
 0xd94   : > { %v5891_v37 = vunpack.c.l.b16 %v5883_v56  ;;  %v7953_v56 = vld [vmem:[%s15087_s15 + $0x20] sm:$0xf] }
 0xd96   : > { %v5893_v50 = vpack.c.b16 %v5891_v37, %v5890_v20  ;;  %v8193_v20 = vld [vmem:[%s15087_s15 + $0x2c] sm:$0xf0]  ;;  %v8191_v37 = vld [vmem:[%s15087_s15 + $0x24] sm:$0xf] }
 0xd98   : > { %5896 = vrot.lane.b32.xlu1 %v5893_v50, %s15056_s30  ;;  %v7955_v50 = vld [vmem:[%s15087_s15 + $0x30] sm:$0xf0]  ;;  %s7628_s6 = scalar_lea.hbm %s15093_s2, %s8235_s13 }
 0xde2   : > { %v5895_v36 = vpop.permute.xlu2 %5894 }
 0xde3   : > { %v5899_v42 = vsel %vm4490_vm15, 0, %v5895_v36  ;;  %v7954_v36 = vor.u32 %v8193_v20, %v7953_v56 }
 0xde4   : > { %v13742_v54 = vsel %vm5902_vm9, %v5899_v42, 0  ;;  %v7958_v42 = vor.u32 %v8191_v37, %v7955_v50 }
 0xde5   : > { %5993 = vrot.lane.b32.xlu0 %v13742_v54, %s14799_s14  ;;  %5921 = vrot.lane.b32.xlu2 %v13742_v54, %s14787_s9 }
 0xde6   : > { %5969 = vrot.lane.b32.xlu1 %v13742_v54, %s14661_s26 }
 0xded   : > { %5963 = vrot.lane.b32.xlu0 %v13742_v54, %s14770_s22  ;;  %5987 = vrot.lane.b32.xlu2 %v13742_v54, %s14783_s12 }
 0xdee   : > { %5945 = vrot.lane.b32.xlu1 %v13742_v54, %s14795_s5 }
 0xdf5   : > { %5939 = vrot.lane.b32.xlu0 %v13742_v54, %s14789_s1  ;;  %5957 = vrot.lane.b32.xlu2 %v13742_v54, %s14781_s23 }
 0xdf6   : > { %5915 = vrot.lane.b32.xlu1 %v13742_v54, %s14772_s25 }
 0xdfd   : > { %5909 = vrot.lane.b32.xlu0 %v13742_v54, %s14771_s0  ;;  %5933 = vrot.lane.b32.xlu2 %v13742_v54, %s14784_s10 }
 0xdfe   : > { %5981 = vrot.lane.b32.xlu1 %v13742_v54, %s14796_s11 }
 0xe0a   : > { %v5897_v41 = vpop.permute.xlu1 %5896 }
 0xe0b   : > { %v5901_v8 = vsel %vm4490_vm15, 0, %v5897_v41  ;;  %v8194_v41 = vld [vmem:[%s15087_s15 + $0x34] sm:$0xf0] }
 0xe0c   : > { %v13770_v22 = vsel %vm5902_vm9, %v5901_v8, 0  ;;  %v8192_v8 = vld [vmem:[%s15087_s15 + $0x2c] sm:$0xf] }
 0xe0d   : > { %5971 = vrot.lane.b32.xlu0 %v13770_v22, %s14661_s26  ;;  %5995 = vrot.lane.b32.xlu2 %v13770_v22, %s14799_s14 }
 0xe0e   : > { %5923 = vrot.lane.b32.xlu1 %v13770_v22, %s14787_s9 }
 0xe15   : > { %5947 = vrot.lane.b32.xlu0 %v13770_v22, %s14795_s5  ;;  %5965 = vrot.lane.b32.xlu2 %v13770_v22, %s14770_s22 }
 0xe16   : > { %5989 = vrot.lane.b32.xlu1 %v13770_v22, %s14783_s12 }
 0xe1d   : > { %5917 = vrot.lane.b32.xlu0 %v13770_v22, %s14772_s25  ;;  %5941 = vrot.lane.b32.xlu2 %v13770_v22, %s14789_s1 }
 0xe1e   : > { %5959 = vrot.lane.b32.xlu1 %v13770_v22, %s14781_s23 }
 0xe25   : > { %5983 = vrot.lane.b32.xlu0 %v13770_v22, %s14796_s11  ;;  %5911 = vrot.lane.b32.xlu2 %v13770_v22, %s14771_s0 }
 0xe26   : > { %5935 = vrot.lane.b32.xlu1 %v13770_v22, %s14784_s10 }
 0xe2d   : > { %5953 = vrot.lane.b32.xlu0 %v13770_v22, %s14782_s24  ;;  %5929 = vrot.lane.b32.xlu2 %v13770_v22, %s14769_s7 }
 0xe2e   : > { %5977 = vrot.lane.b32.xlu1 %v13770_v22, %s14619_s20 }
 0xe35   : > { %5951 = vrot.lane.b32.xlu0 %v13742_v54, %s14782_s24  ;;  %5927 = vrot.lane.b32.xlu2 %v13742_v54, %s14769_s7 }
 0xe36   : > { %5975 = vrot.lane.b32.xlu1 %v13742_v54, %s14619_s20 }
 0xe3d   : > { %6045 = vperm.xlu2 %8562, %v6019_v19   ;;  %6055 = vperm.xlu0 %8560, %v6021_v17  }
 0xe3e   : > { %6060 = vperm.xlu1 %8561, %v6022_v57   ;;  %v8199_v57 = vld [vmem:[%s15087_s15 + $0x64] sm:$0xf] }
 0xe3f   : > { %v5922_v16 = vpop.permute.xlu2 %5921 }
 0xe45   : > { %6035 = vperm.xlu2 %8562, %v6017_v29   ;;  %6040 = vperm.xlu0 %8560, %v6018_v2  }
 0xe46   : > { %6050 = vperm.xlu1 %8561, %v6020_v63   ;;  %v7993_v63 = vld [vmem:[%s15087_s15 + $0x68] sm:$0xf] }
 0xe47   : > { %v5988_v53 = vpop.permute.xlu2 %5987 }
 0xe4d   : > { %6030 = vperm.xlu2 %8562, %v6016_v11  }
 0xe4e   : > { %6025 = vperm.xlu1 %8561, %v6015_v26   ;;  %v8202_v26 = vld [vmem:[%s15087_s15 + $0x74] sm:$0xf0] }
 0xe4f   : > { %v5958_v32 = vpop.permute.xlu2 %5957 }
 0xe57   : > { %v5994_v49 = vpop.permute.xlu0 %5993  ;;  %v5934_v10 = vpop.permute.xlu2 %5933 }
 0xe58   : > { %v5970_v15 = vpop.permute.xlu1 %5969 }
 0xe5f   : > { %v5964_v31 = vpop.permute.xlu0 %5963 }
 0xe60   : > { %v5946_v62 = vpop.permute.xlu1 %5945 }
 0xe67   : > { %v5996_v61 = vpop.permute.xlu2 %5995  ;;  %v5940_v47 = vpop.permute.xlu0 %5939 }
 0xe68   : > { %6230 = vmatpush.bf16.msra.mxu3 %v5996_v61  ;;  %v5916_v18 = vpop.permute.xlu1 %5915  ;;  %v7977_v61 = vld [vmem:[%s15087_s15 + $0x48] sm:$0xf] }
 0xe6c   : > { %6231 = vmatpush.bf16.msra.mxu3 %v5994_v49  ;;  %v8197_v49 = vld [vmem:[%s15087_s15 + $0x4c] sm:$0xf0] }
 0xe6f   : > { %v5910_v21 = vpop.permute.xlu0 %5909  ;;  %v5966_v33 = vpop.permute.xlu2 %5965 }
 0xe70   : > { %v5982_v51 = vpop.permute.xlu1 %5981 }
 0xe77   : > { %v5942_v7 = vpop.permute.xlu2 %5941 }
 0xe7f   : > { %v5972_v55 = vpop.permute.xlu0 %5971  ;;  %v5912_v52 = vpop.permute.xlu2 %5911 }
 0xe80   : > { %v5924_v3 = vpop.permute.xlu1 %5923  ;;  %6201 = vmatpush.bf16.msra.mxu2 %v5972_v55  ;;  %v7985_v55 = vld [vmem:[%s15087_s15 + $0x60] sm:$0xf] }
 0xe81   : > { %6143 = vmatpush.bf16.msrb.mxu0 %v5924_v3  ;;  %v8201_v3 = vld [vmem:[%s15087_s15 + $0x6c] sm:$0xf0] }
 0xe84   : > { %6202 = vmatpush.bf16.msra.mxu2 %v5970_v15  ;;  %v8195_v15 = vld [vmem:[%s15087_s15 + $0x44] sm:$0xf] }
 0xe85   : > { %6144 = vmatpush.bf16.msrb.mxu0 %v5922_v16 }
 0xe87   : > { %v5948_v40 = vpop.permute.xlu0 %5947  ;;  %v5930_v5 = vpop.permute.xlu2 %5929 }
 0xe88   : > { %v5990_v59 = vpop.permute.xlu1 %5989  ;;  %6172 = vmatpush.bf16.msrb.mxu1 %v5948_v40  ;;  %6203 = vmatpush.bf16.msra.mxu2 %v5966_v33  ;;  %v7986_v40 = vor.u32 %v8201_v3, %v7985_v55 }
 0xe89   : > { %6232 = vmatpush.bf16.msra.mxu3 %v5990_v59 }
 0xe8c   : > { %6173 = vmatpush.bf16.msrb.mxu1 %v5946_v62  ;;  %6204 = vmatpush.bf16.msra.mxu2 %v5964_v31 }
 0xe8d   : > { %6233 = vmatpush.bf16.msra.mxu3 %v5988_v53 }
 0xe8f   : > { %v5918_v13 = vpop.permute.xlu0 %5917  ;;  %v5928_v14 = vpop.permute.xlu2 %5927 }
 0xe90   : > { %v5960_v43 = vpop.permute.xlu1 %5959  ;;  %6145 = vmatpush.bf16.msrb.mxu0 %v5918_v13  ;;  %6174 = vmatpush.bf16.msrb.mxu1 %v5942_v7  ;;  %v7987_v7 = vld [vmem:[%s15087_s15 + $0x70] sm:$0xf0]  ;;  %v8200_v13 = vld [vmem:[%s15087_s15 + $0x6c] sm:$0xf] }
 0xe91   : > { %6205 = vmatpush.bf16.msra.mxu2 %v5960_v43  ;;  %v7990_v59 = vor.u32 %v8199_v57, %v7987_v7  ;;  %v7994_v43 = vor.u32 %v8202_v26, %v7993_v63 }
 0xe94   : > { %6146 = vmatpush.bf16.msrb.mxu0 %v5916_v18  ;;  %6175 = vmatpush.bf16.msrb.mxu1 %v5940_v47  ;;  %v8198_v47 = vld [vmem:[%s15087_s15 + $0x54] sm:$0xf0]  ;;  %v8196_v18 = vld [vmem:[%s15087_s15 + $0x4c] sm:$0xf] }
 0xe95   : > { %6206 = vmatpush.bf16.msra.mxu2 %v5958_v32  ;;  %v7969_v32 = vld [vmem:[%s15087_s15 + $0x40] sm:$0xf] }
 0xe96   : > { %v7970_v31 = vor.u32 %v8197_v49, %v7969_v32 }
 0xe97   : > { %v5984_v24 = vpop.permute.xlu0 %5983  ;;  %v6046_v19 = vpop.permute.xlu2 %6045 }
 0xe98   : > { %v5936_v1 = vpop.permute.xlu1 %5935  ;;  %6147 = vmatpush.bf16.msrb.mxu0 %v5912_v52  ;;  %6234 = vmatpush.bf16.msra.mxu3 %v5984_v24  ;;  %v7995_v52 = vld [vmem:[%s15087_s15 + $0x78] sm:$0xf0] }
 0xe99   : > { %6176 = vmatpush.bf16.msrb.mxu1 %v5936_v1  ;;  %v7998_v24 = vor.u32 %v8200_v13, %v7995_v52 }
 0xe9c   : > { %6148 = vmatpush.bf16.msrb.mxu0 %v5910_v21  ;;  %6235 = vmatpush.bf16.msra.mxu3 %v5982_v51  ;;  %v7979_v21 = vld [vmem:[%s15087_s15 + $0x58] sm:$0xf0]  ;;  %v7978_v51 = vor.u32 %v8198_v47, %v7977_v61 }
 0xe9d   : > { %6177 = vmatpush.bf16.msrb.mxu1 %v5934_v10  ;;  %v7971_v10 = vld [vmem:[%s15087_s15 + $0x50] sm:$0xf0]  ;;  %v7982_v33 = vor.u32 %v8196_v18, %v7979_v21 }
 0xe9e   : > { %v7974_v62 = vor.u32 %v8195_v15, %v7971_v10 }
 0xe9f   : > { %v5954_v46 = vpop.permute.xlu0 %5953  ;;  %v6036_v29 = vpop.permute.xlu2 %6035 }
 0xea0   : > { %v5978_v25 = vpop.permute.xlu1 %5977  ;;  %6149 = vmatpush.bf16.msrb.mxu0 %v13770_v22  ;;  %6207 = vmatpush.bf16.msra.mxu2 %v5954_v46  ;;  %v7963_v22 = vld [vmem:[%s15087_s15 + $0x38] sm:$0xf0] }
 0xea1   : > { %6178 = vmatpush.bf16.msrb.mxu1 %v5930_v5  ;;  %6236 = vmatpush.bf16.msra.mxu3 %v5978_v25  ;;  %v7966_v53 = vor.u32 %v8192_v8, %v7963_v22 }
 0xea4   : > { %6150 = vmatpush.bf16.msrb.mxu0 %v13742_v54  ;;  %v7961_v54 = vld [vmem:[%s15087_s15 + $0x28] sm:$0xf] }
 0xea5   : > { %6179 = vmatpush.bf16.msrb.mxu1 %v5928_v14  ;;  %v7962_v16 = vor.u32 %v8194_v41, %v7961_v54 }
 0xea7   : > { %v5952_v38 = vpop.permute.xlu0 %5951  ;;  %6151 = vmatmul.bf16.vlgmr.msrb.gmra.mxu0 %v7938_v35  ;;  %v6031_v4 = vpop.permute.xlu2 %6030 }
 0xea8   : > { %6180 = vmatmul.bf16.vlgmr.msrb.gmra.mxu1 %v7942_v44  ;;  %v5976_v34 = vpop.permute.xlu1 %5975  ;;  %6208 = vmatpush.bf16.msra.mxu2 %v5952_v38 }
 0xea9   : > { %6237 = vmatpush.bf16.msra.mxu3 %v5976_v34 }
 0xeab   : > { %6209 = vmatmul.bf16.vlgmr.msra.gmra.mxu2 %v7946_v45 }
 0xeac   : > { %6238 = vmatmul.bf16.vlgmr.msra.gmra.mxu3 %v7950_v0 }
 0xeaf   : > { %v13937_v38 = vpop.permute.xlu0 %6055 }
 0xeb0   : > { %v13930_v1 = vpop.permute.xlu1 %6060 }
 0xeb7   : > { %6156 = vmatmul.bf16.gmra.mxu0 %v7954_v36  ;;  %v6041_v22 = vpop.permute.xlu0 %6040 }
 0xeb8   : > { %6185 = vmatmul.bf16.gmra.mxu1 %v7958_v42  ;;  %v13932_v5 = vpop.permute.xlu1 %6050 }
 0xebb   : > { %6214 = vmatmul.bf16.gmra.mxu2 %v7962_v16 }
 0xebc   : > { %6243 = vmatmul.bf16.gmra.mxu3 %v7966_v53 }
 0xec0   : > { %v6026_v25 = vpop.permute.xlu1 %6025 }
 0xec7   : > { %6161 = vmatmul.bf16.gmra.mxu0 %v7970_v31 }
 0xec8   : > { %6190 = vmatmul.bf16.gmra.mxu1 %v7974_v62 }
 0xecb   : > { %6219 = vmatmul.bf16.gmra.mxu2 %v7978_v51 }
 0xecc   : > { %6248 = vmatmul.bf16.gmra.mxu3 %v7982_v33 }
 0xed7   : > { %6166 = vmatmul.bf16.gmra.mxu0 %v7986_v40 }
 0xed8   : > { %6195 = vmatmul.bf16.gmra.mxu1 %v7990_v59 }
 0xedb   : > { %6224 = vmatmul.bf16.gmra.mxu2 %v7994_v43 }
 0xedc   : > { %6253 = vmatmul.bf16.gmra.mxu3 %v7998_v24 }
 0xf24   : > { %v6152_v17 = vpop.f32.mrf.mxu0 }
 0xf25   : > { %v6181_v46 = vpop.f32.mrf.mxu1  ;;  %v6153_v48 = vadd.f32 %v6152_v17, %v6026_v25 }
 0xf27   : > { %v6182_v39 = vadd.f32 %v6181_v46, %v6153_v48 }
 0xf2c   : > { %v6154_v58 = vpop.f32.mrf.mxu0 }
 0xf2d   : > { %v6183_v60 = vpop.f32.mrf.mxu1  ;;  %v6155_v12 = vadd.f32 %v6154_v58, %v6031_v4 }
 0xf2e   : > { %v6210_v35 = vpop.f32.mrf.mxu2 }
 0xf2f   : > { %v6211_v14 = vadd.f32 %v6210_v35, %v6182_v39  ;;  %v6239_v44 = vpop.f32.mrf.mxu3  ;;  %v6184_v34 = vadd.f32 %v6183_v60, %v6155_v12 }
 0xf31   : > { %v13934_v27 = vadd.f32 %v6239_v44, %v6211_v14 }
 0xf33   : > { %v7999_v9 = vmul.f32 -1.442695, %v13934_v27 }
 0xf34   : > { %v6157_v45 = vpop.f32.mrf.mxu0 }
 0xf35   : > { %8835 = vpow2.f32 %v7999_v9  ;;  %v6186_v0 = vpop.f32.mrf.mxu1  ;;  %v6158_v20 = vadd.f32 %v6157_v45, %v6036_v29 }
 0xf36   : > { %v6212_v11 = vpop.f32.mrf.mxu2 }
 0xf37   : > { %v6213_v2 = vadd.f32 %v6212_v11, %v6184_v34  ;;  %v6241_v56 = vpop.f32.mrf.mxu3  ;;  %v6187_v41 = vadd.f32 %v6186_v0, %v6158_v20 }
 0xf39   : > { %v13939_v37 = vadd.f32 %v6241_v56, %v6213_v2 }
 0xf3b   : > { %v8836_v50 = vpop.eup %8835  ;;  %v8000_v36 = vmul.f32 -1.442695, %v13939_v37 }
 0xf3c   : > { %v6283_v42 = vadd.f32 1.0, %v8836_v50  ;;  %v6159_v54 = vpop.f32.mrf.mxu0 }
 0xf3d   : > { %8837 = vpow2.f32 %v8000_v36  ;;  %v6188_v8 = vpop.f32.mrf.mxu1  ;;  %v6160_v49 = vadd.f32 %v6159_v54, %v6041_v22 }
 0xf3e   : > { %8839 = vrcp.f32 %v6283_v42  ;;  %v6215_v16 = vpop.f32.mrf.mxu2  ;;  %v6302_v59 = vand.u32 2147483648, %v6283_v42  ;;  %vm6296_vm12 = vweird.f32 %v6283_v42  ;;  %v6300_v52 = vand.u32 2147483647, %v6283_v42 }
 0xf3f   : > { %v6216_v53 = vadd.f32 %v6215_v16, %v6187_v41  ;;  %v6244_v32 = vpop.f32.mrf.mxu3  ;;  %v6189_v21 = vadd.f32 %v6188_v8, %v6160_v49 }
 0xf40   : > { %v6303_v48 = vor.u32 1.1754944e-38, %v6302_v59  ;;  %vm6301_vm5 = vcmp.eq.f32.partialorder %v6300_v52, 8.507059e+37 }
 0xf41   : > { %v13942_v15 = vadd.f32 %v6244_v32, %v6216_v53 }
 0xf43   : > { %v8838_v10 = vpop.eup %8837  ;;  %v8001_v31 = vmul.f32 -1.442695, %v13942_v15 }
 0xf44   : > { %v8840_v62 = vpop.eup %8839  ;;  %v6284_v61 = vadd.f32 1.0, %v8838_v10  ;;  %v6162_v47 = vpop.f32.mrf.mxu0 }
 0xf45   : > { %v6292_v18 = vmul.f32 %v8840_v62, %v6283_v42  ;;  %8841 = vpow2.f32 %v8001_v31  ;;  %v6191_v55 = vpop.f32.mrf.mxu1  ;;  %vm6297_vm3 = vweird.f32 %v8840_v62  ;;  %v6163_v63 = vadd.f32 %v6162_v47, %v6046_v19 }
 0xf46   : > { %8843 = vrcp.f32 %v6284_v61  ;;  %v6217_v51 = vpop.f32.mrf.mxu2  ;;  %vm6298_vm11 = vmor %vm6296_vm12, %vm6297_vm3  ;;  %v6317_v14 = vand.u32 2147483648, %v6284_v61  ;;  %v6315_v12 = vand.u32 2147483647, %v6284_v61  ;;  %vm6311_vm10 = vweird.f32 %v6284_v61 }
 0xf47   : > { %v6293_v33 = vsub.f32 1.0, %v6292_v18  ;;  %v6218_v3 = vadd.f32 %v6217_v51, %v6189_v21  ;;  %v6246_v57 = vpop.f32.mrf.mxu3  ;;  %v6192_v58 = vadd.f32 %v6191_v55, %v6163_v63 }
 0xf48   : > { %v6318_v20 = vor.u32 1.1754944e-38, %v6317_v14  ;;  %vm6316_vm1 = vcmp.eq.f32.partialorder %v6315_v12, 8.507059e+37 }
 0xf49   : > { %v6294_v7 = vmul.f32 %v8840_v62, %v6293_v33  ;;  %v13945_v40 = vadd.f32 %v6246_v57, %v6218_v3 }
 0xf4b   : > { %v8842_v26 = vpop.eup %8841  ;;  %v6295_v13 = vadd.f32 %v8840_v62, %v6294_v7  ;;  %v8002_v43 = vmul.f32 -1.442695, %v13945_v40 }
 0xf4c   : > { %v8844_v24 = vpop.eup %8843  ;;  %v13948_v17 = vadd.f32 1.0, %v8842_v26  ;;  %v6164_v46 = vpop.f32.mrf.mxu0 }
 0xf4d   : > { %v6299_v29 = vsel %vm6298_vm11, %v8840_v62, %v6295_v13  ;;  %v6307_v25 = vmul.f32 %v8844_v24, %v6284_v61  ;;  %8845 = vpow2.f32 %v8002_v43  ;;  %vm6312_vm14 = vweird.f32 %v8844_v24  ;;  %v6193_v9 = vpop.f32.mrf.mxu1 }
 0xf4e   : > { %8847 = vrcp.f32 %v13948_v17  ;;  %v6220_v39 = vpop.f32.mrf.mxu2  ;;  %v6304_v35 = vsel %vm6301_vm5, %v6303_v48, %v6299_v29  ;;  %v6165_v45 = vadd.f32 %v6164_v46, %v13932_v5  ;;  %vm6313_vm2 = vmor %vm6311_vm10, %vm6312_vm14  ;;  %vm6326_vm6 = vweird.f32 %v13948_v17 }
 0xf4f   : > { %v6308_v19 = vsub.f32 1.0, %v6307_v25  ;;  %v6249_v60 = vpop.f32.mrf.mxu3  ;;  %v6221_v44 = vadd.f32 %v6220_v39, %v6192_v58  ;;  %v6411_v11 = vmul.f32 %v6304_v35, %v13934_v27  ;;  %v6332_v61 = vand.u32 2147483648, %v13948_v17 }
 0xf50   : > { %v6194_v8 = vadd.f32 %v6193_v9, %v6165_v45 }
 0xf51   : > { %v6309_v4 = vmul.f32 %v8844_v24, %v6308_v19  ;;  %v13952_v34 = vadd.f32 %v6249_v60, %v6221_v44  ;;  %v6419_v27 = vpack.c.bf16 %v6411_v11, %v6411_v11  ;;  %v6333_v13 = vor.u32 1.1754944e-38, %v6332_v61 }
 0xf53   : > { %v8846_v0 = vpop.eup %8845  ;;  %v6310_v2 = vadd.f32 %v8844_v24, %v6309_v4  ;;  %v8003_v36 = vmul.f32 -1.442695, %v13952_v34  ;;  %v6435_v18 = vunpack.c.l.b16 %v6419_v27 }
 0xf54   : > { %v8848_v56 = vpop.eup %8847  ;;  %v13955_v50 = vadd.f32 1.0, %v8846_v0  ;;  %v6167_v41 = vpop.f32.mrf.mxu0 }
 0xf55   : > { %v6314_v42 = vsel %vm6313_vm2, %v8844_v24, %v6310_v2  ;;  %v6322_v54 = vmul.f32 %v8848_v56, %v13948_v17  ;;  %vm6327_vm8 = vweird.f32 %v8848_v56  ;;  %v6168_v62 = vadd.f32 %v6167_v41, %v13937_v38  ;;  %v6196_v33 = vpop.f32.mrf.mxu1 }
 0xf56   : > { %v6319_v5 = vsel %vm6316_vm1, %v6318_v20, %v6314_v42  ;;  %8849 = vrcp.f32 %v13955_v50  ;;  %v6222_v22 = vpop.f32.mrf.mxu2  ;;  %vm13967_vm7 = vmor %vm6326_vm6, %vm6327_vm8  ;;  %v6347_v48 = vand.u32 2147483648, %v13955_v50  ;;  %v6345_v39 = vand.u32 2147483647, %v13955_v50 }
 0xf57   : > { %v6412_v16 = vmul.f32 %v6319_v5, %v13939_v37  ;;  %v6323_v53 = vsub.f32 1.0, %v6322_v54  ;;  %8851 = vpow2.f32 %v8003_v36  ;;  %v6251_v32 = vpop.f32.mrf.mxu3  ;;  %v6223_v49 = vadd.f32 %v6222_v22, %v6194_v8 }
 0xf58   : > { %v6330_v37 = vand.u32 2147483647, %v13948_v17  ;;  %v6197_v26 = vadd.f32 %v6196_v33, %v6168_v62  ;;  %vm6341_vm0 = vweird.f32 %v13955_v50  ;;  %v6348_v12 = vor.u32 1.1754944e-38, %v6347_v48 }
 0xf59   : > { %v6420_v10 = vpack.c.bf16 %v6412_v16, %v6412_v16  ;;  %v6324_v31 = vmul.f32 %v8848_v56, %v6323_v53  ;;  %v13964_v47 = vadd.f32 %v6251_v32, %v6223_v49  ;;  %vm6346_vm3 = vcmp.eq.f32.partialorder %v6345_v39, 8.507059e+37 }
 0xf5a   : > { %vm6331_vm13 = vcmp.eq.f32.partialorder %v6330_v37, 8.507059e+37 }
 0xf5b   : > { %v6436_v21 = vunpack.c.l.b16 %v6420_v10  ;;  %v6325_v51 = vadd.f32 %v8848_v56, %v6324_v31  ;;  %v8004_v57 = vmul.f32 -1.442695, %v13964_v47 }
 0xf5c   : > { %v8850_v55 = vpop.eup %8849  ;;  %v6169_v17 = vpop.f32.mrf.mxu0 }
 0xf5d   : > { %v8852_v38 = vpop.eup %8851  ;;  %v6443_v7 = vpack.c.b16 %v6436_v21, %v6435_v18  ;;  %v6329_v59 = vsel %vm13967_vm7, %v8848_v56, %v6325_v51  ;;  %v6337_v63 = vmul.f32 %v8850_v55, %v13955_v50  ;;  %8853 = vpow2.f32 %v8004_v57  ;;  %v6198_v0 = vpop.f32.mrf.mxu1 }
 0xf5e   : > { %v6287_v52 = vadd.f32 1.0, %v8852_v38  ;;  %v6225_v43 = vpop.f32.mrf.mxu2  ;;  %v6334_v25 = vsel %vm6331_vm13, %v6333_v13, %v6329_v59  ;;  %vm6342_vm4 = vweird.f32 %v8850_v55  ;;  %v6170_v60 = vadd.f32 %v6169_v17, %v13930_v1 }
 0xf5f   : > { %v6338_v24 = vsub.f32 1.0, %v6337_v63  ;;  %v6226_v46 = vadd.f32 %v6225_v43, %v6197_v26  ;;  %v6254_v29 = vpop.f32.mrf.mxu3  ;;  %6447 = vrot.lane.b32.xlu0 %v6443_v7, %s15056_s30  ;;  %v6413_v35 = vmul.f32 %v6334_v25, %v13942_v15  ;;  %vm6343_vm9 = vmor %vm6341_vm0, %vm6342_vm4 }
 0xf60   : > { %8855 = vrcp.f32 %v6287_v52  ;;  %v6199_v56 = vadd.f32 %v6198_v0, %v6170_v60  ;;  %v6362_v5 = vand.u32 2147483648, %v6287_v52  ;;  %v6360_v32 = vand.u32 2147483647, %v6287_v52 }
 0xf61   : > { %v6339_v58 = vmul.f32 %v8850_v55, %v6338_v24  ;;  %v13978_v19 = vadd.f32 %v6254_v29, %v6226_v46  ;;  %v6421_v1 = vpack.c.bf16 %v6413_v35, %v6413_v35  ;;  %vm6356_vm11 = vweird.f32 %v6287_v52 }
 0xf62   : > { %v6363_v21 = vor.u32 1.1754944e-38, %v6362_v5  ;;  %vm6361_vm14 = vcmp.eq.f32.partialorder %v6360_v32, 8.507059e+37 }
 0xf63   : > { %v6340_v14 = vadd.f32 %v8850_v55, %v6339_v58  ;;  %v8005_v44 = vmul.f32 -1.442695, %v13978_v19  ;;  %v8854_v4 = vpop.eup %8853  ;;  %v6437_v27 = vunpack.c.l.b16 %v6421_v1 }
 0xf64   : > { %v6288_v45 = vadd.f32 1.0, %v8854_v4 }
 0xf65   : > { %v6344_v9 = vsel %vm6343_vm9, %v8850_v55, %v6340_v14  ;;  %8857 = vpow2.f32 %v8005_v44 }
 0xf66   : > { %v8856_v11 = vpop.eup %8855  ;;  %v6349_v2 = vsel %vm6346_vm3, %v6348_v12, %v6344_v9  ;;  %v6227_v20 = vpop.f32.mrf.mxu2  ;;  %8859 = vrcp.f32 %v6288_v45  ;;  %v6377_v33 = vand.u32 2147483648, %v6288_v45  ;;  %v6375_v3 = vand.u32 2147483647, %v6288_v45 }
 0xf67   : > { %v6414_v15 = vmul.f32 %v6349_v2, %v13945_v40  ;;  %v6352_v36 = vmul.f32 %v8856_v11, %v6287_v52  ;;  %v6228_v50 = vadd.f32 %v6227_v20, %v6199_v56  ;;  %v6256_v41 = vpop.f32.mrf.mxu3  ;;  %vm6357_vm12 = vweird.f32 %v8856_v11 }
 0xf68   : > { %vm6358_vm5 = vmor %vm6356_vm11, %vm6357_vm12  ;;  %vm6371_vm2 = vweird.f32 %v6288_v45  ;;  %v6378_v63 = vor.u32 1.1754944e-38, %v6377_v33  ;;  %vm6376_vm8 = vcmp.eq.f32.partialorder %v6375_v3, 8.507059e+37  ;;  %vm6463_vm11 = vcmask 302080  }
 0xf69   : > { %v6422_v42 = vpack.c.bf16 %v6414_v15, %v6414_v15  ;;  %v6353_v54 = vsub.f32 1.0, %v6352_v36  ;;  %v13985_v8 = vadd.f32 %v6256_v41, %v6228_v50 }
 0xf6b   : > { %v8858_v22 = vpop.eup %8857  ;;  %v6438_v16 = vunpack.c.l.b16 %v6422_v42  ;;  %v6354_v53 = vmul.f32 %v8856_v11, %v6353_v54  ;;  %v8006_v10 = vmul.f32 -1.442695, %v13985_v8 }
 0xf6c   : > { %v6289_v49 = vadd.f32 1.0, %v8858_v22  ;;  %v8860_v31 = vpop.eup %8859 }
 0xf6d   : > { %v6444_v40 = vpack.c.b16 %v6438_v16, %v6437_v27  ;;  %v6355_v62 = vadd.f32 %v8856_v11, %v6354_v53  ;;  %v6367_v61 = vmul.f32 %v8860_v31, %v6288_v45  ;;  %vm6372_vm10 = vweird.f32 %v8860_v31 }
 0xf6e   : > { %8861 = vrcp.f32 %v6289_v49  ;;  %vm6373_vm1 = vmor %vm6371_vm2, %vm6372_vm10  ;;  %v6392_v39 = vand.u32 2147483648, %v6289_v49  ;;  %vm6386_vm7 = vweird.f32 %v6289_v49  ;;  %v6390_v60 = vand.u32 2147483647, %v6289_v49 }
 0xf6f   : > { %v6359_v18 = vsel %vm6358_vm5, %v8856_v11, %v6355_v62  ;;  %8863 = vpow2.f32 %v8006_v10  ;;  %6449 = vrot.lane.b32.xlu2 %v6444_v40, %s15056_s30  ;;  %v6368_v51 = vsub.f32 1.0, %v6367_v61  ;;  %vm7183_vm5 = vcmask 187392  }
 0xf70   : > { %v6364_v37 = vsel %vm6361_vm14, %v6363_v21, %v6359_v18  ;;  %v6393_v12 = vor.u32 1.1754944e-38, %v6392_v39  ;;  %vm6391_vm4 = vcmp.eq.f32.partialorder %v6390_v60, 8.507059e+37  ;;  %vm15092_vm14 = vcmask 1042432  }
 0xf71   : > { %v6369_v55 = vmul.f32 %v8860_v31, %v6368_v51  ;;  %v6415_v38 = vmul.f32 %v6364_v37, %v13952_v34 }
 0xf73   : > { %v6370_v7 = vadd.f32 %v8860_v31, %v6369_v55  ;;  %v6423_v17 = vpack.c.bf16 %v6415_v38, %v6415_v38 }
 0xf74   : > { %v8862_v57 = vpop.eup %8861 }
 0xf75   : > { %v8864_v59 = vpop.eup %8863  ;;  %v6382_v26 = vmul.f32 %v8862_v57, %v6289_v49  ;;  %v6374_v13 = vsel %vm6373_vm1, %v8860_v31, %v6370_v7  ;;  %vm6387_vm6 = vweird.f32 %v8862_v57  ;;  %v6439_v34 = vunpack.c.l.b16 %v6423_v17 }
 0xf76   : > { %v6290_v52 = vadd.f32 1.0, %v8864_v59  ;;  %v6379_v43 = vsel %vm6376_vm8, %v6378_v63, %v6374_v13  ;;  %vm6388_vm13 = vmor %vm6386_vm7, %vm6387_vm6  ;;  %vm7538_vm6 = vcmask 89088  }
 0xf77   : > { %v6383_v24 = vsub.f32 1.0, %v6382_v26  ;;  %v6416_v46 = vmul.f32 %v6379_v43, %v13964_v47 }
 0xf78   : > { %8865 = vrcp.f32 %v6290_v52  ;;  %v6407_v45 = vand.u32 2147483648, %v6290_v52  ;;  %v6405_v11 = vand.u32 2147483647, %v6290_v52  ;;  %vm6401_vm9 = vweird.f32 %v6290_v52 }
 0xf79   : > { %v6384_v29 = vmul.f32 %v8862_v57, %v6383_v24  ;;  %v6424_v25 = vpack.c.bf16 %v6416_v46, %v6416_v46 }
 0xf7a   : > { %v6408_v20 = vor.u32 1.1754944e-38, %v6407_v45  ;;  %vm6406_vm12 = vcmp.eq.f32.partialorder %v6405_v11, 8.507059e+37  ;;  %v8207_v11 = vld [vmem:[#allocation8 + $0x1c] sm:$0xf0] }
 0xf7b   : > { %v6385_v48 = vadd.f32 %v8862_v57, %v6384_v29  ;;  %v6440_v58 = vunpack.c.l.b16 %v6424_v25 }
 0xf7d   : > { %v6445_v14 = vpack.c.b16 %v6440_v58, %v6439_v34  ;;  %v6389_v44 = vsel %vm6388_vm13, %v8862_v57, %v6385_v48 }
 0xf7e   : > { %v8866_v35 = vpop.eup %8865  ;;  %v6394_v9 = vsel %vm6391_vm4, %v6393_v12, %v6389_v44 }
 0xf7f   : > { %v6397_v4 = vmul.f32 %v8866_v35, %v6290_v52  ;;  %6451 = vrot.lane.b32.xlu1 %v6445_v14, %s15056_s30  ;;  %vm6402_vm0 = vweird.f32 %v8866_v35  ;;  %v6417_v2 = vmul.f32 %v6394_v9, %v13978_v19 }
 0xf80   : > { %vm6403_vm3 = vmor %vm6401_vm9, %vm6402_vm0 }
 0xf81   : > { %v6398_v47 = vsub.f32 1.0, %v6397_v4  ;;  %v6425_v36 = vpack.c.bf16 %v6417_v2, %v6417_v2  ;;  %v8966_v4 = vld [vmem:[%s14961_s3] ss:$0 sm:$0xff] }
 0xf83   : > { %v6399_v0 = vmul.f32 %v8866_v35, %v6398_v47  ;;  %v6441_v54 = vunpack.c.l.b16 %v6425_v36 }
 0xf85   : > { %v6400_v56 = vadd.f32 %v8866_v35, %v6399_v0  ;;  %v8009_v0 = vld [vmem:[#allocation8] sm:$0xf] }
 0xf87   : > { %v6404_v1 = vsel %vm6403_vm3, %v8866_v35, %v6400_v56  ;;  %v8010_v56 = vor.u32 %v8207_v11, %v8009_v0  ;;  %v8219_v0 = vld [vmem:[#allocation8 + $0x84] sm:$0xf] }
 0xf88   : > { %v6409_v15 = vsel %vm6406_vm12, %v6408_v20, %v6404_v1  ;;  %v8075_v11 = vld [vmem:[#allocation8 + $0xa0] sm:$0xf0] }
 0xf89   : > { %v6418_v50 = vmul.f32 %v6409_v15, %v13985_v8 }
 0xf8b   : > { %v6426_v42 = vpack.c.bf16 %v6418_v50, %v6418_v50  ;;  %v8017_v50 = vld [vmem:[#allocation8 + $0x8] sm:$0xf] }
 0xf8d   : > { %v6442_v41 = vunpack.c.l.b16 %v6426_v42  ;;  %v8208_v42 = vld [vmem:[#allocation8 + $0x24] sm:$0xf0] }
 0xf8f   : > { %v6446_v5 = vpack.c.b16 %v6442_v41, %v6441_v54  ;;  %v8041_v54 = vld [vmem:[#allocation8 + $0x40] sm:$0xf] }
 0xf90   : > { %v8215_v41 = vld [vmem:[#allocation8 + $0x5c] sm:$0xf0] }
 0xf91   : > { %6453 = vrot.lane.b32.xlu0 %v6446_v5, %s15056_s30  ;;  %v8018_v5 = vor.u32 %v8208_v42, %v8017_v50 }
 0xfc9   : > { %v6450_v8 = vpop.permute.xlu2 %6449 }
 0xfca   : > { %v6458_v16 = vsel %vm4490_vm15, 0, %v6450_v8  ;;  %v8019_v8 = vld [vmem:[#allocation8 + $0x28] sm:$0xf0] }
 0xfcb   : > { %v14013_v53 = vsel %vm6463_vm11, %v6458_v16, 0 }
 0xfd1   : > { %v6448_v22 = vpop.permute.xlu0 %6447 }
 0xfd2   : > { %v6456_v19 = vsel %vm4490_vm15, 0, %v6448_v22 }
 0xfd3   : > { %v13997_v27 = vsel %vm6463_vm11, %v6456_v19, 0  ;;  %v8042_v19 = vor.u32 %v8215_v41, %v8041_v54  ;;  %v8228_v54 = vld [vmem:[#allocation8 + $0xcc] sm:$0xf] }
 0xfd4   : > { %6548 = vrot.lane.b32.xlu0 %v13997_v27, %s14795_s5  ;;  %6476 = vrot.lane.b32.xlu2 %v13997_v27, %s14771_s0  ;;  %v8115_v41 = vld [vmem:[#allocation8 + $0xe8] sm:$0xf0] }
 0xfd5   : > { %6524 = vrot.lane.b32.xlu1 %v13997_v27, %s14784_s10 }
 0xfdc   : > { %6536 = vrot.lane.b32.xlu0 %v13997_v27, %s14789_s1  ;;  %6512 = vrot.lane.b32.xlu2 %v13997_v27, %s14769_s7 }
 0xfdd   : > { %6500 = vrot.lane.b32.xlu1 %v13997_v27, %s14787_s9 }
 0xfe4   : > { %6526 = vrot.lane.b32.xlu0 %v14013_v53, %s14784_s10  ;;  %6550 = vrot.lane.b32.xlu2 %v14013_v53, %s14795_s5 }
 0xfe5   : > { %6478 = vrot.lane.b32.xlu1 %v14013_v53, %s14771_s0 }
 0xfec   : > { %6502 = vrot.lane.b32.xlu0 %v14013_v53, %s14787_s9  ;;  %6514 = vrot.lane.b32.xlu2 %v14013_v53, %s14769_s7 }
 0xfed   : > { %6490 = vrot.lane.b32.xlu1 %v14013_v53, %s14772_s25 }
 0xff1   : > { %v6452_v32 = vpop.permute.xlu1 %6451 }
 0xff2   : > { %v6460_v49 = vsel %vm4490_vm15, 0, %v6452_v32  ;;  %v8011_v32 = vld [vmem:[#allocation8 + $0x20] sm:$0xf0] }
 0xff3   : > { %v14029_v10 = vsel %vm6463_vm11, %v6460_v49, 0 }
 0xff4   : > { %6538 = vrot.lane.b32.xlu0 %v14013_v53, %s14789_s1  ;;  %6528 = vrot.lane.b32.xlu2 %v14029_v10, %s14784_s10 }
 0xff5   : > { %6552 = vrot.lane.b32.xlu1 %v14029_v10, %s14795_s5 }
 0xffc   : > { %6480 = vrot.lane.b32.xlu0 %v14029_v10, %s14771_s0  ;;  %6504 = vrot.lane.b32.xlu2 %v14029_v10, %s14787_s9 }
 0xffd   : > { %6492 = vrot.lane.b32.xlu1 %v14029_v10, %s14772_s25 }
0x1003   : > { %v6454_v31 = vpop.permute.xlu0 %6453 }
0x1004   : > { %v6462_v40 = vsel %vm4490_vm15, 0, %v6454_v31  ;;  %6540 = vrot.lane.b32.xlu0 %v14029_v10, %s14789_s1  ;;  %6516 = vrot.lane.b32.xlu2 %v14029_v10, %s14769_s7  ;;  %vm15091_vm15 = vcmask 1046528  }
0x1005   : > { %v14047_v62 = vsel %vm6463_vm11, %v6462_v40, 0 }
0x1006   : > { %6530 = vrot.lane.b32.xlu1 %v14047_v62, %s14784_s10  ;;  %s7631_s10 = sshll.u32 %s7628_s6, 4  ;;  %s7632_s10 = int_to_ptr.hbm [resolvable:$true] %s7631_s10 }
0x100c   : > { %6554 = vrot.lane.b32.xlu0 %v14047_v62, %s14795_s5  ;;  %6482 = vrot.lane.b32.xlu2 %v14047_v62, %s14771_s0 }
0x100e   : > { %6506 = vrot.lane.b32.xlu1 %v14047_v62, %s14787_s9  ;;  %s9227_s9 = scalar_lea.hbm %s15093_s2, 128 }
0x1014   : > { %6624 = vrot.lane.b32.xlu0 %v14029_v10, %s14796_s11  ;;  %6518 = vrot.lane.b32.xlu2 %v14047_v62, %s14769_s7 }
0x1016   : > { %6488 = vrot.lane.b32.xlu1 %v13997_v27, %s14772_s25 }
0x101c   : > { %6542 = vrot.lane.b32.xlu0 %v14047_v62, %s14789_s1  ;;  %6648 = vrot.lane.b32.xlu2 %v14029_v10, %s14799_s14  ;;  %s9221_s1 = sshra.s32 %s7632_s10, 4  ;;  %s9222_s1 = int_to_ptr.hbm [resolvable:$true] %s9221_s1 }
0x101d   : > { %p9228_p12 = scmp.lt.s32.totalorder %s9222_s1, %s15093_s2 }
0x101e   : > { %6494 = vrot.lane.b32.xlu1 %v14047_v62, %s14772_s25 }
0x1024   : > { %6600 = vrot.lane.b32.xlu0 %v14029_v10, %s14661_s26  ;;  %6574 = vrot.lane.b32.xlu2 %v14013_v53, %s14781_s23 }
0x1026   : > { %6576 = vrot.lane.b32.xlu1 %v14029_v10, %s14781_s23 }
0x102c   : > { %6646 = vrot.lane.b32.xlu0 %v14013_v53, %s14799_s14  ;;  %6620 = vrot.lane.b32.xlu2 %v13997_v27, %s14796_s11 }
0x102e   : > { %6622 = vrot.lane.b32.xlu1 %v14013_v53, %s14796_s11  ;;  %v6477_v61 = vpop.permute.xlu2 %6476 }
0x1034   : > { %6572 = vrot.lane.b32.xlu0 %v13997_v27, %s14781_s23  ;;  %6596 = vrot.lane.b32.xlu2 %v13997_v27, %s14661_s26 }
0x1036   : > { %6598 = vrot.lane.b32.xlu1 %v14013_v53, %s14661_s26  ;;  %v14089_v18 = vpop.permute.xlu2 %6512 }
0x103c   : > { %6636 = vrot.lane.b32.xlu0 %v14029_v10, %s14783_s12  ;;  %6564 = vrot.lane.b32.xlu2 %v14029_v10, %s14782_s24 }
0x103e   : > { %6644 = vrot.lane.b32.xlu1 %v13997_v27, %s14799_s14  ;;  %v14097_v21 = vpop.permute.xlu2 %6550 }
0x1044   : > { %6578 = vrot.lane.b32.xlu0 %v14047_v62, %s14781_s23  ;;  %6626 = vrot.lane.b32.xlu2 %v14047_v62, %s14796_s11  ;;  %s15090_s23 = sld [smem:[#allocation51_spill]] }
0x1046   : > { %6612 = vrot.lane.b32.xlu1 %v14029_v10, %s14619_s20  ;;  %v14105_v51 = vpop.permute.xlu2 %6514  ;;  %v14107_v37 = vpop.permute.xlu0 %6548 }
0x1047   : > { %v14109_v33 = vpop.permute.xlu1 %6524 }
0x104a   : > { %v14156_v25 = vld [vmem:[%s15090_s23 + $0x10] sm:$0xff]  ;;  %v14161_v48 = vld [vmem:[%s15090_s23 + $0x8] sm:$0xff]  ;;  %v14166_v34 = vld [vmem:[%s15090_s23] sm:$0xff] }
0x104b   : > { %v14176_v35 = vld [vmem:[%s15090_s23 + $0x20] sm:$0xff]  ;;  %v14182_v14 = vld [vmem:[%s15090_s23 + $0x18] sm:$0xff]  ;;  %v14202_v45 = vld [vmem:[%s15090_s23 + $0x28] sm:$0xff] }
0x104c   : > { %6562 = vrot.lane.b32.xlu0 %v14013_v53, %s14782_s24  ;;  %6602 = vrot.lane.b32.xlu2 %v14047_v62, %s14661_s26  ;;  %v14196_v9 = vld [vmem:[%s15090_s23 + $0x38] sm:$0xff]  ;;  %s7617_s26 = scalar_lea.sflag [#allocation4], %s9559_s18 }
0x104e   : > { %6650 = vrot.lane.b32.xlu1 %v14047_v62, %s14799_s14  ;;  %v14117_v55 = vpop.permute.xlu0 %6536  ;;  %v6529_v3 = vpop.permute.xlu2 %6528  ;;  %s7629_s14 = sshll.u32 %s708_s28, 4  ;;  %s7630_s14 = int_to_ptr.vmem [resolvable:$true] %s7629_s14 }
0x104f   : > { %v14119_v57 = vpop.permute.xlu1 %6500 }
0x1054   : > { %6614 = vrot.lane.b32.xlu0 %v14047_v62, %s14619_s20  ;;  %6610 = vrot.lane.b32.xlu2 %v14013_v53, %s14619_s20 }
0x1056   : > { %6588 = vrot.lane.b32.xlu1 %v14029_v10, %s14770_s22  ;;  %v6527_v38 = vpop.permute.xlu0 %6526  ;;  %v6505_v7 = vpop.permute.xlu2 %6504 }
0x1057   : > { %v6479_v59 = vpop.permute.xlu1 %6478 }
0x105c   : > { %6590 = vrot.lane.b32.xlu0 %v14047_v62, %s14770_s22  ;;  %6638 = vrot.lane.b32.xlu2 %v14047_v62, %s14783_s12 }
0x105e   : > { %6566 = vrot.lane.b32.xlu1 %v14047_v62, %s14782_s24  ;;  %v6503_v63 = vpop.permute.xlu0 %6502  ;;  %v14133_v26 = vpop.permute.xlu2 %6516 }
0x105f   : > { %v14135_v13 = vpop.permute.xlu1 %6490 }
0x1064   : > { %6608 = vrot.lane.b32.xlu0 %v13997_v27, %s14619_s20  ;;  %6586 = vrot.lane.b32.xlu2 %v14013_v53, %s14770_s22 }
0x1066   : > { %6634 = vrot.lane.b32.xlu1 %v14013_v53, %s14783_s12  ;;  %v14143_v52 = vpop.permute.xlu0 %6538  ;;  %v6483_v43 = vpop.permute.xlu2 %6482 }
0x1067   : > { %v6553_v24 = vpop.permute.xlu1 %6552  ;;  %6896 = vmatpush.bf16.msra.mxu0 %v6483_v43 }
0x106c   : > { %6584 = vrot.lane.b32.xlu0 %v13997_v27, %s14770_s22  ;;  %6632 = vrot.lane.b32.xlu2 %v13997_v27, %s14783_s12  ;;  %s9223_s12 = scalar_lea.hbm %s9222_s1, 64 }
0x106d   : > { %p9224_p1 = scmp.ne.s32.totalorder %s9222_s1, %s9223_s12  ;;  %p9229_p8 = scmp.lt.s32.totalorder %s9227_s9, %s9223_s12 }
0x106e   : > { %6560 = vrot.lane.b32.xlu1 %v13997_v27, %s14782_s24  ;;  %v6481_v17 = vpop.permute.xlu0 %6480  ;;  %v6519_v46 = vpop.permute.xlu2 %6518 }
0x106f   : > { %v14151_v29 = vpop.permute.xlu1 %6492  ;;  %6897 = vmatpush.bf16.msra.mxu0 %v6481_v17  ;;  %v8224_v17 = vld [vmem:[#allocation8 + $0xa4] sm:$0xf0]  ;;  %p9225_p3 = pnand %p9224_p1, %p9528_p13  ;;  %p9230_p7 = por %p9229_p8, %p9228_p12 }
0x1071   : > { %p9226_p5 = pneg %p9225_p3 }
0x1073   : > { %6898 = vmatpush.bf16.msra.mxu0 %v6479_v59  ;;  %v8211_v59 = vld [vmem:[#allocation8 + $0x44] sm:$0xf]  ;;  %p9231_p9 = pnand %p9230_p7, %p9226_p5 }
0x1074   : > { %6708 = vperm.xlu0 %8560, %v14156_v25   ;;  %6703 = vperm.xlu2 %8562, %v14161_v48  }
0x1076   : > { %6698 = vperm.xlu1 %8561, %v14166_v34   ;;  %v6541_v58 = vpop.permute.xlu0 %6540  ;;  %v14171_v39 = vpop.permute.xlu2 %6648 }
0x1077   : > { %6899 = vmatpush.bf16.msra.mxu0 %v6477_v61  ;;  %v8049_v61 = vld [vmem:[#allocation8 + $0x48] sm:$0xf] }
0x1078   : > { %v6531_v60 = vpop.permute.xlu1 %6530 }
0x1079   : > { %6954 = vmatpush.bf16.msrb.mxu2 %v6531_v60 }
0x107b   : > { %6900 = vmatpush.bf16.msra.mxu0 %v14047_v62 }
0x107c   : > { %6718 = vperm.xlu0 %8560, %v14176_v35   ;;  %8563 = vset.pattern.permute.xlu2 %v9324_v23 }
0x107d   : > { %6955 = vmatpush.bf16.msrb.mxu2 %v6529_v3  ;;  %7153 = vperm.xlu2 %8563, %v8966_v4   ;;  %v8083_v4 = vld [vmem:[#allocation8 + $0xa8] sm:$0xf0] }
0x107e   : > { %6713 = vperm.xlu1 %8561, %v14182_v14   ;;  %v6555_v44 = vpop.permute.xlu0 %6554  ;;  %v14190_v12 = vpop.permute.xlu2 %6574 }
0x107f   : > { %6901 = vmatpush.bf16.msra.mxu0 %v14029_v10  ;;  %6983 = vmatpush.bf16.msrb.mxu3 %v6555_v44  ;;  %v8220_v44 = vld [vmem:[#allocation8 + $0x8c] sm:$0xf] }
0x1080   : > { %v6507_v47 = vpop.permute.xlu1 %6506 }
0x1081   : > { %6925 = vmatpush.bf16.msra.mxu1 %v6507_v47  ;;  %6956 = vmatpush.bf16.msrb.mxu2 %v6527_v38  ;;  %v8051_v38 = vld [vmem:[#allocation8 + $0x68] sm:$0xf0] }
0x1083   : > { %6902 = vmatpush.bf16.msra.mxu0 %v14013_v53  ;;  %6984 = vmatpush.bf16.msrb.mxu3 %v6553_v24  ;;  %v8203_v53 = vld [vmem:[#allocation8 + $0x4] sm:$0xf]  ;;  %v8081_v24 = vld [vmem:[#allocation8 + $0x88] sm:$0xf] }
0x1084   : > { %6733 = vperm.xlu0 %8560, %v14196_v9   ;;  %v8014_v10 = vor.u32 %v8203_v53, %v8011_v32  ;;  %v8033_v32 = vld [vmem:[#allocation8 + $0x18] sm:$0xf] }
0x1085   : > { %6926 = vmatpush.bf16.msra.mxu1 %v6505_v7  ;;  %6957 = vmatpush.bf16.msrb.mxu2 %v14109_v33 }
0x1086   : > { %6723 = vperm.xlu1 %8561, %v14202_v45   ;;  %v14207_v2 = vpop.permute.xlu0 %6624  ;;  %8564 = vset.pattern.permute.xlu2 %v15006_v6  ;;  %v14210_v20 = vpop.permute.xlu2 %6620 }
0x1087   : > { %6903 = vmatpush.bf16.msra.mxu0 %v13997_v27  ;;  %6985 = vmatpush.bf16.msrb.mxu3 %v14097_v21  ;;  %v8073_v21 = vld [vmem:[#allocation8 + $0x80] sm:$0xf] }
0x1088   : > { %v6489_v1 = vpop.permute.xlu1 %6488 }
0x1089   : > { %6927 = vmatpush.bf16.msra.mxu1 %v6503_v63  ;;  %6958 = vmatpush.bf16.msrb.mxu2 %v6519_v46  ;;  %v8043_v63 = vld [vmem:[#allocation8 + $0x60] sm:$0xf0]  ;;  %v8105_v46 = vld [vmem:[#allocation8 + $0xc0] sm:$0xf] }
0x108a   : > { %6904 = vmatmul.bf16.vlgmr.msra.gmra.mxu0 %v8010_v56  ;;  %v8078_v56 = vor.u32 %v8219_v0, %v8075_v11  ;;  %v8221_v0 = vld [vmem:[#allocation8 + $0x94] sm:$0xf] }
0x108b   : > { %6986 = vmatpush.bf16.msrb.mxu3 %v14107_v37  ;;  %v8091_v11 = vld [vmem:[#allocation8 + $0xb0] sm:$0xf0] }
0x108c   : > { %8567 = vset.pattern.permute.xlu0 %v9324_v23 }
0x108d   : > { %6928 = vmatpush.bf16.msra.mxu1 %v14119_v57  ;;  %6959 = vmatpush.bf16.msrb.mxu2 %v14133_v26  ;;  %v8212_v57 = vld [vmem:[#allocation8 + $0x4c] sm:$0xf] }
0x108e   : > { %v6543_v15 = vpop.permute.xlu0 %6542  ;;  %8565 = vset.pattern.permute.xlu1 %v9324_v23  ;;  %7337 = vperm.xlu0 %8567, %v14166_v34   ;;  %v14220_v6 = vpop.permute.xlu2 %6596  ;;  %v8054_v26 = vor.u32 %v8212_v57, %v8051_v38 }
0x108f   : > { %6987 = vmatpush.bf16.msrb.mxu3 %v6543_v15  ;;  %7269 = vperm.xlu1 %8565, %v12766_v30   ;;  %v8204_v30 = vld [vmem:[#allocation8 + $0xc] sm:$0xf] }
0x1090   : > { %v6495_v36 = vpop.permute.xlu1 %6494  ;;  %v8022_v49 = vor.u32 %v8204_v30, %v8019_v8  ;;  %v8118_v30 = vor.u32 %v8228_v54, %v8115_v41  ;;  %v8123_v54 = vld [vmem:[#allocation8 + $0xf0] sm:$0xf0] }
0x1091   : > { %6929 = vmatpush.bf16.msra.mxu1 %v6495_v36  ;;  %6960 = vmatpush.bf16.msrb.mxu2 %v14105_v51  ;;  %v8223_v51 = vld [vmem:[#allocation8 + $0x9c] sm:$0xf0]  ;;  %v8232_v36 = vld [vmem:[#allocation8 + $0xe4] sm:$0xf0] }
0x1093   : > { %6988 = vmatpush.bf16.msrb.mxu3 %v6541_v58  ;;  %v8082_v58 = vor.u32 %v8224_v17, %v8081_v24  ;;  %v8059_v24 = vld [vmem:[#allocation8 + $0x70] sm:$0xf0] }
0x1095   : > { %6930 = vmatpush.bf16.msra.mxu1 %v14151_v29  ;;  %6961 = vmatpush.bf16.msrb.mxu2 %v14089_v18  ;;  %v8216_v18 = vld [vmem:[#allocation8 + $0x64] sm:$0xf0]  ;;  %v8231_v29 = vld [vmem:[#allocation8 + $0xdc] sm:$0xf0] }
0x1096   : > { %v6601_v22 = vpop.permute.xlu0 %6600  ;;  %8570 = vset.pattern.permute.xlu0 %v9323_v28  ;;  %v14227_v27 = vpop.permute.xlu2 %6564  ;;  %v8050_v37 = vor.u32 %v8216_v18, %v8049_v61  ;;  %v8035_v61 = vld [vmem:[#allocation8 + $0x38] sm:$0xf0]  ;;  %v8205_v18 = vld [vmem:[#allocation8 + $0x14] sm:$0xf] }
0x1097   : > { %6989 = vmatpush.bf16.msrb.mxu3 %v14143_v52  ;;  %8568 = vset.pattern.permute.xlu1 %v9323_v28 }
0x1098   : > { %v14231_v16 = vpop.permute.xlu1 %6576  ;;  %6962 = vmatmul.bf16.vlgmr.msrb.gmra.mxu2 %v8018_v5  ;;  %7301 = vperm.xlu1 %8568, %v14161_v48  }
0x1099   : > { %6931 = vmatpush.bf16.msra.mxu1 %v14135_v13  ;;  %7309 = vperm.xlu0 %8570, %v14182_v14   ;;  %v8046_v13 = vor.u32 %v8211_v59, %v8043_v63  ;;  %v8065_v59 = vld [vmem:[#allocation8 + $0x58] sm:$0xf] }
0x109a   : > { %6909 = vmatmul.bf16.gmra.mxu0 %v8042_v19  ;;  %v8227_v19 = vld [vmem:[#allocation8 + $0xc4] sm:$0xf]  ;;  %v8218_v63 = vld [vmem:[#allocation8 + $0x74] sm:$0xf0] }
0x109b   : > { %6990 = vmatpush.bf16.msrb.mxu3 %v14117_v55  ;;  %v8074_v55 = vor.u32 %v8223_v51, %v8073_v21  ;;  %v8027_v21 = vld [vmem:[#allocation8 + $0x30] sm:$0xf0]  ;;  %v14260_v51 = vld [vmem:[%s15090_s23 + $0x30] sm:$0xff] }
0x109c   : > { %6728 = vperm.xlu2 %8564, %v14260_v51   ;;  %v8030_v57 = vor.u32 %v8205_v18, %v8027_v21  ;;  %v7182_v18 = vld [vmem:[#allocation13 + $0x10] sm:$0x7f] }
0x109d   : > { %6932 = vmatpush.bf16.msra.mxu1 %v6489_v1 }
0x109e   : > { %v14237_v31 = vpop.permute.xlu0 %6646  ;;  %6991 = vmatmul.bf16.vlgmr.msrb.gmra.mxu3 %v8022_v49  ;;  %v6627_v40 = vpop.permute.xlu2 %6626  ;;  %v8210_v49 = vld [vmem:[#allocation8 + $0x34] sm:$0xf0] }
0x109f   : > { %7070 = vmatpush.bf16.msra.mxu2 %v6627_v40 }
0x10a0   : > { %6933 = vmatmul.bf16.vlgmr.msra.gmra.mxu1 %v8014_v10  ;;  %v6623_v62 = vpop.permute.xlu1 %6622  ;;  %7305 = vperm.xlu1 %8568, %v14156_v25  }
0x10a1   : > { %8573 = vset.pattern.permute.xlu0 %v9324_v23 }
0x10a2   : > { %7357 = vperm.xlu0 %8573, %v14202_v45  }
0x10a3   : > { %7071 = vmatpush.bf16.msra.mxu2 %v14207_v2  ;;  %v8086_v2 = vor.u32 %v8220_v44, %v8083_v4  ;;  %v8222_v4 = vld [vmem:[#allocation8 + $0x9c] sm:$0xf] }
0x10a4   : > { %8566 = vset.pattern.permute.xlu2 %v9323_v28 }
0x10a5   : > { %7297 = vperm.xlu2 %8566, %v14166_v34   ;;  %v8097_v34 = vld [vmem:[#allocation8 + $0x98] sm:$0xf] }
0x10a6   : > { %v6573_v33 = vpop.permute.xlu0 %6572  ;;  %v6603_v3 = vpop.permute.xlu2 %6602 }
0x10a7   : > { %7041 = vmatpush.bf16.msrb.mxu1 %v6603_v3  ;;  %7072 = vmatpush.bf16.msra.mxu2 %v6623_v62  ;;  %v8206_v62 = vld [vmem:[#allocation8 + $0x1c] sm:$0xf] }
0x10a8   : > { %v6599_v7 = vpop.permute.xlu1 %6598  ;;  %6967 = vmatmul.bf16.gmra.mxu2 %v8050_v37  ;;  %8571 = vset.pattern.permute.xlu1 %v9324_v23  ;;  %v8038_v37 = vor.u32 %v8206_v62, %v8035_v61 }
0x10a9   : > { %7349 = vperm.xlu1 %8571, %v14182_v14   ;;  %v8106_v14 = vor.u32 %v8231_v29, %v8105_v46  ;;  %v8057_v46 = vld [vmem:[#allocation8 + $0x50] sm:$0xf] }
0x10aa   : > { %6914 = vmatmul.bf16.gmra.mxu0 %v8074_v55  ;;  %v8209_v55 = vld [vmem:[#allocation8 + $0x2c] sm:$0xf0] }
0x10ab   : > { %7042 = vmatpush.bf16.msrb.mxu1 %v6601_v22  ;;  %7073 = vmatpush.bf16.msra.mxu2 %v14210_v20  ;;  %v8217_v29 = vld [vmem:[#allocation8 + $0x6c] sm:$0xf0] }
0x10ad   : > { %8569 = vset.pattern.permute.xlu2 %v9324_v23 }
0x10ae   : > { %v14246_v52 = vpop.permute.xlu0 %6636  ;;  %6996 = vmatmul.bf16.gmra.mxu3 %v8054_v26  ;;  %v6611_v20 = vpop.permute.xlu2 %6610  ;;  %v8066_v26 = vor.u32 %v8218_v63, %v8065_v59  ;;  %7341 = vperm.xlu2 %8569, %v14161_v48  }
0x10af   : > { %7043 = vmatpush.bf16.msrb.mxu1 %v6599_v7 }
0x10b0   : > { %6938 = vmatmul.bf16.gmra.mxu1 %v8046_v13  ;;  %v6645_v43 = vpop.permute.xlu1 %6644  ;;  %v8214_v13 = vld [vmem:[#allocation8 + $0x5c] sm:$0xf] }
0x10b1   : > { %7353 = vperm.xlu1 %8571, %v14176_v35  }
0x10b3   : > { %7044 = vmatpush.bf16.msrb.mxu1 %v14220_v6  ;;  %v8113_v6 = vld [vmem:[#allocation8 + $0xc8] sm:$0xf] }
0x10b4   : > { %v8114_v50 = vor.u32 %v8232_v36, %v8113_v6  ;;  %v8234_v6 = vld [vmem:[#allocation8 + $0xf4] sm:$0xf0]  ;;  %v8230_v36 = vld [vmem:[#allocation8 + $0xdc] sm:$0xf] }
0x10b6   : > { %v6579_v60 = vpop.permute.xlu0 %6578  ;;  %v6639_v5 = vpop.permute.xlu2 %6638  ;;  %7345 = vperm.xlu2 %8569, %v14156_v25  }
0x10b7   : > { %7012 = vmatpush.bf16.msrb.mxu0 %v6579_v60  ;;  %v8058_v60 = vor.u32 %v8217_v29, %v8057_v46 }
0x10b8   : > { %v6613_v47 = vpop.permute.xlu1 %6612  ;;  %6972 = vmatmul.bf16.gmra.mxu2 %v8082_v58 }
0x10b9   : > { %8574 = vset.pattern.permute.xlu1 %v9323_v28 }
0x10ba   : > { %6919 = vmatmul.bf16.gmra.mxu0 %v8106_v14  ;;  %7321 = vperm.xlu1 %8574, %v14260_v51   ;;  %v8226_v14 = vld [vmem:[#allocation8 + $0xb4] sm:$0xf0] }
0x10bb   : > { %7013 = vmatpush.bf16.msrb.mxu0 %v14231_v16  ;;  %v8098_v44 = vor.u32 %v8226_v14, %v8097_v34 }
0x10be   : > { %v6563_v1 = vpop.permute.xlu0 %6562  ;;  %7001 = vmatmul.bf16.gmra.mxu3 %v8086_v2  ;;  %v6587_v53 = vpop.permute.xlu2 %6586  ;;  %8572 = vset.pattern.permute.xlu2 %v9323_v28 }
0x10bf   : > { %7014 = vmatpush.bf16.msrb.mxu0 %v14190_v12  ;;  %v8107_v12 = vld [vmem:[#allocation8 + $0xe0] sm:$0xf0]  ;;  %7313 = vperm.xlu2 %8572, %v14176_v35  }
0x10c0   : > { %6943 = vmatmul.bf16.gmra.mxu1 %v8078_v56  ;;  %v6651_v15 = vpop.permute.xlu1 %6650  ;;  %v8110_v8 = vor.u32 %v8227_v19, %v8107_v12  ;;  %v8089_v56 = vld [vmem:[#allocation8 + $0x90] sm:$0xf] }
0x10c1   : > { %7099 = vmatpush.bf16.msra.mxu3 %v6651_v15  ;;  %v8129_v15 = vld [vmem:[#allocation8 + $0xd8] sm:$0xf] }
0x10c2   : > { %7325 = vperm.xlu1 %8574, %v14196_v9   ;;  %v8130_v25 = vor.u32 %v8234_v6, %v8129_v15 }
0x10c3   : > { %7015 = vmatpush.bf16.msrb.mxu0 %v6573_v33  ;;  %v8025_v33 = vld [vmem:[#allocation8 + $0x10] sm:$0xf] }
0x10c4   : > { %v8026_v7 = vor.u32 %v8209_v55, %v8025_v33 }
0x10c5   : > { %7100 = vmatpush.bf16.msra.mxu3 %v14171_v39 }
0x10c6   : > { %v6615_v42 = vpop.permute.xlu0 %6614 }
0x10c7   : > { %7074 = vmatpush.bf16.msra.mxu2 %v6615_v42  ;;  %7317 = vperm.xlu2 %8572, %v14202_v45   ;;  %v8229_v42 = vld [vmem:[#allocation8 + $0xd4] sm:$0xf] }
0x10c8   : > { %v6589_v22 = vpop.permute.xlu1 %6588  ;;  %6977 = vmatmul.bf16.gmra.mxu2 %v8114_v50  ;;  %v8131_v50 = vld [vmem:[#allocation8 + $0xf8] sm:$0xf0]  ;;  %v8126_v28 = vor.u32 %v8229_v42, %v8123_v54 }
0x10c9   : > { %7101 = vmatpush.bf16.msra.mxu3 %v14237_v31  ;;  %v8034_v31 = vor.u32 %v8210_v49, %v8033_v32  ;;  %v8134_v41 = vor.u32 %v8230_v36, %v8131_v50 }
0x10cb   : > { %7075 = vmatpush.bf16.msra.mxu2 %v6613_v47  ;;  %v8099_v47 = vld [vmem:[#allocation8 + $0xb8] sm:$0xf0] }
0x10cc   : > { %v8102_v2 = vor.u32 %v8222_v4, %v8099_v47  ;;  %v7181_v4 = vld [vmem:[#allocation13 + $0x8] sm:$0xff] }
0x10cd   : > { %7102 = vmatpush.bf16.msra.mxu3 %v6645_v43  ;;  %v8213_v43 = vld [vmem:[#allocation8 + $0x54] sm:$0xf] }
0x10ce   : > { %v6591_v16 = vpop.permute.xlu0 %6590  ;;  %7006 = vmatmul.bf16.gmra.mxu3 %v8118_v30  ;;  %v8062_v58 = vor.u32 %v8213_v43, %v8059_v24 }
0x10cf   : > { %7045 = vmatpush.bf16.msrb.mxu1 %v6591_v16  ;;  %7076 = vmatpush.bf16.msra.mxu2 %v6611_v20  ;;  %v8225_v20 = vld [vmem:[#allocation8 + $0xac] sm:$0xf0] }
0x10d0   : > { %6948 = vmatmul.bf16.gmra.mxu1 %v8110_v8  ;;  %v6567_v39 = vpop.permute.xlu1 %6566  ;;  %v8090_v48 = vor.u32 %v8225_v20, %v8089_v56  ;;  %8575 = vset.pattern.permute.xlu2 %v9324_v23 }
0x10d1   : > { %7016 = vmatpush.bf16.msrb.mxu0 %v6567_v39  ;;  %7103 = vmatpush.bf16.msra.mxu3 %v6639_v5  ;;  %v8121_v5 = vld [vmem:[#allocation8 + $0xd0] sm:$0xf] }
0x10d2   : > { %7361 = vperm.xlu2 %8575, %v14260_v51  }
0x10d3   : > { %7046 = vmatpush.bf16.msrb.mxu1 %v6589_v22  ;;  %v8233_v22 = vld [vmem:[#allocation8 + $0xec] sm:$0xf0] }
0x10d4   : > { %v8122_v35 = vor.u32 %v8233_v22, %v8121_v5 }
0x10d5   : > { %7017 = vmatpush.bf16.msrb.mxu0 %v14227_v27  ;;  %7104 = vmatpush.bf16.msra.mxu3 %v14246_v52  ;;  %v6633_v27 = vpop.permute.xlu2 %6632  ;;  %v8067_v52 = vld [vmem:[#allocation8 + $0x78] sm:$0xf0] }
0x10d6   : > { %v6609_v10 = vpop.permute.xlu0 %6608  ;;  %v8070_v17 = vor.u32 %v8214_v13, %v8067_v52 }
0x10d7   : > { %7047 = vmatpush.bf16.msrb.mxu1 %v6587_v53  ;;  %7077 = vmatpush.bf16.msra.mxu2 %v6609_v10 }
0x10d8   : > { %v6635_v40 = vpop.permute.xlu1 %6634 }
0x10d9   : > { %7018 = vmatpush.bf16.msrb.mxu0 %v6563_v1  ;;  %7105 = vmatpush.bf16.msra.mxu3 %v6635_v40  ;;  %v8094_v1 = vor.u32 %v8221_v0, %v8091_v11 }
0x10da   : > { %7078 = vmatmul.bf16.vlgmr.msra.gmra.mxu2 %v8034_v31  ;;  %7365 = vperm.xlu2 %8575, %v14196_v9  }
0x10dd   : > { %7106 = vmatpush.bf16.msra.mxu3 %v6633_v27 }
0x10de   : > { %v6585_v3 = vpop.permute.xlu0 %6584 }
0x10df   : > { %7048 = vmatpush.bf16.msrb.mxu1 %v6585_v3 }
0x10e0   : > { %v6561_v38 = vpop.permute.xlu1 %6560  ;;  %7107 = vmatmul.bf16.vlgmr.msra.gmra.mxu3 %v8038_v37 }
0x10e1   : > { %7019 = vmatpush.bf16.msrb.mxu0 %v6561_v38 }
0x10e2   : > { %7049 = vmatmul.bf16.vlgmr.msrb.gmra.mxu1 %v8030_v57 }
0x10e4   : > { %7020 = vmatmul.bf16.vlgmr.msrb.gmra.mxu0 %v8026_v7 }
0x10e5   : > { %8135 = vmatpush.msk.msra.mxu0 %vm15091_vm15, %v7182_v18 }
0x10e6   : > { %v6709_v15 = vpop.permute.xlu0 %6708 }
0x10e7   : > { %7225 = vmatpush.msra.mxu0 %v7181_v4 }
0x10ea   : > { %7083 = vmatmul.bf16.gmra.mxu2 %v8066_v26  ;;  %v6699_v26 = vpop.permute.xlu1 %6698 }
0x10f0   : > { %7112 = vmatmul.bf16.gmra.mxu3 %v8070_v17 }
0x10f2   : > { %7054 = vmatmul.bf16.gmra.mxu1 %v8062_v58  ;;  %v6704_v58 = vpop.permute.xlu2 %6703 }
0x10f4   : > { %7025 = vmatmul.bf16.gmra.mxu0 %v8058_v60 }
0x10fa   : > { %7088 = vmatmul.bf16.gmra.mxu2 %v8098_v44 }
0x1100   : > { %7117 = vmatmul.bf16.gmra.mxu3 %v8102_v2  ;;  %v7180_v2 = vld [vmem:[#allocation13] sm:$0xff] }
0x1101   : > { %7226 = vmatpush.msra.mxu0 %v7180_v2 }
0x1102   : > { %7059 = vmatmul.bf16.gmra.mxu1 %v8094_v1 }
0x1104   : > { %7030 = vmatmul.bf16.gmra.mxu0 %v8090_v48 }
0x1107   : > { %v6905_v19 = vpop.f32.mrf.mxu0 }
0x1108   : > { %v6906_v52 = vadd.f32 %v6905_v19, %v6699_v26 }
0x110a   : > { %7093 = vmatmul.bf16.gmra.mxu2 %v8130_v25 }
0x110f   : > { %v6907_v12 = vpop.f32.mrf.mxu0 }
0x1110   : > { %7122 = vmatmul.bf16.gmra.mxu3 %v8134_v41  ;;  %v6908_v34 = vadd.f32 %v6907_v12, %v6704_v58  ;;  %v6714_v12 = vpop.permute.xlu1 %6713 }
0x1112   : > { %7064 = vmatmul.bf16.gmra.mxu1 %v8126_v28 }
0x1114   : > { %7035 = vmatmul.bf16.gmra.mxu0 %v8122_v35 }
0x1117   : > { %v6910_v53 = vpop.f32.mrf.mxu0 }
0x1118   : > { %v6911_v25 = vadd.f32 %v6910_v53, %v6709_v15  ;;  %v6724_v15 = vpop.permute.xlu1 %6723 }
0x111b   : > { %v6963_v45 = vpop.f32.mrf.mxu2 }
0x111d   : > { %v6934_v30 = vpop.f32.mrf.mxu1 }
0x111e   : > { %v6935_v17 = vadd.f32 %v6934_v30, %v6906_v52 }
0x111f   : > { %v6912_v23 = vpop.f32.mrf.mxu0 }
0x1120   : > { %v6964_v29 = vadd.f32 %v6963_v45, %v6935_v17 }
0x1121   : > { %v6992_v8 = vpop.f32.mrf.mxu3 }
0x1122   : > { %v6993_v14 = vadd.f32 %v6992_v8, %v6964_v29  ;;  %v6913_v8 = vadd.f32 %v6912_v23, %v6714_v12 }
0x1123   : > { %v6965_v16 = vpop.f32.mrf.mxu2 }
0x1125   : > { %v6936_v39 = vpop.f32.mrf.mxu1 }
0x1126   : > { %v6937_v47 = vadd.f32 %v6936_v39, %v6908_v34 }
0x1127   : > { %v14282_v9 = vpop.f32.mrf.mxu0 }
0x1128   : > { %v6966_v1 = vadd.f32 %v6965_v16, %v6937_v47 }
0x1129   : > { %v6994_v32 = vpop.f32.mrf.mxu3 }
0x112a   : > { %v6995_v36 = vadd.f32 %v6994_v32, %v6966_v1 }
0x112b   : > { %v6968_v49 = vpop.f32.mrf.mxu2 }
0x112d   : > { %v6939_v10 = vpop.f32.mrf.mxu1 }
0x112e   : > { %v6940_v54 = vadd.f32 %v6939_v10, %v6911_v25 }
0x112f   : > { %v14293_v33 = vpop.f32.mrf.mxu0 }
0x1130   : > { %v6969_v19 = vadd.f32 %v6968_v49, %v6940_v54 }
0x1131   : > { %v6997_v31 = vpop.f32.mrf.mxu3 }
0x1132   : > { %v6998_v16 = vadd.f32 %v6997_v31, %v6969_v19  ;;  %v6719_v31 = vpop.permute.xlu0 %6718 }
0x1133   : > { %v14276_v40 = vpop.f32.mrf.mxu2 }
0x1135   : > { %v14278_v62 = vpop.f32.mrf.mxu1 }
0x1136   : > { %v6942_v53 = vadd.f32 %v14278_v62, %v6913_v8 }
0x1137   : > { %v14303_v7 = vpop.f32.mrf.mxu0 }
0x1139   : > { %v14280_v61 = vpop.f32.mrf.mxu3 }
0x113b   : > { %v14285_v21 = vpop.f32.mrf.mxu2 }
0x113d   : > { %v14287_v51 = vpop.f32.mrf.mxu1 }
0x113f   : > { %v14311_v43 = vpop.f32.mrf.mxu0 }
0x1141   : > { %v14289_v27 = vpop.f32.mrf.mxu3 }
0x1143   : > { %v14291_v37 = vpop.f32.mrf.mxu2 }
0x1145   : > { %v14295_v55 = vpop.f32.mrf.mxu1 }
0x1149   : > { %v14297_v3 = vpop.f32.mrf.mxu3 }
0x114b   : > { %v14299_v57 = vpop.f32.mrf.mxu2 }
0x114d   : > { %v14301_v38 = vpop.f32.mrf.mxu1 }
0x1151   : > { %v14305_v59 = vpop.f32.mrf.mxu3 }
0x1153   : > { %v14307_v63 = vpop.f32.mrf.mxu2 }
0x1155   : > { %v14309_v13 = vpop.f32.mrf.mxu1 }
0x1159   : > { %v14313_v24 = vpop.f32.mrf.mxu3 }
0x115d   : > { %v7079_v46 = vpop.f32.mrf.mxu2 }
0x115f   : > { %v7050_v60 = vpop.f32.mrf.mxu1 }
0x1161   : > { %v7021_v44 = vpop.f32.mrf.mxu0 }
0x1162   : > { %v7022_v0 = vadd.f32 %v7021_v44, %v6993_v14  ;;  %v6916_v44 = vadd.f32 %v14282_v9, %v6719_v31 }
0x1163   : > { %v7108_v11 = vpop.f32.mrf.mxu3 }
0x1164   : > { %v7051_v56 = vadd.f32 %v7050_v60, %v7022_v0  ;;  %v6971_v60 = vadd.f32 %v14276_v40, %v6942_v53 }
0x1165   : > { %v7081_v20 = vpop.f32.mrf.mxu2 }
0x1166   : > { %v7080_v48 = vadd.f32 %v7079_v46, %v7051_v56  ;;  %v14316_v46 = vpop.permute.xlu2 %7153  ;;  %v7000_v62 = vadd.f32 %v14280_v61, %v6971_v60 }
0x1167   : > { %v7052_v6 = vpop.f32.mrf.mxu1 }
0x1168   : > { %v7109_v50 = vadd.f32 %v7108_v11, %v7080_v48  ;;  %v6945_v11 = vadd.f32 %v14287_v51, %v6916_v44 }
0x1169   : > { %v7023_v42 = vpop.f32.mrf.mxu0 }
0x116a   : > { %v7128_v41 = vmax.f32 %v7109_v50, 1e-06  ;;  %v7024_v5 = vadd.f32 %v7023_v42, %v6995_v36  ;;  %v6974_v9 = vadd.f32 %v14285_v21, %v6945_v11  ;;  %v6918_v42 = vadd.f32 %v14293_v33, %v6724_v15 }
0x116b   : > { %v7110_v22 = vpop.f32.mrf.mxu3 }
0x116c   : > { %8867 = vlog2.f32 %v7128_v41  ;;  %v7053_v28 = vadd.f32 %v7052_v6, %v7024_v5  ;;  %v7003_v51 = vadd.f32 %v14289_v27, %v6974_v9 }
0x116d   : > { %v7084_v35 = vpop.f32.mrf.mxu2 }
0x116e   : > { %v7082_v45 = vadd.f32 %v7081_v20, %v7053_v28  ;;  %v6729_v41 = vpop.permute.xlu2 %6728  ;;  %v6947_v28 = vadd.f32 %v14295_v55, %v6918_v42 }
0x116f   : > { %v7055_v30 = vpop.f32.mrf.mxu1  ;;  %v6921_v12 = vadd.f32 %v14303_v7, %v6729_v41 }
0x1170   : > { %v7111_v39 = vadd.f32 %v7110_v22, %v7082_v45  ;;  %v6976_v27 = vadd.f32 %v14291_v37, %v6947_v28 }
0x1171   : > { %v7026_v18 = vpop.f32.mrf.mxu0  ;;  %v6950_v55 = vadd.f32 %v14301_v38, %v6921_v12  ;;  %v6734_v38 = vpop.permute.xlu0 %6733 }
0x1172   : > { %v8868_v26 = vpop.eup %8867  ;;  %v7129_v32 = vmax.f32 %v7111_v39, 1e-06  ;;  %v7027_v52 = vadd.f32 %v7026_v18, %v6998_v16 }
0x1173   : > { %v7137_v10 = vmul.f32 0.6931472, %v8868_v26  ;;  %v7113_v17 = vpop.f32.mrf.mxu3  ;;  %v7005_v26 = vadd.f32 %v14297_v3, %v6976_v27 }
0x1174   : > { %8869 = vlog2.f32 %v7129_v32  ;;  %v7056_v29 = vadd.f32 %v7055_v30, %v7027_v52 }
0x1175   : > { %v7156_v49 = vmul.f32 %v14316_v46, %v7137_v10  ;;  %v7086_v58 = vpop.f32.mrf.mxu2 }
0x1176   : > { %v7085_v23 = vadd.f32 %v7084_v35, %v7056_v29 }
0x1177   : > { %v7164_v34 = vmul.f32 1.442695, %v7156_v49  ;;  %v7057_v14 = vpop.f32.mrf.mxu1 }
0x1178   : > { %v7114_v4 = vadd.f32 %v7113_v17, %v7085_v23 }
0x1179   : > { %8871 = vpow2.f32 %v7164_v34  ;;  %v7028_v47 = vpop.f32.mrf.mxu0  ;;  %v6923_v34 = vadd.f32 %v14311_v43, %v6734_v38 }
0x117a   : > { %v8870_v0 = vpop.eup %8869  ;;  %v7130_v2 = vmax.f32 %v7114_v4, 1e-06  ;;  %v7029_v56 = vadd.f32 %v7028_v47, %v7000_v62 }
0x117b   : > { %v7139_v20 = vmul.f32 0.6931472, %v8870_v0  ;;  %v7115_v1 = vpop.f32.mrf.mxu3  ;;  %v6952_v0 = vadd.f32 %v14309_v13, %v6923_v34 }
0x117c   : > { %8873 = vlog2.f32 %v7130_v2  ;;  %v7058_v40 = vadd.f32 %v7057_v14, %v7029_v56 }
0x117d   : > { %v7157_v48 = vmul.f32 %v14316_v46, %v7139_v20  ;;  %v7089_v50 = vpop.f32.mrf.mxu2 }
0x117e   : > { %v7087_v6 = vadd.f32 %v7086_v58, %v7058_v40  ;;  %v6979_v58 = vadd.f32 %v14299_v57, %v6950_v55  ;;  %v6981_v40 = vadd.f32 %v14307_v63, %v6952_v0  ;;  %v7536_v0 = vld [vmem:[#allocation14] sm:$0xff] }
0x117f   : > { %v8872_v61 = vpop.eup %8871  ;;  %v7166_v25 = vmul.f32 1.442695, %v7157_v48  ;;  %v7060_v36 = vpop.f32.mrf.mxu1 }
0x1180   : > { %v7116_v54 = vadd.f32 %v7115_v1, %v7087_v6  ;;  %8136 = vmatmul.msk.f32.vlgmr.msra.gmra.mxu0 %vm7183_vm5, %v8872_v61  ;;  %v7008_v44 = vadd.f32 %v14305_v59, %v6979_v58  ;;  %v7010_v9 = vadd.f32 %v14313_v24, %v6981_v40 }
0x1181   : > { %8875 = vpow2.f32 %v7166_v25  ;;  %v7031_v5 = vpop.f32.mrf.mxu0 }
0x1182   : > { %v8874_v22 = vpop.eup %8873  ;;  %v7131_v35 = vmax.f32 %v7116_v54, 1e-06  ;;  %v7032_v21 = vadd.f32 %v7031_v5, %v7003_v51 }
0x1183   : > { %v7141_v19 = vmul.f32 0.6931472, %v8874_v22  ;;  %v7118_v45 = vpop.f32.mrf.mxu3 }
0x1184   : > { %8877 = vlog2.f32 %v7131_v35  ;;  %v7061_v30 = vadd.f32 %v7060_v36, %v7032_v21 }
0x1185   : > { %v7158_v33 = vmul.f32 %v14316_v46, %v7141_v19  ;;  %v7091_v7 = vpop.f32.mrf.mxu2 }
0x1186   : > { %v7090_v8 = vadd.f32 %v7089_v50, %v7061_v30 }
0x1187   : > { %v8876_v16 = vpop.eup %8875  ;;  %v7168_v39 = vmul.f32 1.442695, %v7158_v33  ;;  %v7062_v18 = vpop.f32.mrf.mxu1 }
0x1188   : > { %v7119_v53 = vadd.f32 %v7118_v45, %v7090_v8  ;;  %8137 = vmatmul.msk.f32.gmra.mxu0 %vm7183_vm5, %v8876_v16 }
0x1189   : > { %8879 = vpow2.f32 %v7168_v39  ;;  %v7033_v32 = vpop.f32.mrf.mxu0 }
0x118a   : > { %v8878_v52 = vpop.eup %8877  ;;  %v7132_v10 = vmax.f32 %v7119_v53, 1e-06  ;;  %v7034_v17 = vadd.f32 %v7033_v32, %v7005_v26  ;;  %v7537_v26 = vld [vmem:[#allocation14 + $0x8] sm:$0x7]  ;;  %v14353_v32 = vpop.permute.xlu1 %7269 }
0x118b   : > { %v7143_v29 = vmul.f32 0.6931472, %v8878_v52  ;;  %v7120_v49 = vpop.f32.mrf.mxu3  ;;  %8152 = vmatpush.msk.msra.mxu1 %vm15092_vm14, %v7537_v26 }
0x118c   : > { %8881 = vlog2.f32 %v7132_v10  ;;  %v7063_v37 = vadd.f32 %v7062_v18, %v7034_v17 }
0x118d   : > { %v7159_v60 = vmul.f32 %v14316_v46, %v7143_v29  ;;  %v7094_v56 = vpop.f32.mrf.mxu2  ;;  %7581 = vmatpush.msra.mxu1 %v7536_v0 }
0x118e   : > { %v7092_v3 = vadd.f32 %v7091_v7, %v7063_v37  ;;  %v7298_v37 = vpop.permute.xlu2 %7297 }
0x118f   : > { %v8880_v23 = vpop.eup %8879  ;;  %v7170_v31 = vmul.f32 1.442695, %v7159_v60  ;;  %v7065_v4 = vpop.f32.mrf.mxu1 }
0x1190   : > { %v7121_v14 = vadd.f32 %v7120_v49, %v7092_v3  ;;  %8138 = vmatmul.msk.f32.gmra.mxu0 %vm7183_vm5, %v8880_v23  ;;  %v7338_v3 = vpop.permute.xlu0 %7337 }
0x1191   : > { %8883 = vpow2.f32 %v7170_v31  ;;  %v7036_v62 = vpop.f32.mrf.mxu0 }
0x1192   : > { %v8882_v47 = vpop.eup %8881  ;;  %v7133_v57 = vmax.f32 %v7121_v14, 1e-06  ;;  %v7037_v11 = vadd.f32 %v7036_v62, %v7008_v44 }
0x1193   : > { %v7145_v2 = vmul.f32 0.6931472, %v8882_v47  ;;  %v7123_v43 = vpop.f32.mrf.mxu3  ;;  %v7302_v47 = vpop.permute.xlu1 %7301 }
0x1194   : > { %8885 = vlog2.f32 %v7133_v57  ;;  %v7066_v20 = vadd.f32 %v7065_v4, %v7037_v11 }
0x1195   : > { %v7160_v1 = vmul.f32 %v14316_v46, %v7145_v2  ;;  %v7096_v63 = vpop.f32.mrf.mxu2 }
0x1196   : > { %v7095_v48 = vadd.f32 %v7094_v56, %v7066_v20  ;;  %v7342_v2 = vpop.permute.xlu2 %7341 }
0x1197   : > { %v8884_v15 = vpop.eup %8883  ;;  %v7172_v59 = vmul.f32 1.442695, %v7160_v1  ;;  %v7067_v42 = vpop.f32.mrf.mxu1 }
0x1198   : > { %v7124_v6 = vadd.f32 %v7123_v43, %v7095_v48  ;;  %8139 = vmatmul.msk.f32.gmra.mxu0 %vm7183_vm5, %v8884_v15 }
0x1199   : > { %8887 = vpow2.f32 %v7172_v59  ;;  %v7038_v13 = vpop.f32.mrf.mxu0 }
0x119a   : > { %v8886_v61 = vpop.eup %8885  ;;  %v7134_v25 = vmax.f32 %v7124_v6, 1e-06  ;;  %v7039_v36 = vadd.f32 %v7038_v13, %v7010_v9 }
0x119b   : > { %v7147_v50 = vmul.f32 0.6931472, %v8886_v61  ;;  %v7125_v28 = vpop.f32.mrf.mxu3  ;;  %v7306_v13 = vpop.permute.xlu1 %7305 }
0x119c   : > { %8889 = vlog2.f32 %v7134_v25  ;;  %v7068_v51 = vadd.f32 %v7067_v42, %v7039_v36 }
0x119d   : > { %v7161_v54 = vmul.f32 %v14316_v46, %v7147_v50 }
0x119e   : > { %v7097_v41 = vadd.f32 %v7096_v63, %v7068_v51  ;;  %v7346_v36 = vpop.permute.xlu2 %7345 }
0x119f   : > { %v8888_v5 = vpop.eup %8887  ;;  %v7174_v22 = vmul.f32 1.442695, %v7161_v54 }
0x11a0   : > { %v7126_v24 = vadd.f32 %v7125_v28, %v7097_v41  ;;  %8140 = vmatmul.msk.f32.gmra.mxu0 %vm7183_vm5, %v8888_v5 }
0x11a1   : > { %8891 = vpow2.f32 %v7174_v22 }
0x11a2   : > { %v8890_v35 = vpop.eup %8889  ;;  %v7135_v21 = vmax.f32 %v7126_v24, 1e-06 }
0x11a3   : > { %v7149_v19 = vmul.f32 0.6931472, %v8890_v35  ;;  %v7310_v35 = vpop.permute.xlu0 %7309 }
0x11a4   : > { %8893 = vlog2.f32 %v7135_v21 }
0x11a5   : > { %v7162_v45 = vmul.f32 %v14316_v46, %v7149_v19 }
0x11a7   : > { %v8892_v12 = vpop.eup %8891  ;;  %v7176_v30 = vmul.f32 1.442695, %v7162_v45 }
0x11a8   : > { %8141 = vmatmul.msk.f32.gmra.mxu0 %vm7183_vm5, %v8892_v12  ;;  %v7350_v12 = vpop.permute.xlu1 %7349 }
0x11a9   : > { %8895 = vpow2.f32 %v7176_v30 }
0x11aa   : > { %v8894_v33 = vpop.eup %8893 }
0x11ab   : > { %v7151_v27 = vmul.f32 0.6931472, %v8894_v33 }
0x11ad   : > { %v7163_v8 = vmul.f32 %v14316_v46, %v7151_v27 }
0x11af   : > { %v8896_v16 = vpop.eup %8895  ;;  %v7178_v39 = vmul.f32 1.442695, %v7163_v8 }
0x11b0   : > { %8142 = vmatmul.msk.f32.gmra.mxu0 %vm7183_vm5, %v8896_v16 }
0x11b1   : > { %8897 = vpow2.f32 %v7178_v39 }
0x11b7   : > { %v8898_v18 = vpop.eup %8897 }
0x11b8   : > { %8143 = vmatmul.msk.f32.gmra.mxu0 %vm7183_vm5, %v8898_v18 }
0x11fd   : > { %v7228_v55 = vpop.f32.mrf.mxu0 }
0x11fe   : > { %8899 = vlog2.f32 %v7228_v55 }
0x1204   : > { %v8900_v53 = vpop.eup %8899 }
0x1205   : > { %v7253_v7 = vmul.f32 0.6931472, %v8900_v53  ;;  %v7231_v52 = vpop.f32.mrf.mxu0 }
0x1206   : > { %8901 = vlog2.f32 %v7231_v52 }
0x1207   : > { %v7272_v46 = vmul.f32 %v14353_v32, %v7253_v7 }
0x1209   : > { %v7280_v10 = vmul.f32 1.442695, %v7272_v46 }
0x120b   : > { %8903 = vpow2.f32 %v7280_v10 }
0x120c   : > { %v8902_v17 = vpop.eup %8901 }
0x120d   : > { %v7255_v29 = vmul.f32 0.6931472, %v8902_v17  ;;  %v7234_v49 = vpop.f32.mrf.mxu0 }
0x120e   : > { %8905 = vlog2.f32 %v7234_v49 }
0x120f   : > { %v7273_v58 = vmul.f32 %v14353_v32, %v7255_v29 }
0x1211   : > { %v8904_v60 = vpop.eup %8903  ;;  %v7282_v23 = vmul.f32 1.442695, %v7273_v58 }
0x1212   : > { %v7328_v38 = vmul.f32 %v8904_v60, %v7298_v37  ;;  %v7314_v37 = vpop.permute.xlu2 %7313 }
0x1213   : > { %8907 = vpow2.f32 %v7282_v23 }
0x1214   : > { %v8906_v31 = vpop.eup %8905  ;;  %v14357_v34 = vadd.f32 %v7338_v3, %v7328_v38 }
0x1215   : > { %v7257_v14 = vmul.f32 0.6931472, %v8906_v31  ;;  %v7237_v44 = vpop.f32.mrf.mxu0 }
0x1216   : > { %v8144_v62 = vmul.f32 -1.442695, %v14357_v34  ;;  %8909 = vlog2.f32 %v7237_v44 }
0x1217   : > { %v7274_v4 = vmul.f32 %v14353_v32, %v7257_v14 }
0x1218   : > { %8911 = vpow2.f32 %v8144_v62 }
0x1219   : > { %v8908_v57 = vpop.eup %8907  ;;  %v7284_v11 = vmul.f32 1.442695, %v7274_v4 }
0x121a   : > { %v7329_v56 = vmul.f32 %v8908_v57, %v7302_v47  ;;  %v7354_v47 = vpop.permute.xlu1 %7353 }
0x121b   : > { %8913 = vpow2.f32 %v7284_v11 }
0x121c   : > { %v8910_v20 = vpop.eup %8909  ;;  %v14361_v1 = vadd.f32 %v7342_v2, %v7329_v56 }
0x121d   : > { %v7259_v43 = vmul.f32 0.6931472, %v8910_v20  ;;  %v7240_v40 = vpop.f32.mrf.mxu0 }
0x121e   : > { %v8912_v48 = vpop.eup %8911  ;;  %v8145_v15 = vmul.f32 -1.442695, %v14361_v1  ;;  %8915 = vlog2.f32 %v7240_v40 }
0x121f   : > { %v7400_v59 = vadd.f32 1.0, %v8912_v48  ;;  %v7275_v9 = vmul.f32 %v14353_v32, %v7259_v43 }
0x1220   : > { %8917 = vpow2.f32 %v8145_v15 }
0x1221   : > { %v8914_v6 = vpop.eup %8913  ;;  %8919 = vrcp.f32 %v7400_v59  ;;  %v7286_v61 = vmul.f32 1.442695, %v7275_v9  ;;  %v7419_v30 = vand.u32 2147483648, %v7400_v59  ;;  %v7417_v16 = vand.u32 2147483647, %v7400_v59 }
0x1222   : > { %v7330_v25 = vmul.f32 %v8914_v6, %v7306_v13  ;;  %vm7413_vm2 = vweird.f32 %v7400_v59 }
0x1223   : > { %8921 = vpow2.f32 %v7286_v61  ;;  %v7420_v52 = vor.u32 1.1754944e-38, %v7419_v30  ;;  %vm7418_vm8 = vcmp.eq.f32.partialorder %v7417_v16, 8.507059e+37  ;;  %v7322_v30 = vpop.permute.xlu1 %7321 }
0x1224   : > { %v8916_v50 = vpop.eup %8915  ;;  %v14365_v42 = vadd.f32 %v7346_v36, %v7330_v25  ;;  %v7318_v36 = vpop.permute.xlu2 %7317 }
0x1225   : > { %v7261_v51 = vmul.f32 0.6931472, %v8916_v50  ;;  %v7243_v54 = vpop.f32.mrf.mxu0  ;;  %v7358_v50 = vpop.permute.xlu0 %7357 }
0x1226   : > { %v8918_v63 = vpop.eup %8917  ;;  %v8146_v41 = vmul.f32 -1.442695, %v14365_v42  ;;  %8923 = vlog2.f32 %v7243_v54 }
0x1227   : > { %v8920_v5 = vpop.eup %8919  ;;  %v14368_v22 = vadd.f32 1.0, %v8918_v63  ;;  %v7276_v28 = vmul.f32 %v14353_v32, %v7261_v51 }
0x1228   : > { %v7409_v24 = vmul.f32 %v8920_v5, %v7400_v59  ;;  %8925 = vpow2.f32 %v8146_v41  ;;  %vm7414_vm10 = vweird.f32 %v8920_v5 }
0x1229   : > { %8927 = vrcp.f32 %v14368_v22  ;;  %v8922_v21 = vpop.eup %8921  ;;  %v7288_v45 = vmul.f32 1.442695, %v7276_v28  ;;  %vm7415_vm1 = vmor %vm7413_vm2, %vm7414_vm10  ;;  %v7434_v31 = vand.u32 2147483648, %v14368_v22  ;;  %v7432_v4 = vand.u32 2147483647, %v14368_v22 }
0x122a   : > { %v7410_v19 = vsub.f32 1.0, %v7409_v24  ;;  %v7331_v33 = vmul.f32 %v8922_v21, %v7310_v35  ;;  %vm7428_vm13 = vweird.f32 %v14368_v22 }
0x122b   : > { %8929 = vpow2.f32 %v7288_v45  ;;  %v7435_v56 = vor.u32 1.1754944e-38, %v7434_v31  ;;  %vm7433_vm0 = vcmp.eq.f32.partialorder %v7432_v4, 8.507059e+37 }
0x122c   : > { %v8924_v27 = vpop.eup %8923  ;;  %v7411_v8 = vmul.f32 %v8920_v5, %v7410_v19  ;;  %v14372_v18 = vadd.f32 %v7350_v12, %v7331_v33 }
0x122d   : > { %v7263_v39 = vmul.f32 0.6931472, %v8924_v27  ;;  %v7246_v26 = vpop.f32.mrf.mxu0 }
0x122e   : > { %v8926_v55 = vpop.eup %8925  ;;  %v7412_v53 = vadd.f32 %v8920_v5, %v7411_v8  ;;  %8931 = vlog2.f32 %v7246_v26  ;;  %v8147_v17 = vmul.f32 -1.442695, %v14372_v18  ;;  %v7362_v26 = vpop.permute.xlu2 %7361 }
0x122f   : > { %v8928_v7 = vpop.eup %8927  ;;  %v14374_v46 = vadd.f32 1.0, %v8926_v55  ;;  %v7277_v10 = vmul.f32 %v14353_v32, %v7263_v39 }
0x1230   : > { %v7416_v29 = vsel %vm7415_vm1, %v8920_v5, %v7412_v53  ;;  %v7424_v49 = vmul.f32 %v8928_v7, %v14368_v22  ;;  %vm7429_vm7 = vweird.f32 %v8928_v7 }
0x1231   : > { %v7421_v58 = vsel %vm7418_vm8, %v7420_v52, %v7416_v29  ;;  %8933 = vrcp.f32 %v14374_v46  ;;  %v8930_v60 = vpop.eup %8929  ;;  %v7290_v38 = vmul.f32 1.442695, %v7277_v10  ;;  %vm7430_vm4 = vmor %vm7428_vm13, %vm7429_vm7  ;;  %v7449_v51 = vand.u32 2147483648, %v14374_v46 }
0x1232   : > { %v7528_v3 = vmul.f32 %v7421_v58, %v14357_v34  ;;  %v7425_v23 = vsub.f32 1.0, %v7424_v49  ;;  %8935 = vpow2.f32 %v8147_v17  ;;  %v7332_v14 = vmul.f32 %v8930_v60, %v7314_v37 }
0x1233   : > { %8937 = vpow2.f32 %v7290_v38  ;;  %v7447_v5 = vand.u32 2147483647, %v14374_v46  ;;  %vm7443_vm3 = vweird.f32 %v14374_v46  ;;  %v7450_v35 = vor.u32 1.1754944e-38, %v7449_v51 }
0x1234   : > { %v8932_v44 = vpop.eup %8931  ;;  %v7426_v62 = vmul.f32 %v8928_v7, %v7425_v23  ;;  %8153 = vmatmul.msk.f32.vlgmr.msra.gmra.mxu1 %vm7538_vm6, %v7528_v3  ;;  %v14384_v57 = vadd.f32 %v7354_v47, %v7332_v14  ;;  %v7326_v23 = vpop.permute.xlu1 %7325 }
0x1235   : > { %v7265_v0 = vmul.f32 0.6931472, %v8932_v44  ;;  %v7249_v11 = vpop.f32.mrf.mxu0  ;;  %vm7448_vm11 = vcmp.eq.f32.partialorder %v7447_v5, 8.507059e+37 }
0x1236   : > { %v7427_v34 = vadd.f32 %v8928_v7, %v7426_v62  ;;  %8939 = vlog2.f32 %v7249_v11  ;;  %v8148_v43 = vmul.f32 -1.442695, %v14384_v57  ;;  %v7366_v47 = vpop.permute.xlu2 %7365 }
0x1237   : > { %v8934_v2 = vpop.eup %8933  ;;  %v7278_v20 = vmul.f32 %v14353_v32, %v7265_v0 }
0x1238   : > { %v7431_v40 = vsel %vm7430_vm4, %v8928_v7, %v7427_v34  ;;  %v7439_v48 = vmul.f32 %v8934_v2, %v14374_v46  ;;  %v8936_v15 = vpop.eup %8935  ;;  %8941 = vpow2.f32 %v8148_v43  ;;  %vm7444_vm9 = vweird.f32 %v8934_v2 }
0x1239   : > { %v7436_v59 = vsel %vm7433_vm0, %v7435_v56, %v7431_v40  ;;  %v7292_v9 = vmul.f32 1.442695, %v7278_v20  ;;  %v8938_v6 = vpop.eup %8937  ;;  %v7403_v25 = vadd.f32 1.0, %v8936_v15  ;;  %vm7445_vm12 = vmor %vm7443_vm3, %vm7444_vm9 }
0x123a   : > { %v7529_v13 = vmul.f32 %v7436_v59, %v14361_v1  ;;  %v7440_v61 = vsub.f32 1.0, %v7439_v48  ;;  %v7333_v54 = vmul.f32 %v8938_v6, %v7318_v36 }
0x123b   : > { %8943 = vpow2.f32 %v7292_v9  ;;  %v7462_v7 = vand.u32 2147483647, %v7403_v25  ;;  %v7464_v52 = vand.u32 2147483648, %v7403_v25  ;;  %vm7458_vm5 = vweird.f32 %v7403_v25 }
0x123c   : > { %v8940_v63 = vpop.eup %8939  ;;  %v7441_v41 = vmul.f32 %v8934_v2, %v7440_v61  ;;  %8945 = vrcp.f32 %v7403_v25  ;;  %8154 = vmatmul.msk.f32.gmra.mxu1 %vm7538_vm6, %v7529_v13  ;;  %v14394_v28 = vadd.f32 %v7358_v50, %v7333_v54 }
0x123d   : > { %v7267_v22 = vmul.f32 0.6931472, %v8940_v63  ;;  %vm7463_vm10 = vcmp.eq.f32.partialorder %v7462_v7, 8.507059e+37  ;;  %v7465_v3 = vor.u32 1.1754944e-38, %v7464_v52 }
0x123e   : > { %v7442_v1 = vadd.f32 %v8934_v2, %v7441_v41  ;;  %v8942_v24 = vpop.eup %8941  ;;  %v8149_v19 = vmul.f32 -1.442695, %v14394_v28 }
0x123f   : > { %v7279_v21 = vmul.f32 %v14353_v32, %v7267_v22  ;;  %v7404_v12 = vadd.f32 1.0, %v8942_v24 }
0x1240   : > { %v7446_v45 = vsel %vm7445_vm12, %v8934_v2, %v7442_v1  ;;  %8947 = vpow2.f32 %v8149_v19 }
0x1241   : > { %v8944_v33 = vpop.eup %8943  ;;  %v7451_v27 = vsel %vm7448_vm11, %v7450_v35, %v7446_v45  ;;  %v7294_v8 = vmul.f32 1.442695, %v7279_v21  ;;  %8949 = vrcp.f32 %v7404_v12  ;;  %v7477_v62 = vand.u32 2147483647, %v7404_v12 }
0x1242   : > { %v8946_v16 = vpop.eup %8945  ;;  %v7530_v39 = vmul.f32 %v7451_v27, %v14365_v42  ;;  %v7334_v53 = vmul.f32 %v8944_v33, %v7322_v30  ;;  %v7479_v4 = vand.u32 2147483648, %v7404_v12  ;;  %vm7473_vm1 = vweird.f32 %v7404_v12 }
0x1243   : > { %v7454_v55 = vmul.f32 %v8946_v16, %v7403_v25  ;;  %8951 = vpow2.f32 %v7294_v8  ;;  %vm7459_vm15 = vweird.f32 %v8946_v16  ;;  %vm7478_vm7 = vcmp.eq.f32.partialorder %v7477_v62, 8.507059e+37 }
0x1244   : > { %8155 = vmatmul.msk.f32.gmra.mxu1 %vm7538_vm6, %v7530_v39  ;;  %v14401_v46 = vadd.f32 %v7362_v26, %v7334_v53  ;;  %vm7460_vm14 = vmor %vm7458_vm5, %vm7459_vm15  ;;  %v7480_v43 = vor.u32 1.1754944e-38, %v7479_v4 }
0x1245   : > { %v7455_v32 = vsub.f32 1.0, %v7454_v55 }
0x1246   : > { %v8948_v10 = vpop.eup %8947  ;;  %v8150_v37 = vmul.f32 -1.442695, %v14401_v46 }
0x1247   : > { %v7456_v17 = vmul.f32 %v8946_v16, %v7455_v32  ;;  %v8950_v29 = vpop.eup %8949  ;;  %v7405_v49 = vadd.f32 1.0, %v8948_v10 }
0x1248   : > { %v7469_v60 = vmul.f32 %v8950_v29, %v7404_v12  ;;  %vm7474_vm2 = vweird.f32 %v8950_v29 }
0x1249   : > { %v8952_v42 = vpop.eup %8951  ;;  %v7457_v58 = vadd.f32 %v8946_v16, %v7456_v17  ;;  %8953 = vrcp.f32 %v7405_v49  ;;  %vm7475_vm8 = vmor %vm7473_vm1, %vm7474_vm2  ;;  %v7494_v13 = vand.u32 2147483648, %v7405_v49  ;;  %v7492_v25 = vand.u32 2147483647, %v7405_v49 }
0x124a   : > { %v7470_v31 = vsub.f32 1.0, %v7469_v60  ;;  %8955 = vpow2.f32 %v8150_v37  ;;  %v7335_v14 = vmul.f32 %v8952_v42, %v7326_v23  ;;  %vm7488_vm4 = vweird.f32 %v7405_v49 }
0x124b   : > { %v7461_v38 = vsel %vm7460_vm14, %v8946_v16, %v7457_v58  ;;  %v7495_v51 = vor.u32 1.1754944e-38, %v7494_v13  ;;  %vm7493_vm9 = vcmp.eq.f32.partialorder %v7492_v25, 8.507059e+37  ;;  %vm7607_vm1 = vcmask 523264  }
0x124c   : > { %v7466_v44 = vsel %vm7463_vm10, %v7465_v3, %v7461_v38  ;;  %v7471_v11 = vmul.f32 %v8950_v29, %v7470_v31  ;;  %v14405_v34 = vadd.f32 %v7366_v47, %v7335_v14 }
0x124d   : > { %v7531_v0 = vmul.f32 %v7466_v44, %v14372_v18 }
0x124e   : > { %v7472_v2 = vadd.f32 %v8950_v29, %v7471_v11  ;;  %v8151_v56 = vmul.f32 -1.442695, %v14405_v34 }
0x124f   : > { %8156 = vmatmul.msk.f32.gmra.mxu1 %vm7538_vm6, %v7531_v0  ;;  %v8954_v20 = vpop.eup %8953 }
0x1250   : > { %v8956_v40 = vpop.eup %8955  ;;  %v7476_v48 = vsel %vm7475_vm8, %v8950_v29, %v7472_v2  ;;  %v7484_v15 = vmul.f32 %v8954_v20, %v7405_v49  ;;  %8957 = vpow2.f32 %v8151_v56  ;;  %vm7489_vm13 = vweird.f32 %v8954_v20 }
0x1251   : > { %v7481_v59 = vsel %vm7478_vm7, %v7480_v43, %v7476_v48  ;;  %v7406_v18 = vadd.f32 1.0, %v8956_v40  ;;  %vm7490_vm0 = vmor %vm7488_vm4, %vm7489_vm13 }
0x1252   : > { %v7532_v9 = vmul.f32 %v7481_v59, %v14384_v57  ;;  %v7485_v6 = vsub.f32 1.0, %v7484_v15 }
0x1253   : > { %8959 = vrcp.f32 %v7406_v18  ;;  %v7509_v24 = vand.u32 2147483648, %v7406_v18  ;;  %v7507_v21 = vand.u32 2147483647, %v7406_v18  ;;  %vm7503_vm12 = vweird.f32 %v7406_v18 }
0x1254   : > { %v7486_v61 = vmul.f32 %v8954_v20, %v7485_v6 }
0x1255   : > { %v7510_v30 = vor.u32 1.1754944e-38, %v7509_v24  ;;  %vm7508_vm15 = vcmp.eq.f32.partialorder %v7507_v21, 8.507059e+37 }
0x1256   : > { %v8958_v36 = vpop.eup %8957  ;;  %v7487_v50 = vadd.f32 %v8954_v20, %v7486_v61 }
0x1257   : > { %8157 = vmatmul.msk.f32.gmra.mxu1 %vm7538_vm6, %v7532_v9  ;;  %v7407_v54 = vadd.f32 1.0, %v8958_v36 }
0x1258   : > { %v7491_v63 = vsel %vm7490_vm0, %v8954_v20, %v7487_v50 }
0x1259   : > { %v8960_v41 = vpop.eup %8959  ;;  %v7496_v5 = vsel %vm7493_vm9, %v7495_v51, %v7491_v63  ;;  %8961 = vrcp.f32 %v7407_v54  ;;  %v7522_v26 = vand.u32 2147483647, %v7407_v54  ;;  %vm7518_vm14 = vweird.f32 %v7407_v54 }
0x125a   : > { %v7533_v57 = vmul.f32 %v7496_v5, %v14394_v28  ;;  %v7499_v22 = vmul.f32 %v8960_v41, %v7406_v18  ;;  %vm7504_vm3 = vweird.f32 %v8960_v41  ;;  %v7524_v28 = vand.u32 2147483648, %v7407_v54 }
0x125b   : > { %vm7505_vm11 = vmor %vm7503_vm12, %vm7504_vm3  ;;  %vm7523_vm2 = vcmp.eq.f32.partialorder %v7522_v26, 8.507059e+37 }
0x125c   : > { %v7500_v1 = vsub.f32 1.0, %v7499_v22  ;;  %v7525_v53 = vor.u32 1.1754944e-38, %v7524_v28 }
0x125e   : > { %v7501_v35 = vmul.f32 %v8960_v41, %v7500_v1 }
0x125f   : > { %8158 = vmatmul.msk.f32.gmra.mxu1 %vm7538_vm6, %v7533_v57  ;;  %v8962_v19 = vpop.eup %8961 }
0x1260   : > { %v7502_v45 = vadd.f32 %v8960_v41, %v7501_v35  ;;  %v7514_v12 = vmul.f32 %v8962_v19, %v7407_v54  ;;  %vm7519_vm5 = vweird.f32 %v8962_v19 }
0x1261   : > { %vm7520_vm10 = vmor %vm7518_vm14, %vm7519_vm5 }
0x1262   : > { %v7506_v33 = vsel %vm7505_vm11, %v8960_v41, %v7502_v45  ;;  %v7515_v27 = vsub.f32 1.0, %v7514_v12 }
0x1263   : > { %v7511_v8 = vsel %vm7508_vm15, %v7510_v30, %v7506_v33 }
0x1264   : > { %v7534_v16 = vmul.f32 %v7511_v8, %v14401_v46  ;;  %v7516_v39 = vmul.f32 %v8962_v19, %v7515_v27 }
0x1266   : > { %v7517_v55 = vadd.f32 %v8962_v19, %v7516_v39 }
0x1267   : > { %8159 = vmatmul.msk.f32.gmra.mxu1 %vm7538_vm6, %v7534_v16 }
0x1268   : > { %v7521_v32 = vsel %vm7520_vm10, %v8962_v19, %v7517_v55 }
0x1269   : > { %v7526_v7 = vsel %vm7523_vm2, %v7525_v53, %v7521_v32 }
0x126a   : > { %v7535_v52 = vmul.f32 %v7526_v7, %v14405_v34 }
0x126f   : > { %8160 = vmatmul.msk.f32.gmra.mxu1 %vm7538_vm6, %v7535_v52 }
0x12b1   : > { %v7583_v46 = vpop.f32.mrf.mxu1 }
0x12b2   : > { %7608 = vst.msk [vmem:[%s708_s28] sm:$0xff] %vm7607_vm1, %v7583_v46 }
0x12b9   : > { %v7586_v10 = vpop.f32.mrf.mxu1 }
0x12ba   : > { %7609 = vst.msk [vmem:[%s708_s28 + $0x8] sm:$0xff] %vm7607_vm1, %v7586_v10 }
0x12c1   : > { %v7589_v17 = vpop.f32.mrf.mxu1 }
0x12c2   : > { %7610 = vst.msk [vmem:[%s708_s28 + $0x10] sm:$0xff] %vm7607_vm1, %v7589_v17 }
0x12cc   : > { %v7592_v29 = vpop.f32.mrf.mxu1 }
0x12cd   : > { %7611 = vst.msk [vmem:[%s708_s28 + $0x18] sm:$0xff] %vm7607_vm1, %v7592_v29 }
0x12d4   : > { %v7595_v49 = vpop.f32.mrf.mxu1 }
0x12d5   : > { %7612 = vst.msk [vmem:[%s708_s28 + $0x20] sm:$0xff] %vm7607_vm1, %v7595_v49 }
0x12dc   : > { %v7598_v37 = vpop.f32.mrf.mxu1 }
0x12dd   : > { %7613 = vst.msk [vmem:[%s708_s28 + $0x28] sm:$0xff] %vm7607_vm1, %v7598_v37 }
0x12e4   : > { %v7601_v42 = vpop.f32.mrf.mxu1 }
0x12e5   : > { %7614 = vst.msk [vmem:[%s708_s28 + $0x30] sm:$0xff] %vm7607_vm1, %v7601_v42 }
0x12ec   : > { %v7604_v58 = vpop.f32.mrf.mxu1 }
0x12ed   : > { %7615 = vst.msk [vmem:[%s708_s28 + $0x38] sm:$0xff] %vm7607_vm1, %v7604_v58 }
0x12ee   : > { %9234 = shalt.err (!%p9231_p9)
}
0x12ef   : > { %s9326_s18 = smov 128   ;;  %s9327_s5 = smov 8  }
0x12f0   : > { %8266 = dma.vmem_to_hbm [thread:$0]  (%p9528_p13), %s7630_s14, 1024, %s7632_s10, %s7617_s26, %s9326_s18, %s9326_s18, %s9327_s5  }
0x12f1 PF: > { %s15094_s7 = sld [smem:[#allocation23_spill]] }
0x12f2   : > { %s15096_s0 = sld [smem:[#allocation26_spill]] }
0x12f7   : > { %s7646_s25 = sand.u32 1, %s15094_s7  }
0x12f8   : > { %p15097_p10 = scmp.ge.s32.totalorder %s15096_s0, 2  ;;  %s7647_s30 = scalar_lea.sflag [#allocation4], %s7646_s25 }
0x12fa   : > { %p8295_p11 = pnand %p15097_p10, %p9533_p4 }
0x12fc   : > { %p8296_p0 = pneg %p8295_p11 }
0x12fe   : > { %9272 = dma.done.wait (%p8296_p0), %s7647_s30, 1024  }
0x12ff   : > { %9274 = vsyncadd (%p8296_p0), %s7647_s30, 4294966272  ;;  %s15098_s30 = sld [smem:[#allocation27_spill]] }
0x1300   : > { %s15099_s27 = sld [smem:[#allocation24_spill]] }
0x1301   : > { %s15100_s28 = sld [smem:[#allocation25_spill]] }
0x1302   : > { %s15101_s29 = sld [smem:[#allocation28_spill]] }
0x1305   : > { %p35_p2 = scmp.ge.s32.totalorder %s15098_s30, 4  }
0x1307   :  { %37 = sbr.rel (!%p35_p2) target bundleno = 29 (0x1d), region = 165 }
0x130c   :  { %7653 = vsyncpa [#allocation3], 1 }
0x130d   :  { %7655 = vsyncpa [#allocation3 + $0x1], 1 }
0x130e   :  { %7656 = vsyncpa [#allocation6], 1 }
0x130f   :  { %7657 = vsyncpa [#allocation9], 1 }
0x1310   :  { %7658 = vsyncpa [#allocation12], 1 }
0x1311   :  { %7659 = vsyncpa [#allocation15], 1 }
0x1312   :  { %7660 = vsyncpa [#allocation4], 1 }
0x1313   :  { %7662 = vsyncpa [#allocation4 + $0x1], 1 }

</bundles_post_ra>
